<compile_context>
chip_gen: v5e
topology: v5e:2x2
jax: 0.10.0
libtpu: 0.0.40
codegen_flags: <defaults>
</compile_context>

<pallas_src>
import functools

import jax
import jax.numpy as jnp
from jax.experimental import pallas as pl
from jax.experimental.pallas import tpu as pltpu

LANE = 128  # lane-dense output width (padded C_out)


# ----------------------------------------------------------------------------
# in-kernel helpers
# ----------------------------------------------------------------------------
def _apply_act(x, act):
    if act == "relu":
        return jnp.maximum(x, 0.0)
    if act == "sigmoid":
        return 1.0 / (1.0 + jnp.exp(-x))
    return x


# ----------------------------------------------------------------------------
# Pallas kernels
# ----------------------------------------------------------------------------
def _conv_s2_kernel(x_ref, w_ref, b_ref, o_ref, cols_ref, *, taps, tap_c, ho, wo, act):
    """3x3 stride-2 conv for one batch element.

    x_ref  : (1, ho+1, wo+1, 4*tap_c)  space-to-depth input tile (bf16)
    w_ref  : (9*tap_c, 128)            bf16 weights, lane-padded
    b_ref  : (1, 128)                  f32 bias, lane-padded
    o_ref  : (1, ho*wo, 128)           lane-dense output
    cols_ref: (ho*wo, 9*tap_c)         VMEM im2col scratch
    """
    x = x_ref[0]
    parts = [x[r:r + ho, c0:c0 + wo, ch:ch + tap_c] for (r, c0, ch) in taps]
    cols = jnp.concatenate(parts, axis=-1)                # (ho, wo, 9*tap_c)
    # flatten spatial dims via row-block copies through VMEM scratch
    # (avoids relying on sublane-folding value reshape).
    for i in range(ho):
        cols_ref[i * wo:(i + 1) * wo, :] = cols[i]
    acc = jnp.dot(cols_ref[...], w_ref[...], preferred_element_type=jnp.float32)
    acc = _apply_act(acc + b_ref[...], act)               # f32 epilogue
    o_ref[0] = acc.astype(o_ref.dtype)


def _conv_up_kernel(x_ref, w_ref, b_ref, o_ref, cols_ref, *, hd, wd, act):
    """Fused nearest-x2-upsample + 3x3 stride-1 conv for one batch element.

    Output parity (pr, ps) is a 3x3-window conv over the padded SMALL input:
      out[2a+pr, 2b+ps] = sum_{di,dj} x_pad[a + (pr+di-1)//2 + 1,
                                            b + (ps+dj-1)//2 + 1] * W[di,dj]
    x_ref  : (1, hd+2, wd+2, cin)   padded pre-upsample input (bf16)
    o_ref  : (1, 4, hd*wd, 128)     parity-major, lane-dense output
    """
    x = x_ref[0]
    for p_idx, (pr, ps) in enumerate(((0, 0), (0, 1), (1, 0), (1, 1))):
        parts = []
        for di in range(3):
            r0 = (pr + di - 1) // 2 + 1
            for dj in range(3):
                c0 = (ps + dj - 1) // 2 + 1
                parts.append(x[r0:r0 + hd, c0:c0 + wd, :])
        cols = jnp.concatenate(parts, axis=-1)            # (hd, wd, 9*cin)
        for i in range(hd):
            cols_ref[i * wd:(i + 1) * wd, :] = cols[i]
        acc = jnp.dot(cols_ref[...], w_ref[...], preferred_element_type=jnp.float32)
        acc = _apply_act(acc + b_ref[...], act)
        o_ref[0, p_idx] = acc.astype(o_ref.dtype)


def _latent_kernel(h_ref, wml_ref, bml_ref, eps_ref, wd_ref, bd_ref,
                   mu_ref, lv_ref, z_ref, d_ref, *, latent):
    """Fused: [mu|logvar] = h @ Wml + b ; z = mu + exp(.5*lv)*eps ; d = relu(z @ Wdec + b)."""
    ml = jnp.dot(h_ref[...], wml_ref[...], preferred_element_type=jnp.float32) + bml_ref[...]
    mu = ml[:, :latent]
    lv = ml[:, latent:]
    z = mu + jnp.exp(0.5 * lv) * eps_ref[...]
    mu_ref[...] = mu
    lv_ref[...] = lv
    z_ref[...] = z
    d = jnp.dot(z.astype(wd_ref.dtype), wd_ref[...],
                preferred_element_type=jnp.float32) + bd_ref[...]
    d_ref[...] = jnp.maximum(d, 0.0).astype(d_ref.dtype)


# ----------------------------------------------------------------------------
# wrappers (pallas_call plumbing; cheap XLA glue only)
# ----------------------------------------------------------------------------
def _pad_hw(x):
    return jnp.pad(x, ((0, 0), (1, 1), (1, 1), (0, 0)))


def _space_to_depth2(xp):
    # (N, H+2, W+2, C) -> (N, H/2+1, W/2+1, 4C); parity order (row, col): ee, eo, oe, oo
    return jnp.concatenate(
        [xp[:, 0::2, 0::2, :], xp[:, 0::2, 1::2, :],
         xp[:, 1::2, 0::2, :], xp[:, 1::2, 1::2, :]], axis=-1)


def conv3x3_s2(x_nhwc, w_full, b_full, *, act):
    """3x3 / stride 2 / pad 1 conv; returns (N, (H/2)*(W/2), 128) bf16."""
    n, h, w, c = x_nhwc.shape
    ho, wo = h // 2, w // 2
    xs = _space_to_depth2(_pad_hw(x_nhwc)).astype(jnp.bfloat16)
    taps = tuple((di // 2, dj // 2, ((di % 2) * 2 + (dj % 2)) * c)
                 for di in range(3) for dj in range(3))
    kern = functools.partial(_conv_s2_kernel, taps=taps, tap_c=c, ho=ho, wo=wo, act=act)
    return pl.pallas_call(
        kern,
        out_shape=jax.ShapeDtypeStruct((n, ho * wo, LANE), jnp.bfloat16),
        grid=(n,),
        in_specs=[
            pl.BlockSpec((1, ho + 1, wo + 1, 4 * c), lambda i: (i, 0, 0, 0)),
            pl.BlockSpec((9 * c, LANE), lambda i: (0, 0)),
            pl.BlockSpec((1, LANE), lambda i: (0, 0)),
        ],
        out_specs=pl.BlockSpec((1, ho * wo, LANE), lambda i: (i, 0, 0)),
        scratch_shapes=[pltpu.VMEM((ho * wo, 9 * c), jnp.bfloat16)],
        compiler_params=pltpu.CompilerParams(dimension_semantics=("parallel",)),
    )(xs, w_full, b_full)


def conv3x3_up(x_nhwc, w_full, b_full, *, act, out_dtype):
    """nearest-x2 upsample + 3x3 / stride 1 / pad 1 conv; returns (N, 4, H*W, 128)."""
    n, hd, wd, c = x_nhwc.shape
    xp = _pad_hw(x_nhwc).astype(jnp.bfloat16)
    kern = functools.partial(_conv_up_kernel, hd=hd, wd=wd, act=act)
    return pl.pallas_call(
        kern,
        out_shape=jax.ShapeDtypeStruct((n, 4, hd * wd, LANE), out_dtype),
        grid=(n,),
        in_specs=[
            pl.BlockSpec((1, hd + 2, wd + 2, c), lambda i: (i, 0, 0, 0)),
            pl.BlockSpec((9 * c, LANE), lambda i: (0, 0)),
            pl.BlockSpec((1, LANE), lambda i: (0, 0)),
        ],
        out_specs=pl.BlockSpec((1, 4, hd * wd, LANE), lambda i: (i, 0, 0, 0)),
        scratch_shapes=[pltpu.VMEM((hd * wd, 9 * c), jnp.bfloat16)],
        compiler_params=pltpu.CompilerParams(dimension_semantics=("parallel",)),
    )(xp, w_full, b_full)


def _interleave_parity(o, n, hd, wd):
    """(N, 4, hd*wd, C) parity-major -> dense (N, 2hd, 2wd, C)."""
    c = o.shape[-1]
    o = o.reshape(n, 2, 2, hd, wd, c)
    o = jnp.transpose(o, (0, 3, 1, 4, 2, 5))
    return o.reshape(n, 2 * hd, 2 * wd, c)


def latent_block(h_flat, w_ml, b_ml, eps, w_dec, b_dec, *, latent):
    n, flat = h_flat.shape
    flat_dec = w_dec.shape[1]
    kern = functools.partial(_latent_kernel, latent=latent)
    return pl.pallas_call(
        kern,
        out_shape=(jax.ShapeDtypeStruct((n, latent), jnp.float32),
                   jax.ShapeDtypeStruct((n, latent), jnp.float32),
                   jax.ShapeDtypeStruct((n, latent), jnp.float32),
                   jax.ShapeDtypeStruct((n, flat_dec), jnp.bfloat16)),
        grid=(1,),
        in_specs=[
            pl.BlockSpec((n, flat), lambda i: (0, 0)),
            pl.BlockSpec((flat, 2 * latent), lambda i: (0, 0)),
            pl.BlockSpec((1, 2 * latent), lambda i: (0, 0)),
            pl.BlockSpec((n, latent), lambda i: (0, 0)),
            pl.BlockSpec((latent, flat_dec), lambda i: (0, 0)),
            pl.BlockSpec((1, flat_dec), lambda i: (0, 0)),
        ],
        out_specs=(pl.BlockSpec((n, latent), lambda i: (0, 0)),
                   pl.BlockSpec((n, latent), lambda i: (0, 0)),
                   pl.BlockSpec((n, latent), lambda i: (0, 0)),
                   pl.BlockSpec((n, flat_dec), lambda i: (0, 0))),
        compiler_params=pltpu.CompilerParams(dimension_semantics=("arbitrary",)),
    )(h_flat, w_ml, b_ml, eps, w_dec, b_dec)


# ----------------------------------------------------------------------------
# parameters
# ----------------------------------------------------------------------------
def init_params(key, c_in, latent_dim, h, w):
    keys = jax.random.split(key, 7)

    def wmat(k, shape, fan_in):
        return jax.random.normal(k, shape, jnp.float32) / jnp.sqrt(float(fan_in))

    h4, w4 = h // 4, w // 4
    flat = 32 * h4 * w4
    return {
        "enc1_w": wmat(keys[0], (9 * c_in, 16), 9 * c_in), "enc1_b": jnp.zeros((16,), jnp.float32),
        "enc2_w": wmat(keys[1], (9 * 16, 32), 9 * 16),     "enc2_b": jnp.zeros((32,), jnp.float32),
        "fc_mu_w": wmat(keys[2], (flat, latent_dim), flat), "fc_mu_b": jnp.zeros((latent_dim,), jnp.float32),
        "fc_lv_w": wmat(keys[3], (flat, latent_dim), flat), "fc_lv_b": jnp.zeros((latent_dim,), jnp.float32),
        "fc_dec_w": wmat(keys[4], (latent_dim, flat), latent_dim), "fc_dec_b": jnp.zeros((flat,), jnp.float32),
        "dec1_w": wmat(keys[5], (9 * 32, 16), 9 * 32),     "dec1_b": jnp.zeros((16,), jnp.float32),
        "dec2_w": wmat(keys[6], (9 * 16, c_in), 9 * 16),   "dec2_b": jnp.zeros((c_in,), jnp.float32),
    }


def _embed_conv_w(w_r, cin_real, cin_pad, cout_real):
    """(9*cin_real, cout_real) -> (9*cin_pad, 128) bf16; zero rows/cols for padding."""
    w = w_r.reshape(9, cin_real, cout_real)
    w = jnp.pad(w, ((0, 0), (0, cin_pad - cin_real), (0, LANE - cout_real)))
    return w.reshape(9 * cin_pad, LANE).astype(jnp.bfloat16)


def _embed_bias(b_r):
    return jnp.pad(b_r, (0, LANE - b_r.shape[0])).reshape(1, LANE).astype(jnp.float32)


def prepare_pallas_params(p, c_in):
    """bf16 / lane-padded parameter copies for the Pallas path (done once, outside jit)."""
    return {
        "enc1_w": _embed_conv_w(p["enc1_w"], c_in, c_in, 16), "enc1_b": _embed_bias(p["enc1_b"]),
        "enc2_w": _embed_conv_w(p["enc2_w"], 16, LANE, 32),   "enc2_b": _embed_bias(p["enc2_b"]),
        "fc_ml_w": jnp.concatenate([p["fc_mu_w"], p["fc_lv_w"]], axis=1).astype(jnp.bfloat16),
        "fc_ml_b": jnp.concatenate([p["fc_mu_b"], p["fc_lv_b"]]).reshape(1, -1).astype(jnp.float32),
        "fc_dec_w": p["fc_dec_w"].astype(jnp.bfloat16),
        "fc_dec_b": p["fc_dec_b"].reshape(1, -1).astype(jnp.float32),
        "dec1_w": _embed_conv_w(p["dec1_w"], 32, 32, 16),     "dec1_b": _embed_bias(p["dec1_b"]),
        "dec2_w": _embed_conv_w(p["dec2_w"], 16, LANE, c_in), "dec2_b": _embed_bias(p["dec2_b"]),
    }


# ----------------------------------------------------------------------------
# Adaptive_homotopy_model.forward -> (x_reconstruction, z, mu, logvar)
# ----------------------------------------------------------------------------
def adaptive_homotopy_forward(pp, x_nchw, eps, *, latent):
    n, c, h, w = x_nchw.shape
    x = jnp.transpose(x_nchw, (0, 2, 3, 1))                            # NHWC

    # encoder: two stride-2 3x3 convs (lane-padded bf16 outputs)
    e1 = conv3x3_s2(x, pp["enc1_w"], pp["enc1_b"], act="relu")         # (N, (H/2)(W/2), 128)
    e1 = e1.reshape(n, h // 2, w // 2, LANE)
    e2 = conv3x3_s2(e1, pp["enc2_w"], pp["enc2_b"], act="relu")        # (N, (H/4)(W/4), 128)

    h4, w4 = h // 4, w // 4
    h_flat = e2[:, :, :32].reshape(n, h4 * w4 * 32)                    # real channels only

    # fused latent path: mu | logvar | reparameterize | decoder FC (one kernel)
    mu, logvar, z, d = latent_block(h_flat, pp["fc_ml_w"], pp["fc_ml_b"], eps,
                                    pp["fc_dec_w"], pp["fc_dec_b"], latent=latent)

    # decoder: fused (upsample x2 + 3x3 conv) x2
    d = d.reshape(n, h4, w4, 32)
    d1 = conv3x3_up(d, pp["dec1_w"], pp["dec1_b"], act="relu", out_dtype=jnp.bfloat16)
    d1 = _interleave_parity(d1, n, h4, w4)                             # (N, H/2, W/2, 128)
    d2 = conv3x3_up(d1, pp["dec2_w"], pp["dec2_b"], act="sigmoid", out_dtype=jnp.float32)
    d2 = _interleave_parity(d2, n, h // 2, w // 2)                     # (N, H, W, 128)

    x_rec = jnp.transpose(d2[..., :c], (0, 3, 1, 2))                   # NCHW
    return x_rec, z, mu, logvar


# ----------------------------------------------------------------------------
# plain-JAX f32 reference (same stand-in architecture) for a numerics check
# ----------------------------------------------------------------------------
def reference_forward(p, x_nchw, eps):
    n, c, h, w = x_nchw.shape
    x = jnp.transpose(x_nchw, (0, 2, 3, 1))

    def conv(t, w_r, b_r, cin, cout, stride):
        wt = w_r.reshape(3, 3, cin, cout)
        y = jax.lax.conv_general_dilated(t, wt, (stride, stride), ((1, 1), (1, 1)),
                                         dimension_numbers=("NHWC", "HWIO", "NHWC"))
        return y + b_r

    e = jax.nn.relu(conv(x, p["enc1_w"], p["enc1_b"], c, 16, 2))
    e = jax.nn.relu(conv(e, p["enc2_w"], p["enc2_b"], 16, 32, 2))
    hf = e.reshape(n, -1)
    mu = hf @ p["fc_mu_w"] + p["fc_mu_b"]
    lv = hf @ p["fc_lv_w"] + p["fc_lv_b"]
    z = mu + jnp.exp(0.5 * lv) * eps
    d = jax.nn.relu(z @ p["fc_dec_w"] + p["fc_dec_b"])
    d = d.reshape(n, h // 4, w // 4, 32)
    d = jnp.repeat(jnp.repeat(d, 2, axis=1), 2, axis=2)
    d = jax.nn.relu(conv(d, p["dec1_w"], p["dec1_b"], 32, 16, 1))
    d = jnp.repeat(jnp.repeat(d, 2, axis=1), 2, axis=2)
    d = jax.nn.sigmoid(conv(d, p["dec2_w"], p["dec2_b"], 16, c, 1))
    return jnp.transpose(d, (0, 3, 1, 2)), z, mu, lv


# ----------------------------------------------------------------------------
if __name__ == "__main__":
    N, C, H, W = 2, 4, 16, 16
    LATENT = 32

    key = jax.random.PRNGKey(0)
    kx, kp, ke = jax.random.split(key, 3)

    x = jax.random.normal(kx, (N, C, H, W), jnp.float32)
    params = init_params(kp, C, LATENT, H, W)
    eps = jax.random.normal(ke, (N, LATENT), jnp.float32)   # deterministic noise
    pparams = prepare_pallas_params(params, C)

    fwd = jax.jit(functools.partial(adaptive_homotopy_forward, latent=LATENT))
    x_rec, z, mu, logvar = fwd(pparams, x, eps)
    jax.block_until_ready((x_rec, z, mu, logvar))

    assert x_rec.shape == (N, C, H, W)
    assert z.shape == (N, LATENT) and mu.shape == (N, LATENT) and logvar.shape == (N, LATENT)

    # numerics check vs f32 reference (loose tolerance for bf16 MXU path)
    r_xr, r_z, r_mu, r_lv = jax.jit(reference_forward)(params, x, eps)
    for name, a, b in (("x_rec", x_rec, r_xr), ("z", z, r_z),
                       ("mu", mu, r_mu), ("logvar", logvar, r_lv)):
        ok = bool(jnp.allclose(a, b, rtol=0.1, atol=0.1))
        assert ok, f"mismatch in {name}"

    print("KERNEL_OK")
</pallas_src>

<mosaic_0001>
module attributes {stable_mosaic.version = 11 : i64} {
  func.func @_conv_s2_kernel(%arg0: i32, %arg1: memref<1x9x9x16xbf16, #tpu.memory_space<vmem>>, %arg2: memref<36x128xbf16, #tpu.memory_space<vmem>>, %arg3: memref<1x128xf32, #tpu.memory_space<vmem>>, %arg4: memref<1x64x128xbf16, #tpu.memory_space<vmem>>, %arg5: memref<64x36xbf16, #tpu.memory_space<vmem>>) attributes {dimension_semantics = [#tpu.dimension_semantics<parallel>], iteration_bounds = array<i64: 2>, scalar_prefetch = 0 : i64, scratch_operands = 1 : i64, tpu.core_type = #tpu.core_type<tc>, window_params = [{transform_indices = @transform_0, window_bounds = array<i64: 1, 9, 9, 16>}, {pipeline_mode = #tpu.pipeline_mode<synchronous>, transform_indices = @transform_1, window_bounds = array<i64: 36, 128>}, {pipeline_mode = #tpu.pipeline_mode<synchronous>, transform_indices = @transform_2, window_bounds = array<i64: 1, 128>}, {transform_indices = @transform_3, window_bounds = array<i64: 1, 64, 128>}]} {
    %c0 = arith.constant 0 : index
    %c0_0 = arith.constant 0 : index
    %c0_1 = arith.constant 0 : index
    %c0_2 = arith.constant 0 : index
    %0 = vector.load %arg1[%c0, %c0_0, %c0_1, %c0_2] : memref<1x9x9x16xbf16, #tpu.memory_space<vmem>>, vector<1x9x9x16xbf16>
    %1 = vector.shape_cast %0 : vector<1x9x9x16xbf16> to vector<9x9x16xbf16>
    %2 = vector.extract_strided_slice %1 {offsets = [0, 0, 0], sizes = [8, 8, 4], strides = [1, 1, 1]} : vector<9x9x16xbf16> to vector<8x8x4xbf16>
    %3 = vector.extract_strided_slice %1 {offsets = [0, 0, 4], sizes = [8, 8, 4], strides = [1, 1, 1]} : vector<9x9x16xbf16> to vector<8x8x4xbf16>
    %4 = vector.extract_strided_slice %1 {offsets = [0, 1, 0], sizes = [8, 8, 4], strides = [1, 1, 1]} : vector<9x9x16xbf16> to vector<8x8x4xbf16>
    %5 = vector.extract_strided_slice %1 {offsets = [0, 0, 8], sizes = [8, 8, 4], strides = [1, 1, 1]} : vector<9x9x16xbf16> to vector<8x8x4xbf16>
    %6 = vector.extract_strided_slice %1 {offsets = [0, 0, 12], sizes = [8, 8, 4], strides = [1, 1, 1]} : vector<9x9x16xbf16> to vector<8x8x4xbf16>
    %7 = vector.extract_strided_slice %1 {offsets = [0, 1, 8], sizes = [8, 8, 4], strides = [1, 1, 1]} : vector<9x9x16xbf16> to vector<8x8x4xbf16>
    %8 = vector.extract_strided_slice %1 {offsets = [1, 0, 0], sizes = [8, 8, 4], strides = [1, 1, 1]} : vector<9x9x16xbf16> to vector<8x8x4xbf16>
    %9 = vector.extract_strided_slice %1 {offsets = [1, 0, 4], sizes = [8, 8, 4], strides = [1, 1, 1]} : vector<9x9x16xbf16> to vector<8x8x4xbf16>
    %10 = vector.extract_strided_slice %1 {offsets = [1, 1, 0], sizes = [8, 8, 4], strides = [1, 1, 1]} : vector<9x9x16xbf16> to vector<8x8x4xbf16>
    %11 = tpu.concatenate %2, %3, %4, %5, %6, %7, %8, %9, %10 in 2 : vector<8x8x4xbf16>, vector<8x8x4xbf16>, vector<8x8x4xbf16>, vector<8x8x4xbf16>, vector<8x8x4xbf16>, vector<8x8x4xbf16>, vector<8x8x4xbf16>, vector<8x8x4xbf16>, vector<8x8x4xbf16> -> vector<8x8x36xbf16>
    %12 = vector.extract_strided_slice %11 {offsets = [0, 0, 0], sizes = [1, 8, 36], strides = [1, 1, 1]} : vector<8x8x36xbf16> to vector<1x8x36xbf16>
    %13 = vector.shape_cast %12 : vector<1x8x36xbf16> to vector<8x36xbf16>
    %c0_3 = arith.constant 0 : index
    %c0_4 = arith.constant 0 : index
    %14 = vector.load %arg5[%c0_3, %c0_4] : memref<64x36xbf16, #tpu.memory_space<vmem>>, vector<8x36xbf16>
    tpu.vector_store %arg5[%c0_3, %c0_4], %13 {strides = array<i32>} : memref<64x36xbf16, #tpu.memory_space<vmem>>, vector<8x36xbf16>,
    %15 = vector.extract_strided_slice %11 {offsets = [1, 0, 0], sizes = [1, 8, 36], strides = [1, 1, 1]} : vector<8x8x36xbf16> to vector<1x8x36xbf16>
    %16 = vector.shape_cast %15 : vector<1x8x36xbf16> to vector<8x36xbf16>
    %c8 = arith.constant 8 : index
    %c0_5 = arith.constant 0 : index
    %17 = vector.load %arg5[%c8, %c0_5] : memref<64x36xbf16, #tpu.memory_space<vmem>>, vector<8x36xbf16>
    tpu.vector_store %arg5[%c8, %c0_5], %16 {strides = array<i32>} : memref<64x36xbf16, #tpu.memory_space<vmem>>, vector<8x36xbf16>,
    %18 = vector.extract_strided_slice %11 {offsets = [2, 0, 0], sizes = [1, 8, 36], strides = [1, 1, 1]} : vector<8x8x36xbf16> to vector<1x8x36xbf16>
    %19 = vector.shape_cast %18 : vector<1x8x36xbf16> to vector<8x36xbf16>
    %c16 = arith.constant 16 : index
    %c0_6 = arith.constant 0 : index
    %20 = vector.load %arg5[%c16, %c0_6] : memref<64x36xbf16, #tpu.memory_space<vmem>>, vector<8x36xbf16>
    tpu.vector_store %arg5[%c16, %c0_6], %19 {strides = array<i32>} : memref<64x36xbf16, #tpu.memory_space<vmem>>, vector<8x36xbf16>,
    %21 = vector.extract_strided_slice %11 {offsets = [3, 0, 0], sizes = [1, 8, 36], strides = [1, 1, 1]} : vector<8x8x36xbf16> to vector<1x8x36xbf16>
    %22 = vector.shape_cast %21 : vector<1x8x36xbf16> to vector<8x36xbf16>
    %c24 = arith.constant 24 : index
    %c0_7 = arith.constant 0 : index
    %23 = vector.load %arg5[%c24, %c0_7] : memref<64x36xbf16, #tpu.memory_space<vmem>>, vector<8x36xbf16>
    tpu.vector_store %arg5[%c24, %c0_7], %22 {strides = array<i32>} : memref<64x36xbf16, #tpu.memory_space<vmem>>, vector<8x36xbf16>,
    %24 = vector.extract_strided_slice %11 {offsets = [4, 0, 0], sizes = [1, 8, 36], strides = [1, 1, 1]} : vector<8x8x36xbf16> to vector<1x8x36xbf16>
    %25 = vector.shape_cast %24 : vector<1x8x36xbf16> to vector<8x36xbf16>
    %c32 = arith.constant 32 : index
    %c0_8 = arith.constant 0 : index
    %26 = vector.load %arg5[%c32, %c0_8] : memref<64x36xbf16, #tpu.memory_space<vmem>>, vector<8x36xbf16>
    tpu.vector_store %arg5[%c32, %c0_8], %25 {strides = array<i32>} : memref<64x36xbf16, #tpu.memory_space<vmem>>, vector<8x36xbf16>,
    %27 = vector.extract_strided_slice %11 {offsets = [5, 0, 0], sizes = [1, 8, 36], strides = [1, 1, 1]} : vector<8x8x36xbf16> to vector<1x8x36xbf16>
    %28 = vector.shape_cast %27 : vector<1x8x36xbf16> to vector<8x36xbf16>
    %c40 = arith.constant 40 : index
    %c0_9 = arith.constant 0 : index
    %29 = vector.load %arg5[%c40, %c0_9] : memref<64x36xbf16, #tpu.memory_space<vmem>>, vector<8x36xbf16>
    tpu.vector_store %arg5[%c40, %c0_9], %28 {strides = array<i32>} : memref<64x36xbf16, #tpu.memory_space<vmem>>, vector<8x36xbf16>,
    %30 = vector.extract_strided_slice %11 {offsets = [6, 0, 0], sizes = [1, 8, 36], strides = [1, 1, 1]} : vector<8x8x36xbf16> to vector<1x8x36xbf16>
    %31 = vector.shape_cast %30 : vector<1x8x36xbf16> to vector<8x36xbf16>
    %c48 = arith.constant 48 : index
    %c0_10 = arith.constant 0 : index
    %32 = vector.load %arg5[%c48, %c0_10] : memref<64x36xbf16, #tpu.memory_space<vmem>>, vector<8x36xbf16>
    tpu.vector_store %arg5[%c48, %c0_10], %31 {strides = array<i32>} : memref<64x36xbf16, #tpu.memory_space<vmem>>, vector<8x36xbf16>,
    %33 = vector.extract_strided_slice %11 {offsets = [7, 0, 0], sizes = [1, 8, 36], strides = [1, 1, 1]} : vector<8x8x36xbf16> to vector<1x8x36xbf16>
    %34 = vector.shape_cast %33 : vector<1x8x36xbf16> to vector<8x36xbf16>
    %c56 = arith.constant 56 : index
    %c0_11 = arith.constant 0 : index
    %35 = vector.load %arg5[%c56, %c0_11] : memref<64x36xbf16, #tpu.memory_space<vmem>>, vector<8x36xbf16>
    tpu.vector_store %arg5[%c56, %c0_11], %34 {strides = array<i32>} : memref<64x36xbf16, #tpu.memory_space<vmem>>, vector<8x36xbf16>,
    %c0_12 = arith.constant 0 : index
    %c0_13 = arith.constant 0 : index
    %36 = vector.load %arg5[%c0_12, %c0_13] : memref<64x36xbf16, #tpu.memory_space<vmem>>, vector<64x36xbf16>
    %c0_14 = arith.constant 0 : index
    %c0_15 = arith.constant 0 : index
    %37 = vector.load %arg2[%c0_14, %c0_15] : memref<36x128xbf16, #tpu.memory_space<vmem>>, vector<36x128xbf16>
    %cst = arith.constant dense<0.000000e+00> : vector<64x128xf32>
    %38 = tpu.matmul %36, %37, %cst {dimension_numbers = #tpu.dot_dimension_numbers<[1], [0], [0], [1], [0, 0, 1, 1], [], []>} : vector<64x36xbf16>, vector<36x128xbf16>, vector<64x128xf32> -> vector<64x128xf32>
    %c0_16 = arith.constant 0 : index
    %c0_17 = arith.constant 0 : index
    %39 = vector.load %arg3[%c0_16, %c0_17] : memref<1x128xf32, #tpu.memory_space<vmem>>, vector<1x128xf32>
    %40 = vector.broadcast %39 : vector<1x128xf32> to vector<64x128xf32>
    %41 = arith.addf %38, %40 : vector<64x128xf32>
    %cst_18 = arith.constant 0.000000e+00 : f32
    %42 = vector.broadcast %cst_18 : f32 to vector<64x128xf32>
    %43 = arith.maximumf %41, %42 : vector<64x128xf32>
    %44 = arith.truncf %43 : vector<64x128xf32> to vector<64x128xbf16>
    %c0_19 = arith.constant 0 : index
    %c0_20 = arith.constant 0 : index
    %c0_21 = arith.constant 0 : index
    %45 = vector.load %arg4[%c0_19, %c0_20, %c0_21] : memref<1x64x128xbf16, #tpu.memory_space<vmem>>, vector<1x64x128xbf16>
    %46 = vector.shape_cast %45 : vector<1x64x128xbf16> to vector<64x128xbf16>
    %47 = vector.shape_cast %44 : vector<64x128xbf16> to vector<1x64x128xbf16>
    tpu.vector_store %arg4[%c0_19, %c0_20, %c0_21], %47 {strides = array<i32>} : memref<1x64x128xbf16, #tpu.memory_space<vmem>>, vector<1x64x128xbf16>,
    return
  }
  func.func @transform_0(%arg0: i32) -> (i32, i32, i32, i32) {
    %c0_i32 = arith.constant 0 : i32
    %c0_i32_0 = arith.constant 0 : i32
    %c0_i32_1 = arith.constant 0 : i32
    %c0_i32_2 = arith.constant 0 : i32
    return %arg0, %c0_i32, %c0_i32_0, %c0_i32_1 : i32, i32, i32, i32
  }
  func.func @transform_1(%arg0: i32) -> (i32, i32) {
    %c0_i32 = arith.constant 0 : i32
    %c0_i32_0 = arith.constant 0 : i32
    %c0_i32_1 = arith.constant 0 : i32
    return %c0_i32, %c0_i32_0 : i32, i32
  }
  func.func @transform_2(%arg0: i32) -> (i32, i32) {
    %c0_i32 = arith.constant 0 : i32
    %c0_i32_0 = arith.constant 0 : i32
    %c0_i32_1 = arith.constant 0 : i32
    return %c0_i32, %c0_i32_0 : i32, i32
  }
  func.func @transform_3(%arg0: i32) -> (i32, i32, i32) {
    %c0_i32 = arith.constant 0 : i32
    %c0_i32_0 = arith.constant 0 : i32
    %c0_i32_1 = arith.constant 0 : i32
    return %arg0, %c0_i32, %c0_i32_0 : i32, i32, i32
  }
}

module attributes {stable_mosaic.version = 11 : i64} {
  func.func @_conv_s2_kernel(%arg0: i32, %arg1: memref<1x5x5x512xbf16, #tpu.memory_space<vmem>>, %arg2: memref<1152x128xbf16, #tpu.memory_space<vmem>>, %arg3: memref<1x128xf32, #tpu.memory_space<vmem>>, %arg4: memref<1x16x128xbf16, #tpu.memory_space<vmem>>, %arg5: memref<16x1152xbf16, #tpu.memory_space<vmem>>) attributes {dimension_semantics = [#tpu.dimension_semantics<parallel>], iteration_bounds = array<i64: 2>, scalar_prefetch = 0 : i64, scratch_operands = 1 : i64, tpu.core_type = #tpu.core_type<tc>, window_params = [{transform_indices = @transform_0, window_bounds = array<i64: 1, 5, 5, 512>}, {pipeline_mode = #tpu.pipeline_mode<synchronous>, transform_indices = @transform_1, window_bounds = array<i64: 1152, 128>}, {pipeline_mode = #tpu.pipeline_mode<synchronous>, transform_indices = @transform_2, window_bounds = array<i64: 1, 128>}, {transform_indices = @transform_3, window_bounds = array<i64: 1, 16, 128>}]} {
    %c0 = arith.constant 0 : index
    %c0_0 = arith.constant 0 : index
    %c0_1 = arith.constant 0 : index
    %c0_2 = arith.constant 0 : index
    %0 = vector.load %arg1[%c0, %c0_0, %c0_1, %c0_2] : memref<1x5x5x512xbf16, #tpu.memory_space<vmem>>, vector<1x5x5x512xbf16>
    %1 = vector.shape_cast %0 : vector<1x5x5x512xbf16> to vector<5x5x512xbf16>
    %2 = vector.extract_strided_slice %1 {offsets = [0, 0, 0], sizes = [4, 4, 128], strides = [1, 1, 1]} : vector<5x5x512xbf16> to vector<4x4x128xbf16>
    %3 = vector.extract_strided_slice %1 {offsets = [0, 0, 128], sizes = [4, 4, 128], strides = [1, 1, 1]} : vector<5x5x512xbf16> to vector<4x4x128xbf16>
    %4 = vector.extract_strided_slice %1 {offsets = [0, 1, 0], sizes = [4, 4, 128], strides = [1, 1, 1]} : vector<5x5x512xbf16> to vector<4x4x128xbf16>
    %5 = vector.extract_strided_slice %1 {offsets = [0, 0, 256], sizes = [4, 4, 128], strides = [1, 1, 1]} : vector<5x5x512xbf16> to vector<4x4x128xbf16>
    %6 = vector.extract_strided_slice %1 {offsets = [0, 0, 384], sizes = [4, 4, 128], strides = [1, 1, 1]} : vector<5x5x512xbf16> to vector<4x4x128xbf16>
    %7 = vector.extract_strided_slice %1 {offsets = [0, 1, 256], sizes = [4, 4, 128], strides = [1, 1, 1]} : vector<5x5x512xbf16> to vector<4x4x128xbf16>
    %8 = vector.extract_strided_slice %1 {offsets = [1, 0, 0], sizes = [4, 4, 128], strides = [1, 1, 1]} : vector<5x5x512xbf16> to vector<4x4x128xbf16>
    %9 = vector.extract_strided_slice %1 {offsets = [1, 0, 128], sizes = [4, 4, 128], strides = [1, 1, 1]} : vector<5x5x512xbf16> to vector<4x4x128xbf16>
    %10 = vector.extract_strided_slice %1 {offsets = [1, 1, 0], sizes = [4, 4, 128], strides = [1, 1, 1]} : vector<5x5x512xbf16> to vector<4x4x128xbf16>
    %11 = tpu.concatenate %2, %3, %4, %5, %6, %7, %8, %9, %10 in 2 : vector<4x4x128xbf16>, vector<4x4x128xbf16>, vector<4x4x128xbf16>, vector<4x4x128xbf16>, vector<4x4x128xbf16>, vector<4x4x128xbf16>, vector<4x4x128xbf16>, vector<4x4x128xbf16>, vector<4x4x128xbf16> -> vector<4x4x1152xbf16>
    %12 = vector.extract_strided_slice %11 {offsets = [0, 0, 0], sizes = [1, 4, 1152], strides = [1, 1, 1]} : vector<4x4x1152xbf16> to vector<1x4x1152xbf16>
    %13 = vector.shape_cast %12 : vector<1x4x1152xbf16> to vector<4x1152xbf16>
    %c0_3 = arith.constant 0 : index
    %c0_4 = arith.constant 0 : index
    %14 = vector.load %arg5[%c0_3, %c0_4] : memref<16x1152xbf16, #tpu.memory_space<vmem>>, vector<4x1152xbf16>
    tpu.vector_store %arg5[%c0_3, %c0_4], %13 {strides = array<i32>} : memref<16x1152xbf16, #tpu.memory_space<vmem>>, vector<4x1152xbf16>,
    %15 = vector.extract_strided_slice %11 {offsets = [1, 0, 0], sizes = [1, 4, 1152], strides = [1, 1, 1]} : vector<4x4x1152xbf16> to vector<1x4x1152xbf16>
    %16 = vector.shape_cast %15 : vector<1x4x1152xbf16> to vector<4x1152xbf16>
    %c4 = arith.constant 4 : index
    %c0_5 = arith.constant 0 : index
    %17 = vector.load %arg5[%c4, %c0_5] : memref<16x1152xbf16, #tpu.memory_space<vmem>>, vector<4x1152xbf16>
    tpu.vector_store %arg5[%c4, %c0_5], %16 {strides = array<i32>} : memref<16x1152xbf16, #tpu.memory_space<vmem>>, vector<4x1152xbf16>,
    %18 = vector.extract_strided_slice %11 {offsets = [2, 0, 0], sizes = [1, 4, 1152], strides = [1, 1, 1]} : vector<4x4x1152xbf16> to vector<1x4x1152xbf16>
    %19 = vector.shape_cast %18 : vector<1x4x1152xbf16> to vector<4x1152xbf16>
    %c8 = arith.constant 8 : index
    %c0_6 = arith.constant 0 : index
    %20 = vector.load %arg5[%c8, %c0_6] : memref<16x1152xbf16, #tpu.memory_space<vmem>>, vector<4x1152xbf16>
    tpu.vector_store %arg5[%c8, %c0_6], %19 {strides = array<i32>} : memref<16x1152xbf16, #tpu.memory_space<vmem>>, vector<4x1152xbf16>,
    %21 = vector.extract_strided_slice %11 {offsets = [3, 0, 0], sizes = [1, 4, 1152], strides = [1, 1, 1]} : vector<4x4x1152xbf16> to vector<1x4x1152xbf16>
    %22 = vector.shape_cast %21 : vector<1x4x1152xbf16> to vector<4x1152xbf16>
    %c12 = arith.constant 12 : index
    %c0_7 = arith.constant 0 : index
    %23 = vector.load %arg5[%c12, %c0_7] : memref<16x1152xbf16, #tpu.memory_space<vmem>>, vector<4x1152xbf16>
    tpu.vector_store %arg5[%c12, %c0_7], %22 {strides = array<i32>} : memref<16x1152xbf16, #tpu.memory_space<vmem>>, vector<4x1152xbf16>,
    %c0_8 = arith.constant 0 : index
    %c0_9 = arith.constant 0 : index
    %24 = vector.load %arg5[%c0_8, %c0_9] : memref<16x1152xbf16, #tpu.memory_space<vmem>>, vector<16x1152xbf16>
    %c0_10 = arith.constant 0 : index
    %c0_11 = arith.constant 0 : index
    %25 = vector.load %arg2[%c0_10, %c0_11] : memref<1152x128xbf16, #tpu.memory_space<vmem>>, vector<1152x128xbf16>
    %cst = arith.constant dense<0.000000e+00> : vector<16x128xf32>
    %26 = tpu.matmul %24, %25, %cst {dimension_numbers = #tpu.dot_dimension_numbers<[1], [0], [0], [1], [0, 0, 1, 1], [], []>} : vector<16x1152xbf16>, vector<1152x128xbf16>, vector<16x128xf32> -> vector<16x128xf32>
    %c0_12 = arith.constant 0 : index
    %c0_13 = arith.constant 0 : index
    %27 = vector.load %arg3[%c0_12, %c0_13] : memref<1x128xf32, #tpu.memory_space<vmem>>, vector<1x128xf32>
    %28 = vector.broadcast %27 : vector<1x128xf32> to vector<16x128xf32>
    %29 = arith.addf %26, %28 : vector<16x128xf32>
    %cst_14 = arith.constant 0.000000e+00 : f32
    %30 = vector.broadcast %cst_14 : f32 to vector<16x128xf32>
    %31 = arith.maximumf %29, %30 : vector<16x128xf32>
    %32 = arith.truncf %31 : vector<16x128xf32> to vector<16x128xbf16>
    %c0_15 = arith.constant 0 : index
    %c0_16 = arith.constant 0 : index
    %c0_17 = arith.constant 0 : index
    %33 = vector.load %arg4[%c0_15, %c0_16, %c0_17] : memref<1x16x128xbf16, #tpu.memory_space<vmem>>, vector<1x16x128xbf16>
    %34 = vector.shape_cast %33 : vector<1x16x128xbf16> to vector<16x128xbf16>
    %35 = vector.shape_cast %32 : vector<16x128xbf16> to vector<1x16x128xbf16>
    tpu.vector_store %arg4[%c0_15, %c0_16, %c0_17], %35 {strides = array<i32>} : memref<1x16x128xbf16, #tpu.memory_space<vmem>>, vector<1x16x128xbf16>,
    return
  }
  func.func @transform_0(%arg0: i32) -> (i32, i32, i32, i32) {
    %c0_i32 = arith.constant 0 : i32
    %c0_i32_0 = arith.constant 0 : i32
    %c0_i32_1 = arith.constant 0 : i32
    %c0_i32_2 = arith.constant 0 : i32
    return %arg0, %c0_i32, %c0_i32_0, %c0_i32_1 : i32, i32, i32, i32
  }
  func.func @transform_1(%arg0: i32) -> (i32, i32) {
    %c0_i32 = arith.constant 0 : i32
    %c0_i32_0 = arith.constant 0 : i32
    %c0_i32_1 = arith.constant 0 : i32
    return %c0_i32, %c0_i32_0 : i32, i32
  }
  func.func @transform_2(%arg0: i32) -> (i32, i32) {
    %c0_i32 = arith.constant 0 : i32
    %c0_i32_0 = arith.constant 0 : i32
    %c0_i32_1 = arith.constant 0 : i32
    return %c0_i32, %c0_i32_0 : i32, i32
  }
  func.func @transform_3(%arg0: i32) -> (i32, i32, i32) {
    %c0_i32 = arith.constant 0 : i32
    %c0_i32_0 = arith.constant 0 : i32
    %c0_i32_1 = arith.constant 0 : i32
    return %arg0, %c0_i32, %c0_i32_0 : i32, i32, i32
  }
}

module attributes {stable_mosaic.version = 11 : i64} {
  func.func @_latent_kernel(%arg0: i32, %arg1: memref<2x512xbf16, #tpu.memory_space<vmem>>, %arg2: memref<512x64xbf16, #tpu.memory_space<vmem>>, %arg3: memref<1x64xf32, #tpu.memory_space<vmem>>, %arg4: memref<2x32xf32, #tpu.memory_space<vmem>>, %arg5: memref<32x512xbf16, #tpu.memory_space<vmem>>, %arg6: memref<1x512xf32, #tpu.memory_space<vmem>>, %arg7: memref<2x32xf32, #tpu.memory_space<vmem>>, %arg8: memref<2x32xf32, #tpu.memory_space<vmem>>, %arg9: memref<2x32xf32, #tpu.memory_space<vmem>>, %arg10: memref<2x512xbf16, #tpu.memory_space<vmem>>) attributes {dimension_semantics = [#tpu.dimension_semantics<arbitrary>], iteration_bounds = array<i64: 1>, scalar_prefetch = 0 : i64, scratch_operands = 0 : i64, tpu.core_type = #tpu.core_type<tc>, window_params = [{pipeline_mode = #tpu.pipeline_mode<synchronous>, transform_indices = @transform_0, window_bounds = array<i64: 2, 512>}, {pipeline_mode = #tpu.pipeline_mode<synchronous>, transform_indices = @transform_1, window_bounds = array<i64: 512, 64>}, {pipeline_mode = #tpu.pipeline_mode<synchronous>, transform_indices = @transform_2, window_bounds = array<i64: 1, 64>}, {pipeline_mode = #tpu.pipeline_mode<synchronous>, transform_indices = @transform_3, window_bounds = array<i64: 2, 32>}, {pipeline_mode = #tpu.pipeline_mode<synchronous>, transform_indices = @transform_4, window_bounds = array<i64: 32, 512>}, {pipeline_mode = #tpu.pipeline_mode<synchronous>, transform_indices = @transform_5, window_bounds = array<i64: 1, 512>}, {pipeline_mode = #tpu.pipeline_mode<synchronous>, transform_indices = @transform_6, window_bounds = array<i64: 2, 32>}, {pipeline_mode = #tpu.pipeline_mode<synchronous>, transform_indices = @transform_7, window_bounds = array<i64: 2, 32>}, {pipeline_mode = #tpu.pipeline_mode<synchronous>, transform_indices = @transform_8, window_bounds = array<i64: 2, 32>}, {pipeline_mode = #tpu.pipeline_mode<synchronous>, transform_indices = @transform_9, window_bounds = array<i64: 2, 512>}]} {
    %c0 = arith.constant 0 : index
    %c0_0 = arith.constant 0 : index
    %0 = vector.load %arg1[%c0, %c0_0] : memref<2x512xbf16, #tpu.memory_space<vmem>>, vector<2x512xbf16>
    %c0_1 = arith.constant 0 : index
    %c0_2 = arith.constant 0 : index
    %1 = vector.load %arg2[%c0_1, %c0_2] : memref<512x64xbf16, #tpu.memory_space<vmem>>, vector<512x64xbf16>
    %cst = arith.constant dense<0.000000e+00> : vector<2x64xf32>
    %2 = tpu.matmul %0, %1, %cst {dimension_numbers = #tpu.dot_dimension_numbers<[1], [0], [0], [1], [0, 0, 1, 1], [], []>} : vector<2x512xbf16>, vector<512x64xbf16>, vector<2x64xf32> -> vector<2x64xf32>
    %c0_3 = arith.constant 0 : index
    %c0_4 = arith.constant 0 : index
    %3 = vector.load %arg3[%c0_3, %c0_4] : memref<1x64xf32, #tpu.memory_space<vmem>>, vector<1x64xf32>
    %4 = vector.broadcast %3 : vector<1x64xf32> to vector<2x64xf32>
    %5 = arith.addf %2, %4 : vector<2x64xf32>
    %6 = vector.extract_strided_slice %5 {offsets = [0, 0], sizes = [2, 32], strides = [1, 1]} : vector<2x64xf32> to vector<2x32xf32>
    %7 = vector.extract_strided_slice %5 {offsets = [0, 32], sizes = [2, 32], strides = [1, 1]} : vector<2x64xf32> to vector<2x32xf32>
    %cst_5 = arith.constant 5.000000e-01 : f32
    %8 = vector.broadcast %cst_5 : f32 to vector<2x32xf32>
    %9 = arith.mulf %8, %7 : vector<2x32xf32>
    %10 = math.exp %9 : vector<2x32xf32>
    %c0_6 = arith.constant 0 : index
    %c0_7 = arith.constant 0 : index
    %11 = vector.load %arg4[%c0_6, %c0_7] : memref<2x32xf32, #tpu.memory_space<vmem>>, vector<2x32xf32>
    %12 = arith.mulf %10, %11 : vector<2x32xf32>
    %13 = arith.addf %6, %12 : vector<2x32xf32>
    %c0_8 = arith.constant 0 : index
    %c0_9 = arith.constant 0 : index
    %14 = vector.load %arg7[%c0_8, %c0_9] : memref<2x32xf32, #tpu.memory_space<vmem>>, vector<2x32xf32>
    tpu.vector_store %arg7[%c0_8, %c0_9], %6 {strides = array<i32>} : memref<2x32xf32, #tpu.memory_space<vmem>>, vector<2x32xf32>,
    %c0_10 = arith.constant 0 : index
    %c0_11 = arith.constant 0 : index
    %15 = vector.load %arg8[%c0_10, %c0_11] : memref<2x32xf32, #tpu.memory_space<vmem>>, vector<2x32xf32>
    tpu.vector_store %arg8[%c0_10, %c0_11], %7 {strides = array<i32>} : memref<2x32xf32, #tpu.memory_space<vmem>>, vector<2x32xf32>,
    %c0_12 = arith.constant 0 : index
    %c0_13 = arith.constant 0 : index
    %16 = vector.load %arg9[%c0_12, %c0_13] : memref<2x32xf32, #tpu.memory_space<vmem>>, vector<2x32xf32>
    tpu.vector_store %arg9[%c0_12, %c0_13], %13 {strides = array<i32>} : memref<2x32xf32, #tpu.memory_space<vmem>>, vector<2x32xf32>,
    %17 = arith.truncf %13 : vector<2x32xf32> to vector<2x32xbf16>
    %c0_14 = arith.constant 0 : index
    %c0_15 = arith.constant 0 : index
    %18 = vector.load %arg5[%c0_14, %c0_15] : memref<32x512xbf16, #tpu.memory_space<vmem>>, vector<32x512xbf16>
    %cst_16 = arith.constant dense<0.000000e+00> : vector<2x512xf32>
    %19 = tpu.matmul %17, %18, %cst_16 {dimension_numbers = #tpu.dot_dimension_numbers<[1], [0], [0], [1], [0, 0, 1, 1], [], []>} : vector<2x32xbf16>, vector<32x512xbf16>, vector<2x512xf32> -> vector<2x512xf32>
    %c0_17 = arith.constant 0 : index
    %c0_18 = arith.constant 0 : index
    %20 = vector.load %arg6[%c0_17, %c0_18] : memref<1x512xf32, #tpu.memory_space<vmem>>, vector<1x512xf32>
    %21 = vector.broadcast %20 : vector<1x512xf32> to vector<2x512xf32>
    %22 = arith.addf %19, %21 : vector<2x512xf32>
    %cst_19 = arith.constant 0.000000e+00 : f32
    %23 = vector.broadcast %cst_19 : f32 to vector<2x512xf32>
    %24 = arith.maximumf %22, %23 : vector<2x512xf32>
    %25 = arith.truncf %24 : vector<2x512xf32> to vector<2x512xbf16>
    %c0_20 = arith.constant 0 : index
    %c0_21 = arith.constant 0 : index
    %26 = vector.load %arg10[%c0_20, %c0_21] : memref<2x512xbf16, #tpu.memory_space<vmem>>, vector<2x512xbf16>
    tpu.vector_store %arg10[%c0_20, %c0_21], %25 {strides = array<i32>} : memref<2x512xbf16, #tpu.memory_space<vmem>>, vector<2x512xbf16>,
    return
  }
  func.func @transform_0(%arg0: i32) -> (i32, i32) {
    %c0_i32 = arith.constant 0 : i32
    %c0_i32_0 = arith.constant 0 : i32
    %c0_i32_1 = arith.constant 0 : i32
    return %c0_i32, %c0_i32_0 : i32, i32
  }
  func.func @transform_1(%arg0: i32) -> (i32, i32) {
    %c0_i32 = arith.constant 0 : i32
    %c0_i32_0 = arith.constant 0 : i32
    %c0_i32_1 = arith.constant 0 : i32
    return %c0_i32, %c0_i32_0 : i32, i32
  }
  func.func @transform_2(%arg0: i32) -> (i32, i32) {
    %c0_i32 = arith.constant 0 : i32
    %c0_i32_0 = arith.constant 0 : i32
    %c0_i32_1 = arith.constant 0 : i32
    return %c0_i32, %c0_i32_0 : i32, i32
  }
  func.func @transform_3(%arg0: i32) -> (i32, i32) {
    %c0_i32 = arith.constant 0 : i32
    %c0_i32_0 = arith.constant 0 : i32
    %c0_i32_1 = arith.constant 0 : i32
    return %c0_i32, %c0_i32_0 : i32, i32
  }
  func.func @transform_4(%arg0: i32) -> (i32, i32) {
    %c0_i32 = arith.constant 0 : i32
    %c0_i32_0 = arith.constant 0 : i32
    %c0_i32_1 = arith.constant 0 : i32
    return %c0_i32, %c0_i32_0 : i32, i32
  }
  func.func @transform_5(%arg0: i32) -> (i32, i32) {
    %c0_i32 = arith.constant 0 : i32
    %c0_i32_0 = arith.constant 0 : i32
    %c0_i32_1 = arith.constant 0 : i32
    return %c0_i32, %c0_i32_0 : i32, i32
  }
  func.func @transform_6(%arg0: i32) -> (i32, i32) {
    %c0_i32 = arith.constant 0 : i32
    %c0_i32_0 = arith.constant 0 : i32
    %c0_i32_1 = arith.constant 0 : i32
    return %c0_i32, %c0_i32_0 : i32, i32
  }
  func.func @transform_7(%arg0: i32) -> (i32, i32) {
    %c0_i32 = arith.constant 0 : i32
    %c0_i32_0 = arith.constant 0 : i32
    %c0_i32_1 = arith.constant 0 : i32
    return %c0_i32, %c0_i32_0 : i32, i32
  }
  func.func @transform_8(%arg0: i32) -> (i32, i32) {
    %c0_i32 = arith.constant 0 : i32
    %c0_i32_0 = arith.constant 0 : i32
    %c0_i32_1 = arith.constant 0 : i32
    return %c0_i32, %c0_i32_0 : i32, i32
  }
  func.func @transform_9(%arg0: i32) -> (i32, i32) {
    %c0_i32 = arith.constant 0 : i32
    %c0_i32_0 = arith.constant 0 : i32
    %c0_i32_1 = arith.constant 0 : i32
    return %c0_i32, %c0_i32_0 : i32, i32
  }
}

module attributes {stable_mosaic.version = 11 : i64} {
  func.func @_conv_up_kernel(%arg0: i32, %arg1: memref<1x6x6x32xbf16, #tpu.memory_space<vmem>>, %arg2: memref<288x128xbf16, #tpu.memory_space<vmem>>, %arg3: memref<1x128xf32, #tpu.memory_space<vmem>>, %arg4: memref<1x4x16x128xbf16, #tpu.memory_space<vmem>>, %arg5: memref<16x288xbf16, #tpu.memory_space<vmem>>) attributes {dimension_semantics = [#tpu.dimension_semantics<parallel>], iteration_bounds = array<i64: 2>, scalar_prefetch = 0 : i64, scratch_operands = 1 : i64, tpu.core_type = #tpu.core_type<tc>, window_params = [{transform_indices = @transform_0, window_bounds = array<i64: 1, 6, 6, 32>}, {pipeline_mode = #tpu.pipeline_mode<synchronous>, transform_indices = @transform_1, window_bounds = array<i64: 288, 128>}, {pipeline_mode = #tpu.pipeline_mode<synchronous>, transform_indices = @transform_2, window_bounds = array<i64: 1, 128>}, {transform_indices = @transform_3, window_bounds = array<i64: 1, 4, 16, 128>}]} {
    %c0 = arith.constant 0 : index
    %c0_0 = arith.constant 0 : index
    %c0_1 = arith.constant 0 : index
    %c0_2 = arith.constant 0 : index
    %0 = vector.load %arg1[%c0, %c0_0, %c0_1, %c0_2] : memref<1x6x6x32xbf16, #tpu.memory_space<vmem>>, vector<1x6x6x32xbf16>
    %1 = vector.shape_cast %0 : vector<1x6x6x32xbf16> to vector<6x6x32xbf16>
    %2 = vector.extract_strided_slice %1 {offsets = [0, 0, 0], sizes = [4, 4, 32], strides = [1, 1, 1]} : vector<6x6x32xbf16> to vector<4x4x32xbf16>
    %3 = vector.extract_strided_slice %1 {offsets = [0, 1, 0], sizes = [4, 4, 32], strides = [1, 1, 1]} : vector<6x6x32xbf16> to vector<4x4x32xbf16>
    %4 = vector.extract_strided_slice %1 {offsets = [0, 1, 0], sizes = [4, 4, 32], strides = [1, 1, 1]} : vector<6x6x32xbf16> to vector<4x4x32xbf16>
    %5 = vector.extract_strided_slice %1 {offsets = [1, 0, 0], sizes = [4, 4, 32], strides = [1, 1, 1]} : vector<6x6x32xbf16> to vector<4x4x32xbf16>
    %6 = vector.extract_strided_slice %1 {offsets = [1, 1, 0], sizes = [4, 4, 32], strides = [1, 1, 1]} : vector<6x6x32xbf16> to vector<4x4x32xbf16>
    %7 = vector.extract_strided_slice %1 {offsets = [1, 1, 0], sizes = [4, 4, 32], strides = [1, 1, 1]} : vector<6x6x32xbf16> to vector<4x4x32xbf16>
    %8 = vector.extract_strided_slice %1 {offsets = [1, 0, 0], sizes = [4, 4, 32], strides = [1, 1, 1]} : vector<6x6x32xbf16> to vector<4x4x32xbf16>
    %9 = vector.extract_strided_slice %1 {offsets = [1, 1, 0], sizes = [4, 4, 32], strides = [1, 1, 1]} : vector<6x6x32xbf16> to vector<4x4x32xbf16>
    %10 = vector.extract_strided_slice %1 {offsets = [1, 1, 0], sizes = [4, 4, 32], strides = [1, 1, 1]} : vector<6x6x32xbf16> to vector<4x4x32xbf16>
    %11 = tpu.concatenate %2, %3, %4, %5, %6, %7, %8, %9, %10 in 2 : vector<4x4x32xbf16>, vector<4x4x32xbf16>, vector<4x4x32xbf16>, vector<4x4x32xbf16>, vector<4x4x32xbf16>, vector<4x4x32xbf16>, vector<4x4x32xbf16>, vector<4x4x32xbf16>, vector<4x4x32xbf16> -> vector<4x4x288xbf16>
    %12 = vector.extract_strided_slice %11 {offsets = [0, 0, 0], sizes = [1, 4, 288], strides = [1, 1, 1]} : vector<4x4x288xbf16> to vector<1x4x288xbf16>
    %13 = vector.shape_cast %12 : vector<1x4x288xbf16> to vector<4x288xbf16>
    %c0_3 = arith.constant 0 : index
    %c0_4 = arith.constant 0 : index
    %14 = vector.load %arg5[%c0_3, %c0_4] : memref<16x288xbf16, #tpu.memory_space<vmem>>, vector<4x288xbf16>
    tpu.vector_store %arg5[%c0_3, %c0_4], %13 {strides = array<i32>} : memref<16x288xbf16, #tpu.memory_space<vmem>>, vector<4x288xbf16>,
    %15 = vector.extract_strided_slice %11 {offsets = [1, 0, 0], sizes = [1, 4, 288], strides = [1, 1, 1]} : vector<4x4x288xbf16> to vector<1x4x288xbf16>
    %16 = vector.shape_cast %15 : vector<1x4x288xbf16> to vector<4x288xbf16>
    %c4 = arith.constant 4 : index
    %c0_5 = arith.constant 0 : index
    %17 = vector.load %arg5[%c4, %c0_5] : memref<16x288xbf16, #tpu.memory_space<vmem>>, vector<4x288xbf16>
    tpu.vector_store %arg5[%c4, %c0_5], %16 {strides = array<i32>} : memref<16x288xbf16, #tpu.memory_space<vmem>>, vector<4x288xbf16>,
    %18 = vector.extract_strided_slice %11 {offsets = [2, 0, 0], sizes = [1, 4, 288], strides = [1, 1, 1]} : vector<4x4x288xbf16> to vector<1x4x288xbf16>
    %19 = vector.shape_cast %18 : vector<1x4x288xbf16> to vector<4x288xbf16>
    %c8 = arith.constant 8 : index
    %c0_6 = arith.constant 0 : index
    %20 = vector.load %arg5[%c8, %c0_6] : memref<16x288xbf16, #tpu.memory_space<vmem>>, vector<4x288xbf16>
    tpu.vector_store %arg5[%c8, %c0_6], %19 {strides = array<i32>} : memref<16x288xbf16, #tpu.memory_space<vmem>>, vector<4x288xbf16>,
    %21 = vector.extract_strided_slice %11 {offsets = [3, 0, 0], sizes = [1, 4, 288], strides = [1, 1, 1]} : vector<4x4x288xbf16> to vector<1x4x288xbf16>
    %22 = vector.shape_cast %21 : vector<1x4x288xbf16> to vector<4x288xbf16>
    %c12 = arith.constant 12 : index
    %c0_7 = arith.constant 0 : index
    %23 = vector.load %arg5[%c12, %c0_7] : memref<16x288xbf16, #tpu.memory_space<vmem>>, vector<4x288xbf16>
    tpu.vector_store %arg5[%c12, %c0_7], %22 {strides = array<i32>} : memref<16x288xbf16, #tpu.memory_space<vmem>>, vector<4x288xbf16>,
    %c0_8 = arith.constant 0 : index
    %c0_9 = arith.constant 0 : index
    %24 = vector.load %arg5[%c0_8, %c0_9] : memref<16x288xbf16, #tpu.memory_space<vmem>>, vector<16x288xbf16>
    %c0_10 = arith.constant 0 : index
    %c0_11 = arith.constant 0 : index
    %25 = vector.load %arg2[%c0_10, %c0_11] : memref<288x128xbf16, #tpu.memory_space<vmem>>, vector<288x128xbf16>
    %cst = arith.constant dense<0.000000e+00> : vector<16x128xf32>
    %26 = tpu.matmul %24, %25, %cst {dimension_numbers = #tpu.dot_dimension_numbers<[1], [0], [0], [1], [0, 0, 1, 1], [], []>} : vector<16x288xbf16>, vector<288x128xbf16>, vector<16x128xf32> -> vector<16x128xf32>
    %c0_12 = arith.constant 0 : index
    %c0_13 = arith.constant 0 : index
    %27 = vector.load %arg3[%c0_12, %c0_13] : memref<1x128xf32, #tpu.memory_space<vmem>>, vector<1x128xf32>
    %28 = vector.broadcast %27 : vector<1x128xf32> to vector<16x128xf32>
    %29 = arith.addf %26, %28 : vector<16x128xf32>
    %cst_14 = arith.constant 0.000000e+00 : f32
    %30 = vector.broadcast %cst_14 : f32 to vector<16x128xf32>
    %31 = arith.maximumf %29, %30 : vector<16x128xf32>
    %32 = arith.truncf %31 : vector<16x128xf32> to vector<16x128xbf16>
    %c0_15 = arith.constant 0 : index
    %c0_16 = arith.constant 0 : index
    %c0_17 = arith.constant 0 : index
    %c0_18 = arith.constant 0 : index
    %33 = vector.load %arg4[%c0_15, %c0_16, %c0_17, %c0_18] : memref<1x4x16x128xbf16, #tpu.memory_space<vmem>>, vector<1x1x16x128xbf16>
    %34 = vector.shape_cast %33 : vector<1x1x16x128xbf16> to vector<16x128xbf16>
    %35 = vector.shape_cast %32 : vector<16x128xbf16> to vector<1x1x16x128xbf16>
    tpu.vector_store %arg4[%c0_15, %c0_16, %c0_17, %c0_18], %35 {strides = array<i32>} : memref<1x4x16x128xbf16, #tpu.memory_space<vmem>>, vector<1x1x16x128xbf16>,
    %36 = vector.extract_strided_slice %1 {offsets = [0, 1, 0], sizes = [4, 4, 32], strides = [1, 1, 1]} : vector<6x6x32xbf16> to vector<4x4x32xbf16>
    %37 = vector.extract_strided_slice %1 {offsets = [0, 1, 0], sizes = [4, 4, 32], strides = [1, 1, 1]} : vector<6x6x32xbf16> to vector<4x4x32xbf16>
    %38 = vector.extract_strided_slice %1 {offsets = [0, 2, 0], sizes = [4, 4, 32], strides = [1, 1, 1]} : vector<6x6x32xbf16> to vector<4x4x32xbf16>
    %39 = vector.extract_strided_slice %1 {offsets = [1, 1, 0], sizes = [4, 4, 32], strides = [1, 1, 1]} : vector<6x6x32xbf16> to vector<4x4x32xbf16>
    %40 = vector.extract_strided_slice %1 {offsets = [1, 1, 0], sizes = [4, 4, 32], strides = [1, 1, 1]} : vector<6x6x32xbf16> to vector<4x4x32xbf16>
    %41 = vector.extract_strided_slice %1 {offsets = [1, 2, 0], sizes = [4, 4, 32], strides = [1, 1, 1]} : vector<6x6x32xbf16> to vector<4x4x32xbf16>
    %42 = vector.extract_strided_slice %1 {offsets = [1, 1, 0], sizes = [4, 4, 32], strides = [1, 1, 1]} : vector<6x6x32xbf16> to vector<4x4x32xbf16>
    %43 = vector.extract_strided_slice %1 {offsets = [1, 1, 0], sizes = [4, 4, 32], strides = [1, 1, 1]} : vector<6x6x32xbf16> to vector<4x4x32xbf16>
    %44 = vector.extract_strided_slice %1 {offsets = [1, 2, 0], sizes = [4, 4, 32], strides = [1, 1, 1]} : vector<6x6x32xbf16> to vector<4x4x32xbf16>
    %45 = tpu.concatenate %36, %37, %38, %39, %40, %41, %42, %43, %44 in 2 : vector<4x4x32xbf16>, vector<4x4x32xbf16>, vector<4x4x32xbf16>, vector<4x4x32xbf16>, vector<4x4x32xbf16>, vector<4x4x32xbf16>, vector<4x4x32xbf16>, vector<4x4x32xbf16>, vector<4x4x32xbf16> -> vector<4x4x288xbf16>
    %46 = vector.extract_strided_slice %45 {offsets = [0, 0, 0], sizes = [1, 4, 288], strides = [1, 1, 1]} : vector<4x4x288xbf16> to vector<1x4x288xbf16>
    %47 = vector.shape_cast %46 : vector<1x4x288xbf16> to vector<4x288xbf16>
    %c0_19 = arith.constant 0 : index
    %c0_20 = arith.constant 0 : index
    %48 = vector.load %arg5[%c0_19, %c0_20] : memref<16x288xbf16, #tpu.memory_space<vmem>>, vector<4x288xbf16>
    tpu.vector_store %arg5[%c0_19, %c0_20], %47 {strides = array<i32>} : memref<16x288xbf16, #tpu.memory_space<vmem>>, vector<4x288xbf16>,
    %49 = vector.extract_strided_slice %45 {offsets = [1, 0, 0], sizes = [1, 4, 288], strides = [1, 1, 1]} : vector<4x4x288xbf16> to vector<1x4x288xbf16>
    %50 = vector.shape_cast %49 : vector<1x4x288xbf16> to vector<4x288xbf16>
    %c4_21 = arith.constant 4 : index
    %c0_22 = arith.constant 0 : index
    %51 = vector.load %arg5[%c4_21, %c0_22] : memref<16x288xbf16, #tpu.memory_space<vmem>>, vector<4x288xbf16>
    tpu.vector_store %arg5[%c4_21, %c0_22], %50 {strides = array<i32>} : memref<16x288xbf16, #tpu.memory_space<vmem>>, vector<4x288xbf16>,
    %52 = vector.extract_strided_slice %45 {offsets = [2, 0, 0], sizes = [1, 4, 288], strides = [1, 1, 1]} : vector<4x4x288xbf16> to vector<1x4x288xbf16>
    %53 = vector.shape_cast %52 : vector<1x4x288xbf16> to vector<4x288xbf16>
    %c8_23 = arith.constant 8 : index
    %c0_24 = arith.constant 0 : index
    %54 = vector.load %arg5[%c8_23, %c0_24] : memref<16x288xbf16, #tpu.memory_space<vmem>>, vector<4x288xbf16>
    tpu.vector_store %arg5[%c8_23, %c0_24], %53 {strides = array<i32>} : memref<16x288xbf16, #tpu.memory_space<vmem>>, vector<4x288xbf16>,
    %55 = vector.extract_strided_slice %45 {offsets = [3, 0, 0], sizes = [1, 4, 288], strides = [1, 1, 1]} : vector<4x4x288xbf16> to vector<1x4x288xbf16>
    %56 = vector.shape_cast %55 : vector<1x4x288xbf16> to vector<4x288xbf16>
    %c12_25 = arith.constant 12 : index
    %c0_26 = arith.constant 0 : index
    %57 = vector.load %arg5[%c12_25, %c0_26] : memref<16x288xbf16, #tpu.memory_space<vmem>>, vector<4x288xbf16>
    tpu.vector_store %arg5[%c12_25, %c0_26], %56 {strides = array<i32>} : memref<16x288xbf16, #tpu.memory_space<vmem>>, vector<4x288xbf16>,
    %c0_27 = arith.constant 0 : index
    %c0_28 = arith.constant 0 : index
    %58 = vector.load %arg5[%c0_27, %c0_28] : memref<16x288xbf16, #tpu.memory_space<vmem>>, vector<16x288xbf16>
    %c0_29 = arith.constant 0 : index
    %c0_30 = arith.constant 0 : index
    %59 = vector.load %arg2[%c0_29, %c0_30] : memref<288x128xbf16, #tpu.memory_space<vmem>>, vector<288x128xbf16>
    %cst_31 = arith.constant dense<0.000000e+00> : vector<16x128xf32>
    %60 = tpu.matmul %58, %59, %cst_31 {dimension_numbers = #tpu.dot_dimension_numbers<[1], [0], [0], [1], [0, 0, 1, 1], [], []>} : vector<16x288xbf16>, vector<288x128xbf16>, vector<16x128xf32> -> vector<16x128xf32>
    %c0_32 = arith.constant 0 : index
    %c0_33 = arith.constant 0 : index
    %61 = vector.load %arg3[%c0_32, %c0_33] : memref<1x128xf32, #tpu.memory_space<vmem>>, vector<1x128xf32>
    %62 = vector.broadcast %61 : vector<1x128xf32> to vector<16x128xf32>
    %63 = arith.addf %60, %62 : vector<16x128xf32>
    %cst_34 = arith.constant 0.000000e+00 : f32
    %64 = vector.broadcast %cst_34 : f32 to vector<16x128xf32>
    %65 = arith.maximumf %63, %64 : vector<16x128xf32>
    %66 = arith.truncf %65 : vector<16x128xf32> to vector<16x128xbf16>
    %c0_35 = arith.constant 0 : index
    %c1 = arith.constant 1 : index
    %c0_36 = arith.constant 0 : index
    %c0_37 = arith.constant 0 : index
    %67 = vector.load %arg4[%c0_35, %c1, %c0_36, %c0_37] : memref<1x4x16x128xbf16, #tpu.memory_space<vmem>>, vector<1x1x16x128xbf16>
    %68 = vector.shape_cast %67 : vector<1x1x16x128xbf16> to vector<16x128xbf16>
    %69 = vector.shape_cast %66 : vector<16x128xbf16> to vector<1x1x16x128xbf16>
    tpu.vector_store %arg4[%c0_35, %c1, %c0_36, %c0_37], %69 {strides = array<i32>} : memref<1x4x16x128xbf16, #tpu.memory_space<vmem>>, vector<1x1x16x128xbf16>,
    %70 = vector.extract_strided_slice %1 {offsets = [1, 0, 0], sizes = [4, 4, 32], strides = [1, 1, 1]} : vector<6x6x32xbf16> to vector<4x4x32xbf16>
    %71 = vector.extract_strided_slice %1 {offsets = [1, 1, 0], sizes = [4, 4, 32], strides = [1, 1, 1]} : vector<6x6x32xbf16> to vector<4x4x32xbf16>
    %72 = vector.extract_strided_slice %1 {offsets = [1, 1, 0], sizes = [4, 4, 32], strides = [1, 1, 1]} : vector<6x6x32xbf16> to vector<4x4x32xbf16>
    %73 = vector.extract_strided_slice %1 {offsets = [1, 0, 0], sizes = [4, 4, 32], strides = [1, 1, 1]} : vector<6x6x32xbf16> to vector<4x4x32xbf16>
    %74 = vector.extract_strided_slice %1 {offsets = [1, 1, 0], sizes = [4, 4, 32], strides = [1, 1, 1]} : vector<6x6x32xbf16> to vector<4x4x32xbf16>
    %75 = vector.extract_strided_slice %1 {offsets = [1, 1, 0], sizes = [4, 4, 32], strides = [1, 1, 1]} : vector<6x6x32xbf16> to vector<4x4x32xbf16>
    %76 = vector.extract_strided_slice %1 {offsets = [2, 0, 0], sizes = [4, 4, 32], strides = [1, 1, 1]} : vector<6x6x32xbf16> to vector<4x4x32xbf16>
    %77 = vector.extract_strided_slice %1 {offsets = [2, 1, 0], sizes = [4, 4, 32], strides = [1, 1, 1]} : vector<6x6x32xbf16> to vector<4x4x32xbf16>
    %78 = vector.extract_strided_slice %1 {offsets = [2, 1, 0], sizes = [4, 4, 32], strides = [1, 1, 1]} : vector<6x6x32xbf16> to vector<4x4x32xbf16>
    %79 = tpu.concatenate %70, %71, %72, %73, %74, %75, %76, %77, %78 in 2 : vector<4x4x32xbf16>, vector<4x4x32xbf16>, vector<4x4x32xbf16>, vector<4x4x32xbf16>, vector<4x4x32xbf16>, vector<4x4x32xbf16>, vector<4x4x32xbf16>, vector<4x4x32xbf16>, vector<4x4x32xbf16> -> vector<4x4x288xbf16>
    %80 = vector.extract_strided_slice %79 {offsets = [0, 0, 0], sizes = [1, 4, 288], strides = [1, 1, 1]} : vector<4x4x288xbf16> to vector<1x4x288xbf16>
    %81 = vector.shape_cast %80 : vector<1x4x288xbf16> to vector<4x288xbf16>
    %c0_38 = arith.constant 0 : index
    %c0_39 = arith.constant 0 : index
    %82 = vector.load %arg5[%c0_38, %c0_39] : memref<16x288xbf16, #tpu.memory_space<vmem>>, vector<4x288xbf16>
    tpu.vector_store %arg5[%c0_38, %c0_39], %81 {strides = array<i32>} : memref<16x288xbf16, #tpu.memory_space<vmem>>, vector<4x288xbf16>,
    %83 = vector.extract_strided_slice %79 {offsets = [1, 0, 0], sizes = [1, 4, 288], strides = [1, 1, 1]} : vector<4x4x288xbf16> to vector<1x4x288xbf16>
    %84 = vector.shape_cast %83 : vector<1x4x288xbf16> to vector<4x288xbf16>
    %c4_40 = arith.constant 4 : index
    %c0_41 = arith.constant 0 : index
    %85 = vector.load %arg5[%c4_40, %c0_41] : memref<16x288xbf16, #tpu.memory_space<vmem>>, vector<4x288xbf16>
    tpu.vector_store %arg5[%c4_40, %c0_41], %84 {strides = array<i32>} : memref<16x288xbf16, #tpu.memory_space<vmem>>, vector<4x288xbf16>,
    %86 = vector.extract_strided_slice %79 {offsets = [2, 0, 0], sizes = [1, 4, 288], strides = [1, 1, 1]} : vector<4x4x288xbf16> to vector<1x4x288xbf16>
    %87 = vector.shape_cast %86 : vector<1x4x288xbf16> to vector<4x288xbf16>
    %c8_42 = arith.constant 8 : index
    %c0_43 = arith.constant 0 : index
    %88 = vector.load %arg5[%c8_42, %c0_43] : memref<16x288xbf16, #tpu.memory_space<vmem>>, vector<4x288xbf16>
    tpu.vector_store %arg5[%c8_42, %c0_43], %87 {strides = array<i32>} : memref<16x288xbf16, #tpu.memory_space<vmem>>, vector<4x288xbf16>,
    %89 = vector.extract_strided_slice %79 {offsets = [3, 0, 0], sizes = [1, 4, 288], strides = [1, 1, 1]} : vector<4x4x288xbf16> to vector<1x4x288xbf16>
    %90 = vector.shape_cast %89 : vector<1x4x288xbf16> to vector<4x288xbf16>
    %c12_44 = arith.constant 12 : index
    %c0_45 = arith.constant 0 : index
    %91 = vector.load %arg5[%c12_44, %c0_45] : memref<16x288xbf16, #tpu.memory_space<vmem>>, vector<4x288xbf16>
    tpu.vector_store %arg5[%c12_44, %c0_45], %90 {strides = array<i32>} : memref<16x288xbf16, #tpu.memory_space<vmem>>, vector<4x288xbf16>,
    %c0_46 = arith.constant 0 : index
    %c0_47 = arith.constant 0 : index
    %92 = vector.load %arg5[%c0_46, %c0_47] : memref<16x288xbf16, #tpu.memory_space<vmem>>, vector<16x288xbf16>
    %c0_48 = arith.constant 0 : index
    %c0_49 = arith.constant 0 : index
    %93 = vector.load %arg2[%c0_48, %c0_49] : memref<288x128xbf16, #tpu.memory_space<vmem>>, vector<288x128xbf16>
    %cst_50 = arith.constant dense<0.000000e+00> : vector<16x128xf32>
    %94 = tpu.matmul %92, %93, %cst_50 {dimension_numbers = #tpu.dot_dimension_numbers<[1], [0], [0], [1], [0, 0, 1, 1], [], []>} : vector<16x288xbf16>, vector<288x128xbf16>, vector<16x128xf32> -> vector<16x128xf32>
    %c0_51 = arith.constant 0 : index
    %c0_52 = arith.constant 0 : index
    %95 = vector.load %arg3[%c0_51, %c0_52] : memref<1x128xf32, #tpu.memory_space<vmem>>, vector<1x128xf32>
    %96 = vector.broadcast %95 : vector<1x128xf32> to vector<16x128xf32>
    %97 = arith.addf %94, %96 : vector<16x128xf32>
    %cst_53 = arith.constant 0.000000e+00 : f32
    %98 = vector.broadcast %cst_53 : f32 to vector<16x128xf32>
    %99 = arith.maximumf %97, %98 : vector<16x128xf32>
    %100 = arith.truncf %99 : vector<16x128xf32> to vector<16x128xbf16>
    %c0_54 = arith.constant 0 : index
    %c2 = arith.constant 2 : index
    %c0_55 = arith.constant 0 : index
    %c0_56 = arith.constant 0 : index
    %101 = vector.load %arg4[%c0_54, %c2, %c0_55, %c0_56] : memref<1x4x16x128xbf16, #tpu.memory_space<vmem>>, vector<1x1x16x128xbf16>
    %102 = vector.shape_cast %101 : vector<1x1x16x128xbf16> to vector<16x128xbf16>
    %103 = vector.shape_cast %100 : vector<16x128xbf16> to vector<1x1x16x128xbf16>
    tpu.vector_store %arg4[%c0_54, %c2, %c0_55, %c0_56], %103 {strides = array<i32>} : memref<1x4x16x128xbf16, #tpu.memory_space<vmem>>, vector<1x1x16x128xbf16>,
    %104 = vector.extract_strided_slice %1 {offsets = [1, 1, 0], sizes = [4, 4, 32], strides = [1, 1, 1]} : vector<6x6x32xbf16> to vector<4x4x32xbf16>
    %105 = vector.extract_strided_slice %1 {offsets = [1, 1, 0], sizes = [4, 4, 32], strides = [1, 1, 1]} : vector<6x6x32xbf16> to vector<4x4x32xbf16>
    %106 = vector.extract_strided_slice %1 {offsets = [1, 2, 0], sizes = [4, 4, 32], strides = [1, 1, 1]} : vector<6x6x32xbf16> to vector<4x4x32xbf16>
    %107 = vector.extract_strided_slice %1 {offsets = [1, 1, 0], sizes = [4, 4, 32], strides = [1, 1, 1]} : vector<6x6x32xbf16> to vector<4x4x32xbf16>
    %108 = vector.extract_strided_slice %1 {offsets = [1, 1, 0], sizes = [4, 4, 32], strides = [1, 1, 1]} : vector<6x6x32xbf16> to vector<4x4x32xbf16>
    %109 = vector.extract_strided_slice %1 {offsets = [1, 2, 0], sizes = [4, 4, 32], strides = [1, 1, 1]} : vector<6x6x32xbf16> to vector<4x4x32xbf16>
    %110 = vector.extract_strided_slice %1 {offsets = [2, 1, 0], sizes = [4, 4, 32], strides = [1, 1, 1]} : vector<6x6x32xbf16> to vector<4x4x32xbf16>
    %111 = vector.extract_strided_slice %1 {offsets = [2, 1, 0], sizes = [4, 4, 32], strides = [1, 1, 1]} : vector<6x6x32xbf16> to vector<4x4x32xbf16>
    %112 = vector.extract_strided_slice %1 {offsets = [2, 2, 0], sizes = [4, 4, 32], strides = [1, 1, 1]} : vector<6x6x32xbf16> to vector<4x4x32xbf16>
    %113 = tpu.concatenate %104, %105, %106, %107, %108, %109, %110, %111, %112 in 2 : vector<4x4x32xbf16>, vector<4x4x32xbf16>, vector<4x4x32xbf16>, vector<4x4x32xbf16>, vector<4x4x32xbf16>, vector<4x4x32xbf16>, vector<4x4x32xbf16>, vector<4x4x32xbf16>, vector<4x4x32xbf16> -> vector<4x4x288xbf16>
    %114 = vector.extract_strided_slice %113 {offsets = [0, 0, 0], sizes = [1, 4, 288], strides = [1, 1, 1]} : vector<4x4x288xbf16> to vector<1x4x288xbf16>
    %115 = vector.shape_cast %114 : vector<1x4x288xbf16> to vector<4x288xbf16>
    %c0_57 = arith.constant 0 : index
    %c0_58 = arith.constant 0 : index
    %116 = vector.load %arg5[%c0_57, %c0_58] : memref<16x288xbf16, #tpu.memory_space<vmem>>, vector<4x288xbf16>
    tpu.vector_store %arg5[%c0_57, %c0_58], %115 {strides = array<i32>} : memref<16x288xbf16, #tpu.memory_space<vmem>>, vector<4x288xbf16>,
    %117 = vector.extract_strided_slice %113 {offsets = [1, 0, 0], sizes = [1, 4, 288], strides = [1, 1, 1]} : vector<4x4x288xbf16> to vector<1x4x288xbf16>
    %118 = vector.shape_cast %117 : vector<1x4x288xbf16> to vector<4x288xbf16>
    %c4_59 = arith.constant 4 : index
    %c0_60 = arith.constant 0 : index
    %119 = vector.load %arg5[%c4_59, %c0_60] : memref<16x288xbf16, #tpu.memory_space<vmem>>, vector<4x288xbf16>
    tpu.vector_store %arg5[%c4_59, %c0_60], %118 {strides = array<i32>} : memref<16x288xbf16, #tpu.memory_space<vmem>>, vector<4x288xbf16>,
    %120 = vector.extract_strided_slice %113 {offsets = [2, 0, 0], sizes = [1, 4, 288], strides = [1, 1, 1]} : vector<4x4x288xbf16> to vector<1x4x288xbf16>
    %121 = vector.shape_cast %120 : vector<1x4x288xbf16> to vector<4x288xbf16>
    %c8_61 = arith.constant 8 : index
    %c0_62 = arith.constant 0 : index
    %122 = vector.load %arg5[%c8_61, %c0_62] : memref<16x288xbf16, #tpu.memory_space<vmem>>, vector<4x288xbf16>
    tpu.vector_store %arg5[%c8_61, %c0_62], %121 {strides = array<i32>} : memref<16x288xbf16, #tpu.memory_space<vmem>>, vector<4x288xbf16>,
    %123 = vector.extract_strided_slice %113 {offsets = [3, 0, 0], sizes = [1, 4, 288], strides = [1, 1, 1]} : vector<4x4x288xbf16> to vector<1x4x288xbf16>
    %124 = vector.shape_cast %123 : vector<1x4x288xbf16> to vector<4x288xbf16>
    %c12_63 = arith.constant 12 : index
    %c0_64 = arith.constant 0 : index
    %125 = vector.load %arg5[%c12_63, %c0_64] : memref<16x288xbf16, #tpu.memory_space<vmem>>, vector<4x288xbf16>
    tpu.vector_store %arg5[%c12_63, %c0_64], %124 {strides = array<i32>} : memref<16x288xbf16, #tpu.memory_space<vmem>>, vector<4x288xbf16>,
    %c0_65 = arith.constant 0 : index
    %c0_66 = arith.constant 0 : index
    %126 = vector.load %arg5[%c0_65, %c0_66] : memref<16x288xbf16, #tpu.memory_space<vmem>>, vector<16x288xbf16>
    %c0_67 = arith.constant 0 : index
    %c0_68 = arith.constant 0 : index
    %127 = vector.load %arg2[%c0_67, %c0_68] : memref<288x128xbf16, #tpu.memory_space<vmem>>, vector<288x128xbf16>
    %cst_69 = arith.constant dense<0.000000e+00> : vector<16x128xf32>
    %128 = tpu.matmul %126, %127, %cst_69 {dimension_numbers = #tpu.dot_dimension_numbers<[1], [0], [0], [1], [0, 0, 1, 1], [], []>} : vector<16x288xbf16>, vector<288x128xbf16>, vector<16x128xf32> -> vector<16x128xf32>
    %c0_70 = arith.constant 0 : index
    %c0_71 = arith.constant 0 : index
    %129 = vector.load %arg3[%c0_70, %c0_71] : memref<1x128xf32, #tpu.memory_space<vmem>>, vector<1x128xf32>
    %130 = vector.broadcast %129 : vector<1x128xf32> to vector<16x128xf32>
    %131 = arith.addf %128, %130 : vector<16x128xf32>
    %cst_72 = arith.constant 0.000000e+00 : f32
    %132 = vector.broadcast %cst_72 : f32 to vector<16x128xf32>
    %133 = arith.maximumf %131, %132 : vector<16x128xf32>
    %134 = arith.truncf %133 : vector<16x128xf32> to vector<16x128xbf16>
    %c0_73 = arith.constant 0 : index
    %c3 = arith.constant 3 : index
    %c0_74 = arith.constant 0 : index
    %c0_75 = arith.constant 0 : index
    %135 = vector.load %arg4[%c0_73, %c3, %c0_74, %c0_75] : memref<1x4x16x128xbf16, #tpu.memory_space<vmem>>, vector<1x1x16x128xbf16>
    %136 = vector.shape_cast %135 : vector<1x1x16x128xbf16> to vector<16x128xbf16>
    %137 = vector.shape_cast %134 : vector<16x128xbf16> to vector<1x1x16x128xbf16>
    tpu.vector_store %arg4[%c0_73, %c3, %c0_74, %c0_75], %137 {strides = array<i32>} : memref<1x4x16x128xbf16, #tpu.memory_space<vmem>>, vector<1x1x16x128xbf16>,
    return
  }
  func.func @transform_0(%arg0: i32) -> (i32, i32, i32, i32) {
    %c0_i32 = arith.constant 0 : i32
    %c0_i32_0 = arith.constant 0 : i32
    %c0_i32_1 = arith.constant 0 : i32
    %c0_i32_2 = arith.constant 0 : i32
    return %arg0, %c0_i32, %c0_i32_0, %c0_i32_1 : i32, i32, i32, i32
  }
  func.func @transform_1(%arg0: i32) -> (i32, i32) {
    %c0_i32 = arith.constant 0 : i32
    %c0_i32_0 = arith.constant 0 : i32
    %c0_i32_1 = arith.constant 0 : i32
    return %c0_i32, %c0_i32_0 : i32, i32
  }
  func.func @transform_2(%arg0: i32) -> (i32, i32) {
    %c0_i32 = arith.constant 0 : i32
    %c0_i32_0 = arith.constant 0 : i32
    %c0_i32_1 = arith.constant 0 : i32
    return %c0_i32, %c0_i32_0 : i32, i32
  }
  func.func @transform_3(%arg0: i32) -> (i32, i32, i32, i32) {
    %c0_i32 = arith.constant 0 : i32
    %c0_i32_0 = arith.constant 0 : i32
    %c0_i32_1 = arith.constant 0 : i32
    %c0_i32_2 = arith.constant 0 : i32
    return %arg0, %c0_i32, %c0_i32_0, %c0_i32_1 : i32, i32, i32, i32
  }
}

module attributes {stable_mosaic.version = 11 : i64} {
  func.func @_conv_up_kernel(%arg0: i32, %arg1: memref<1x10x10x128xbf16, #tpu.memory_space<vmem>>, %arg2: memref<1152x128xbf16, #tpu.memory_space<vmem>>, %arg3: memref<1x128xf32, #tpu.memory_space<vmem>>, %arg4: memref<1x4x64x128xf32, #tpu.memory_space<vmem>>, %arg5: memref<64x1152xbf16, #tpu.memory_space<vmem>>) attributes {dimension_semantics = [#tpu.dimension_semantics<parallel>], iteration_bounds = array<i64: 2>, scalar_prefetch = 0 : i64, scratch_operands = 1 : i64, tpu.core_type = #tpu.core_type<tc>, window_params = [{transform_indices = @transform_0, window_bounds = array<i64: 1, 10, 10, 128>}, {pipeline_mode = #tpu.pipeline_mode<synchronous>, transform_indices = @transform_1, window_bounds = array<i64: 1152, 128>}, {pipeline_mode = #tpu.pipeline_mode<synchronous>, transform_indices = @transform_2, window_bounds = array<i64: 1, 128>}, {transform_indices = @transform_3, window_bounds = array<i64: 1, 4, 64, 128>}]} {
    %c0 = arith.constant 0 : index
    %c0_0 = arith.constant 0 : index
    %c0_1 = arith.constant 0 : index
    %c0_2 = arith.constant 0 : index
    %0 = vector.load %arg1[%c0, %c0_0, %c0_1, %c0_2] : memref<1x10x10x128xbf16, #tpu.memory_space<vmem>>, vector<1x10x10x128xbf16>
    %1 = vector.shape_cast %0 : vector<1x10x10x128xbf16> to vector<10x10x128xbf16>
    %2 = vector.extract_strided_slice %1 {offsets = [0, 0, 0], sizes = [8, 8, 128], strides = [1, 1, 1]} : vector<10x10x128xbf16> to vector<8x8x128xbf16>
    %3 = vector.extract_strided_slice %1 {offsets = [0, 1, 0], sizes = [8, 8, 128], strides = [1, 1, 1]} : vector<10x10x128xbf16> to vector<8x8x128xbf16>
    %4 = vector.extract_strided_slice %1 {offsets = [0, 1, 0], sizes = [8, 8, 128], strides = [1, 1, 1]} : vector<10x10x128xbf16> to vector<8x8x128xbf16>
    %5 = vector.extract_strided_slice %1 {offsets = [1, 0, 0], sizes = [8, 8, 128], strides = [1, 1, 1]} : vector<10x10x128xbf16> to vector<8x8x128xbf16>
    %6 = vector.extract_strided_slice %1 {offsets = [1, 1, 0], sizes = [8, 8, 128], strides = [1, 1, 1]} : vector<10x10x128xbf16> to vector<8x8x128xbf16>
    %7 = vector.extract_strided_slice %1 {offsets = [1, 1, 0], sizes = [8, 8, 128], strides = [1, 1, 1]} : vector<10x10x128xbf16> to vector<8x8x128xbf16>
    %8 = vector.extract_strided_slice %1 {offsets = [1, 0, 0], sizes = [8, 8, 128], strides = [1, 1, 1]} : vector<10x10x128xbf16> to vector<8x8x128xbf16>
    %9 = vector.extract_strided_slice %1 {offsets = [1, 1, 0], sizes = [8, 8, 128], strides = [1, 1, 1]} : vector<10x10x128xbf16> to vector<8x8x128xbf16>
    %10 = vector.extract_strided_slice %1 {offsets = [1, 1, 0], sizes = [8, 8, 128], strides = [1, 1, 1]} : vector<10x10x128xbf16> to vector<8x8x128xbf16>
    %11 = tpu.concatenate %2, %3, %4, %5, %6, %7, %8, %9, %10 in 2 : vector<8x8x128xbf16>, vector<8x8x128xbf16>, vector<8x8x128xbf16>, vector<8x8x128xbf16>, vector<8x8x128xbf16>, vector<8x8x128xbf16>, vector<8x8x128xbf16>, vector<8x8x128xbf16>, vector<8x8x128xbf16> -> vector<8x8x1152xbf16>
    %12 = vector.extract_strided_slice %11 {offsets = [0, 0, 0], sizes = [1, 8, 1152], strides = [1, 1, 1]} : vector<8x8x1152xbf16> to vector<1x8x1152xbf16>
    %13 = vector.shape_cast %12 : vector<1x8x1152xbf16> to vector<8x1152xbf16>
    %c0_3 = arith.constant 0 : index
    %c0_4 = arith.constant 0 : index
    %14 = vector.load %arg5[%c0_3, %c0_4] : memref<64x1152xbf16, #tpu.memory_space<vmem>>, vector<8x1152xbf16>
    tpu.vector_store %arg5[%c0_3, %c0_4], %13 {strides = array<i32>} : memref<64x1152xbf16, #tpu.memory_space<vmem>>, vector<8x1152xbf16>,
    %15 = vector.extract_strided_slice %11 {offsets = [1, 0, 0], sizes = [1, 8, 1152], strides = [1, 1, 1]} : vector<8x8x1152xbf16> to vector<1x8x1152xbf16>
    %16 = vector.shape_cast %15 : vector<1x8x1152xbf16> to vector<8x1152xbf16>
    %c8 = arith.constant 8 : index
    %c0_5 = arith.constant 0 : index
    %17 = vector.load %arg5[%c8, %c0_5] : memref<64x1152xbf16, #tpu.memory_space<vmem>>, vector<8x1152xbf16>
    tpu.vector_store %arg5[%c8, %c0_5], %16 {strides = array<i32>} : memref<64x1152xbf16, #tpu.memory_space<vmem>>, vector<8x1152xbf16>,
    %18 = vector.extract_strided_slice %11 {offsets = [2, 0, 0], sizes = [1, 8, 1152], strides = [1, 1, 1]} : vector<8x8x1152xbf16> to vector<1x8x1152xbf16>
    %19 = vector.shape_cast %18 : vector<1x8x1152xbf16> to vector<8x1152xbf16>
    %c16 = arith.constant 16 : index
    %c0_6 = arith.constant 0 : index
    %20 = vector.load %arg5[%c16, %c0_6] : memref<64x1152xbf16, #tpu.memory_space<vmem>>, vector<8x1152xbf16>
    tpu.vector_store %arg5[%c16, %c0_6], %19 {strides = array<i32>} : memref<64x1152xbf16, #tpu.memory_space<vmem>>, vector<8x1152xbf16>,
    %21 = vector.extract_strided_slice %11 {offsets = [3, 0, 0], sizes = [1, 8, 1152], strides = [1, 1, 1]} : vector<8x8x1152xbf16> to vector<1x8x1152xbf16>
    %22 = vector.shape_cast %21 : vector<1x8x1152xbf16> to vector<8x1152xbf16>
    %c24 = arith.constant 24 : index
    %c0_7 = arith.constant 0 : index
    %23 = vector.load %arg5[%c24, %c0_7] : memref<64x1152xbf16, #tpu.memory_space<vmem>>, vector<8x1152xbf16>
    tpu.vector_store %arg5[%c24, %c0_7], %22 {strides = array<i32>} : memref<64x1152xbf16, #tpu.memory_space<vmem>>, vector<8x1152xbf16>,
    %24 = vector.extract_strided_slice %11 {offsets = [4, 0, 0], sizes = [1, 8, 1152], strides = [1, 1, 1]} : vector<8x8x1152xbf16> to vector<1x8x1152xbf16>
    %25 = vector.shape_cast %24 : vector<1x8x1152xbf16> to vector<8x1152xbf16>
    %c32 = arith.constant 32 : index
    %c0_8 = arith.constant 0 : index
    %26 = vector.load %arg5[%c32, %c0_8] : memref<64x1152xbf16, #tpu.memory_space<vmem>>, vector<8x1152xbf16>
    tpu.vector_store %arg5[%c32, %c0_8], %25 {strides = array<i32>} : memref<64x1152xbf16, #tpu.memory_space<vmem>>, vector<8x1152xbf16>,
    %27 = vector.extract_strided_slice %11 {offsets = [5, 0, 0], sizes = [1, 8, 1152], strides = [1, 1, 1]} : vector<8x8x1152xbf16> to vector<1x8x1152xbf16>
    %28 = vector.shape_cast %27 : vector<1x8x1152xbf16> to vector<8x1152xbf16>
    %c40 = arith.constant 40 : index
    %c0_9 = arith.constant 0 : index
    %29 = vector.load %arg5[%c40, %c0_9] : memref<64x1152xbf16, #tpu.memory_space<vmem>>, vector<8x1152xbf16>
    tpu.vector_store %arg5[%c40, %c0_9], %28 {strides = array<i32>} : memref<64x1152xbf16, #tpu.memory_space<vmem>>, vector<8x1152xbf16>,
    %30 = vector.extract_strided_slice %11 {offsets = [6, 0, 0], sizes = [1, 8, 1152], strides = [1, 1, 1]} : vector<8x8x1152xbf16> to vector<1x8x1152xbf16>
    %31 = vector.shape_cast %30 : vector<1x8x1152xbf16> to vector<8x1152xbf16>
    %c48 = arith.constant 48 : index
    %c0_10 = arith.constant 0 : index
    %32 = vector.load %arg5[%c48, %c0_10] : memref<64x1152xbf16, #tpu.memory_space<vmem>>, vector<8x1152xbf16>
    tpu.vector_store %arg5[%c48, %c0_10], %31 {strides = array<i32>} : memref<64x1152xbf16, #tpu.memory_space<vmem>>, vector<8x1152xbf16>,
    %33 = vector.extract_strided_slice %11 {offsets = [7, 0, 0], sizes = [1, 8, 1152], strides = [1, 1, 1]} : vector<8x8x1152xbf16> to vector<1x8x1152xbf16>
    %34 = vector.shape_cast %33 : vector<1x8x1152xbf16> to vector<8x1152xbf16>
    %c56 = arith.constant 56 : index
    %c0_11 = arith.constant 0 : index
    %35 = vector.load %arg5[%c56, %c0_11] : memref<64x1152xbf16, #tpu.memory_space<vmem>>, vector<8x1152xbf16>
    tpu.vector_store %arg5[%c56, %c0_11], %34 {strides = array<i32>} : memref<64x1152xbf16, #tpu.memory_space<vmem>>, vector<8x1152xbf16>,
    %c0_12 = arith.constant 0 : index
    %c0_13 = arith.constant 0 : index
    %36 = vector.load %arg5[%c0_12, %c0_13] : memref<64x1152xbf16, #tpu.memory_space<vmem>>, vector<64x1152xbf16>
    %c0_14 = arith.constant 0 : index
    %c0_15 = arith.constant 0 : index
    %37 = vector.load %arg2[%c0_14, %c0_15] : memref<1152x128xbf16, #tpu.memory_space<vmem>>, vector<1152x128xbf16>
    %cst = arith.constant dense<0.000000e+00> : vector<64x128xf32>
    %38 = tpu.matmul %36, %37, %cst {dimension_numbers = #tpu.dot_dimension_numbers<[1], [0], [0], [1], [0, 0, 1, 1], [], []>} : vector<64x1152xbf16>, vector<1152x128xbf16>, vector<64x128xf32> -> vector<64x128xf32>
    %c0_16 = arith.constant 0 : index
    %c0_17 = arith.constant 0 : index
    %39 = vector.load %arg3[%c0_16, %c0_17] : memref<1x128xf32, #tpu.memory_space<vmem>>, vector<1x128xf32>
    %40 = vector.broadcast %39 : vector<1x128xf32> to vector<64x128xf32>
    %41 = arith.addf %38, %40 : vector<64x128xf32>
    %cst_18 = arith.constant 0.000000e+00 : f32
    %42 = vector.broadcast %cst_18 : f32 to vector<64x128xf32>
    %43 = arith.subf %42, %41 : vector<64x128xf32>
    %44 = math.exp %43 : vector<64x128xf32>
    %cst_19 = arith.constant 1.000000e+00 : f32
    %45 = vector.broadcast %cst_19 : f32 to vector<64x128xf32>
    %46 = arith.addf %45, %44 : vector<64x128xf32>
    %cst_20 = arith.constant 1.000000e+00 : f32
    %47 = vector.broadcast %cst_20 : f32 to vector<64x128xf32>
    %48 = arith.divf %47, %46 : vector<64x128xf32>
    %c0_21 = arith.constant 0 : index
    %c0_22 = arith.constant 0 : index
    %c0_23 = arith.constant 0 : index
    %c0_24 = arith.constant 0 : index
    %49 = vector.load %arg4[%c0_21, %c0_22, %c0_23, %c0_24] : memref<1x4x64x128xf32, #tpu.memory_space<vmem>>, vector<1x1x64x128xf32>
    %50 = vector.shape_cast %49 : vector<1x1x64x128xf32> to vector<64x128xf32>
    %51 = vector.shape_cast %48 : vector<64x128xf32> to vector<1x1x64x128xf32>
    tpu.vector_store %arg4[%c0_21, %c0_22, %c0_23, %c0_24], %51 {strides = array<i32>} : memref<1x4x64x128xf32, #tpu.memory_space<vmem>>, vector<1x1x64x128xf32>,
    %52 = vector.extract_strided_slice %1 {offsets = [0, 1, 0], sizes = [8, 8, 128], strides = [1, 1, 1]} : vector<10x10x128xbf16> to vector<8x8x128xbf16>
    %53 = vector.extract_strided_slice %1 {offsets = [0, 1, 0], sizes = [8, 8, 128], strides = [1, 1, 1]} : vector<10x10x128xbf16> to vector<8x8x128xbf16>
    %54 = vector.extract_strided_slice %1 {offsets = [0, 2, 0], sizes = [8, 8, 128], strides = [1, 1, 1]} : vector<10x10x128xbf16> to vector<8x8x128xbf16>
    %55 = vector.extract_strided_slice %1 {offsets = [1, 1, 0], sizes = [8, 8, 128], strides = [1, 1, 1]} : vector<10x10x128xbf16> to vector<8x8x128xbf16>
    %56 = vector.extract_strided_slice %1 {offsets = [1, 1, 0], sizes = [8, 8, 128], strides = [1, 1, 1]} : vector<10x10x128xbf16> to vector<8x8x128xbf16>
    %57 = vector.extract_strided_slice %1 {offsets = [1, 2, 0], sizes = [8, 8, 128], strides = [1, 1, 1]} : vector<10x10x128xbf16> to vector<8x8x128xbf16>
    %58 = vector.extract_strided_slice %1 {offsets = [1, 1, 0], sizes = [8, 8, 128], strides = [1, 1, 1]} : vector<10x10x128xbf16> to vector<8x8x128xbf16>
    %59 = vector.extract_strided_slice %1 {offsets = [1, 1, 0], sizes = [8, 8, 128], strides = [1, 1, 1]} : vector<10x10x128xbf16> to vector<8x8x128xbf16>
    %60 = vector.extract_strided_slice %1 {offsets = [1, 2, 0], sizes = [8, 8, 128], strides = [1, 1, 1]} : vector<10x10x128xbf16> to vector<8x8x128xbf16>
    %61 = tpu.concatenate %52, %53, %54, %55, %56, %57, %58, %59, %60 in 2 : vector<8x8x128xbf16>, vector<8x8x128xbf16>, vector<8x8x128xbf16>, vector<8x8x128xbf16>, vector<8x8x128xbf16>, vector<8x8x128xbf16>, vector<8x8x128xbf16>, vector<8x8x128xbf16>, vector<8x8x128xbf16> -> vector<8x8x1152xbf16>
    %62 = vector.extract_strided_slice %61 {offsets = [0, 0, 0], sizes = [1, 8, 1152], strides = [1, 1, 1]} : vector<8x8x1152xbf16> to vector<1x8x1152xbf16>
    %63 = vector.shape_cast %62 : vector<1x8x1152xbf16> to vector<8x1152xbf16>
    %c0_25 = arith.constant 0 : index
    %c0_26 = arith.constant 0 : index
    %64 = vector.load %arg5[%c0_25, %c0_26] : memref<64x1152xbf16, #tpu.memory_space<vmem>>, vector<8x1152xbf16>
    tpu.vector_store %arg5[%c0_25, %c0_26], %63 {strides = array<i32>} : memref<64x1152xbf16, #tpu.memory_space<vmem>>, vector<8x1152xbf16>,
    %65 = vector.extract_strided_slice %61 {offsets = [1, 0, 0], sizes = [1, 8, 1152], strides = [1, 1, 1]} : vector<8x8x1152xbf16> to vector<1x8x1152xbf16>
    %66 = vector.shape_cast %65 : vector<1x8x1152xbf16> to vector<8x1152xbf16>
    %c8_27 = arith.constant 8 : index
    %c0_28 = arith.constant 0 : index
    %67 = vector.load %arg5[%c8_27, %c0_28] : memref<64x1152xbf16, #tpu.memory_space<vmem>>, vector<8x1152xbf16>
    tpu.vector_store %arg5[%c8_27, %c0_28], %66 {strides = array<i32>} : memref<64x1152xbf16, #tpu.memory_space<vmem>>, vector<8x1152xbf16>,
    %68 = vector.extract_strided_slice %61 {offsets = [2, 0, 0], sizes = [1, 8, 1152], strides = [1, 1, 1]} : vector<8x8x1152xbf16> to vector<1x8x1152xbf16>
    %69 = vector.shape_cast %68 : vector<1x8x1152xbf16> to vector<8x1152xbf16>
    %c16_29 = arith.constant 16 : index
    %c0_30 = arith.constant 0 : index
    %70 = vector.load %arg5[%c16_29, %c0_30] : memref<64x1152xbf16, #tpu.memory_space<vmem>>, vector<8x1152xbf16>
    tpu.vector_store %arg5[%c16_29, %c0_30], %69 {strides = array<i32>} : memref<64x1152xbf16, #tpu.memory_space<vmem>>, vector<8x1152xbf16>,
    %71 = vector.extract_strided_slice %61 {offsets = [3, 0, 0], sizes = [1, 8, 1152], strides = [1, 1, 1]} : vector<8x8x1152xbf16> to vector<1x8x1152xbf16>
    %72 = vector.shape_cast %71 : vector<1x8x1152xbf16> to vector<8x1152xbf16>
    %c24_31 = arith.constant 24 : index
    %c0_32 = arith.constant 0 : index
    %73 = vector.load %arg5[%c24_31, %c0_32] : memref<64x1152xbf16, #tpu.memory_space<vmem>>, vector<8x1152xbf16>
    tpu.vector_store %arg5[%c24_31, %c0_32], %72 {strides = array<i32>} : memref<64x1152xbf16, #tpu.memory_space<vmem>>, vector<8x1152xbf16>,
    %74 = vector.extract_strided_slice %61 {offsets = [4, 0, 0], sizes = [1, 8, 1152], strides = [1, 1, 1]} : vector<8x8x1152xbf16> to vector<1x8x1152xbf16>
    %75 = vector.shape_cast %74 : vector<1x8x1152xbf16> to vector<8x1152xbf16>
    %c32_33 = arith.constant 32 : index
    %c0_34 = arith.constant 0 : index
    %76 = vector.load %arg5[%c32_33, %c0_34] : memref<64x1152xbf16, #tpu.memory_space<vmem>>, vector<8x1152xbf16>
    tpu.vector_store %arg5[%c32_33, %c0_34], %75 {strides = array<i32>} : memref<64x1152xbf16, #tpu.memory_space<vmem>>, vector<8x1152xbf16>,
    %77 = vector.extract_strided_slice %61 {offsets = [5, 0, 0], sizes = [1, 8, 1152], strides = [1, 1, 1]} : vector<8x8x1152xbf16> to vector<1x8x1152xbf16>
    %78 = vector.shape_cast %77 : vector<1x8x1152xbf16> to vector<8x1152xbf16>
    %c40_35 = arith.constant 40 : index
    %c0_36 = arith.constant 0 : index
    %79 = vector.load %arg5[%c40_35, %c0_36] : memref<64x1152xbf16, #tpu.memory_space<vmem>>, vector<8x1152xbf16>
    tpu.vector_store %arg5[%c40_35, %c0_36], %78 {strides = array<i32>} : memref<64x1152xbf16, #tpu.memory_space<vmem>>, vector<8x1152xbf16>,
    %80 = vector.extract_strided_slice %61 {offsets = [6, 0, 0], sizes = [1, 8, 1152], strides = [1, 1, 1]} : vector<8x8x1152xbf16> to vector<1x8x1152xbf16>
    %81 = vector.shape_cast %80 : vector<1x8x1152xbf16> to vector<8x1152xbf16>
    %c48_37 = arith.constant 48 : index
    %c0_38 = arith.constant 0 : index
    %82 = vector.load %arg5[%c48_37, %c0_38] : memref<64x1152xbf16, #tpu.memory_space<vmem>>, vector<8x1152xbf16>
    tpu.vector_store %arg5[%c48_37, %c0_38], %81 {strides = array<i32>} : memref<64x1152xbf16, #tpu.memory_space<vmem>>, vector<8x1152xbf16>,
    %83 = vector.extract_strided_slice %61 {offsets = [7, 0, 0], sizes = [1, 8, 1152], strides = [1, 1, 1]} : vector<8x8x1152xbf16> to vector<1x8x1152xbf16>
    %84 = vector.shape_cast %83 : vector<1x8x1152xbf16> to vector<8x1152xbf16>
    %c56_39 = arith.constant 56 : index
    %c0_40 = arith.constant 0 : index
    %85 = vector.load %arg5[%c56_39, %c0_40] : memref<64x1152xbf16, #tpu.memory_space<vmem>>, vector<8x1152xbf16>
    tpu.vector_store %arg5[%c56_39, %c0_40], %84 {strides = array<i32>} : memref<64x1152xbf16, #tpu.memory_space<vmem>>, vector<8x1152xbf16>,
    %c0_41 = arith.constant 0 : index
    %c0_42 = arith.constant 0 : index
    %86 = vector.load %arg5[%c0_41, %c0_42] : memref<64x1152xbf16, #tpu.memory_space<vmem>>, vector<64x1152xbf16>
    %c0_43 = arith.constant 0 : index
    %c0_44 = arith.constant 0 : index
    %87 = vector.load %arg2[%c0_43, %c0_44] : memref<1152x128xbf16, #tpu.memory_space<vmem>>, vector<1152x128xbf16>
    %cst_45 = arith.constant dense<0.000000e+00> : vector<64x128xf32>
    %88 = tpu.matmul %86, %87, %cst_45 {dimension_numbers = #tpu.dot_dimension_numbers<[1], [0], [0], [1], [0, 0, 1, 1], [], []>} : vector<64x1152xbf16>, vector<1152x128xbf16>, vector<64x128xf32> -> vector<64x128xf32>
    %c0_46 = arith.constant 0 : index
    %c0_47 = arith.constant 0 : index
    %89 = vector.load %arg3[%c0_46, %c0_47] : memref<1x128xf32, #tpu.memory_space<vmem>>, vector<1x128xf32>
    %90 = vector.broadcast %89 : vector<1x128xf32> to vector<64x128xf32>
    %91 = arith.addf %88, %90 : vector<64x128xf32>
    %cst_48 = arith.constant 0.000000e+00 : f32
    %92 = vector.broadcast %cst_48 : f32 to vector<64x128xf32>
    %93 = arith.subf %92, %91 : vector<64x128xf32>
    %94 = math.exp %93 : vector<64x128xf32>
    %cst_49 = arith.constant 1.000000e+00 : f32
    %95 = vector.broadcast %cst_49 : f32 to vector<64x128xf32>
    %96 = arith.addf %95, %94 : vector<64x128xf32>
    %cst_50 = arith.constant 1.000000e+00 : f32
    %97 = vector.broadcast %cst_50 : f32 to vector<64x128xf32>
    %98 = arith.divf %97, %96 : vector<64x128xf32>
    %c0_51 = arith.constant 0 : index
    %c1 = arith.constant 1 : index
    %c0_52 = arith.constant 0 : index
    %c0_53 = arith.constant 0 : index
    %99 = vector.load %arg4[%c0_51, %c1, %c0_52, %c0_53] : memref<1x4x64x128xf32, #tpu.memory_space<vmem>>, vector<1x1x64x128xf32>
    %100 = vector.shape_cast %99 : vector<1x1x64x128xf32> to vector<64x128xf32>
    %101 = vector.shape_cast %98 : vector<64x128xf32> to vector<1x1x64x128xf32>
    tpu.vector_store %arg4[%c0_51, %c1, %c0_52, %c0_53], %101 {strides = array<i32>} : memref<1x4x64x128xf32, #tpu.memory_space<vmem>>, vector<1x1x64x128xf32>,
    %102 = vector.extract_strided_slice %1 {offsets = [1, 0, 0], sizes = [8, 8, 128], strides = [1, 1, 1]} : vector<10x10x128xbf16> to vector<8x8x128xbf16>
    %103 = vector.extract_strided_slice %1 {offsets = [1, 1, 0], sizes = [8, 8, 128], strides = [1, 1, 1]} : vector<10x10x128xbf16> to vector<8x8x128xbf16>
    %104 = vector.extract_strided_slice %1 {offsets = [1, 1, 0], sizes = [8, 8, 128], strides = [1, 1, 1]} : vector<10x10x128xbf16> to vector<8x8x128xbf16>
    %105 = vector.extract_strided_slice %1 {offsets = [1, 0, 0], sizes = [8, 8, 128], strides = [1, 1, 1]} : vector<10x10x128xbf16> to vector<8x8x128xbf16>
    %106 = vector.extract_strided_slice %1 {offsets = [1, 1, 0], sizes = [8, 8, 128], strides = [1, 1, 1]} : vector<10x10x128xbf16> to vector<8x8x128xbf16>
    %107 = vector.extract_strided_slice %1 {offsets = [1, 1, 0], sizes = [8, 8, 128], strides = [1, 1, 1]} : vector<10x10x128xbf16> to vector<8x8x128xbf16>
    %108 = vector.extract_strided_slice %1 {offsets = [2, 0, 0], sizes = [8, 8, 128], strides = [1, 1, 1]} : vector<10x10x128xbf16> to vector<8x8x128xbf16>
    %109 = vector.extract_strided_slice %1 {offsets = [2, 1, 0], sizes = [8, 8, 128], strides = [1, 1, 1]} : vector<10x10x128xbf16> to vector<8x8x128xbf16>
    %110 = vector.extract_strided_slice %1 {offsets = [2, 1, 0], sizes = [8, 8, 128], strides = [1, 1, 1]} : vector<10x10x128xbf16> to vector<8x8x128xbf16>
    %111 = tpu.concatenate %102, %103, %104, %105, %106, %107, %108, %109, %110 in 2 : vector<8x8x128xbf16>, vector<8x8x128xbf16>, vector<8x8x128xbf16>, vector<8x8x128xbf16>, vector<8x8x128xbf16>, vector<8x8x128xbf16>, vector<8x8x128xbf16>, vector<8x8x128xbf16>, vector<8x8x128xbf16> -> vector<8x8x1152xbf16>
    %112 = vector.extract_strided_slice %111 {offsets = [0, 0, 0], sizes = [1, 8, 1152], strides = [1, 1, 1]} : vector<8x8x1152xbf16> to vector<1x8x1152xbf16>
    %113 = vector.shape_cast %112 : vector<1x8x1152xbf16> to vector<8x1152xbf16>
    %c0_54 = arith.constant 0 : index
    %c0_55 = arith.constant 0 : index
    %114 = vector.load %arg5[%c0_54, %c0_55] : memref<64x1152xbf16, #tpu.memory_space<vmem>>, vector<8x1152xbf16>
    tpu.vector_store %arg5[%c0_54, %c0_55], %113 {strides = array<i32>} : memref<64x1152xbf16, #tpu.memory_space<vmem>>, vector<8x1152xbf16>,
    %115 = vector.extract_strided_slice %111 {offsets = [1, 0, 0], sizes = [1, 8, 1152], strides = [1, 1, 1]} : vector<8x8x1152xbf16> to vector<1x8x1152xbf16>
    %116 = vector.shape_cast %115 : vector<1x8x1152xbf16> to vector<8x1152xbf16>
    %c8_56 = arith.constant 8 : index
    %c0_57 = arith.constant 0 : index
    %117 = vector.load %arg5[%c8_56, %c0_57] : memref<64x1152xbf16, #tpu.memory_space<vmem>>, vector<8x1152xbf16>
    tpu.vector_store %arg5[%c8_56, %c0_57], %116 {strides = array<i32>} : memref<64x1152xbf16, #tpu.memory_space<vmem>>, vector<8x1152xbf16>,
    %118 = vector.extract_strided_slice %111 {offsets = [2, 0, 0], sizes = [1, 8, 1152], strides = [1, 1, 1]} : vector<8x8x1152xbf16> to vector<1x8x1152xbf16>
    %119 = vector.shape_cast %118 : vector<1x8x1152xbf16> to vector<8x1152xbf16>
    %c16_58 = arith.constant 16 : index
    %c0_59 = arith.constant 0 : index
    %120 = vector.load %arg5[%c16_58, %c0_59] : memref<64x1152xbf16, #tpu.memory_space<vmem>>, vector<8x1152xbf16>
    tpu.vector_store %arg5[%c16_58, %c0_59], %119 {strides = array<i32>} : memref<64x1152xbf16, #tpu.memory_space<vmem>>, vector<8x1152xbf16>,
    %121 = vector.extract_strided_slice %111 {offsets = [3, 0, 0], sizes = [1, 8, 1152], strides = [1, 1, 1]} : vector<8x8x1152xbf16> to vector<1x8x1152xbf16>
    %122 = vector.shape_cast %121 : vector<1x8x1152xbf16> to vector<8x1152xbf16>
    %c24_60 = arith.constant 24 : index
    %c0_61 = arith.constant 0 : index
    %123 = vector.load %arg5[%c24_60, %c0_61] : memref<64x1152xbf16, #tpu.memory_space<vmem>>, vector<8x1152xbf16>
    tpu.vector_store %arg5[%c24_60, %c0_61], %122 {strides = array<i32>} : memref<64x1152xbf16, #tpu.memory_space<vmem>>, vector<8x1152xbf16>,
    %124 = vector.extract_strided_slice %111 {offsets = [4, 0, 0], sizes = [1, 8, 1152], strides = [1, 1, 1]} : vector<8x8x1152xbf16> to vector<1x8x1152xbf16>
    %125 = vector.shape_cast %124 : vector<1x8x1152xbf16> to vector<8x1152xbf16>
    %c32_62 = arith.constant 32 : index
    %c0_63 = arith.constant 0 : index
    %126 = vector.load %arg5[%c32_62, %c0_63] : memref<64x1152xbf16, #tpu.memory_space<vmem>>, vector<8x1152xbf16>
    tpu.vector_store %arg5[%c32_62, %c0_63], %125 {strides = array<i32>} : memref<64x1152xbf16, #tpu.memory_space<vmem>>, vector<8x1152xbf16>,
    %127 = vector.extract_strided_slice %111 {offsets = [5, 0, 0], sizes = [1, 8, 1152], strides = [1, 1, 1]} : vector<8x8x1152xbf16> to vector<1x8x1152xbf16>
    %128 = vector.shape_cast %127 : vector<1x8x1152xbf16> to vector<8x1152xbf16>
    %c40_64 = arith.constant 40 : index
    %c0_65 = arith.constant 0 : index
    %129 = vector.load %arg5[%c40_64, %c0_65] : memref<64x1152xbf16, #tpu.memory_space<vmem>>, vector<8x1152xbf16>
    tpu.vector_store %arg5[%c40_64, %c0_65], %128 {strides = array<i32>} : memref<64x1152xbf16, #tpu.memory_space<vmem>>, vector<8x1152xbf16>,
    %130 = vector.extract_strided_slice %111 {offsets = [6, 0, 0], sizes = [1, 8, 1152], strides = [1, 1, 1]} : vector<8x8x1152xbf16> to vector<1x8x1152xbf16>
    %131 = vector.shape_cast %130 : vector<1x8x1152xbf16> to vector<8x1152xbf16>
    %c48_66 = arith.constant 48 : index
    %c0_67 = arith.constant 0 : index
    %132 = vector.load %arg5[%c48_66, %c0_67] : memref<64x1152xbf16, #tpu.memory_space<vmem>>, vector<8x1152xbf16>
    tpu.vector_store %arg5[%c48_66, %c0_67], %131 {strides = array<i32>} : memref<64x1152xbf16, #tpu.memory_space<vmem>>, vector<8x1152xbf16>,
    %133 = vector.extract_strided_slice %111 {offsets = [7, 0, 0], sizes = [1, 8, 1152], strides = [1, 1, 1]} : vector<8x8x1152xbf16> to vector<1x8x1152xbf16>
    %134 = vector.shape_cast %133 : vector<1x8x1152xbf16> to vector<8x1152xbf16>
    %c56_68 = arith.constant 56 : index
    %c0_69 = arith.constant 0 : index
    %135 = vector.load %arg5[%c56_68, %c0_69] : memref<64x1152xbf16, #tpu.memory_space<vmem>>, vector<8x1152xbf16>
    tpu.vector_store %arg5[%c56_68, %c0_69], %134 {strides = array<i32>} : memref<64x1152xbf16, #tpu.memory_space<vmem>>, vector<8x1152xbf16>,
    %c0_70 = arith.constant 0 : index
    %c0_71 = arith.constant 0 : index
    %136 = vector.load %arg5[%c0_70, %c0_71] : memref<64x1152xbf16, #tpu.memory_space<vmem>>, vector<64x1152xbf16>
    %c0_72 = arith.constant 0 : index
    %c0_73 = arith.constant 0 : index
    %137 = vector.load %arg2[%c0_72, %c0_73] : memref<1152x128xbf16, #tpu.memory_space<vmem>>, vector<1152x128xbf16>
    %cst_74 = arith.constant dense<0.000000e+00> : vector<64x128xf32>
    %138 = tpu.matmul %136, %137, %cst_74 {dimension_numbers = #tpu.dot_dimension_numbers<[1], [0], [0], [1], [0, 0, 1, 1], [], []>} : vector<64x1152xbf16>, vector<1152x128xbf16>, vector<64x128xf32> -> vector<64x128xf32>
    %c0_75 = arith.constant 0 : index
    %c0_76 = arith.constant 0 : index
    %139 = vector.load %arg3[%c0_75, %c0_76] : memref<1x128xf32, #tpu.memory_space<vmem>>, vector<1x128xf32>
    %140 = vector.broadcast %139 : vector<1x128xf32> to vector<64x128xf32>
    %141 = arith.addf %138, %140 : vector<64x128xf32>
    %cst_77 = arith.constant 0.000000e+00 : f32
    %142 = vector.broadcast %cst_77 : f32 to vector<64x128xf32>
    %143 = arith.subf %142, %141 : vector<64x128xf32>
    %144 = math.exp %143 : vector<64x128xf32>
    %cst_78 = arith.constant 1.000000e+00 : f32
    %145 = vector.broadcast %cst_78 : f32 to vector<64x128xf32>
    %146 = arith.addf %145, %144 : vector<64x128xf32>
    %cst_79 = arith.constant 1.000000e+00 : f32
    %147 = vector.broadcast %cst_79 : f32 to vector<64x128xf32>
    %148 = arith.divf %147, %146 : vector<64x128xf32>
    %c0_80 = arith.constant 0 : index
    %c2 = arith.constant 2 : index
    %c0_81 = arith.constant 0 : index
    %c0_82 = arith.constant 0 : index
    %149 = vector.load %arg4[%c0_80, %c2, %c0_81, %c0_82] : memref<1x4x64x128xf32, #tpu.memory_space<vmem>>, vector<1x1x64x128xf32>
    %150 = vector.shape_cast %149 : vector<1x1x64x128xf32> to vector<64x128xf32>
    %151 = vector.shape_cast %148 : vector<64x128xf32> to vector<1x1x64x128xf32>
    tpu.vector_store %arg4[%c0_80, %c2, %c0_81, %c0_82], %151 {strides = array<i32>} : memref<1x4x64x128xf32, #tpu.memory_space<vmem>>, vector<1x1x64x128xf32>,
    %152 = vector.extract_strided_slice %1 {offsets = [1, 1, 0], sizes = [8, 8, 128], strides = [1, 1, 1]} : vector<10x10x128xbf16> to vector<8x8x128xbf16>
    %153 = vector.extract_strided_slice %1 {offsets = [1, 1, 0], sizes = [8, 8, 128], strides = [1, 1, 1]} : vector<10x10x128xbf16> to vector<8x8x128xbf16>
    %154 = vector.extract_strided_slice %1 {offsets = [1, 2, 0], sizes = [8, 8, 128], strides = [1, 1, 1]} : vector<10x10x128xbf16> to vector<8x8x128xbf16>
    %155 = vector.extract_strided_slice %1 {offsets = [1, 1, 0], sizes = [8, 8, 128], strides = [1, 1, 1]} : vector<10x10x128xbf16> to vector<8x8x128xbf16>
    %156 = vector.extract_strided_slice %1 {offsets = [1, 1, 0], sizes = [8, 8, 128], strides = [1, 1, 1]} : vector<10x10x128xbf16> to vector<8x8x128xbf16>
    %157 = vector.extract_strided_slice %1 {offsets = [1, 2, 0], sizes = [8, 8, 128], strides = [1, 1, 1]} : vector<10x10x128xbf16> to vector<8x8x128xbf16>
    %158 = vector.extract_strided_slice %1 {offsets = [2, 1, 0], sizes = [8, 8, 128], strides = [1, 1, 1]} : vector<10x10x128xbf16> to vector<8x8x128xbf16>
    %159 = vector.extract_strided_slice %1 {offsets = [2, 1, 0], sizes = [8, 8, 128], strides = [1, 1, 1]} : vector<10x10x128xbf16> to vector<8x8x128xbf16>
    %160 = vector.extract_strided_slice %1 {offsets = [2, 2, 0], sizes = [8, 8, 128], strides = [1, 1, 1]} : vector<10x10x128xbf16> to vector<8x8x128xbf16>
    %161 = tpu.concatenate %152, %153, %154, %155, %156, %157, %158, %159, %160 in 2 : vector<8x8x128xbf16>, vector<8x8x128xbf16>, vector<8x8x128xbf16>, vector<8x8x128xbf16>, vector<8x8x128xbf16>, vector<8x8x128xbf16>, vector<8x8x128xbf16>, vector<8x8x128xbf16>, vector<8x8x128xbf16> -> vector<8x8x1152xbf16>
    %162 = vector.extract_strided_slice %161 {offsets = [0, 0, 0], sizes = [1, 8, 1152], strides = [1, 1, 1]} : vector<8x8x1152xbf16> to vector<1x8x1152xbf16>
    %163 = vector.shape_cast %162 : vector<1x8x1152xbf16> to vector<8x1152xbf16>
    %c0_83 = arith.constant 0 : index
    %c0_84 = arith.constant 0 : index
    %164 = vector.load %arg5[%c0_83, %c0_84] : memref<64x1152xbf16, #tpu.memory_space<vmem>>, vector<8x1152xbf16>
    tpu.vector_store %arg5[%c0_83, %c0_84], %163 {strides = array<i32>} : memref<64x1152xbf16, #tpu.memory_space<vmem>>, vector<8x1152xbf16>,
    %165 = vector.extract_strided_slice %161 {offsets = [1, 0, 0], sizes = [1, 8, 1152], strides = [1, 1, 1]} : vector<8x8x1152xbf16> to vector<1x8x1152xbf16>
    %166 = vector.shape_cast %165 : vector<1x8x1152xbf16> to vector<8x1152xbf16>
    %c8_85 = arith.constant 8 : index
    %c0_86 = arith.constant 0 : index
    %167 = vector.load %arg5[%c8_85, %c0_86] : memref<64x1152xbf16, #tpu.memory_space<vmem>>, vector<8x1152xbf16>
    tpu.vector_store %arg5[%c8_85, %c0_86], %166 {strides = array<i32>} : memref<64x1152xbf16, #tpu.memory_space<vmem>>, vector<8x1152xbf16>,
    %168 = vector.extract_strided_slice %161 {offsets = [2, 0, 0], sizes = [1, 8, 1152], strides = [1, 1, 1]} : vector<8x8x1152xbf16> to vector<1x8x1152xbf16>
    %169 = vector.shape_cast %168 : vector<1x8x1152xbf16> to vector<8x1152xbf16>
    %c16_87 = arith.constant 16 : index
    %c0_88 = arith.constant 0 : index
    %170 = vector.load %arg5[%c16_87, %c0_88] : memref<64x1152xbf16, #tpu.memory_space<vmem>>, vector<8x1152xbf16>
    tpu.vector_store %arg5[%c16_87, %c0_88], %169 {strides = array<i32>} : memref<64x1152xbf16, #tpu.memory_space<vmem>>, vector<8x1152xbf16>,
    %171 = vector.extract_strided_slice %161 {offsets = [3, 0, 0], sizes = [1, 8, 1152], strides = [1, 1, 1]} : vector<8x8x1152xbf16> to vector<1x8x1152xbf16>
    %172 = vector.shape_cast %171 : vector<1x8x1152xbf16> to vector<8x1152xbf16>
    %c24_89 = arith.constant 24 : index
    %c0_90 = arith.constant 0 : index
    %173 = vector.load %arg5[%c24_89, %c0_90] : memref<64x1152xbf16, #tpu.memory_space<vmem>>, vector<8x1152xbf16>
    tpu.vector_store %arg5[%c24_89, %c0_90], %172 {strides = array<i32>} : memref<64x1152xbf16, #tpu.memory_space<vmem>>, vector<8x1152xbf16>,
    %174 = vector.extract_strided_slice %161 {offsets = [4, 0, 0], sizes = [1, 8, 1152], strides = [1, 1, 1]} : vector<8x8x1152xbf16> to vector<1x8x1152xbf16>
    %175 = vector.shape_cast %174 : vector<1x8x1152xbf16> to vector<8x1152xbf16>
    %c32_91 = arith.constant 32 : index
    %c0_92 = arith.constant 0 : index
    %176 = vector.load %arg5[%c32_91, %c0_92] : memref<64x1152xbf16, #tpu.memory_space<vmem>>, vector<8x1152xbf16>
    tpu.vector_store %arg5[%c32_91, %c0_92], %175 {strides = array<i32>} : memref<64x1152xbf16, #tpu.memory_space<vmem>>, vector<8x1152xbf16>,
    %177 = vector.extract_strided_slice %161 {offsets = [5, 0, 0], sizes = [1, 8, 1152], strides = [1, 1, 1]} : vector<8x8x1152xbf16> to vector<1x8x1152xbf16>
    %178 = vector.shape_cast %177 : vector<1x8x1152xbf16> to vector<8x1152xbf16>
    %c40_93 = arith.constant 40 : index
    %c0_94 = arith.constant 0 : index
    %179 = vector.load %arg5[%c40_93, %c0_94] : memref<64x1152xbf16, #tpu.memory_space<vmem>>, vector<8x1152xbf16>
    tpu.vector_store %arg5[%c40_93, %c0_94], %178 {strides = array<i32>} : memref<64x1152xbf16, #tpu.memory_space<vmem>>, vector<8x1152xbf16>,
    %180 = vector.extract_strided_slice %161 {offsets = [6, 0, 0], sizes = [1, 8, 1152], strides = [1, 1, 1]} : vector<8x8x1152xbf16> to vector<1x8x1152xbf16>
    %181 = vector.shape_cast %180 : vector<1x8x1152xbf16> to vector<8x1152xbf16>
    %c48_95 = arith.constant 48 : index
    %c0_96 = arith.constant 0 : index
    %182 = vector.load %arg5[%c48_95, %c0_96] : memref<64x1152xbf16, #tpu.memory_space<vmem>>, vector<8x1152xbf16>
    tpu.vector_store %arg5[%c48_95, %c0_96], %181 {strides = array<i32>} : memref<64x1152xbf16, #tpu.memory_space<vmem>>, vector<8x1152xbf16>,
    %183 = vector.extract_strided_slice %161 {offsets = [7, 0, 0], sizes = [1, 8, 1152], strides = [1, 1, 1]} : vector<8x8x1152xbf16> to vector<1x8x1152xbf16>
    %184 = vector.shape_cast %183 : vector<1x8x1152xbf16> to vector<8x1152xbf16>
    %c56_97 = arith.constant 56 : index
    %c0_98 = arith.constant 0 : index
    %185 = vector.load %arg5[%c56_97, %c0_98] : memref<64x1152xbf16, #tpu.memory_space<vmem>>, vector<8x1152xbf16>
    tpu.vector_store %arg5[%c56_97, %c0_98], %184 {strides = array<i32>} : memref<64x1152xbf16, #tpu.memory_space<vmem>>, vector<8x1152xbf16>,
    %c0_99 = arith.constant 0 : index
    %c0_100 = arith.constant 0 : index
    %186 = vector.load %arg5[%c0_99, %c0_100] : memref<64x1152xbf16, #tpu.memory_space<vmem>>, vector<64x1152xbf16>
    %c0_101 = arith.constant 0 : index
    %c0_102 = arith.constant 0 : index
    %187 = vector.load %arg2[%c0_101, %c0_102] : memref<1152x128xbf16, #tpu.memory_space<vmem>>, vector<1152x128xbf16>
    %cst_103 = arith.constant dense<0.000000e+00> : vector<64x128xf32>
    %188 = tpu.matmul %186, %187, %cst_103 {dimension_numbers = #tpu.dot_dimension_numbers<[1], [0], [0], [1], [0, 0, 1, 1], [], []>} : vector<64x1152xbf16>, vector<1152x128xbf16>, vector<64x128xf32> -> vector<64x128xf32>
    %c0_104 = arith.constant 0 : index
    %c0_105 = arith.constant 0 : index
    %189 = vector.load %arg3[%c0_104, %c0_105] : memref<1x128xf32, #tpu.memory_space<vmem>>, vector<1x128xf32>
    %190 = vector.broadcast %189 : vector<1x128xf32> to vector<64x128xf32>
    %191 = arith.addf %188, %190 : vector<64x128xf32>
    %cst_106 = arith.constant 0.000000e+00 : f32
    %192 = vector.broadcast %cst_106 : f32 to vector<64x128xf32>
    %193 = arith.subf %192, %191 : vector<64x128xf32>
    %194 = math.exp %193 : vector<64x128xf32>
    %cst_107 = arith.constant 1.000000e+00 : f32
    %195 = vector.broadcast %cst_107 : f32 to vector<64x128xf32>
    %196 = arith.addf %195, %194 : vector<64x128xf32>
    %cst_108 = arith.constant 1.000000e+00 : f32
    %197 = vector.broadcast %cst_108 : f32 to vector<64x128xf32>
    %198 = arith.divf %197, %196 : vector<64x128xf32>
    %c0_109 = arith.constant 0 : index
    %c3 = arith.constant 3 : index
    %c0_110 = arith.constant 0 : index
    %c0_111 = arith.constant 0 : index
    %199 = vector.load %arg4[%c0_109, %c3, %c0_110, %c0_111] : memref<1x4x64x128xf32, #tpu.memory_space<vmem>>, vector<1x1x64x128xf32>
    %200 = vector.shape_cast %199 : vector<1x1x64x128xf32> to vector<64x128xf32>
    %201 = vector.shape_cast %198 : vector<64x128xf32> to vector<1x1x64x128xf32>
    tpu.vector_store %arg4[%c0_109, %c3, %c0_110, %c0_111], %201 {strides = array<i32>} : memref<1x4x64x128xf32, #tpu.memory_space<vmem>>, vector<1x1x64x128xf32>,
    return
  }
  func.func @transform_0(%arg0: i32) -> (i32, i32, i32, i32) {
    %c0_i32 = arith.constant 0 : i32
    %c0_i32_0 = arith.constant 0 : i32
    %c0_i32_1 = arith.constant 0 : i32
    %c0_i32_2 = arith.constant 0 : i32
    return %arg0, %c0_i32, %c0_i32_0, %c0_i32_1 : i32, i32, i32, i32
  }
  func.func @transform_1(%arg0: i32) -> (i32, i32) {
    %c0_i32 = arith.constant 0 : i32
    %c0_i32_0 = arith.constant 0 : i32
    %c0_i32_1 = arith.constant 0 : i32
    return %c0_i32, %c0_i32_0 : i32, i32
  }
  func.func @transform_2(%arg0: i32) -> (i32, i32) {
    %c0_i32 = arith.constant 0 : i32
    %c0_i32_0 = arith.constant 0 : i32
    %c0_i32_1 = arith.constant 0 : i32
    return %c0_i32, %c0_i32_0 : i32, i32
  }
  func.func @transform_3(%arg0: i32) -> (i32, i32, i32, i32) {
    %c0_i32 = arith.constant 0 : i32
    %c0_i32_0 = arith.constant 0 : i32
    %c0_i32_1 = arith.constant 0 : i32
    %c0_i32_2 = arith.constant 0 : i32
    return %arg0, %c0_i32, %c0_i32_0, %c0_i32_1 : i32, i32, i32, i32
  }
}

</mosaic_0001>

<bundles_post_ra>
// kernel: adaptive_homotopy_forward.5
= control target key start
LH: loop header
LB: loop body
LE: loop exit
PB: predicated region body
PF: predicated region fallthrough
CT: control target
= control target key end

     0   :  { %s817_s12 = smov 0   ;;  %s1040_s0 = inlined_call_operand.vmem [shape: bf16[2,9,9,16], index: 0, kind: input, shape index: {}]   ;;  %s1041_s1 = inlined_call_operand.vmem [shape: bf16[36,128], index: 1, kind: input, shape index: {}]   ;;  %s1042_s2 = inlined_call_operand.vmem [shape: f32[1,128], index: 2, kind: input, shape index: {}]   ;;  %s1043_s3 = inlined_call_operand.vmem [shape: bf16[2,64,128], index: 3, kind: output, shape index: {}]  }
   0x1 LB: > { %s692_s13 = sadd.s32 4294967295, %s790_s12   ;;  %p696_p0 = scmp.ge.s32.totalorder %s790_s12, 1  ;;  %s790_s12 = sphi %s817_s12, %s13_s12  }
   0x2   : > { %p137_p1 = scmp.lt.s32.totalorder %s790_s12, 3 }
   0x4   : > { %p138_p2 = pnand %p696_p0, %p137_p1 }
   0x5   : > { %p161_p3 = scmp.lt.s32.totalorder (!%p138_p2), %s692_s13, 1  ;;  %s792_s18 = smov (!%p138_p2), 4  }
   0x6   : > { %141 = sbr.rel (%p138_p2) target bundleno = 389 (0x185), region = 32  ;;  %s793_s19 = smov (!%p138_p2), 8  }
   0x7   : > { %s794_s20 = smov (!%p138_p2), 12   ;;  %s795_s21 = smov (!%p138_p2), 24  }
   0x8   : > { %s796_s22 = smov (!%p138_p2), 32  }
   0xb   : > { %s1045_s13 = smov (!%p161_p3, %s692_s13), 1  ;;  %vm395_vm0 = vcmask 64512   ;;  %vm412_vm1 = vcmask 97280   ;;  %vm580_vm2 = vcmask 1041408   ;;  %vm429_vm3 = vcmask 130048  }
   0xc   : > { %s769_s14 = smul.u32 72, %s1045_s13  ;;  %vm438_vm4 = vcmask 162816   ;;  %vm455_vm5 = vcmask 195584   ;;  %vm481_vm6 = vcmask 261120   ;;  %vm472_vm7 = vcmask 228352   ;;  %s730_s4 = sshll.u32 %s1045_s13, 5 }
   0xd   : > { %vm506_vm8 = vcmask 289792   ;;  %vm567_vm9 = vcmask 293888   ;;  %s170_s7 = scalar_lea.vmem %s1043_s3, %s730_s4 }
   0xe   : > { %s831_s17 = scalar_lea.vmem %s1040_s0, %s769_s14 }
   0xf   : > { %v834_v0 = vld [vmem:[%s831_s17 + $0x38] sm:$0xf]  ;;  %v187_v1 = vld [vmem:[%s831_s17 + $0x3c] sm:$0x1]  ;;  %v838_v2 = vld [vmem:[%s831_s17 + $0x30] sm:$0xf] }
  0x10   : > { %v220_v3 = vunpack.c.l.b16 %v834_v0  ;;  %v221_v4 = vunpack.c.l.b16 %v187_v1  ;;  %v185_v5 = vld [vmem:[%s831_s17 + $0x34] sm:$0x1]  ;;  %v218_v6 = vunpack.c.l.b16 %v838_v2  ;;  %v844_v7 = vld [vmem:[%s831_s17 + $0x20] sm:$0xf]  ;;  %v181_v8 = vld [vmem:[%s831_s17 + $0x24] sm:$0x1] }
  0x11   : > { %v219_v9 = vunpack.c.l.b16 %v185_v5  ;;  %v214_v10 = vunpack.c.l.b16 %v844_v7  ;;  %v215_v11 = vunpack.c.l.b16 %v181_v8  ;;  %v849_v12 = vld [vmem:[%s831_s17 + $0x28] sm:$0xf]  ;;  %v183_v13 = vld [vmem:[%s831_s17 + $0x2c] sm:$0x1]  ;;  %v879_v40 = vld [vmem:[%s831_s17] sm:$0xf] }
  0x12   : > { %v852_v14 = vpack.c.b16 %v220_v3, %v220_v3  ;;  %v308_v15 = vpack.c.b16 %v218_v6, %v218_v6  ;;  %v216_v16 = vunpack.c.l.b16 %v849_v12  ;;  %v217_v20 = vunpack.c.l.b16 %v183_v13  ;;  %v173_v41 = vld [vmem:[%s831_s17 + $0x4] sm:$0x1]  ;;  %v883_v42 = vld [vmem:[%s831_s17 + $0x8] sm:$0xf]  ;;  %v175_v43 = vld [vmem:[%s831_s17 + $0xc] sm:$0x1] }
  0x13   : > { %v228_v17 = vpack.c.b16 %v219_v9, %v218_v6  ;;  %v226_v18 = vpack.c.b16 %v215_v11, %v214_v10  ;;  %v855_v19 = vpack.c.b16 %v214_v10, %v214_v10  ;;  %v229_v21 = vpack.c.b16 %v221_v4, %v220_v3  ;;  %v892_v49 = vld [vmem:[%s831_s17 + $0x10] sm:$0xf]  ;;  %v177_v50 = vld [vmem:[%s831_s17 + $0x14] sm:$0x1]  ;;  %v898_v51 = vld [vmem:[%s831_s17 + $0x18] sm:$0xf] }
  0x14   : > { %324 = vrot.lane.b32.xlu1 %v852_v14, %s792_s18  ;;  %322 = vrot.lane.b32.xlu0 %v308_v15, %s792_s18  ;;  %v227_v26 = vpack.c.b16 %v217_v20, %v216_v16  ;;  %v307_v33 = vpack.c.b16 %v216_v16, %v216_v16  ;;  %v206_v44 = vunpack.c.l.b16 %v879_v40  ;;  %v207_v45 = vunpack.c.l.b16 %v173_v41  ;;  %v179_v52 = vld [vmem:[%s831_s17 + $0x1c] sm:$0x1]  ;;  %v188_v55 = vld [vmem:[%s831_s17 + $0x40] sm:$0xf] }
  0x15   : > { %v273_v22 = vshrl.u32 %v228_v17, 16  ;;  %v275_v23 = vshll.u32 %v228_v17, 16  ;;  %v259_v24 = vshrl.u32 %v226_v18, 16  ;;  %v261_v25 = vshll.u32 %v226_v18, 16  ;;  %318 = vrot.lane.b32.xlu2 %v855_v19, %s792_s18  ;;  %v189_v6 = vld [vmem:[%s831_s17 + $0x44] sm:$0x1] }
  0x16   : > { %v282_v29 = vshll.u32 %v229_v21, 16  ;;  %v268_v30 = vshll.u32 %v227_v26, 16  ;;  %v280_v34 = vshrl.u32 %v229_v21, 16  ;;  %v266_v36 = vshrl.u32 %v227_v26, 16 }
  0x17   : > { %v277_v27 = vrot.slane %v275_v23, 1  ;;  %v263_v28 = vrot.slane %v261_v25, 1  ;;  %v208_v46 = vunpack.c.l.b16 %v883_v42  ;;  %v209_v47 = vunpack.c.l.b16 %v175_v43 }
  0x18   : > { %v284_v35 = vrot.slane %v282_v29, 1  ;;  %v270_v37 = vrot.slane %v268_v30, 1  ;;  %v222_v48 = vpack.c.b16 %v207_v45, %v206_v44  ;;  %v210_v54 = vunpack.c.l.b16 %v892_v49  ;;  %v527_v45 = vld [vmem:[%s1041_s1 + $0x10] sm:$0x3] }
  0x19   : > { %v862_v31 = vor.u32 %v277_v27, %v273_v22  ;;  %v864_v32 = vor.u32 %v263_v28, %v259_v24  ;;  %v223_v53 = vpack.c.b16 %v209_v47, %v208_v46  ;;  %v211_v57 = vunpack.c.l.b16 %v177_v50 }
  0x1a   : > { %v871_v38 = vor.u32 %v284_v35, %v280_v34  ;;  %v271_v39 = vor.u32 %v270_v37, %v266_v36  ;;  %v233_v56 = vshll.u32 %v222_v48, 16  ;;  %v212_v58 = vunpack.c.l.b16 %v898_v51 }
  0x1b   : > { %v213_v59 = vunpack.c.l.b16 %v179_v52  ;;  %v240_v60 = vshll.u32 %v223_v53, 16  ;;  %v343_v61 = vunpack.c.l.b16 %v188_v55  ;;  %v231_v62 = vshrl.u32 %v222_v48, 16 }
  0x1c   : > { %298 = vrot.lane.b32.xlu1 %v862_v31, %s793_s19  ;;  %294 = vrot.lane.b32.xlu0 %v864_v32, %s793_s19  ;;  %v235_v63 = vrot.slane %v233_v56, 1  ;;  %v224_v1 = vpack.c.b16 %v211_v57, %v210_v54  ;;  %v238_v4 = vshrl.u32 %v223_v53, 16  ;;  %v362_v16 = vunpack.c.l.b16 %v189_v6  ;;  %v735_v57 = vld [vmem:[%s1041_s1] sm:$0xff] }
  0x1d   : > { %320 = vrot.lane.b32.xlu2 %v307_v33, %s792_s18  ;;  %v225_v3 = vpack.c.b16 %v213_v59, %v212_v58  ;;  %v242_v5 = vrot.slane %v240_v60, 1  ;;  %v344_v8 = vpack.c.b16 %v343_v61, %v343_v61  ;;  %v302_v27 = vpack.c.b16 %v206_v44, %v206_v44 }
  0x1e   : > { %v236_v9 = vor.u32 %v235_v63, %v231_v62  ;;  %v247_v10 = vshll.u32 %v224_v1, 16  ;;  %v303_v28 = vpack.c.b16 %v208_v46, %v208_v46  ;;  %v304_v29 = vpack.c.b16 %v210_v54, %v210_v54  ;;  %v736_v54 = vld [vmem:[%s1041_s1 + $0x8] sm:$0xff] }
  0x1f   : > { %v254_v11 = vshll.u32 %v225_v3, 16  ;;  %v243_v13 = vor.u32 %v242_v5, %v238_v4  ;;  %v252_v18 = vshrl.u32 %v225_v3, 16  ;;  %v305_v30 = vpack.c.b16 %v212_v58, %v212_v58 }
  0x20   : > { %v249_v17 = vrot.slane %v247_v10, 1  ;;  %v561_v46 = vunpack.c.l.b16 %v527_v45 }
  0x21   : > { %v256_v20 = vrot.slane %v254_v11, 1 }
  0x23   : > { %v257_v22 = vor.u32 %v256_v20, %v252_v18 }
  0x24   : > { %300 = vrot.lane.b32.xlu1 %v871_v38, %s793_s19  ;;  %296 = vrot.lane.b32.xlu0 %v271_v39, %s793_s19 }
  0x25   : > { %334 = vrot.lane.b32.xlu2 %v864_v32, %s794_s20 }
  0x2c   : > { %338 = vrot.lane.b32.xlu1 %v862_v31, %s794_s20  ;;  %336 = vrot.lane.b32.xlu0 %v271_v39, %s794_s20 }
  0x2d   : > { %340 = vrot.lane.b32.xlu2 %v871_v38, %s794_s20 }
  0x34   : > { %355 = vrot.lane.b32.xlu1 %v308_v15, %s795_s21  ;;  %353 = vrot.lane.b32.xlu0 %v307_v33, %s795_s21  ;;  %v245_v15 = vshrl.u32 %v224_v1, 16 }
  0x35   : > { %357 = vrot.lane.b32.xlu2 %v852_v14, %s795_s21  ;;  %v363_v14 = vpack.c.b16 %v362_v16, %v343_v61 }
  0x36   : > { %v250_v21 = vor.u32 %v249_v17, %v245_v15 }
  0x37   : > { %v367_v23 = vshll.u32 %v363_v14, 16  ;;  %v365_v24 = vshrl.u32 %v363_v14, 16 }
  0x39   : > { %v369_v25 = vrot.slane %v367_v23, 1 }
  0x3b   : > { %v370_v26 = vor.u32 %v369_v25, %v365_v24 }
  0x3c   : > { %359 = vrot.lane.b32.xlu0 %v344_v8, %s795_s21  ;;  %286 = vrot.lane.b32.xlu1 %v236_v9, %s793_s19 }
  0x3d   : > { %288 = vrot.lane.b32.xlu2 %v243_v13, %s793_s19 }
  0x44   : > { %290 = vrot.lane.b32.xlu0 %v250_v21, %s793_s19  ;;  %292 = vrot.lane.b32.xlu1 %v257_v22, %s793_s19 }
  0x45   : > { %379 = vrot.lane.b32.xlu2 %v271_v39, %s796_s22 }
  0x4c   : > { %381 = vrot.lane.b32.xlu0 %v862_v31, %s796_s22  ;;  %383 = vrot.lane.b32.xlu1 %v871_v38, %s796_s22 }
  0x4d   : > { %385 = vrot.lane.b32.xlu2 %v370_v26, %s796_s22 }
  0x54   : > { %310 = vrot.lane.b32.xlu0 %v302_v27, %s792_s18  ;;  %312 = vrot.lane.b32.xlu1 %v303_v28, %s792_s18 }
  0x55   : > { %314 = vrot.lane.b32.xlu2 %v304_v29, %s792_s18 }
  0x5c   : > { %316 = vrot.lane.b32.xlu0 %v305_v30, %s792_s18  ;;  %326 = vrot.lane.b32.xlu1 %v236_v9, %s794_s20 }
  0x5d   : > { %328 = vrot.lane.b32.xlu2 %v243_v13, %s794_s20 }
  0x64   : > { %330 = vrot.lane.b32.xlu0 %v250_v21, %s794_s20  ;;  %332 = vrot.lane.b32.xlu1 %v257_v22, %s794_s20 }
  0x65   : > { %345 = vrot.lane.b32.xlu2 %v303_v28, %s795_s21 }
  0x6c   : > { %347 = vrot.lane.b32.xlu0 %v304_v29, %s795_s21  ;;  %349 = vrot.lane.b32.xlu1 %v305_v30, %s795_s21 }
  0x6d   : > { %351 = vrot.lane.b32.xlu2 %v855_v19, %s795_s21 }
  0x6f   : > { %v319_v31 = vpop.permute.xlu2 %318 }
  0x74   : > { %371 = vrot.lane.b32.xlu0 %v243_v13, %s796_s22  ;;  %373 = vrot.lane.b32.xlu1 %v250_v21, %s796_s22 }
  0x75   : > { %375 = vrot.lane.b32.xlu2 %v257_v22, %s796_s22 }
  0x77   : > { %v929_v33 = vpop.permute.xlu2 %320 }
  0x7c   : > { %377 = vrot.lane.b32.xlu0 %v864_v32, %s796_s22  ;;  %v564_v32 = vpack.c.b16 %v561_v46, %v561_v46 }
  0x7e   : > { %v582_v52 = vsel %vm580_vm2, %v564_v32, 0 }
  0x7f   : > { %v335_v34 = vpop.permute.xlu2 %334  ;;  %761 = vmatpush.bf16.msra.mxu2 %v582_v52  ;;  %762 = vmatpush.bf16.msra.mxu3 %v582_v52 }
  0x80   : > { %589 = vmatpush.bf16.msra.mxu0 %v582_v52  ;;  %760 = vmatpush.bf16.msra.mxu1 %v582_v52 }
  0x83   : > { %764 = vmatpush.bf16.msra.mxu2 %v736_v54  ;;  %765 = vmatpush.bf16.msra.mxu3 %v736_v54 }
  0x84   : > { %590 = vmatpush.bf16.msra.mxu0 %v736_v54  ;;  %763 = vmatpush.bf16.msra.mxu1 %v736_v54 }
  0x86   : > { %v325_v35 = vpop.permute.xlu1 %324  ;;  %v932_v36 = vpop.permute.xlu0 %322 }
  0x87   : > { %v341_v37 = vpop.permute.xlu2 %340  ;;  %767 = vmatpush.bf16.msra.mxu2 %v735_v57  ;;  %768 = vmatpush.bf16.msra.mxu3 %v735_v57 }
  0x88   : > { %591 = vmatpush.bf16.msra.mxu0 %v735_v57  ;;  %766 = vmatpush.bf16.msra.mxu1 %v735_v57 }
  0x8e   : > { %v299_v38 = vpop.permute.xlu1 %298  ;;  %v295_v39 = vpop.permute.xlu0 %294 }
  0x8f   : > { %v934_v41 = vpop.permute.xlu2 %357  ;;  %v405_v47 = vsel %vm395_vm0, %v844_v7, %v295_v39  ;;  %v409_v10 = vsel %vm395_vm0, %v838_v2, %v299_v38 }
  0x90   : > { %v422_v53 = vsel %vm412_vm1, %v405_v47, %v319_v31  ;;  %v426_v16 = vsel %vm412_vm1, %v409_v10, %v932_v36 }
  0x91   : > { %v434_v55 = vsel %vm429_vm3, %v422_v53, %v319_v31  ;;  %v436_v20 = vsel %vm429_vm3, %v426_v16, %v932_v36 }
  0x92   : > { %v448_v59 = vsel %vm438_vm4, %v434_v55, %v335_v34 }
  0x96   : > { %v301_v43 = vpop.permute.xlu1 %300  ;;  %v297_v44 = vpop.permute.xlu0 %296 }
  0x97   : > { %v936_v19 = vpop.permute.xlu2 %288  ;;  %v411_v7 = vsel %vm395_vm0, %v834_v0, %v301_v43  ;;  %v407_v13 = vsel %vm395_vm0, %v849_v12, %v297_v44 }
  0x98   : > { %v428_v62 = vsel %vm412_vm1, %v411_v7, %v325_v35  ;;  %v424_v15 = vsel %vm412_vm1, %v407_v13, %v929_v33  ;;  %v399_v52 = vsel %vm395_vm0, %v883_v42, %v936_v19 }
  0x99   : > { %v437_v1 = vsel %vm429_vm3, %v428_v62, %v325_v35  ;;  %v435_v21 = vsel %vm429_vm3, %v424_v15, %v929_v33 }
  0x9a   : > { %v454_v4 = vsel %vm438_vm4, %v437_v1, %v341_v37 }
  0x9e   : > { %v339_v48 = vpop.permute.xlu1 %338  ;;  %v337_v50 = vpop.permute.xlu0 %336 }
  0x9f   : > { %v380_v56 = vpop.permute.xlu2 %379  ;;  %v452_v2 = vsel %vm438_vm4, %v436_v20, %v339_v48  ;;  %v450_v22 = vsel %vm438_vm4, %v435_v21, %v337_v50 }
  0xa0   : > { %v469_v12 = vsel %vm455_vm5, %v452_v2, %v934_v41 }
  0xa1   : > { %v479_v26 = vsel %vm472_vm7, %v469_v12, %v934_v41 }
  0xa6   : > { %v356_v58 = vpop.permute.xlu1 %355  ;;  %v354_v60 = vpop.permute.xlu0 %353 }
  0xa7   : > { %v465_v61 = vsel %vm455_vm5, %v448_v59, %v354_v60  ;;  %v386_v3 = vpop.permute.xlu2 %385  ;;  %v467_v23 = vsel %vm455_vm5, %v450_v22, %v356_v58 }
  0xa8   : > { %v477_v0 = vsel %vm472_vm7, %v465_v61, %v354_v60  ;;  %v478_v24 = vsel %vm472_vm7, %v467_v23, %v356_v58 }
  0xa9   : > { %v495_v63 = vsel %vm481_vm6, %v477_v0, %v380_v56 }
  0xaa   : > { %511 = vst.msk [vmem:[#allocation2 + $0x10] sm:$0xf] %vm506_vm8, %v495_v63 }
  0xae   : > { %v360_v5 = vpop.permute.xlu0 %359  ;;  %v287_v6 = vpop.permute.xlu1 %286 }
  0xaf   : > { %v471_v8 = vsel %vm455_vm5, %v454_v4, %v360_v5  ;;  %v315_v14 = vpop.permute.xlu2 %314  ;;  %v397_v53 = vsel %vm395_vm0, %v879_v40, %v287_v6 }
  0xb0   : > { %v480_v9 = vsel %vm472_vm7, %v471_v8, %v360_v5 }
  0xb1   : > { %v504_v11 = vsel %vm481_vm6, %v480_v9, %v386_v3 }
  0xb2   : > { %514 = vst.msk [vmem:[#allocation2 + $0x1c] sm:$0xf] %vm506_vm8, %v504_v11 }
  0xb6   : > { %v291_v17 = vpop.permute.xlu0 %290  ;;  %v293_v18 = vpop.permute.xlu1 %292 }
  0xb7   : > { %v329_v30 = vpop.permute.xlu2 %328  ;;  %v403_v37 = vsel %vm395_vm0, %v898_v51, %v293_v18  ;;  %v401_v32 = vsel %vm395_vm0, %v892_v49, %v291_v17  ;;  %v783_v17 = vld [vmem:[%s1042_s2] ss:$0 sm:$0xff] }
  0xb8   : > { %v418_v51 = vsel %vm412_vm1, %v401_v32, %v315_v14 }
  0xb9   : > { %v432_v49 = vsel %vm429_vm3, %v418_v51, %v315_v14 }
  0xbe   : > { %v382_v25 = vpop.permute.xlu0 %381  ;;  %v384_v27 = vpop.permute.xlu1 %383 }
  0xbf   : > { %v498_v28 = vsel %vm481_vm6, %v478_v24, %v382_v25  ;;  %v501_v29 = vsel %vm481_vm6, %v479_v26, %v384_v27  ;;  %v346_v36 = vpop.permute.xlu2 %345 }
  0xc0   : > { %512 = vst.msk [vmem:[#allocation2 + $0x14] sm:$0xf] %vm506_vm8, %v498_v28 }
  0xc1   : > { %513 = vst.msk [vmem:[#allocation2 + $0x18] sm:$0xf] %vm506_vm8, %v501_v29 }
  0xc6   : > { %v311_v31 = vpop.permute.xlu0 %310  ;;  %v313_v33 = vpop.permute.xlu1 %312 }
  0xc7   : > { %v733_v34 = vld [vmem:[#allocation2 + $0x10] sm:$0xff]  ;;  %v352_v44 = vpop.permute.xlu2 %351  ;;  %v414_v54 = vsel %vm412_vm1, %v397_v53, %v311_v31  ;;  %v416_v55 = vsel %vm412_vm1, %v399_v52, %v313_v33 }
  0xc8   : > { %v734_v35 = vld [vmem:[#allocation2 + $0x18] sm:$0xff]  ;;  %726 = vmatmul.msk.bf16.vlgmr.msra.gmra.mxu2 %vm567_vm9, %v733_v34  ;;  %v430_v59 = vsel %vm429_vm3, %v414_v54, %v311_v31  ;;  %v431_v60 = vsel %vm429_vm3, %v416_v55, %v313_v33 }
  0xc9   : > { %727 = vmatmul.msk.bf16.vlgmr.msra.gmra.mxu3 %vm567_vm9, %v734_v35  ;;  %v442_v62 = vsel %vm438_vm4, %v431_v60, %v329_v30 }
  0xce   : > { %v317_v38 = vpop.permute.xlu0 %316  ;;  %v327_v39 = vpop.permute.xlu1 %326 }
  0xcf   : > { %v420_v41 = vsel %vm412_vm1, %v403_v37, %v317_v38  ;;  %v376_v56 = vpop.permute.xlu2 %375  ;;  %v440_v19 = vsel %vm438_vm4, %v430_v59, %v327_v39 }
  0xd0   : > { %v433_v43 = vsel %vm429_vm3, %v420_v41, %v317_v38  ;;  %v457_v0 = vsel %vm455_vm5, %v440_v19, %v346_v36 }
  0xd1   : > { %v473_v1 = vsel %vm472_vm7, %v457_v0, %v346_v36 }
  0xd6   : > { %v331_v45 = vpop.permute.xlu0 %330  ;;  %v333_v46 = vpop.permute.xlu1 %332 }
  0xd7   : > { %v446_v47 = vsel %vm438_vm4, %v433_v43, %v333_v46  ;;  %v444_v7 = vsel %vm438_vm4, %v432_v49, %v331_v45 }
  0xd8   : > { %v463_v48 = vsel %vm455_vm5, %v446_v47, %v352_v44 }
  0xd9   : > { %v476_v50 = vsel %vm472_vm7, %v463_v48, %v352_v44 }
  0xde   : > { %v348_v57 = vpop.permute.xlu0 %347  ;;  %v350_v58 = vpop.permute.xlu1 %349 }
  0xdf   : > { %v461_v42 = vsel %vm455_vm5, %v444_v7, %v350_v58  ;;  %v459_v63 = vsel %vm455_vm5, %v442_v62, %v348_v57 }
  0xe0   : > { %v475_v40 = vsel %vm472_vm7, %v461_v42, %v350_v58  ;;  %v474_v3 = vsel %vm472_vm7, %v459_v63, %v348_v57 }
  0xe1   : > { %v489_v61 = vsel %vm481_vm6, %v475_v40, %v376_v56 }
  0xe2   : > { %509 = vst.msk [vmem:[#allocation2 + $0x8] sm:$0xf] %vm506_vm8, %v489_v61 }
  0xe6   : > { %v372_v4 = vpop.permute.xlu0 %371  ;;  %v374_v5 = vpop.permute.xlu1 %373 }
  0xe7   : > { %v483_v6 = vsel %vm481_vm6, %v473_v1, %v372_v4  ;;  %v486_v8 = vsel %vm481_vm6, %v474_v3, %v374_v5 }
  0xe8   : > { %507 = vst.msk [vmem:[#allocation2] sm:$0xf] %vm506_vm8, %v483_v6 }
  0xe9   : > { %508 = vst.msk [vmem:[#allocation2 + $0x4] sm:$0xf] %vm506_vm8, %v486_v8 }
  0xee   : > { %v378_v9 = vpop.permute.xlu0 %377 }
  0xef   : > { %v492_v10 = vsel %vm481_vm6, %v476_v50, %v378_v9 }
  0xf0   : > { %510 = vst.msk [vmem:[#allocation2 + $0xc] sm:$0xf] %vm506_vm8, %v492_v10  ;;  %v731_v11 = vld [vmem:[#allocation2] sm:$0xff] }
  0xf1   : > { %724 = vmatmul.msk.bf16.vlgmr.msra.gmra.mxu0 %vm567_vm9, %v731_v11 }
  0xf7   : > { %v732_v13 = vld [vmem:[#allocation2 + $0x8] sm:$0xff] }
  0xf8   : > { %725 = vmatmul.msk.bf16.vlgmr.msra.gmra.mxu1 %vm567_vm9, %v732_v13 }
 0x14b   : > { %v603_v16 = vpop.f32.mrf.mxu2 }
 0x14c   : > { %v608_v15 = vpop.f32.mrf.mxu3  ;;  %v604_v18 = vadd.f32 %v783_v17, %v603_v16 }
 0x14d   : > { %v609_v20 = vadd.f32 %v783_v17, %v608_v15 }
 0x14e   : > { %v617_v12 = vmax.f32 %v604_v18, 0.0 }
 0x14f   : > { %v619_v24 = vmax.f32 %v609_v20, 0.0 }
 0x153   : > { %v605_v14 = vpop.f32.mrf.mxu2 }
 0x154   : > { %v606_v2 = vadd.f32 %v783_v17, %v605_v14  ;;  %v610_v21 = vpop.f32.mrf.mxu3 }
 0x155   : > { %v611_v22 = vadd.f32 %v783_v17, %v610_v21 }
 0x156   : > { %v618_v23 = vmax.f32 %v606_v2, 0.0 }
 0x157   : > { %v620_v25 = vmax.f32 %v611_v22, 0.0 }
 0x158   : > { %v750_v26 = vpack.c.bf16 %v618_v23, %v617_v12 }
 0x159   : > { %v755_v27 = vpack.c.bf16 %v620_v25, %v619_v24 }
 0x15a   : > { %758 = vst [vmem:[%s170_s7 + $0x10] sm:$0xff] %v750_v26  }
 0x15b   : > { %759 = vst [vmem:[%s170_s7 + $0x18] sm:$0xff] %v755_v27  }
 0x16e   : > { %v593_v28 = vpop.f32.mrf.mxu0 }
 0x16f   : > { %v594_v29 = vadd.f32 %v783_v17, %v593_v28 }
 0x171   : > { %v613_v34 = vmax.f32 %v594_v29, 0.0 }
 0x175   : > { %v598_v30 = vpop.f32.mrf.mxu1 }
 0x176   : > { %v595_v31 = vpop.f32.mrf.mxu0  ;;  %v599_v37 = vadd.f32 %v783_v17, %v598_v30 }
 0x177   : > { %v596_v33 = vadd.f32 %v783_v17, %v595_v31 }
 0x178   : > { %v615_v41 = vmax.f32 %v599_v37, 0.0 }
 0x179   : > { %v614_v35 = vmax.f32 %v596_v33, 0.0 }
 0x17b   : > { %v740_v36 = vpack.c.bf16 %v614_v35, %v613_v34 }
 0x17d   : > { %741 = vst [vmem:[%s170_s7] sm:$0xff] %v740_v36   ;;  %v600_v38 = vpop.f32.mrf.mxu1 }
 0x17e   : > { %v601_v39 = vadd.f32 %v783_v17, %v600_v38 }
 0x180   : > { %v616_v43 = vmax.f32 %v601_v39, 0.0 }
 0x182   : > { %v745_v44 = vpack.c.bf16 %v616_v43, %v615_v41 }
 0x184   : > { %757 = vst [vmem:[%s170_s7 + $0x8] sm:$0xff] %v745_v44  }
 0x185 PF: > { %s13_s12 = sadd.s32 1, %s790_s12  }
 0x186   : > { %p10_p4 = scmp.ge.s32.totalorder %s13_s12, 4  }
 0x188   :  { %12 = sbr.rel (!%p10_p4) target bundleno = 1 (0x1), region = 62 }

// kernel: adaptive_homotopy_forward.7
= control target key start
LH: loop header
LB: loop body
LE: loop exit
PB: predicated region body
PF: predicated region fallthrough
CT: control target
= control target key end

     0   :  { %15 = vsyncpa [#allocation3], 0  ;;  %s852_s24 = smov 32   ;;  %s1078_s0 = inlined_call_operand.vmem [shape: bf16[2,512], index: 0, kind: input, shape index: {}]   ;;  %s1079_s1 = inlined_call_operand.vmem [shape: bf16[512,64], index: 1, kind: input, shape index: {}]   ;;  %s1080_s2 = inlined_call_operand.vmem [shape: f32[1,64], index: 2, kind: input, shape index: {}]   ;;  %s1081_s3 = inlined_call_operand.vmem [shape: f32[2,32], index: 3, kind: input, shape index: {}]   ;;  %s1082_s4 = inlined_call_operand.vmem [shape: bf16[32,512], index: 4, kind: input, shape index: {}]   ;;  %s1083_s5 = inlined_call_operand.vmem [shape: f32[1,512], index: 5, kind: input, shape index: {}]   ;;  %s1084_s6 = inlined_call_operand.hbm [shape: f32[2,32], index: 6, kind: output, shape index: {0}]   ;;  %s1085_s7 = inlined_call_operand.hbm [shape: f32[2,32], index: 7, kind: output, shape index: {1}]   ;;  %s1086_s8 = inlined_call_operand.hbm [shape: f32[2,32], index: 8, kind: output, shape index: {2}]   ;;  %s1087_s9 = inlined_call_operand.vmem [shape: bf16[2,512], index: 9, kind: output, shape index: {3}]  }
   0x1   :  { %v735_v0 = vld [vmem:[%s1079_s1 + $0x38] sm:$0xff]  ;;  %v734_v4 = vld [vmem:[%s1079_s1 + $0x30] sm:$0xff]  ;;  %v733_v8 = vld [vmem:[%s1079_s1 + $0x28] sm:$0xff] }
   0x2   :  { %v743_v1 = vld [vmem:[%s1079_s1 + $0x78] sm:$0xff]  ;;  %301 = vmatpush.bf16.msra.mxu0 %v735_v0  ;;  %v742_v5 = vld [vmem:[%s1079_s1 + $0x70] sm:$0xff]  ;;  %v741_v9 = vld [vmem:[%s1079_s1 + $0x68] sm:$0xff] }
   0x3   :  { %v751_v2 = vld [vmem:[%s1079_s1 + $0xb8] sm:$0xff]  ;;  %314 = vmatpush.bf16.msra.mxu1 %v743_v1  ;;  %v750_v6 = vld [vmem:[%s1079_s1 + $0xb0] sm:$0xff]  ;;  %v749_v10 = vld [vmem:[%s1079_s1 + $0xa8] sm:$0xff] }
   0x4   :  { %v759_v3 = vld [vmem:[%s1079_s1 + $0xf8] sm:$0xff]  ;;  %327 = vmatpush.bf16.msra.mxu2 %v751_v2  ;;  %v758_v7 = vld [vmem:[%s1079_s1 + $0xf0] sm:$0xff]  ;;  %v757_v11 = vld [vmem:[%s1079_s1 + $0xe8] sm:$0xff] }
   0x5   :  { %340 = vmatpush.bf16.msra.mxu3 %v759_v3  ;;  %v732_v12 = vld [vmem:[%s1079_s1 + $0x20] sm:$0xff] }
   0x6   :  { %302 = vmatpush.bf16.msra.mxu0 %v734_v4  ;;  %v740_v13 = vld [vmem:[%s1079_s1 + $0x60] sm:$0xff] }
   0x7   :  { %315 = vmatpush.bf16.msra.mxu1 %v742_v5  ;;  %v748_v14 = vld [vmem:[%s1079_s1 + $0xa0] sm:$0xff] }
   0x8   :  { %328 = vmatpush.bf16.msra.mxu2 %v750_v6  ;;  %v756_v15 = vld [vmem:[%s1079_s1 + $0xe0] sm:$0xff] }
   0x9   :  { %341 = vmatpush.bf16.msra.mxu3 %v758_v7  ;;  %v30_v16 = vld [vmem:[%s1078_s0] sm:$0xf] }
   0xa   :  { %303 = vmatpush.bf16.msra.mxu0 %v733_v8  ;;  %100 = vst [vmem:[#allocation1] ss:$9 sm:$0xff] %v30_v16  ;;  %v356_v17 = vld [vmem:[%s1081_s3] sm:$0x3] }
   0xb   :  { %316 = vmatpush.bf16.msra.mxu1 %v741_v9  ;;  %358 = vrot.lane.b32.xlu0 %v356_v17, %s852_s24 }
   0xc   :  { %329 = vmatpush.bf16.msra.mxu2 %v749_v10 }
   0xd   :  { %342 = vmatpush.bf16.msra.mxu3 %v757_v11 }
   0xe   :  { %16 = vsyncpa [#allocation5], 0  ;;  %304 = vmatpush.bf16.msra.mxu0 %v732_v12  ;;  %v731_v18 = vld [vmem:[%s1079_s1 + $0x18] sm:$0xff]  ;;  %v730_v22 = vld [vmem:[%s1079_s1 + $0x10] sm:$0xff]  ;;  %vm367_vm0 = vcmask 254976   ;;  %vm434_vm1 = vcmask 261120  }
   0xf   :  { %317 = vmatpush.bf16.msra.mxu1 %v740_v13  ;;  %v739_v19 = vld [vmem:[%s1079_s1 + $0x58] sm:$0xff]  ;;  %v738_v23 = vld [vmem:[%s1079_s1 + $0x50] sm:$0xff]  ;;  %v729_v26 = vld [vmem:[%s1079_s1 + $0x8] sm:$0xff]  ;;  %s854_s19 = smov [#allocation4]   ;;  %s531_s22 = sshll.u32 %s1085_s7, 4  ;;  %vm501_vm2 = vcmask 1040384   ;;  %s532_s22 = int_to_ptr.hbm [resolvable:$true] %s531_s22 }
  0x10   :  { %330 = vmatpush.bf16.msra.mxu2 %v748_v14  ;;  %v747_v20 = vld [vmem:[%s1079_s1 + $0x98] sm:$0xff]  ;;  %v746_v24 = vld [vmem:[%s1079_s1 + $0x90] sm:$0xff]  ;;  %v737_v27 = vld [vmem:[%s1079_s1 + $0x48] sm:$0xff]  ;;  %s529_s20 = sshll.u32 %s854_s19, 4  ;;  %s520_s25 = sshll.u32 %s1084_s6, 4  ;;  %vm505_vm3 = vcmask 1042434   ;;  %s530_s20 = int_to_ptr.vmem [resolvable:$true] %s529_s20  ;;  %s521_s25 = int_to_ptr.hbm [resolvable:$true] %s520_s25 }
  0x11   :  { %343 = vmatpush.bf16.msra.mxu3 %v756_v15  ;;  %v755_v21 = vld [vmem:[%s1079_s1 + $0xd8] sm:$0xff]  ;;  %v754_v25 = vld [vmem:[%s1079_s1 + $0xd0] sm:$0xff]  ;;  %v745_v28 = vld [vmem:[%s1079_s1 + $0x88] sm:$0xff]  ;;  %s855_s26 = smov [#allocation2]   ;;  %s856_s28 = smov [#allocation6]   ;;  %vm509_vm4 = vcmask 1041408  }
  0x12   :  { %305 = vmatpush.bf16.msra.mxu0 %v731_v18  ;;  %v753_v29 = vld [vmem:[%s1079_s1 + $0xc8] sm:$0xff]  ;;  %v728_v30 = vld [vmem:[%s1079_s1] sm:$0xff]  ;;  %v103_v36 = vld [vmem:[#allocation1 + $0x12] sm:$0xff]  ;;  %s518_s27 = sshll.u32 %s855_s26, 4  ;;  %s540_s0 = sshll.u32 %s856_s28, 4  ;;  %s519_s27 = int_to_ptr.vmem [resolvable:$true] %s518_s27  ;;  %s541_s0 = int_to_ptr.vmem [resolvable:$true] %s540_s0 }
  0x13   :  { %318 = vmatpush.bf16.msra.mxu1 %v739_v19  ;;  %v736_v31 = vld [vmem:[%s1079_s1 + $0x40] sm:$0xff]  ;;  %v102_v35 = vld [vmem:[#allocation1 + $0x9] sm:$0xff]  ;;  %v767_v57 = vld [vmem:[%s1082_s4 + $0x34] sm:$0xf0]  ;;  %s542_s30 = sshll.u32 %s1086_s8, 4  ;;  %s543_s30 = int_to_ptr.hbm [resolvable:$true] %s542_s30 }
  0x14   :  { %331 = vmatpush.bf16.msra.mxu2 %v747_v20  ;;  %v744_v32 = vld [vmem:[%s1079_s1 + $0x80] sm:$0xff]  ;;  %v718_v56 = vld [vmem:[%s1082_s4 + $0x28] sm:$0xf]  ;;  %v765_v58 = vld [vmem:[%s1082_s4 + $0x2c] sm:$0xf] }
  0x15   :  { %344 = vmatpush.bf16.msra.mxu3 %v755_v21  ;;  %v752_v33 = vld [vmem:[%s1079_s1 + $0xc0] sm:$0xff]  ;;  %s853_s1 = smov 96   ;;  %v719_v59 = vor.u32 %v767_v57, %v718_v56  ;;  %v720_v60 = vld [vmem:[%s1082_s4 + $0x38] sm:$0xf0]  ;;  %v766_v62 = vld [vmem:[%s1082_s4 + $0x2c] sm:$0xf0] }
  0x16   :  { %306 = vmatpush.bf16.msra.mxu0 %v730_v22  ;;  %v101_v34 = vld [vmem:[#allocation1] sm:$0xff]  ;;  %v723_v63 = vor.u32 %v765_v58, %v720_v60  ;;  %v712_v2 = vld [vmem:[%s1082_s4 + $0x30] sm:$0xf0]  ;;  %v702_v3 = vld [vmem:[%s1082_s4 + $0x8] sm:$0xf] }
  0x17   :  { %319 = vmatpush.bf16.msra.mxu1 %v738_v23  ;;  %v104_v37 = vld [vmem:[#allocation1 + $0x1b] sm:$0xff]  ;;  %v764_v1 = vld [vmem:[%s1082_s4 + $0x24] sm:$0xf]  ;;  %v761_v6 = vld [vmem:[%s1082_s4 + $0xc] sm:$0xf] }
  0x18   :  { %332 = vmatpush.bf16.msra.mxu2 %v746_v24  ;;  %v773_v38 = vld [vmem:[%s1080_s2] ss:$0 sm:$0xff]  ;;  %v715_v4 = vor.u32 %v764_v1, %v712_v2  ;;  %v763_v5 = vld [vmem:[%s1082_s4 + $0x14] sm:$0xf0]  ;;  %v704_v7 = vld [vmem:[%s1082_s4 + $0x18] sm:$0xf0] }
  0x19   :  { %345 = vmatpush.bf16.msra.mxu3 %v754_v25  ;;  %v710_v61 = vld [vmem:[%s1082_s4 + $0x20] sm:$0xf]  ;;  %v703_v8 = vor.u32 %v763_v5, %v702_v3  ;;  %v707_v9 = vor.u32 %v761_v6, %v704_v7  ;;  %v762_v11 = vld [vmem:[%s1082_s4 + $0xc] sm:$0xf0]  ;;  %v760_v12 = vld [vmem:[%s1082_s4 + $0x4] sm:$0xf] }
  0x1a   :  { %307 = vmatpush.bf16.msra.mxu0 %v729_v26  ;;  %v711_v0 = vor.u32 %v766_v62, %v710_v61  ;;  %v694_v10 = vld [vmem:[%s1082_s4] sm:$0xf]  ;;  %v696_v14 = vld [vmem:[%s1082_s4 + $0x10] sm:$0xf0] }
  0x1b   :  { %320 = vmatpush.bf16.msra.mxu1 %v737_v27  ;;  %v695_v13 = vor.u32 %v762_v11, %v694_v10  ;;  %v699_v15 = vor.u32 %v760_v12, %v696_v14  ;;  %v384_v20 = vld [vmem:[%s1083_s5] sm:$0xf] }
  0x1c   :  { %333 = vmatpush.bf16.msra.mxu2 %v745_v28  ;;  %v386_v21 = vperm.slane %v384_v20, 0  ;;  %v387_v22 = vperm.slane %v384_v20, 1 }
  0x1d   :  { %346 = vmatpush.bf16.msra.mxu3 %v753_v29  ;;  %v388_v29 = vperm.slane %v384_v20, 2 }
  0x1e   :  { %308 = vmatpush.bf16.msra.mxu0 %v728_v30  ;;  %v389_v30 = vperm.slane %v384_v20, 3 }
  0x1f   :  { %321 = vmatpush.bf16.msra.mxu1 %v736_v31 }
  0x20   :  { %334 = vmatpush.bf16.msra.mxu2 %v744_v32 }
  0x21   :  { %347 = vmatpush.bf16.msra.mxu3 %v752_v33  ;;  %309 = vmatmul.bf16.vlgmr.msra.gmra.mxu0 %v101_v34 }
  0x22   :  { %322 = vmatmul.bf16.vlgmr.msra.gmra.mxu1 %v102_v35  ;;  %444 = vmatpush.bf16.msrb.mxu0 %v711_v0 }
  0x23   :  { %335 = vmatmul.bf16.vlgmr.msra.gmra.mxu2 %v103_v36  ;;  %457 = vmatpush.bf16.msrb.mxu1 %v715_v4 }
  0x24   :  { %348 = vmatmul.bf16.vlgmr.msra.gmra.mxu3 %v104_v37  ;;  %470 = vmatpush.bf16.msrb.mxu2 %v719_v59 }
  0x25   :  { %483 = vmatpush.bf16.msrb.mxu3 %v723_v63 }
  0x26   :  { %445 = vmatpush.bf16.msrb.mxu0 %v695_v13 }
  0x27   :  { %458 = vmatpush.bf16.msrb.mxu1 %v699_v15 }
  0x28   :  { %471 = vmatpush.bf16.msrb.mxu2 %v703_v8 }
  0x29   :  { %484 = vmatpush.bf16.msrb.mxu3 %v707_v9 }
  0x7d   :  { %v359_v53 = vpop.permute.xlu0 %358 }
  0x9e   :  { %v310_v39 = vpop.f32.mrf.mxu0 }
  0x9f   :  { %v323_v40 = vpop.f32.mrf.mxu1  ;;  %v311_v41 = vadd.f32 %v773_v38, %v310_v39 }
  0xa1   :  { %v324_v42 = vadd.f32 %v323_v40, %v311_v41 }
  0xa6   :  { %v336_v43 = vpop.f32.mrf.mxu2  ;;  %v312_v46 = vpop.f32.mrf.mxu0 }
  0xa7   :  { %v349_v44 = vpop.f32.mrf.mxu3  ;;  %v337_v45 = vadd.f32 %v336_v43, %v324_v42  ;;  %v325_v47 = vpop.f32.mrf.mxu1 }
  0xa9   :  { %v350_v48 = vadd.f32 %v349_v44, %v337_v45 }
  0xab   :  { %370 = vrot.lane.b32.xlu1 %v350_v48, %s853_s1  ;;  %v353_v49 = vmul.f32 0.5, %v350_v48  ;;  %368 = vst.msk [vmem:[#allocation2] sm:$0x3] %vm367_vm0, %v350_v48 }
  0xac   :  { %523 = dma.vmem_to_hbm [thread:$0]  %s519_s27, 32, %s521_s25, [#allocation3]  }
  0xad   :  { %v354_v50 = vmul.f32 1.442695, %v353_v49 }
  0xae   :  { %v338_v51 = vpop.f32.mrf.mxu2 }
  0xaf   :  { %v351_v52 = vpop.f32.mrf.mxu3  ;;  %774 = vpow2.f32 %v354_v50 }
  0xb5   :  { %v775_v54 = vpop.eup %774 }
  0xb6   :  { %v361_v55 = vmul.f32 %v775_v54, %v359_v53 }
  0xb8   :  { %363 = vrot.lane.b32.xlu0 %v361_v55, %s853_s1 }
 0x11d   :  { %v371_v16 = vpop.permute.xlu1 %370 }
 0x11e   :  { %373 = vst.msk [vmem:[#allocation4] sm:$0x3] %vm367_vm0, %v371_v16 }
 0x11f   :  { %534 = dma.vmem_to_hbm [thread:$0]  %s530_s20, 32, %s532_s22, [#allocation5]  }
 0x12a   :  { %v364_v17 = vpop.permute.xlu0 %363 }
 0x12b   :  { %v366_v18 = vadd.f32 %v364_v17, %v350_v48 }
 0x12d   :  { %374 = vst.msk [vmem:[#allocation6] sm:$0x3] %vm367_vm0, %v366_v18  ;;  %v375_v19 = vpack.c.bf16 %v366_v18, %v366_v18 }
 0x12e   :  { %545 = dma.vmem_to_hbm [thread:$0]  %s541_s0, 32, %s543_s30, [#allocation5]  }
 0x12f   :  { %724 = vmatmul.msk.bf16.vlgmr.msrb.gmra.mxu0 %vm434_vm1, %v375_v19  ;;  %725 = vmatmul.msk.bf16.vlgmr.msrb.gmra.mxu1 %vm434_vm1, %v375_v19 }
 0x130   :  { %726 = vmatmul.msk.bf16.vlgmr.msrb.gmra.mxu2 %vm434_vm1, %v375_v19  ;;  %727 = vmatmul.msk.bf16.vlgmr.msrb.gmra.mxu3 %vm434_vm1, %v375_v19 }
 0x1ac   :  { %v447_v23 = vpop.f32.mrf.mxu0  ;;  %v460_v24 = vpop.f32.mrf.mxu1 }
 0x1ad   :  { %v448_v25 = vadd.f32 %v447_v23, %v386_v21  ;;  %v461_v26 = vadd.f32 %v460_v24, %v387_v22 }
 0x1af   :  { %v490_v27 = vmax.f32 %v448_v25, 0.0  ;;  %v491_v28 = vmax.f32 %v461_v26, 0.0 }
 0x1b1   :  { %v494_v33 = vpack.c.bf16 %v491_v28, %v490_v27 }
 0x1b3   :  { %v473_v31 = vpop.f32.mrf.mxu2  ;;  %v486_v32 = vpop.f32.mrf.mxu3  ;;  %v498_v40 = vrot.slane %v494_v33, 3 }
 0x1b4   :  { %v474_v34 = vadd.f32 %v473_v31, %v388_v29  ;;  %v487_v35 = vadd.f32 %v486_v32, %v389_v30  ;;  %v449_v36 = vpop.f32.mrf.mxu0  ;;  %v462_v37 = vpop.f32.mrf.mxu1 }
 0x1b5   :  { %v504_v46 = vsel %vm501_vm2, %v494_v33, %v498_v40 }
 0x1b6   :  { %v492_v38 = vmax.f32 %v474_v34, 0.0  ;;  %v493_v39 = vmax.f32 %v487_v35, 0.0 }
 0x1b8   :  { %v495_v41 = vpack.c.bf16 %v493_v39, %v492_v38 }
 0x1ba   :  { %v499_v42 = vrot.slane %v495_v41, 6  ;;  %v500_v43 = vrot.slane %v495_v41, 1 }
 0x1bb   :  { %v475_v44 = vpop.f32.mrf.mxu2  ;;  %v488_v45 = vpop.f32.mrf.mxu3 }
 0x1bc   :  { %v508_v47 = vsel %vm505_vm3, %v499_v42, %v500_v43 }
 0x1bd   :  { %v510_v48 = vsel %vm509_vm4, %v504_v46, %v508_v47 }
 0x1be   :  { %512 = vst [vmem:[%s1087_s9] sm:$0xf] %v510_v48 }
 0x1bf   :  { %848 = dma.done.wait [#allocation3], 32  }
 0x1c0   :  { %849 = vsyncadd [#allocation3], 4294967264 }
 0x1c1   :  { %850 = dma.done.wait [#allocation5], 64  }
 0x1c2   :  { %851 = vsyncadd [#allocation5], 4294967232 }
 0x1c3   :  { %562 = vsyncpa [#allocation3], 1 }
 0x1c4   :  { %563 = vsyncpa [#allocation5], 1 }

// kernel: adaptive_homotopy_forward.6
= control target key start
LH: loop header
LB: loop body
LE: loop exit
PB: predicated region body
PF: predicated region fallthrough
CT: control target
= control target key end

     0   :  { %s1637_s12 = smov 0   ;;  %s1936_s0 = inlined_call_operand.vmem [shape: bf16[2,5,5,512], index: 0, kind: input, shape index: {}]   ;;  %s1937_s1 = inlined_call_operand.vmem [shape: bf16[1152,128], index: 1, kind: input, shape index: {}]   ;;  %s1938_s2 = inlined_call_operand.vmem [shape: f32[1,128], index: 2, kind: input, shape index: {}]   ;;  %s1939_s3 = inlined_call_operand.vmem [shape: bf16[2,16,128], index: 3, kind: output, shape index: {}]  }
   0x1 LB: > { %s1178_s13 = sadd.s32 4294967295, %s1615_s12   ;;  %p1182_p0 = scmp.ge.s32.totalorder %s1615_s12, 1  ;;  %s1615_s12 = sphi %s1637_s12, %s13_s12  }
   0x2   : > { %p137_p1 = scmp.lt.s32.totalorder %s1615_s12, 3 }
   0x4   : > { %p138_p2 = pnand %p1182_p0, %p137_p1 }
   0x5   : > { %p161_p3 = scmp.lt.s32.totalorder (!%p138_p2), %s1178_s13, 1 }
   0x6   : > { %141 = sbr.rel (%p138_p2) target bundleno = 248 (0xf8), region = 32 }
   0xb   : > { %v1529_v0 = vld [vmem:[%s1937_s1 + $0x38] sm:$0xff]  ;;  %v1528_v4 = vld [vmem:[%s1937_s1 + $0x30] sm:$0xff]  ;;  %s1941_s13 = smov (!%p161_p3, %s1178_s13), 1  ;;  %v1527_v8 = vld [vmem:[%s1937_s1 + $0x28] sm:$0xff] }
   0xc   : > { %v1545_v1 = vld [vmem:[%s1937_s1 + $0xb8] sm:$0xff]  ;;  %991 = vmatpush.bf16.msra.mxu0 %v1529_v0  ;;  %v1544_v5 = vld [vmem:[%s1937_s1 + $0xb0] sm:$0xff]  ;;  %v1543_v9 = vld [vmem:[%s1937_s1 + $0xa8] sm:$0xff]  ;;  %s1599_s11 = smul.u32 80, %s1941_s13  ;;  %s1512_s15 = sshll.u32 %s1941_s13, 3 }
   0xd   : > { %v1537_v2 = vld [vmem:[%s1937_s1 + $0x78] sm:$0xff]  ;;  %1019 = vmatpush.bf16.msra.mxu2 %v1545_v1  ;;  %v1536_v6 = vld [vmem:[%s1937_s1 + $0x70] sm:$0xff]  ;;  %v1535_v10 = vld [vmem:[%s1937_s1 + $0x68] sm:$0xff]  ;;  %s170_s18 = scalar_lea.vmem %s1939_s3, %s1512_s15 }
   0xe   : > { %v1553_v3 = vld [vmem:[%s1937_s1 + $0xf8] sm:$0xff]  ;;  %1005 = vmatpush.bf16.msra.mxu1 %v1537_v2  ;;  %v1552_v7 = vld [vmem:[%s1937_s1 + $0xf0] sm:$0xff]  ;;  %v1551_v11 = vld [vmem:[%s1937_s1 + $0xe8] sm:$0xff]  ;;  %s1699_s24 = scalar_lea.vmem %s1936_s0, %s1599_s11 }
   0xf   : > { %1033 = vmatpush.bf16.msra.mxu3 %v1553_v3  ;;  %v1526_v12 = vld [vmem:[%s1937_s1 + $0x20] sm:$0xff]  ;;  %v1525_v16 = vld [vmem:[%s1937_s1 + $0x18] sm:$0xff]  ;;  %v173_v21 = vld [vmem:[%s1699_s24 + $0x10] sm:$0x77] }
  0x10   : > { %992 = vmatpush.bf16.msra.mxu0 %v1528_v4  ;;  %v1542_v13 = vld [vmem:[%s1937_s1 + $0xa0] sm:$0xff]  ;;  %v1541_v17 = vld [vmem:[%s1937_s1 + $0x98] sm:$0xff]  ;;  %v1524_v23 = vld [vmem:[%s1937_s1 + $0x10] sm:$0xff]  ;;  %v189_v26 = vunpack.c.l.b16 %v173_v21  ;;  %v303_v28 = vrot.slane %v173_v21, 6  ;;  %295 = vst [vmem:[#allocation2 + $0x18] sm:$0x33] %v173_v21 }
  0x11   : > { %1020 = vmatpush.bf16.msra.mxu2 %v1544_v5  ;;  %v1534_v14 = vld [vmem:[%s1937_s1 + $0x60] sm:$0xff]  ;;  %v1533_v18 = vld [vmem:[%s1937_s1 + $0x58] sm:$0xff]  ;;  %v177_v24 = vld [vmem:[%s1699_s24 + $0x30] sm:$0x77] }
  0x12   : > { %1006 = vmatpush.bf16.msra.mxu1 %v1536_v6  ;;  %v1550_v15 = vld [vmem:[%s1937_s1 + $0xe0] sm:$0xff]  ;;  %v1549_v19 = vld [vmem:[%s1937_s1 + $0xd8] sm:$0xff]  ;;  %v1540_v29 = vld [vmem:[%s1937_s1 + $0x90] sm:$0xff]  ;;  %v191_v32 = vunpack.c.l.b16 %v177_v24  ;;  %v340_v33 = vrot.slane %v177_v24, 6  ;;  %v193_v35 = vpack.c.b16 %v189_v26, %v189_v26  ;;  %313 = vst [vmem:[#allocation2] sm:$0xcc] %v303_v28 }
  0x13   : > { %1034 = vmatpush.bf16.msra.mxu3 %v1552_v7  ;;  %v171_v20 = vld [vmem:[%s1699_s24] sm:$0x77]  ;;  %v1532_v30 = vld [vmem:[%s1937_s1 + $0x50] sm:$0xff]  ;;  %v1734_v37 = vld [vmem:[%s1699_s24 + $0x8] sm:$0x77] }
  0x14   : > { %993 = vmatpush.bf16.msra.mxu0 %v1527_v8  ;;  %v1716_v22 = vld [vmem:[%s1699_s24 + $0x20] sm:$0x77]  ;;  %v188_v25 = vunpack.c.l.b16 %v171_v20  ;;  %292 = vst [vmem:[#allocation2] sm:$0x33] %v171_v20  ;;  %v1548_v31 = vld [vmem:[%s1937_s1 + $0xd0] sm:$0xff]  ;;  %v1523_v39 = vld [vmem:[%s1937_s1 + $0x8] sm:$0xff]  ;;  %v195_v41 = vpack.c.b16 %v191_v32, %v191_v32  ;;  %v228_v44 = vunpack.c.h.b16 %v1734_v37  ;;  %v232_v58 = vunpack.c.l.b16 %v1734_v37 }
  0x15   : > { %1021 = vmatpush.bf16.msra.mxu2 %v1543_v9  ;;  %v190_v27 = vunpack.c.l.b16 %v1716_v22  ;;  %329 = vst [vmem:[#allocation2 + $0x24] sm:$0x33] %v1716_v22  ;;  %v1737_v38 = vld [vmem:[%s1699_s24 + $0x18] sm:$0x77]  ;;  %v1539_v40 = vld [vmem:[%s1937_s1 + $0x88] sm:$0xff]  ;;  %v204_v47 = vshrl.u32 %v193_v35, 16 }
  0x16   : > { %1007 = vmatpush.bf16.msra.mxu1 %v1535_v10  ;;  %v192_v34 = vpack.c.b16 %v188_v25, %v188_v25  ;;  %350 = vst [vmem:[#allocation2 + $0x24] sm:$0xcc] %v340_v33  ;;  %v1746_v42 = vld [vmem:[%s1699_s24 + $0x28] sm:$0x77]  ;;  %v1749_v43 = vld [vmem:[%s1699_s24 + $0x38] sm:$0x77]  ;;  %v229_v57 = vunpack.c.h.b16 %v1737_v38  ;;  %v1761_v61 = vunpack.c.l.b16 %v1737_v38  ;;  %v1775_v4 = vpack.c.b16 %v232_v58, %v232_v58 }
  0x17   : > { %1035 = vmatpush.bf16.msra.mxu3 %v1551_v11  ;;  %v194_v36 = vpack.c.b16 %v190_v27, %v190_v27  ;;  %v206_v48 = vshll.u32 %v193_v35, 16  ;;  %332 = vst [vmem:[#allocation2 + $0x3c] sm:$0x33] %v177_v24  ;;  %v218_v51 = vshrl.u32 %v195_v41, 16  ;;  %v220_v52 = vshll.u32 %v195_v41, 16  ;;  %v1531_v53 = vld [vmem:[%s1937_s1 + $0x48] sm:$0xff] }
  0x18   : > { %994 = vmatpush.bf16.msra.mxu0 %v1526_v12  ;;  %v197_v45 = vshrl.u32 %v192_v34, 16  ;;  %v199_v46 = vshll.u32 %v192_v34, 16  ;;  %v1547_v54 = vld [vmem:[%s1937_s1 + $0xc8] sm:$0xff]  ;;  %v1764_v62 = vunpack.c.l.b16 %v1746_v42  ;;  %v1522_v63 = vld [vmem:[%s1937_s1] sm:$0xff]  ;;  %v1773_v3 = vunpack.c.l.b16 %v1749_v43  ;;  %v1561_v5 = vld [vmem:[%s1937_s1 + $0x138] sm:$0xff] }
  0x19   : > { %1022 = vmatpush.bf16.msra.mxu2 %v1542_v13  ;;  %v211_v49 = vshrl.u32 %v194_v36, 16  ;;  %v213_v50 = vshll.u32 %v194_v36, 16  ;;  %v208_v56 = vrot.slane %v206_v48, 1  ;;  %v222_v60 = vrot.slane %v220_v52, 1  ;;  %v1538_v0 = vld [vmem:[%s1937_s1 + $0x80] sm:$0xff]  ;;  %v1577_v6 = vld [vmem:[%s1937_s1 + $0x1b8] sm:$0xff] }
  0x1a   : > { %1008 = vmatpush.bf16.msra.mxu1 %v1534_v14  ;;  %v201_v55 = vrot.slane %v199_v46, 1  ;;  %v237_v10 = vpack.c.b16 %v1761_v61, %v1761_v61  ;;  %v306_v11 = vrot.slane %v1716_v22, 6  ;;  %v1530_v12 = vld [vmem:[%s1937_s1 + $0x40] sm:$0xff]  ;;  %v1569_v25 = vld [vmem:[%s1937_s1 + $0x178] sm:$0xff]  ;;  %v1560_v35 = vld [vmem:[%s1937_s1 + $0x130] sm:$0xff] }
  0x1b   : > { %1036 = vmatpush.bf16.msra.mxu3 %v1550_v15  ;;  %v215_v59 = vrot.slane %v213_v50, 1  ;;  %v209_v2 = vor.u32 %v208_v56, %v204_v47  ;;  %v1188_v7 = vld [vmem:[#allocation2] sm:$0xf]  ;;  %v223_v9 = vor.u32 %v222_v60, %v218_v51  ;;  %v238_v15 = vpack.c.b16 %v1764_v62, %v1764_v62  ;;  %v1585_v26 = vld [vmem:[%s1937_s1 + $0x1f8] sm:$0xff]  ;;  %v1576_v36 = vld [vmem:[%s1937_s1 + $0x1b0] sm:$0xff] }
  0x1c   : > { %995 = vmatpush.bf16.msra.mxu0 %v1525_v16  ;;  %v202_v1 = vor.u32 %v201_v55, %v197_v45  ;;  %v1546_v13 = vld [vmem:[%s1937_s1 + $0xc0] sm:$0xff]  ;;  %v239_v16 = vpack.c.b16 %v1773_v3, %v1773_v3  ;;  %v248_v20 = vshrl.u32 %v237_v10, 16  ;;  %v250_v21 = vshll.u32 %v237_v10, 16  ;;  %316 = vst [vmem:[#allocation2 + $0x18] sm:$0xcc] %v306_v11  ;;  %v1568_v51 = vld [vmem:[%s1937_s1 + $0x170] sm:$0xff] }
  0x1d   : > { %1023 = vmatpush.bf16.msra.mxu2 %v1541_v17  ;;  %v216_v8 = vor.u32 %v215_v59, %v211_v49  ;;  %v1517_v14 = vld [vmem:[#allocation2 + $0x20] sm:$0xf0]  ;;  %v241_v17 = vshrl.u32 %v1775_v4, 16  ;;  %v1190_v24 = vld [vmem:[#allocation2 + $0x24] sm:$0xf0]  ;;  %v255_v28 = vshrl.u32 %v238_v15, 16  ;;  %v281_v33 = vunpack.c.l.b16 %v209_v2 }
  0x1e   : > { %1009 = vmatpush.bf16.msra.mxu1 %v1533_v18  ;;  %v243_v18 = vshll.u32 %v1775_v4, 16  ;;  %v279_v22 = vunpack.c.l.b16 %v202_v1  ;;  %v264_v32 = vshll.u32 %v239_v16, 16  ;;  %v319_v41 = vunpack.c.l.b16 %v223_v9  ;;  %v1811_v46 = vld [vmem:[%s1699_s24 + $0x40] sm:$0x77]  ;;  %v1584_v52 = vld [vmem:[%s1937_s1 + $0x1f0] sm:$0xff] }
  0x1f   : > { %1037 = vmatpush.bf16.msra.mxu3 %v1549_v19  ;;  %v1189_v19 = vor.u32 %v1517_v14, %v1188_v7  ;;  %v286_v48 = vpack.c.b16 %v281_v33, %v281_v33  ;;  %v299_v49 = vpack.c.b16 %v1761_v61, %v281_v33  ;;  %v270_v50 = vunpack.c.l.b16 %v1811_v46  ;;  %v1567_v7 = vld [vmem:[%s1937_s1 + $0x168] sm:$0xff]  ;;  %v1574_v14 = vld [vmem:[%s1937_s1 + $0x1a0] sm:$0xff]  ;;  %v1572_v33 = vld [vmem:[%s1937_s1 + $0x190] sm:$0xff] }
  0x20   : > { %996 = vmatpush.bf16.msra.mxu0 %v1524_v23  ;;  %v1513_v23 = vld [vmem:[#allocation2 + $0x4] sm:$0xf]  ;;  %v245_v27 = vrot.slane %v243_v18, 1  ;;  %v283_v34 = vpack.c.b16 %v232_v58, %v279_v22  ;;  %v266_v47 = vrot.slane %v264_v32, 1  ;;  %v323_v56 = vpack.c.b16 %v319_v41, %v319_v41  ;;  %v1556_v32 = vld [vmem:[%s1937_s1 + $0x110] sm:$0xff] }
  0x21   : > { %1024 = vmatpush.bf16.msra.mxu2 %v1540_v29  ;;  %v257_v29 = vshll.u32 %v238_v15, 16  ;;  %v1193_v45 = vor.u32 %v1513_v23, %v1190_v24  ;;  %296 = vst [vmem:[#allocation2 + $0x20] sm:$0x3] %v286_v48  ;;  %v304_v58 = vrot.slane %v299_v49, 6  ;;  %v336_v59 = vpack.c.b16 %v1773_v3, %v319_v41  ;;  %v1582_v18 = vld [vmem:[%s1937_s1 + $0x1e0] sm:$0xff]  ;;  %v1571_v41 = vld [vmem:[%s1937_s1 + $0x188] sm:$0xff] }
  0x22   : > { %1010 = vmatpush.bf16.msra.mxu1 %v1532_v30  ;;  %v262_v30 = vshrl.u32 %v239_v16, 16  ;;  %293 = vst [vmem:[#allocation2 + $0x8] sm:$0x33] %v283_v34  ;;  %v246_v60 = vor.u32 %v245_v27, %v241_v17  ;;  %v343_v38 = vrot.slane %v1811_v46, 6  ;;  %v1579_v46 = vld [vmem:[%s1937_s1 + $0x1c8] sm:$0xff]  ;;  %v1570_v48 = vld [vmem:[%s1937_s1 + $0x180] sm:$0xff] }
  0x23   : > { %1038 = vmatpush.bf16.msra.mxu3 %v1548_v31  ;;  %v252_v31 = vrot.slane %v250_v21, 1  ;;  %314 = vst [vmem:[#allocation2 + $0x8] sm:$0xcc] %v304_v58  ;;  %v341_v3 = vrot.slane %v336_v59, 6  ;;  %v1573_v21 = vld [vmem:[%s1937_s1 + $0x198] sm:$0xff] }
  0x24   : > { %997 = vmatpush.bf16.msra.mxu0 %v1523_v39  ;;  %v259_v39 = vrot.slane %v257_v29, 1  ;;  %v267_v2 = vor.u32 %v266_v47, %v262_v30  ;;  %v280_v4 = vunpack.c.l.b16 %v246_v60  ;;  %333 = vst [vmem:[#allocation2 + $0x44] sm:$0x3] %v323_v56  ;;  %v1554_v47 = vld [vmem:[%s1937_s1 + $0x100] sm:$0xff]  ;;  %v1593_v49 = vld [vmem:[%s1937_s1 + $0x238] sm:$0xff] }
  0x25   : > { %1025 = vmatpush.bf16.msra.mxu2 %v1539_v40  ;;  %v298_v40 = vunpack.c.l.b16 %v216_v8  ;;  %v253_v61 = vor.u32 %v252_v31, %v248_v20  ;;  %351 = vst [vmem:[#allocation2 + $0x2c] sm:$0xcc] %v341_v3  ;;  %v1557_v20 = vld [vmem:[%s1937_s1 + $0x118] sm:$0xff] }
  0x26   : > { %1011 = vmatpush.bf16.msra.mxu1 %v1531_v53  ;;  %v230_v53 = vunpack.c.h.b16 %v1746_v42  ;;  %v1575_v42 = vld [vmem:[%s1937_s1 + $0x1a8] sm:$0xff]  ;;  %v260_v1 = vor.u32 %v259_v39, %v255_v28  ;;  %v334_v9 = vunpack.c.l.b16 %v267_v2  ;;  %v284_v10 = vpack.c.b16 %v280_v4, %v228_v44  ;;  %353 = vst [vmem:[#allocation2 + $0x3c] sm:$0xcc] %v343_v38  ;;  %v1581_v28 = vld [vmem:[%s1937_s1 + $0x1d8] sm:$0xff]  ;;  %v1590_v2 = vld [vmem:[%s1937_s1 + $0x220] sm:$0xff] }
  0x27   : > { %1039 = vmatpush.bf16.msra.mxu3 %v1547_v54  ;;  %v302_v54 = vpack.c.b16 %v298_v40, %v298_v40  ;;  %v320_v55 = vpack.c.b16 %v1764_v62, %v298_v40  ;;  %v231_v62 = vunpack.c.h.b16 %v1749_v43  ;;  %v1583_v43 = vld [vmem:[%s1937_s1 + $0x1e8] sm:$0xff]  ;;  %v1516_v60 = vld [vmem:[#allocation2 + $0x1c] sm:$0xf]  ;;  %v1588_v4 = vld [vmem:[%s1937_s1 + $0x210] sm:$0xff] }
  0x28   : > { %998 = vmatpush.bf16.msra.mxu0 %v1522_v63  ;;  %v1559_v63 = vld [vmem:[%s1937_s1 + $0x128] sm:$0xff]  ;;  %v318_v8 = vunpack.c.l.b16 %v260_v1  ;;  %294 = vst [vmem:[#allocation2 + $0x10] sm:$0x33] %v284_v10  ;;  %v1589_v3 = vld [vmem:[%s1937_s1 + $0x218] sm:$0xff] }
  0x29   : > { %1026 = vmatpush.bf16.msra.mxu2 %v1538_v0  ;;  %v307_v0 = vrot.slane %v302_v54, 6  ;;  %330 = vst [vmem:[#allocation2 + $0x2c] sm:$0x33] %v320_v55  ;;  %v337_v16 = vpack.c.b16 %v334_v9, %v231_v62  ;;  %v1555_v40 = vld [vmem:[%s1937_s1 + $0x108] sm:$0xff]  ;;  %v1212_v54 = vld [vmem:[#allocation2 + $0x18] sm:$0xf] }
  0x2a   : > { %1012 = vmatpush.bf16.msra.mxu1 %v1530_v12  ;;  %v321_v15 = vpack.c.b16 %v318_v8, %v230_v53  ;;  %v1196_v22 = vld [vmem:[#allocation2 + $0x8] sm:$0xf]  ;;  %v1514_v23 = vld [vmem:[#allocation2 + $0xc] sm:$0xf]  ;;  %v1578_v53 = vld [vmem:[%s1937_s1 + $0x1c0] sm:$0xff] }
  0x2b   : > { %1040 = vmatpush.bf16.msra.mxu3 %v1546_v13  ;;  %999 = vmatmul.bf16.vlgmr.msra.gmra.mxu0 %v1189_v19  ;;  %317 = vst [vmem:[#allocation2 + $0x20] sm:$0xc] %v307_v0  ;;  %v1558_v13 = vld [vmem:[%s1937_s1 + $0x120] sm:$0xff]  ;;  %v342_v19 = vrot.slane %v337_v16, 6  ;;  %v1591_v1 = vld [vmem:[%s1937_s1 + $0x228] sm:$0xff] }
  0x2c   : > { %1047 = vmatpush.bf16.msrb.mxu0 %v1561_v5  ;;  %v297_v5 = vunpack.c.l.b16 %v253_v61  ;;  %331 = vst [vmem:[#allocation2 + $0x34] sm:$0x33] %v321_v15 }
  0x2d   : > { %1075 = vmatpush.bf16.msrb.mxu2 %v1577_v6  ;;  %1013 = vmatmul.bf16.vlgmr.msra.gmra.mxu1 %v1193_v45  ;;  %v271_v6 = vpack.c.b16 %v270_v50, %v270_v50  ;;  %352 = vst [vmem:[#allocation2 + $0x34] sm:$0xcc] %v342_v19  ;;  %v1563_v45 = vld [vmem:[%s1937_s1 + $0x148] sm:$0xff]  ;;  %v1520_v55 = vld [vmem:[#allocation2 + $0x38] sm:$0xf0] }
  0x2e   : > { %1061 = vmatpush.bf16.msrb.mxu1 %v1569_v25  ;;  %v300_v11 = vpack.c.b16 %v297_v5, %v229_v57  ;;  %v1566_v57 = vld [vmem:[%s1937_s1 + $0x160] sm:$0xff]  ;;  %v1565_v25 = vld [vmem:[%s1937_s1 + $0x158] sm:$0xff]  ;;  %v1587_v5 = vld [vmem:[%s1937_s1 + $0x208] sm:$0xff] }
  0x2f   : > { %1089 = vmatpush.bf16.msrb.mxu3 %v1585_v26  ;;  %v275_v12 = vshll.u32 %v271_v6, 16  ;;  %v273_v44 = vshrl.u32 %v271_v6, 16  ;;  %v1214_v61 = vld [vmem:[#allocation2 + $0x3c] sm:$0xf0] }
  0x30   : > { %1048 = vmatpush.bf16.msrb.mxu0 %v1560_v35  ;;  %v305_v37 = vrot.slane %v300_v11, 6  ;;  %v1518_v26 = vld [vmem:[#allocation2 + $0x28] sm:$0xf0]  ;;  %v1198_v27 = vld [vmem:[#allocation2 + $0x2c] sm:$0xf0]  ;;  %v1217_v0 = vor.u32 %v1516_v60, %v1214_v61  ;;  %v1586_v6 = vld [vmem:[%s1937_s1 + $0x200] sm:$0xff] }
  0x31   : > { %1076 = vmatpush.bf16.msrb.mxu2 %v1576_v36  ;;  %v277_v17 = vrot.slane %v275_v12, 1  ;;  %v1197_v30 = vor.u32 %v1518_v26, %v1196_v22  ;;  %v1201_v31 = vor.u32 %v1514_v23, %v1198_v27  ;;  %v1564_v35 = vld [vmem:[%s1937_s1 + $0x150] sm:$0xff] }
  0x32   : > { %1062 = vmatpush.bf16.msrb.mxu1 %v1568_v51  ;;  %315 = vst [vmem:[#allocation2 + $0x10] sm:$0xcc] %v305_v37  ;;  %v1580_v36 = vld [vmem:[%s1937_s1 + $0x1d0] sm:$0xff] }
  0x33   : > { %1090 = vmatpush.bf16.msrb.mxu3 %v1584_v52  ;;  %v278_v24 = vor.u32 %v277_v17, %v273_v44  ;;  %1027 = vmatmul.bf16.vlgmr.msra.gmra.mxu2 %v1197_v30  ;;  %v1562_v52 = vld [vmem:[%s1937_s1 + $0x140] sm:$0xff] }
  0x34   : > { %1049 = vmatpush.bf16.msrb.mxu0 %v1559_v63  ;;  %1041 = vmatmul.bf16.vlgmr.msra.gmra.mxu3 %v1201_v31  ;;  %v1519_v51 = vld [vmem:[#allocation2 + $0x30] sm:$0xf0]  ;;  %v1206_v58 = vld [vmem:[#allocation2 + $0x34] sm:$0xf0] }
  0x35   : > { %1077 = vmatpush.bf16.msrb.mxu2 %v1575_v42  ;;  %v335_v29 = vunpack.c.l.b16 %v278_v24  ;;  %v1592_v63 = vld [vmem:[%s1937_s1 + $0x230] sm:$0xff]  ;;  %v1213_v42 = vor.u32 %v1520_v55, %v1212_v54 }
  0x36   : > { %1063 = vmatpush.bf16.msrb.mxu1 %v1567_v7  ;;  %v1220_v7 = vld [vmem:[#allocation2 + $0x20] sm:$0xf] }
  0x37   : > { %1091 = vmatpush.bf16.msrb.mxu3 %v1583_v43  ;;  %v339_v34 = vpack.c.b16 %v335_v29, %v335_v29 }
  0x38   : > { %1050 = vmatpush.bf16.msrb.mxu0 %v1558_v13  ;;  %v1608_v13 = vld [vmem:[%s1938_s2] ss:$0 sm:$0xff] }
  0x39   : > { %1078 = vmatpush.bf16.msrb.mxu2 %v1574_v14  ;;  %v344_v39 = vrot.slane %v339_v34, 6  ;;  %v1204_v50 = vld [vmem:[#allocation2 + $0x10] sm:$0xf]  ;;  %v1515_v56 = vld [vmem:[#allocation2 + $0x14] sm:$0xf] }
  0x3a   : > { %1064 = vmatpush.bf16.msrb.mxu1 %v1566_v57  ;;  %v1205_v59 = vor.u32 %v1519_v51, %v1204_v50  ;;  %v1209_v62 = vor.u32 %v1515_v56, %v1206_v58 }
  0x3b   : > { %1092 = vmatpush.bf16.msrb.mxu3 %v1582_v18  ;;  %354 = vst [vmem:[#allocation2 + $0x44] sm:$0xc] %v344_v39 }
  0x3c   : > { %1051 = vmatpush.bf16.msrb.mxu0 %v1557_v20 }
  0x3d   : > { %1079 = vmatpush.bf16.msrb.mxu2 %v1573_v21 }
  0x3e   : > { %1065 = vmatpush.bf16.msrb.mxu1 %v1565_v25 }
  0x3f   : > { %1093 = vmatpush.bf16.msrb.mxu3 %v1581_v28 }
  0x40   : > { %1052 = vmatpush.bf16.msrb.mxu0 %v1556_v32 }
  0x41   : > { %1080 = vmatpush.bf16.msrb.mxu2 %v1572_v33 }
  0x42   : > { %1066 = vmatpush.bf16.msrb.mxu1 %v1564_v35  ;;  %v1521_v43 = vld [vmem:[#allocation2 + $0x40] sm:$0xf0] }
  0x43   : > { %1094 = vmatpush.bf16.msrb.mxu3 %v1580_v36  ;;  %v1221_v8 = vor.u32 %v1521_v43, %v1220_v7 }
  0x44   : > { %1053 = vmatpush.bf16.msrb.mxu0 %v1555_v40 }
  0x45   : > { %1081 = vmatpush.bf16.msrb.mxu2 %v1571_v41 }
  0x46   : > { %1067 = vmatpush.bf16.msrb.mxu1 %v1563_v45 }
  0x47   : > { %1095 = vmatpush.bf16.msrb.mxu3 %v1579_v46 }
  0x48   : > { %1054 = vmatpush.bf16.msrb.mxu0 %v1554_v47 }
  0x49   : > { %1082 = vmatpush.bf16.msrb.mxu2 %v1570_v48 }
  0x4a   : > { %1068 = vmatpush.bf16.msrb.mxu1 %v1562_v52 }
  0x4b   : > { %1096 = vmatpush.bf16.msrb.mxu3 %v1578_v53  ;;  %1055 = vmatmul.bf16.vlgmr.msrb.gmra.mxu0 %v1205_v59 }
  0x4c   : > { %1103 = vmatpush.bf16.msra.mxu0 %v1593_v49  ;;  %1083 = vmatmul.bf16.vlgmr.msrb.gmra.mxu2 %v1213_v42 }
  0x4d   : > { %1069 = vmatmul.bf16.vlgmr.msrb.gmra.mxu1 %v1209_v62 }
  0x4e   : > { %1097 = vmatmul.bf16.vlgmr.msrb.gmra.mxu3 %v1217_v0 }
  0x50   : > { %1104 = vmatpush.bf16.msra.mxu0 %v1592_v63 }
  0x54   : > { %1105 = vmatpush.bf16.msra.mxu0 %v1591_v1 }
  0x58   : > { %1106 = vmatpush.bf16.msra.mxu0 %v1590_v2 }
  0x5c   : > { %1107 = vmatpush.bf16.msra.mxu0 %v1589_v3 }
  0x60   : > { %1108 = vmatpush.bf16.msra.mxu0 %v1588_v4 }
  0x64   : > { %1109 = vmatpush.bf16.msra.mxu0 %v1587_v5 }
  0x68   : > { %1110 = vmatpush.bf16.msra.mxu0 %v1586_v6 }
  0x6b   : > { %1111 = vmatmul.bf16.vlgmr.msra.gmra.mxu0 %v1221_v8 }
  0xa8   : > { %v1000_v9 = vpop.f32.mrf.mxu0 }
  0xa9   : > { %v1001_v15 = vadd.f32 %v1608_v13, %v1000_v9 }
  0xaa   : > { %v1014_v10 = vpop.f32.mrf.mxu1 }
  0xab   : > { %v1015_v44 = vadd.f32 %v1014_v10, %v1001_v15 }
  0xb0   : > { %v1002_v12 = vpop.f32.mrf.mxu0 }
  0xb1   : > { %v1003_v38 = vadd.f32 %v1608_v13, %v1002_v12 }
  0xb2   : > { %v1016_v16 = vpop.f32.mrf.mxu1 }
  0xb3   : > { %v1017_v19 = vadd.f32 %v1016_v16, %v1003_v38 }
  0xb6   : > { %v1028_v11 = vpop.f32.mrf.mxu2 }
  0xb7   : > { %v1042_v14 = vpop.f32.mrf.mxu3  ;;  %v1029_v18 = vadd.f32 %v1028_v11, %v1015_v44 }
  0xb9   : > { %v1043_v21 = vadd.f32 %v1042_v14, %v1029_v18 }
  0xbe   : > { %v1030_v37 = vpop.f32.mrf.mxu2 }
  0xbf   : > { %v1044_v57 = vpop.f32.mrf.mxu3  ;;  %v1031_v23 = vadd.f32 %v1030_v37, %v1017_v19 }
  0xc1   : > { %v1045_v27 = vadd.f32 %v1044_v57, %v1031_v23 }
  0xc8   : > { %v1056_v17 = vpop.f32.mrf.mxu0 }
  0xc9   : > { %v1057_v25 = vadd.f32 %v1056_v17, %v1043_v21 }
  0xca   : > { %v1070_v20 = vpop.f32.mrf.mxu1 }
  0xcb   : > { %v1071_v28 = vadd.f32 %v1070_v20, %v1057_v25 }
  0xcf   : > { %v1084_v22 = vpop.f32.mrf.mxu2 }
  0xd0   : > { %v1058_v24 = vpop.f32.mrf.mxu0  ;;  %v1085_v33 = vadd.f32 %v1084_v22, %v1071_v28 }
  0xd1   : > { %v1098_v26 = vpop.f32.mrf.mxu3  ;;  %v1059_v29 = vadd.f32 %v1058_v24, %v1045_v27 }
  0xd2   : > { %v1072_v30 = vpop.f32.mrf.mxu1  ;;  %v1099_v39 = vadd.f32 %v1098_v26, %v1085_v33 }
  0xd3   : > { %v1073_v34 = vadd.f32 %v1072_v30, %v1059_v29 }
  0xd7   : > { %v1086_v31 = vpop.f32.mrf.mxu2 }
  0xd8   : > { %v1087_v35 = vadd.f32 %v1086_v31, %v1073_v34 }
  0xd9   : > { %v1100_v36 = vpop.f32.mrf.mxu3 }
  0xda   : > { %v1101_v40 = vadd.f32 %v1100_v36, %v1087_v35 }
  0xe8   : > { %v1112_v32 = vpop.f32.mrf.mxu0 }
  0xe9   : > { %v1113_v41 = vadd.f32 %v1112_v32, %v1099_v39 }
  0xeb   : > { %v1117_v47 = vmax.f32 %v1113_v41, 0.0 }
  0xf0   : > { %v1114_v45 = vpop.f32.mrf.mxu0 }
  0xf1   : > { %v1115_v46 = vadd.f32 %v1114_v45, %v1101_v40 }
  0xf3   : > { %v1118_v48 = vmax.f32 %v1115_v46, 0.0 }
  0xf5   : > { %v1597_v49 = vpack.c.bf16 %v1118_v48, %v1117_v47 }
  0xf7   : > { %1598 = vst [vmem:[%s170_s18] sm:$0xff] %v1597_v49  }
  0xf8 PF: > { %s13_s12 = sadd.s32 1, %s1615_s12  }
  0xf9   : > { %p10_p4 = scmp.ge.s32.totalorder %s13_s12, 4  }
  0xfb   :  { %12 = sbr.rel (!%p10_p4) target bundleno = 1 (0x1), region = 62 }

// kernel: adaptive_homotopy_forward.8
= control target key start
LH: loop header
LB: loop body
LE: loop exit
PB: predicated region body
PF: predicated region fallthrough
CT: control target
= control target key end

     0   :  { %s2138_s12 = smov 0   ;;  %s2863_s0 = inlined_call_operand.vmem [shape: bf16[2,6,6,32], index: 0, kind: input, shape index: {}]   ;;  %s2864_s1 = inlined_call_operand.vmem [shape: bf16[288,128], index: 1, kind: input, shape index: {}]   ;;  %s2865_s2 = inlined_call_operand.vmem [shape: f32[1,128], index: 2, kind: input, shape index: {}]   ;;  %s2866_s3 = inlined_call_operand.vmem [shape: bf16[2,4,16,128], index: 3, kind: output, shape index: {}]  }
   0x1 LB: > { %s1627_s13 = sadd.s32 4294967295, %s2113_s12   ;;  %p1631_p0 = scmp.ge.s32.totalorder %s2113_s12, 1  ;;  %s2113_s12 = sphi %s2138_s12, %s13_s12  }
   0x2   : > { %p137_p1 = scmp.lt.s32.totalorder %s2113_s12, 3 }
   0x4   : > { %p138_p2 = pnand %p1631_p0, %p137_p1 }
   0x5   : > { %p161_p3 = scmp.lt.s32.totalorder (!%p138_p2), %s1627_s13, 1  ;;  %s2115_s18 = smov (!%p138_p2), 64  }
   0x6   : > { %141 = sbr.rel (%p138_p2) target bundleno = 403 (0x193), region = 32  ;;  %s2116_s19 = smov (!%p138_p2), 32  }
   0x7   : > { %s2117_s20 = smov (!%p138_p2), 96  }
   0xb   : > { %s2873_s13 = smov (!%p161_p3, %s1627_s13), 1  ;;  %vm336_vm0 = vcmask 254976   ;;  %vm350_vm1 = vcmask 257026   ;;  %v2002_v57 = vld [vmem:[%s2864_s1 + $0x78] sm:$0xff]  ;;  %v2004_v60 = vld [vmem:[%s2864_s1 + $0x88] sm:$0xff]  ;;  %v2001_v61 = vld [vmem:[%s2864_s1 + $0x70] sm:$0xff] }
   0xc   : > { %s2091_s14 = smul.u32 24, %s2873_s13  ;;  %560 = vmatpush.bf16.msra.mxu1 %v2002_v57  ;;  %v1994_v59 = vld [vmem:[%s2864_s1 + $0x38] sm:$0xff]  ;;  %580 = vmatpush.bf16.msra.mxu3 %v2004_v60  ;;  %vm270_vm2 = vcmask 261120   ;;  %vm283_vm3 = vcmask 523264   ;;  %vm292_vm4 = vcmask 785408   ;;  %v1996_v60 = vld [vmem:[%s2864_s1 + $0x48] sm:$0xff] }
   0xd   : > { %546 = vmatpush.bf16.msra.mxu0 %v1994_v59 }
   0xe   : > { %s2152_s17 = scalar_lea.vmem %s2863_s0, %s2091_s14 }
   0xf   : > { %v2155_v0 = vld [vmem:[%s2152_s17 + $0x10] sm:$0x7]  ;;  %v2158_v1 = vld [vmem:[%s2152_s17 + $0x8] sm:$0x7]  ;;  %v2161_v2 = vld [vmem:[%s2152_s17 + $0x4] sm:$0x7] }
  0x10   : > { %v235_v3 = vunpack.c.l.b16 %v2155_v0  ;;  %v184_v4 = vunpack.c.l.b16 %v2158_v1  ;;  %v183_v5 = vunpack.c.l.b16 %v2161_v2  ;;  %v2167_v6 = vld [vmem:[%s2152_s17 + $0xc] sm:$0x7]  ;;  %v2177_v12 = vld [vmem:[%s2152_s17] sm:$0x7]  ;;  %v177_v45 = vld [vmem:[%s2152_s17 + $0x14] sm:$0x7]  ;;  %561 = vmatpush.bf16.msra.mxu1 %v2001_v61 }
  0x11   : > { %v185_v7 = vunpack.c.l.b16 %v2167_v6  ;;  %v182_v23 = vunpack.c.l.b16 %v2177_v12  ;;  %v954_v46 = vunpack.c.l.b16 %v177_v45  ;;  %v2011_v61 = vld [vmem:[%s2864_s1 + $0x18] sm:$0xff]  ;;  %s1983_s17 = sshll.u32 %s2873_s13, 5 }
  0x12   : > { %v2170_v8 = vpack.c.b16 %v235_v3, %v235_v3  ;;  %v188_v9 = vpack.c.b16 %v184_v4, %v184_v4  ;;  %v2172_v10 = vpack.c.b16 %v183_v5, %v183_v5  ;;  %v1993_v3 = vld [vmem:[%s2864_s1 + $0x30] sm:$0xff]  ;;  %v2003_v4 = vld [vmem:[%s2864_s1 + $0x80] sm:$0xff]  ;;  %v2000_v5 = vld [vmem:[%s2864_s1 + $0x68] sm:$0xff] }
  0x13   : > { %v2174_v11 = vpack.c.b16 %v185_v7, %v185_v7  ;;  %v186_v32 = vpack.c.b16 %v182_v23, %v182_v23  ;;  %v955_v47 = vpack.c.b16 %v954_v46, %v954_v46  ;;  %v2015_v7 = vld [vmem:[%s2864_s1 + $0x38] sm:$0xff]  ;;  %547 = vmatpush.bf16.msra.mxu0 %v1993_v3  ;;  %581 = vmatpush.bf16.msra.mxu3 %v2003_v4 }
  0x14   : > { %260 = vrot.lane.b32.xlu1 %v2170_v8, %s2115_s18  ;;  %256 = vrot.lane.b32.xlu0 %v188_v9, %s2115_s18  ;;  %v198_v13 = vshrl.u32 %v2172_v10, 16  ;;  %v200_v14 = vshll.u32 %v2172_v10, 16  ;;  %v246_v15 = vshrl.u32 %v2170_v8, 16  ;;  %v248_v16 = vshll.u32 %v2170_v8, 16 }
  0x15   : > { %v212_v17 = vshrl.u32 %v2174_v11, 16  ;;  %v214_v18 = vshll.u32 %v2174_v11, 16  ;;  %v205_v19 = vshrl.u32 %v188_v9, 16  ;;  %v207_v20 = vshll.u32 %v188_v9, 16  ;;  %562 = vmatpush.bf16.msra.mxu1 %v2000_v5 }
  0x16   : > { %v202_v21 = vrot.slane %v200_v14, 1  ;;  %v250_v22 = vrot.slane %v248_v16, 1  ;;  %v193_v40 = vshll.u32 %v186_v32, 16  ;;  %v191_v42 = vshrl.u32 %v186_v32, 16  ;;  %v1999_v14 = vld [vmem:[%s2864_s1 + $0x60] sm:$0xff] }
  0x17   : > { %v216_v24 = vrot.slane %v214_v18, 1  ;;  %v209_v25 = vrot.slane %v207_v20, 1  ;;  %v961_v48 = vshll.u32 %v955_v47, 16  ;;  %v959_v49 = vshrl.u32 %v955_v47, 16  ;;  %902 = vmatpush.bf16.msrb.mxu3 %v2015_v7  ;;  %v2013_v20 = vld [vmem:[%s2864_s1 + $0x28] sm:$0xff] }
  0x18   : > { %v2189_v26 = vor.u32 %v202_v21, %v198_v13  ;;  %v2191_v27 = vor.u32 %v250_v22, %v246_v15  ;;  %v195_v43 = vrot.slane %v193_v40, 1  ;;  %v2014_v15 = vld [vmem:[%s2864_s1 + $0x30] sm:$0xff] }
  0x19   : > { %v2193_v28 = vor.u32 %v216_v24, %v212_v17  ;;  %v2195_v29 = vor.u32 %v209_v25, %v205_v19  ;;  %v963_v50 = vrot.slane %v961_v48, 1  ;;  %563 = vmatpush.bf16.msra.mxu1 %v1999_v14  ;;  %v1991_v17 = vld [vmem:[%s2864_s1 + $0x20] sm:$0xff]  ;;  %v1998_v19 = vld [vmem:[%s2864_s1 + $0x58] sm:$0xff]  ;;  %v1988_v14 = vld [vmem:[%s2864_s1 + $0x8] sm:$0xff] }
  0x1a   : > { %228 = vrot.lane.b32.xlu2 %v2189_v26, %s2115_s18  ;;  %v330_v30 = vunpack.c.l.b16 %v2189_v26  ;;  %v367_v31 = vunpack.c.l.b16 %v2191_v27  ;;  %v196_v44 = vor.u32 %v195_v43, %v191_v42 }
  0x1b   : > { %v356_v33 = vunpack.c.l.b16 %v2193_v28  ;;  %v342_v34 = vunpack.c.l.b16 %v2195_v29  ;;  %v2253_v51 = vor.u32 %v963_v50, %v959_v49  ;;  %903 = vmatpush.bf16.msrb.mxu3 %v2014_v15  ;;  %v1989_v49 = vld [vmem:[%s2864_s1 + $0x10] sm:$0xff]  ;;  %v2021_v15 = vld [vmem:[%s2864_s1 + $0x68] sm:$0xff] }
  0x1c   : > { %v2203_v35 = vpack.c.b16 %v330_v30, %v330_v30  ;;  %224 = vrot.lane.b32.xlu1 %v2193_v28, %s2116_s19  ;;  %220 = vrot.lane.b32.xlu0 %v2189_v26, %s2116_s19  ;;  %v2209_v36 = vpack.c.b16 %v367_v31, %v367_v31  ;;  %v2023_v30 = vld [vmem:[%s2864_s1 + $0x78] sm:$0xff] }
  0x1d   : > { %v2211_v37 = vpack.c.b16 %v356_v33, %v356_v33  ;;  %v2213_v38 = vpack.c.b16 %v342_v34, %v342_v34  ;;  %564 = vmatpush.bf16.msra.mxu1 %v1998_v19  ;;  %v2012_v33 = vld [vmem:[%s2864_s1 + $0x20] sm:$0xff]  ;;  %916 = vmatpush.bf16.msra.mxu2 %v2023_v30  ;;  %v2010_v19 = vld [vmem:[%s2864_s1 + $0x10] sm:$0xff] }
  0x1e   : > { %337 = vst.msk [vmem:[#allocation2 + $0x8] sm:$0x3] %vm336_vm0, %v2203_v35  ;;  %v371_v39 = vrot.slane %v2209_v36, 6  ;;  %v643_v40 = vshrl.u32 %v2203_v35, 16 }
  0x1f   : > { %362 = vst.msk [vmem:[#allocation2 + $0x14] sm:$0x3] %vm336_vm0, %v2211_v37  ;;  %v346_v41 = vrot.slane %v2213_v38, 6  ;;  %904 = vmatpush.bf16.msrb.mxu3 %v2013_v20  ;;  %v2036_v20 = vld [vmem:[%s2864_s1 + $0x38] sm:$0xff] }
  0x20   : > { %375 = vst.msk [vmem:[#allocation2 + $0x14] sm:$0xc] %vm350_vm1, %v371_v39 }
  0x21   : > { %351 = vst.msk [vmem:[#allocation2 + $0x8] sm:$0xc] %vm350_vm1, %v346_v41  ;;  %v646_v41 = vshll.u32 %v2203_v35, 16  ;;  %v645_v35 = vrot.slane %v643_v40, 4  ;;  %v724_v40 = vshll.u32 %v2209_v36, 16 }
  0x22   : > { %232 = vrot.lane.b32.xlu2 %v2193_v28, %s2115_s18 }
  0x23   : > { %905 = vmatpush.bf16.msrb.mxu3 %v2012_v33  ;;  %v1016_v33 = vunpack.c.l.b16 %v2253_v51 }
  0x24   : > { %252 = vrot.lane.b32.xlu1 %v2191_v27, %s2116_s19  ;;  %222 = vrot.lane.b32.xlu0 %v2195_v29, %s2116_s19 }
  0x27   : > { %906 = vmatpush.bf16.msrb.mxu3 %v2011_v61 }
  0x2a   : > { %218 = vrot.lane.b32.xlu2 %v196_v44, %s2116_s19 }
  0x2b   : > { %907 = vmatpush.bf16.msrb.mxu3 %v2010_v19 }
  0x2c   : > { %243 = vrot.lane.b32.xlu1 %v2170_v8, %s2117_s20  ;;  %239 = vrot.lane.b32.xlu0 %v188_v9, %s2117_s20 }
  0x32   : > { %264 = vrot.lane.b32.xlu2 %v2195_v29, %s2117_s20 }
  0x34   : > { %268 = vrot.lane.b32.xlu0 %v2191_v27, %s2117_s20  ;;  %594 = vrot.lane.b32.xlu1 %v186_v32, %s2116_s19  ;;  %v1997_v32 = vld [vmem:[%s2864_s1 + $0x50] sm:$0xff] }
  0x35   : > { %565 = vmatpush.bf16.msra.mxu1 %v1997_v32  ;;  %v698_v32 = vshll.u32 %v2211_v37, 16 }
  0x39   : > { %566 = vmatpush.bf16.msra.mxu1 %v1996_v60  ;;  %v2450_v60 = vrot.slane %v724_v40, 5 }
  0x3a   : > { %598 = vrot.lane.b32.xlu2 %v188_v9, %s2116_s19 }
  0x3c   : > { %230 = vrot.lane.b32.xlu1 %v2195_v29, %s2115_s18  ;;  %226 = vrot.lane.b32.xlu0 %v196_v44, %s2115_s18 }
  0x42   : > { %254 = vrot.lane.b32.xlu2 %v2172_v10, %s2115_s18 }
  0x44   : > { %237 = vrot.lane.b32.xlu1 %v2172_v10, %s2117_s20  ;;  %258 = vrot.lane.b32.xlu0 %v2174_v11, %s2115_s18 }
  0x4a   : > { %241 = vrot.lane.b32.xlu2 %v2174_v11, %s2117_s20 }
  0x4c   : > { %266 = vrot.lane.b32.xlu1 %v2193_v28, %s2117_s20  ;;  %262 = vrot.lane.b32.xlu0 %v2189_v26, %s2117_s20 }
  0x52   : > { %596 = vrot.lane.b32.xlu2 %v2172_v10, %s2116_s19 }
  0x54   : > { %951 = vrot.lane.b32.xlu1 %v2191_v27, %s2115_s18  ;;  %600 = vrot.lane.b32.xlu0 %v2174_v11, %s2116_s19  ;;  %v1992_v11 = vld [vmem:[%s2864_s1 + $0x28] sm:$0xff] }
  0x55   : > { %548 = vmatpush.bf16.msra.mxu0 %v1992_v11 }
  0x59   : > { %549 = vmatpush.bf16.msra.mxu0 %v1991_v17  ;;  %v1995_v17 = vld [vmem:[%s2864_s1 + $0x40] sm:$0xff] }
  0x5a   : > { %956 = vrot.lane.b32.xlu2 %v955_v47, %s2115_s18  ;;  %567 = vmatpush.bf16.msra.mxu1 %v1995_v17 }
  0x5c   : > { %1244 = vrot.lane.b32.xlu1 %v2170_v8, %s2116_s19  ;;  %965 = vrot.lane.b32.xlu0 %v2253_v51, %s2117_s20  ;;  %v2009_v51 = vld [vmem:[%s2864_s1 + $0x8] sm:$0xff] }
  0x5d   : > { %908 = vmatpush.bf16.msrb.mxu3 %v2009_v51  ;;  %v2491_v51 = vrot.slane %v724_v40, 7 }
  0x5e   : > { %1195 = vmatpush.bf16.msrb.mxu1 %v2036_v20  ;;  %v2008_v20 = vld [vmem:[%s2864_s1] sm:$0xff] }
  0x61   : > { %909 = vmatpush.bf16.msrb.mxu3 %v2008_v20 }
  0x62   : > { %1246 = vrot.lane.b32.xlu2 %v955_v47, %s2117_s20  ;;  %v648_v47 = vrot.slane %v646_v41, 5  ;;  %v669_v41 = vshrl.u32 %v2213_v38, 16  ;;  %s2845_s20 = scalar_lea.vmem %s2866_s3, %s1983_s17 }
  0x64   : > { %v649_v11 = vor.u32 %v648_v47, %v645_v35  ;;  %v2025_v35 = vld [vmem:[%s2864_s1 + $0x88] sm:$0xff]  ;;  %v672_v47 = vshll.u32 %v2213_v38, 16 }
  0x66   : > { %v650_v30 = vrot.slane %v649_v11, 4 }
  0x74   : > { %v2259_v52 = vpop.permute.xlu2 %228 }
  0x7c   : > { %v2261_v53 = vpop.permute.xlu2 %232 }
  0x84   : > { %v2263_v54 = vpop.permute.xlu2 %218 }
  0x86   : > { %v2265_v55 = vpop.permute.xlu1 %260  ;;  %v2267_v56 = vpop.permute.xlu0 %256 }
  0x8c   : > { %v2272_v58 = vpop.permute.xlu2 %264 }
  0x8e   : > { %v2283_v62 = vpop.permute.xlu1 %224  ;;  %v2285_v63 = vpop.permute.xlu0 %220 }
  0x8f   : > { %v2328_v18 = vsel %vm270_vm2, %v2161_v2, %v2285_v63  ;;  %v2369_v43 = vsel %vm270_vm2, %v2167_v6, %v2283_v62 }
  0x90   : > { %v2343_v23 = vsel %vm283_vm3, %v2328_v18, %v2259_v52  ;;  %v2379_v45 = vsel %vm283_vm3, %v2369_v43, %v2261_v53 }
  0x94   : > { %v2299_v8 = vpop.permute.xlu2 %598 }
  0x95   : > { %v607_v17 = vsel %vm270_vm2, %v2158_v1, %v2299_v8  ;;  %v2034_v8 = vld [vmem:[%s2864_s1 + $0x28] sm:$0xff] }
  0x96   : > { %v2301_v9 = vpop.permute.xlu1 %252  ;;  %v2303_v10 = vpop.permute.xlu0 %222 }
  0x97   : > { %v2311_v13 = vsel %vm270_vm2, %v2195_v29, %v2303_v10  ;;  %v1990_v29 = vld [vmem:[%s2864_s1 + $0x18] sm:$0xff]  ;;  %v2374_v44 = vsel %vm270_vm2, %v2191_v27, %v2301_v9  ;;  %v2022_v27 = vld [vmem:[%s2864_s1 + $0x70] sm:$0xff] }
  0x98   : > { %v313_v16 = vsel %vm283_vm3, %v2311_v13, %v2267_v56  ;;  %550 = vmatpush.bf16.msra.mxu0 %v1990_v29  ;;  %v317_v50 = vsel %vm283_vm3, %v2374_v44, %v2265_v55  ;;  %917 = vmatpush.bf16.msra.mxu2 %v2022_v27  ;;  %v1986_v27 = vld [vmem:[#allocation2 + $0x10] sm:$0xf0] }
  0x99   : > { %v321_v21 = vsel %vm292_vm4, %v313_v16, %v2272_v58 }
  0x9a   : > { %v341_v34 = vunpack.c.l.b16 %v321_v21  ;;  %v721_v21 = vshrl.u32 %v2209_v36, 16 }
  0x9c   : > { %v2338_v22 = vpop.permute.xlu2 %254  ;;  %551 = vmatpush.bf16.msra.mxu0 %v1989_v49  ;;  %918 = vmatpush.bf16.msra.mxu2 %v2021_v15  ;;  %v1645_v49 = vld [vmem:[#allocation2 + $0x8] sm:$0xf]  ;;  %v2452_v61 = vrot.slane %v721_v21, 6 }
  0x9d   : > { %654 = vst.msk [vmem:[#allocation2 + $0x8] sm:$0x3] %vm336_vm0, %v650_v30  ;;  %v1646_v19 = vor.u32 %v1986_v27, %v1645_v49  ;;  %v2479_v30 = vrot.slane %v698_v32, 7  ;;  %v620_v27 = vsel %vm283_vm3, %v2328_v18, %v2338_v22 }
  0x9e   : > { %v2345_v24 = vpop.permute.xlu1 %243  ;;  %v2347_v25 = vpop.permute.xlu0 %239 }
  0x9f   : > { %v296_v31 = vsel %vm292_vm4, %v2343_v23, %v2347_v25  ;;  %v300_v48 = vsel %vm292_vm4, %v2379_v45, %v2345_v24  ;;  %1719 = vmatmul.msk.bf16.vlgmr.msra.gmra.mxu3 %vm270_vm2, %v1646_v19 }
  0xa0   : > { %v340_v39 = vunpack.c.l.b16 %v296_v31  ;;  %v365_v5 = vunpack.c.l.b16 %v300_v48  ;;  %552 = vmatpush.bf16.msra.mxu0 %v1988_v14  ;;  %v695_v31 = vshrl.u32 %v2211_v37, 16  ;;  %v2035_v48 = vld [vmem:[%s2864_s1 + $0x30] sm:$0xff]  ;;  %v2019_v14 = vld [vmem:[%s2864_s1 + $0x58] sm:$0xff] }
  0xa1   : > { %1196 = vmatpush.bf16.msrb.mxu1 %v2035_v48 }
  0xa2   : > { %v343_v42 = vpack.c.b16 %v341_v34, %v340_v39  ;;  %v1987_v34 = vld [vmem:[%s2864_s1] sm:$0xff]  ;;  %v2464_v15 = vrot.slane %v695_v31, 4 }
  0xa3   : > { %v2020_v39 = vld [vmem:[%s2864_s1 + $0x60] sm:$0xff] }
  0xa4   : > { %v345_v46 = vrot.slane %v343_v42, 6  ;;  %v2403_v3 = vpop.permute.xlu2 %241  ;;  %553 = vmatpush.bf16.msra.mxu0 %v1987_v34  ;;  %919 = vmatpush.bf16.msra.mxu2 %v2020_v39  ;;  %v2044_v39 = vld [vmem:[%s2864_s1 + $0x78] sm:$0xff] }
  0xa5   : > { %1197 = vmatpush.bf16.msrb.mxu1 %v2034_v8  ;;  %1209 = vmatpush.bf16.msra.mxu3 %v2044_v39  ;;  %v2550_v8 = vsel %vm270_vm2, %v2158_v1, %v2303_v10 }
  0xa6   : > { %349 = vst [vmem:[#allocation2] sm:$0xcc] %v345_v46  ;;  %v2393_v57 = vpop.permute.xlu0 %268  ;;  %v2395_v59 = vpop.permute.xlu1 %594 }
  0xa7   : > { %v325_v4 = vsel %vm292_vm4, %v317_v50, %v2393_v57  ;;  %v2448_v50 = vrot.slane %v721_v21, 4  ;;  %v2024_v21 = vld [vmem:[%s2864_s1 + $0x80] sm:$0xff]  ;;  %v603_v34 = vsel %vm270_vm2, %v2177_v12, %v2395_v59  ;;  %v2500_v59 = vrot.slane %v672_v47, 7 }
  0xa8   : > { %v366_v7 = vunpack.c.l.b16 %v325_v4  ;;  %v2454_v4 = vrot.slane %v669_v41, 4  ;;  %936 = vmatpush.bf16.msrb.mxu0 %v2025_v35  ;;  %920 = vmatpush.bf16.msra.mxu2 %v2019_v14 }
  0xaa   : > { %v368_v16 = vpack.c.b16 %v366_v7, %v365_v5  ;;  %v2456_v5 = vrot.slane %v672_v47, 5  ;;  %v2458_v7 = vpack.c.b16 %v1016_v33, %v1016_v33  ;;  %v302_v47 = vsel %vm270_vm2, %v2189_v26, %v2285_v63 }
  0xac   : > { %v370_v29 = vrot.slane %v368_v16, 6  ;;  %v597_v11 = vpop.permute.xlu2 %596  ;;  %v2466_v16 = vrot.slane %v698_v32, 5  ;;  %v1342_v33 = vshrl.u32 %v2458_v7, 16  ;;  %v2495_v32 = vrot.slane %v669_v41, 6  ;;  %937 = vmatpush.bf16.msrb.mxu0 %v2024_v21  ;;  %v2033_v21 = vld [vmem:[%s2864_s1 + $0x20] sm:$0xff] }
  0xad   : > { %v605_v35 = vsel %vm270_vm2, %v2161_v2, %v597_v11  ;;  %v2018_v2 = vld [vmem:[%s2864_s1 + $0x50] sm:$0xff]  ;;  %1198 = vmatpush.bf16.msrb.mxu1 %v2033_v21  ;;  %v1257_v21 = vsel %vm283_vm3, %v2369_v43, %v2265_v55 }
  0xae   : > { %374 = vst [vmem:[#allocation2 + $0xc] sm:$0xcc] %v370_v29  ;;  %v2434_v42 = vpop.permute.xlu1 %230  ;;  %v2436_v46 = vpop.permute.xlu0 %226  ;;  %v2477_v29 = vrot.slane %v695_v31, 6  ;;  %v2525_v19 = vrot.slane %v1342_v33, 6  ;;  %v2529_v20 = vsel %vm283_vm3, %v605_v35, %v2259_v52  ;;  %v273_v33 = vsel %vm270_vm2, %v2177_v12, %v2263_v54  ;;  %921 = vmatpush.bf16.msra.mxu2 %v2018_v2  ;;  %v2017_v54 = vld [vmem:[%s2864_s1 + $0x48] sm:$0xff] }
  0xaf   : > { %v2507_v40 = vsel %vm283_vm3, %v607_v17, %v2434_v42  ;;  %v610_v11 = vsel %vm283_vm3, %v603_v34, %v2436_v46  ;;  %v2043_v34 = vld [vmem:[%s2864_s1 + $0x70] sm:$0xff]  ;;  %v306_v52 = vsel %vm270_vm2, %v2193_v28, %v2283_v62  ;;  %v973_v35 = vsel %vm283_vm3, %v302_v47, %v2267_v56 }
  0xb0   : > { %v616_v39 = vsel %vm292_vm4, %v2507_v40, %v2403_v3  ;;  %v1255_v12 = vsel %vm283_vm3, %v2328_v18, %v2267_v56  ;;  %v2563_v28 = vsel %vm270_vm2, %v2155_v0, %v2301_v9  ;;  %v615_v62 = vsel %vm292_vm4, %v2529_v20, %v2347_v25  ;;  %1210 = vmatpush.bf16.msra.mxu3 %v2043_v34  ;;  %v2016_v34 = vld [vmem:[%s2864_s1 + $0x40] sm:$0xff] }
  0xb1   : > { %v621_v9 = vsel %vm283_vm3, %v2550_v8, %v2267_v56 }
  0xb2   : > { %v625_v56 = vsel %vm292_vm4, %v621_v9, %v2347_v25  ;;  %922 = vmatpush.bf16.msra.mxu2 %v2017_v54  ;;  %v623_v54 = vsel %vm283_vm3, %v2563_v28, %v2265_v55 }
  0xb6   : > { %v2521_v14 = vpop.permute.xlu1 %237  ;;  %v2523_v17 = vpop.permute.xlu0 %258  ;;  %923 = vmatpush.bf16.msra.mxu2 %v2016_v34  ;;  %v2045_v34 = vld [vmem:[%s2864_s1 + $0x80] sm:$0xff] }
  0xb7   : > { %v614_v26 = vsel %vm292_vm4, %v610_v11, %v2521_v14  ;;  %v624_v63 = vsel %vm292_vm4, %v620_v27, %v2521_v14  ;;  %v622_v1 = vsel %vm283_vm3, %v2369_v43, %v2523_v17  ;;  %v2581_v27 = vsel %vm292_vm4, %v1255_v12, %v2347_v25 }
  0xb8   : > { %v630_v10 = vunpack.c.l.b16 %v614_v26  ;;  %v631_v2 = vunpack.c.l.b16 %v624_v63  ;;  %v626_v18 = vsel %vm292_vm4, %v622_v1, %v2403_v3  ;;  %v682_v11 = vunpack.c.l.b16 %v616_v39  ;;  %v2032_v26 = vld [vmem:[%s2864_s1 + $0x18] sm:$0xff]  ;;  %v2042_v63 = vld [vmem:[%s2864_s1 + $0x68] sm:$0xff] }
  0xb9   : > { %v683_v31 = vunpack.c.l.b16 %v626_v18  ;;  %v289_v39 = vsel %vm283_vm3, %v2550_v8, %v2434_v42  ;;  %v675_v12 = vor.u32 %v2500_v59, %v2495_v32  ;;  %v2604_v1 = vsel %vm292_vm4, %v973_v35, %v2272_v58  ;;  %v2046_v42 = vld [vmem:[%s2864_s1 + $0x88] sm:$0xff]  ;;  %1199 = vmatpush.bf16.msrb.mxu1 %v2032_v26  ;;  %1211 = vmatpush.bf16.msra.mxu3 %v2042_v63 }
  0xba   : > { %v975_v43 = vsel %vm283_vm3, %v306_v52, %v2265_v55  ;;  %v657_v18 = vunpack.c.l.b16 %v615_v62  ;;  %v311_v32 = vsel %vm283_vm3, %v302_v47, %v2338_v22  ;;  %v632_v58 = vpack.c.b16 %v631_v2, %v630_v10  ;;  %v2041_v10 = vld [vmem:[%s2864_s1 + $0x60] sm:$0xff]  ;;  %1229 = vmatpush.bf16.msrb.mxu2 %v2046_v42 }
  0xbb   : > { %v684_v9 = vpack.c.b16 %v683_v31, %v682_v11  ;;  %v2031_v31 = vld [vmem:[%s2864_s1 + $0x10] sm:$0xff]  ;;  %679 = vst.msk [vmem:[#allocation2 + $0x8] sm:$0xc] %vm350_vm1, %v675_v12  ;;  %v658_v62 = vunpack.c.l.b16 %v625_v56  ;;  %v298_v55 = vsel %vm292_vm4, %v289_v39, %v2403_v3  ;;  %v285_v22 = vsel %vm283_vm3, %v273_v33, %v2436_v46 }
  0xbc   : > { %v2629_v47 = vsel %vm292_vm4, %v623_v54, %v2345_v24  ;;  %v315_v26 = vsel %vm283_vm3, %v306_v52, %v2523_v17  ;;  %v294_v56 = vsel %vm292_vm4, %v285_v22, %v2521_v14  ;;  %v2642_v33 = vsel %vm292_vm4, %v1257_v21, %v2345_v24 }
  0xbd   : > { %v686_v2 = vshrl.u32 %v684_v9, 16  ;;  %v689_v11 = vshll.u32 %v684_v9, 16  ;;  %v659_v12 = vpack.c.b16 %v658_v62, %v657_v18  ;;  %v701_v63 = vor.u32 %v2466_v16, %v2464_v15  ;;  %1200 = vmatpush.bf16.msrb.mxu1 %v2031_v31  ;;  %1212 = vmatpush.bf16.msra.mxu3 %v2041_v10  ;;  %v2030_v15 = vld [vmem:[%s2864_s1 + $0x8] sm:$0xff]  ;;  %v2040_v16 = vld [vmem:[%s2864_s1 + $0x58] sm:$0xff] }
  0xbe   : > { %v2617_v35 = vpop.permute.xlu1 %266  ;;  %v263_v41 = vpop.permute.xlu0 %262  ;;  %v354_v9 = vunpack.c.l.b16 %v298_v55  ;;  %v634_v54 = vshrl.u32 %v632_v58, 16  ;;  %v637_v48 = vshll.u32 %v632_v58, 16  ;;  %v2651_v18 = vsel %vm292_vm4, %v289_v39, %v2347_v25  ;;  %1230 = vmatpush.bf16.msrb.mxu2 %v2045_v34 }
  0xbf   : > { %v323_v46 = vsel %vm292_vm4, %v315_v26, %v2617_v35  ;;  %v319_v21 = vsel %vm292_vm4, %v311_v32, %v263_v41  ;;  %v328_v62 = vunpack.c.l.b16 %v294_v56  ;;  %v710_v42 = vunpack.c.l.b16 %v2629_v47 }
  0xc0   : > { %v355_v52 = vunpack.c.l.b16 %v323_v46  ;;  %v688_v58 = vrot.slane %v686_v2, 4  ;;  %v691_v31 = vrot.slane %v689_v11, 5  ;;  %v329_v22 = vunpack.c.l.b16 %v319_v21  ;;  %v957_v46 = vpop.permute.xlu2 %956  ;;  %v2029_v11 = vld [vmem:[%s2864_s1] sm:$0xff] }
  0xc1   : > { %v661_v39 = vshrl.u32 %v659_v12, 16  ;;  %v664_v26 = vshll.u32 %v659_v12, 16  ;;  %v702_v41 = vrot.slane %v701_v63, 4  ;;  %v727_v32 = vor.u32 %v2491_v51, %v2452_v61  ;;  %1201 = vmatpush.bf16.msrb.mxu1 %v2030_v15  ;;  %1213 = vmatpush.bf16.msra.mxu3 %v2040_v16  ;;  %v2039_v63 = vld [vmem:[%s2864_s1 + $0x50] sm:$0xff] }
  0xc2   : > { %v357_v55 = vpack.c.b16 %v355_v52, %v354_v9  ;;  %v636_v47 = vrot.slane %v634_v54, 4  ;;  %v639_v10 = vrot.slane %v637_v48, 5  ;;  %v331_v56 = vpack.c.b16 %v329_v22, %v328_v62  ;;  %v2697_v34 = vld [vmem:[#allocation2 + $0x8] sm:$0xf] }
  0xc3   : > { %v1309_v59 = vunpack.c.l.b16 %v2642_v33  ;;  %v2671_v12 = vsel %vm292_vm4, %v975_v43, %v2393_v57  ;;  %v1251_v61 = vsel %vm292_vm4, %v2529_v20, %v2521_v14  ;;  %706 = vst.msk [vmem:[#allocation2 + $0x14] sm:$0x3] %vm336_vm0, %v702_v41  ;;  %v998_v48 = vrot.slane %v2211_v37, 6 }
  0xc4   : > { %361 = vst [vmem:[#allocation2 + $0xc] sm:$0x33] %v357_v55  ;;  %v994_v9 = vunpack.c.l.b16 %v2651_v18  ;;  %v2687_v57 = vsel %vm292_vm4, %v2507_v40, %v2347_v25  ;;  %v692_v20 = vor.u32 %v691_v31, %v688_v58  ;;  %v663_v43 = vrot.slane %v661_v39, 6 }
  0xc5   : > { %335 = vst [vmem:[#allocation2] sm:$0x33] %v331_v56  ;;  %v666_v54 = vrot.slane %v664_v26, 7  ;;  %v1256_v37 = vsel %vm283_vm3, %v2550_v8, %v2523_v17  ;;  %v640_v25 = vor.u32 %v639_v10, %v636_v47  ;;  %v1266_v40 = vunpack.c.l.b16 %v1251_v61  ;;  %1202 = vmatpush.bf16.msrb.mxu1 %v2029_v11  ;;  %1214 = vmatpush.bf16.msra.mxu3 %v2039_v63 }
  0xc6   : > { %v2663_v49 = vpop.permute.xlu1 %951  ;;  %v601_v2 = vpop.permute.xlu0 %600  ;;  %731 = vst.msk [vmem:[#allocation2 + $0x14] sm:$0xc] %vm350_vm1, %v727_v32  ;;  %v977_v8 = vsel %vm283_vm3, %v2374_v44, %v957_v46  ;;  %v1258_v15 = vsel %vm283_vm3, %v2563_v28, %v957_v46  ;;  %v2711_v16 = vsel %vm292_vm4, %v2343_v23, %v2521_v14  ;;  %v693_v58 = vrot.slane %v692_v20, 4 }
  0xc7   : > { %v609_v51 = vsel %vm270_vm2, %v2167_v6, %v601_v2  ;;  %991 = vst.msk [vmem:[#allocation2 + $0x8] sm:$0x3] %vm336_vm0, %v2213_v38  ;;  %v2038_v38 = vld [vmem:[%s2864_s1 + $0x48] sm:$0xff]  ;;  %v1260_v31 = vsel %vm292_vm4, %v1256_v37, %v2403_v3  ;;  %v974_v44 = vsel %vm283_vm3, %v2311_v13, %v2523_v17  ;;  %v667_v22 = vor.u32 %v666_v54, %v663_v43  ;;  %v2037_v43 = vld [vmem:[%s2864_s1 + $0x40] sm:$0xff] }
  0xc8   : > { %v613_v6 = vsel %vm283_vm3, %v609_v51, %v2261_v53  ;;  %v1288_v53 = vunpack.c.l.b16 %v2687_v57  ;;  %1002 = vst.msk [vmem:[#allocation2 + $0x8] sm:$0xc] %vm350_vm1, %v998_v48  ;;  %v979_v14 = vsel %vm292_vm4, %v974_v44, %v2617_v35  ;;  %v968_v26 = vsel %vm283_vm3, %v2563_v28, %v2663_v49  ;;  %v1247_v51 = vpop.permute.xlu2 %1246 }
  0xc9   : > { %v617_v52 = vsel %vm292_vm4, %v613_v6, %v2345_v24  ;;  %v1253_v62 = vsel %vm292_vm4, %v613_v6, %v2403_v3  ;;  %v641_v41 = vrot.slane %v640_v25, 4  ;;  %v2867_v32 = vunpack.c.l.b16 %v2581_v27  ;;  %1215 = vmatpush.bf16.msra.mxu3 %v2038_v38  ;;  %v2057_v6 = vld [vmem:[%s2864_s1 + $0x38] sm:$0xff] }
  0xca   : > { %v709_v21 = vunpack.c.l.b16 %v617_v52  ;;  %v1308_v46 = vunpack.c.l.b16 %v1253_v62  ;;  %v1289_v2 = vunpack.c.l.b16 %v1260_v31  ;;  %v995_v48 = vunpack.c.l.b16 %v979_v14 }
  0xcb   : > { %v1639_v39 = vld [vmem:[#allocation2 + $0xc] sm:$0xf0]  ;;  %v1985_v23 = vld [vmem:[#allocation2 + $0x8] sm:$0xf0]  ;;  %v1268_v47 = vpack.c.b16 %v2867_v32, %v1266_v40  ;;  %v972_v27 = vsel %vm292_vm4, %v968_v26, %v2345_v24  ;;  %v1263_v33 = vsel %vm292_vm4, %v1258_v15, %v1247_v51 }
  0xcc   : > { %v711_v55 = vpack.c.b16 %v710_v42, %v709_v21  ;;  %705 = vst [vmem:[#allocation2 + $0xc] sm:$0x33] %v693_v58  ;;  %v985_v42 = vunpack.c.l.b16 %v2711_v16  ;;  %v1984_v11 = vld [vmem:[#allocation2 + $0x4] sm:$0xf]  ;;  %v1637_v61 = vld [vmem:[#allocation2] sm:$0xf]  ;;  %v996_v31 = vpack.c.b16 %v995_v48, %v994_v9  ;;  %v1014_v44 = vunpack.c.l.b16 %v972_v27 }
  0xcd   : > { %653 = vst [vmem:[#allocation2] sm:$0x33] %v641_v41  ;;  %v1638_v37 = vor.u32 %v1985_v23, %v1637_v61  ;;  %v1642_v52 = vor.u32 %v1984_v11, %v1639_v39  ;;  %v2745_v25 = vld [vmem:[#allocation2 + $0x10] sm:$0xf0]  ;;  %v1270_v40 = vshrl.u32 %v1268_v47, 16  ;;  %v1273_v16 = vshll.u32 %v1268_v47, 16  ;;  %1216 = vmatpush.bf16.msra.mxu3 %v2037_v43 }
  0xce   : > { %v713_v10 = vshrl.u32 %v711_v55, 16  ;;  %v716_v56 = vshll.u32 %v711_v55, 16  ;;  %v1245_v13 = vpop.permute.xlu1 %1244  ;;  %v966_v17 = vpop.permute.xlu0 %965  ;;  %678 = vst [vmem:[#allocation2] sm:$0xcc] %v667_v22  ;;  %v2870_v58 = vshll.u32 %v2458_v7, 16  ;;  %v1006_v9 = vunpack.c.l.b16 %v2671_v12  ;;  %v2055_v12 = vld [vmem:[%s2864_s1 + $0x28] sm:$0xff] }
  0xcf   : > { %v1249_v35 = vsel %vm270_vm2, %v2155_v0, %v1245_v13  ;;  %v982_v28 = vsel %vm292_vm4, %v977_v8, %v966_v17  ;;  %v1310_v0 = vpack.c.b16 %v1309_v59, %v1308_v46  ;;  %1011 = vst.msk [vmem:[#allocation2 + $0x14] sm:$0x3] %vm336_vm0, %v2209_v36  ;;  %554 = vmatmul.bf16.vlgmr.msra.gmra.mxu0 %v1638_v37  ;;  %v2067_v36 = vld [vmem:[%s2864_s1 + $0x88] sm:$0xff]  ;;  %v1331_v22 = vunpack.c.l.b16 %v1263_v33  ;;  %v2065_v13 = vld [vmem:[%s2864_s1 + $0x78] sm:$0xff]  ;;  %v2054_v48 = vld [vmem:[%s2864_s1 + $0x20] sm:$0xff] }
  0xd0   : > { %v715_v63 = vrot.slane %v713_v10, 6  ;;  %v718_v20 = vrot.slane %v716_v56, 7  ;;  %v1250_v54 = vsel %vm283_vm3, %v1249_v35, %v2663_v49  ;;  %v1015_v8 = vunpack.c.l.b16 %v982_v28  ;;  %568 = vmatmul.bf16.vlgmr.msra.gmra.mxu1 %v1642_v52  ;;  %1523 = vmatpush.bf16.msra.mxu0 %v2057_v6 }
  0xd1   : > { %v1254_v62 = vsel %vm292_vm4, %v1250_v54, %v2345_v24  ;;  %v2868_v49 = vrot.slane %v2458_v7, 6  ;;  %v2869_v59 = vor.u32 %v2456_v5, %v2454_v4  ;;  %v1301_v24 = vor.u32 %v2479_v30, %v2477_v29  ;;  %v2056_v4 = vld [vmem:[%s2864_s1 + $0x30] sm:$0xff]  ;;  %v2770_v5 = vld [vmem:[#allocation2 + $0x8] sm:$0xf]  ;;  %1557 = vmatpush.bf16.msra.mxu1 %v2067_v36  ;;  %v2062_v36 = vld [vmem:[%s2864_s1 + $0x60] sm:$0xff] }
  0xd2   : > { %v719_v21 = vor.u32 %v718_v20, %v715_v63  ;;  %v1347_v15 = vrot.slane %v2870_v58, 7  ;;  %v1330_v55 = vunpack.c.l.b16 %v1254_v62  ;;  %v986_v29 = vunpack.c.l.b16 %v2604_v1  ;;  %v2064_v54 = vld [vmem:[%s2864_s1 + $0x70] sm:$0xff]  ;;  %v2051_v58 = vld [vmem:[%s2864_s1 + $0x8] sm:$0xff] }
  0xd3   : > { %1024 = vst.msk [vmem:[#allocation2 + $0x14] sm:$0xc] %vm350_vm1, %v2868_v49  ;;  %v1281_v38 = vrot.slane %v2869_v59, 4  ;;  %v971_v7 = vsel %vm292_vm4, %v2379_v45, %v2403_v3  ;;  %v1290_v30 = vpack.c.b16 %v1289_v2, %v1288_v53  ;;  %v1312_v18 = vshrl.u32 %v1310_v0, 16  ;;  %v2052_v49 = vld [vmem:[%s2864_s1 + $0x10] sm:$0xff] }
  0xd4   : > { %730 = vst [vmem:[#allocation2 + $0xc] sm:$0xcc] %v719_v21  ;;  %v1315_v39 = vshll.u32 %v1310_v0, 16  ;;  %v1017_v23 = vpack.c.b16 %v1015_v8, %v1014_v44  ;;  %v987_v14 = vpack.c.b16 %v986_v29, %v985_v42  ;;  %v1272_v1 = vrot.slane %v1270_v40, 4  ;;  %1524 = vmatpush.bf16.msra.mxu0 %v2056_v4  ;;  %v2053_v21 = vld [vmem:[%s2864_s1 + $0x18] sm:$0xff]  ;;  %v2050_v44 = vld [vmem:[%s2864_s1] sm:$0xff] }
  0xd5   : > { %1285 = vst.msk [vmem:[#allocation2 + $0x8] sm:$0x3] %vm336_vm0, %v1281_v38  ;;  %v1275_v26 = vrot.slane %v1273_v16, 5  ;;  %v2871_v45 = vor.u32 %v2450_v60, %v2448_v50  ;;  %v1005_v57 = vunpack.c.l.b16 %v971_v7  ;;  %v997_v53 = vrot.slane %v996_v31, 6  ;;  %v1722_v41 = vld [vmem:[#allocation2] sm:$0xf] }
  0xd6   : > { %1305 = vst.msk [vmem:[#allocation2 + $0x8] sm:$0xc] %vm350_vm1, %v1301_v24  ;;  %v1332_v46 = vpack.c.b16 %v1331_v22, %v1330_v55  ;;  %v2005_v32 = vld [vmem:[#allocation2 + $0x4] sm:$0xf]  ;;  %v1292_v47 = vshrl.u32 %v1290_v30, 16  ;;  %v1295_v10 = vshll.u32 %v1290_v30, 16  ;;  %v1348_v50 = vor.u32 %v1347_v15, %v2525_v19 }
  0xd7   : > { %v1323_v3 = vrot.slane %v2871_v45, 4  ;;  %v1314_v56 = vrot.slane %v1312_v18, 4  ;;  %990 = vst [vmem:[#allocation2] sm:$0x33] %v987_v14  ;;  %v1007_v60 = vpack.c.b16 %v1006_v9, %v1005_v57  ;;  %v1317_v17 = vrot.slane %v1315_v39, 5  ;;  %v2066_v19 = vld [vmem:[%s2864_s1 + $0x80] sm:$0xff] }
  0xd8   : > { %v1019_v42 = vrot.slane %v1017_v23, 6  ;;  %1001 = vst [vmem:[#allocation2] sm:$0xcc] %v997_v53  ;;  %v1276_v11 = vor.u32 %v1275_v26, %v1272_v1  ;;  %v1334_v28 = vshrl.u32 %v1332_v46, 16  ;;  %v1337_v51 = vshll.u32 %v1332_v46, 16  ;;  %1525 = vmatpush.bf16.msra.mxu0 %v2055_v12  ;;  %1558 = vmatpush.bf16.msra.mxu1 %v2066_v19  ;;  %v2061_v31 = vld [vmem:[%s2864_s1 + $0x58] sm:$0xff] }
  0xd9   : > { %v1294_v20 = vrot.slane %v1292_v47, 6  ;;  %v1297_v6 = vrot.slane %v1295_v10, 7  ;;  %v1318_v43 = vor.u32 %v1317_v17, %v1314_v56  ;;  %v1731_v0 = vor.u32 %v2745_v25, %v2697_v34  ;;  %v2063_v34 = vld [vmem:[%s2864_s1 + $0x68] sm:$0xff]  ;;  %v2058_v39 = vld [vmem:[%s2864_s1 + $0x40] sm:$0xff] }
  0xda   : > { %v2028_v2 = vld [vmem:[#allocation2 + $0x10] sm:$0xf0]  ;;  %v1277_v37 = vrot.slane %v1276_v11, 4  ;;  %v1336_v52 = vrot.slane %v1334_v28, 6  ;;  %v1339_v40 = vrot.slane %v1337_v51, 7  ;;  %v2059_v9 = vld [vmem:[%s2864_s1 + $0x48] sm:$0xff] }
  0xdb   : > { %v2006_v61 = vld [vmem:[#allocation2 + $0x8] sm:$0xf0]  ;;  %v1724_v35 = vld [vmem:[#allocation2 + $0xc] sm:$0xf0]  ;;  %1327 = vst.msk [vmem:[#allocation2 + $0x14] sm:$0x3] %vm336_vm0, %v1323_v3  ;;  %v1298_v62 = vor.u32 %v1297_v6, %v1294_v20  ;;  %v1818_v15 = vor.u32 %v2028_v2, %v2770_v5 }
  0xdc   : > { %v1723_v27 = vor.u32 %v2006_v61, %v1722_v41  ;;  %v1727_v63 = vor.u32 %v2005_v32, %v1724_v35  ;;  %1010 = vst [vmem:[#allocation2 + $0xc] sm:$0x33] %v1007_v60  ;;  %1526 = vmatpush.bf16.msra.mxu0 %v2054_v48  ;;  %v1319_v33 = vrot.slane %v1318_v43, 4  ;;  %v1340_v25 = vor.u32 %v1339_v40, %v1336_v52  ;;  %v2060_v5 = vld [vmem:[%s2864_s1 + $0x50] sm:$0xff]  ;;  %v2103_v26 = vld [vmem:[%s2865_s2] ss:$0 sm:$0xff] }
  0xdd   : > { %1023 = vst [vmem:[#allocation2 + $0xc] sm:$0xcc] %v1019_v42  ;;  %v1904_v30 = vld [vmem:[#allocation2 + $0x8] sm:$0xf]  ;;  %v2104_v17 = vld [vmem:[%s2865_s2] ss:$0 sm:$0xff] }
  0xde   : > { %910 = vmatmul.bf16.vlgmr.msrb.gmra.mxu3 %v1723_v27  ;;  %924 = vmatmul.bf16.vlgmr.msra.gmra.mxu2 %v1727_v63  ;;  %1352 = vst.msk [vmem:[#allocation2 + $0x14] sm:$0xc] %vm350_vm1, %v1348_v50 }
  0xdf   : > { %1537 = vmatpush.bf16.msra.mxu2 %v2065_v13  ;;  %v1809_v8 = vld [vmem:[#allocation2] sm:$0xf]  ;;  %v2026_v16 = vld [vmem:[#allocation2 + $0x4] sm:$0xf]  ;;  %1804 = vmatmul.msk.bf16.vlgmr.msrb.gmra.mxu0 %vm270_vm2, %v1731_v0 }
  0xe0   : > { %1284 = vst [vmem:[#allocation2] sm:$0x33] %v1277_v37  ;;  %1527 = vmatpush.bf16.msra.mxu0 %v2053_v21 }
  0xe1   : > { %1304 = vst [vmem:[#allocation2] sm:$0xcc] %v1298_v62 }
  0xe3   : > { %1538 = vmatpush.bf16.msra.mxu2 %v2064_v54  ;;  %v2105_v54 = vld [vmem:[%s2865_s2] ss:$0 sm:$0xff] }
  0xe4   : > { %v2027_v59 = vld [vmem:[#allocation2 + $0x8] sm:$0xf0]  ;;  %v1811_v38 = vld [vmem:[#allocation2 + $0xc] sm:$0xf0]  ;;  %1528 = vmatpush.bf16.msra.mxu0 %v2052_v49 }
  0xe5   : > { %v1810_v24 = vor.u32 %v2027_v59, %v1809_v8  ;;  %1326 = vst [vmem:[#allocation2 + $0xc] sm:$0x33] %v1319_v33  ;;  %v1814_v55 = vor.u32 %v2026_v16, %v1811_v38  ;;  %v2049_v18 = vld [vmem:[#allocation2 + $0x10] sm:$0xf0] }
  0xe6   : > { %1351 = vst [vmem:[#allocation2 + $0xc] sm:$0xcc] %v1340_v25  ;;  %v1905_v22 = vor.u32 %v2049_v18, %v1904_v30 }
  0xe7   : > { %1203 = vmatmul.bf16.vlgmr.msrb.gmra.mxu1 %v1810_v24  ;;  %1539 = vmatpush.bf16.msra.mxu2 %v2063_v34 }
  0xe8   : > { %1529 = vmatpush.bf16.msra.mxu0 %v2051_v58  ;;  %v1896_v29 = vld [vmem:[#allocation2] sm:$0xf]  ;;  %v2047_v14 = vld [vmem:[#allocation2 + $0x4] sm:$0xf] }
  0xeb   : > { %1540 = vmatpush.bf16.msra.mxu2 %v2062_v36 }
  0xec   : > { %1530 = vmatpush.bf16.msra.mxu0 %v2050_v44 }
  0xed   : > { %v2048_v4 = vld [vmem:[#allocation2 + $0x8] sm:$0xf0]  ;;  %v1898_v23 = vld [vmem:[#allocation2 + $0xc] sm:$0xf0] }
  0xee   : > { %1217 = vmatmul.bf16.vlgmr.msra.gmra.mxu3 %v1814_v55  ;;  %1891 = vmatmul.msk.bf16.vlgmr.msrb.gmra.mxu2 %vm270_vm2, %v1818_v15  ;;  %v1897_v7 = vor.u32 %v2048_v4, %v1896_v29  ;;  %v1901_v1 = vor.u32 %v2047_v14, %v1898_v23  ;;  %v2106_v15 = vld [vmem:[%s2865_s2] ss:$0 sm:$0xff] }
  0xef   : > { %1541 = vmatpush.bf16.msra.mxu2 %v2061_v31 }
  0xf0   : > { %1531 = vmatmul.bf16.vlgmr.msra.gmra.mxu0 %v1897_v7 }
  0xf3   : > { %1542 = vmatpush.bf16.msra.mxu2 %v2060_v5 }
  0xf7   : > { %1543 = vmatpush.bf16.msra.mxu2 %v2059_v9  ;;  %1978 = vmatmul.msk.bf16.vlgmr.msra.gmra.mxu1 %vm270_vm2, %v1905_v22 }
  0xfb   : > { %1544 = vmatpush.bf16.msra.mxu2 %v2058_v39 }
  0xfe   : > { %1545 = vmatmul.bf16.vlgmr.msra.gmra.mxu2 %v1901_v1 }
 0x122   : > { %v583_v45 = vpop.f32.mrf.mxu3 }
 0x12a   : > { %v585_v32 = vpop.f32.mrf.mxu3 }
 0x14c   : > { %v555_v3 = vpop.f32.mrf.mxu0 }
 0x14d   : > { %v569_v57 = vpop.f32.mrf.mxu1  ;;  %v556_v53 = vadd.f32 %v2103_v26, %v555_v3 }
 0x14f   : > { %v570_v46 = vadd.f32 %v569_v57, %v556_v53 }
 0x151   : > { %v584_v10 = vadd.f32 %v583_v45, %v570_v46 }
 0x153   : > { %v588_v50 = vmax.f32 %v584_v10, 0.0 }
 0x154   : > { %v557_v12 = vpop.f32.mrf.mxu0 }
 0x155   : > { %v558_v41 = vadd.f32 %v2103_v26, %v557_v12  ;;  %v571_v47 = vpop.f32.mrf.mxu1 }
 0x157   : > { %v572_v56 = vadd.f32 %v571_v47, %v558_v41 }
 0x159   : > { %v586_v13 = vadd.f32 %v585_v32, %v572_v56 }
 0x15b   : > { %v589_v60 = vmax.f32 %v586_v13, 0.0 }
 0x15c   : > { %v939_v61 = vpop.f32.mrf.mxu0 }
 0x15d   : > { %v2071_v42 = vpack.c.bf16 %v589_v60, %v588_v50 }
 0x15f   : > { %2072 = vst [vmem:[%s2845_s20] sm:$0xff] %v2071_v42  }
 0x161   : > { %v911_v2 = vpop.f32.mrf.mxu3  ;;  %v925_v11 = vpop.f32.mrf.mxu2 }
 0x162   : > { %v912_v35 = vadd.f32 %v2104_v17, %v911_v2 }
 0x164   : > { %v926_v28 = vadd.f32 %v925_v11, %v912_v35  ;;  %v1204_v63 = vpop.f32.mrf.mxu1  ;;  %v941_v6 = vpop.f32.mrf.mxu0 }
 0x165   : > { %v1205_v62 = vadd.f32 %v2105_v54, %v1204_v63 }
 0x166   : > { %v940_v19 = vadd.f32 %v939_v61, %v926_v28 }
 0x168   : > { %v944_v0 = vmax.f32 %v940_v19, 0.0 }
 0x169   : > { %v913_v51 = vpop.f32.mrf.mxu3  ;;  %v927_v48 = vpop.f32.mrf.mxu2 }
 0x16a   : > { %v914_v27 = vadd.f32 %v2104_v17, %v913_v51 }
 0x16c   : > { %v928_v20 = vadd.f32 %v927_v48, %v914_v27  ;;  %v1206_v8 = vpop.f32.mrf.mxu1 }
 0x16d   : > { %v1207_v33 = vadd.f32 %v2105_v54, %v1206_v8  ;;  %v1532_v38 = vpop.f32.mrf.mxu0 }
 0x16e   : > { %v942_v43 = vadd.f32 %v941_v6, %v928_v20  ;;  %v1533_v4 = vadd.f32 %v2106_v15, %v1532_v38 }
 0x170   : > { %v945_v37 = vmax.f32 %v942_v43, 0.0 }
 0x171   : > { %v1218_v52 = vpop.f32.mrf.mxu3  ;;  %v1232_v40 = vpop.f32.mrf.mxu2 }
 0x172   : > { %v2076_v21 = vpack.c.bf16 %v945_v37, %v944_v0  ;;  %v1219_v16 = vadd.f32 %v1218_v52, %v1205_v62 }
 0x174   : > { %2088 = vst [vmem:[%s2845_s20 + $0x8] sm:$0xff] %v2076_v21   ;;  %v1233_v49 = vadd.f32 %v1232_v40, %v1219_v16  ;;  %v1560_v44 = vpop.f32.mrf.mxu1 }
 0x175   : > { %v1534_v29 = vpop.f32.mrf.mxu0 }
 0x176   : > { %v1237_v36 = vmax.f32 %v1233_v49, 0.0  ;;  %v1535_v5 = vadd.f32 %v2106_v15, %v1534_v29 }
 0x179   : > { %v1220_v34 = vpop.f32.mrf.mxu3  ;;  %v1234_v25 = vpop.f32.mrf.mxu2 }
 0x17a   : > { %v1221_v59 = vadd.f32 %v1220_v34, %v1207_v33 }
 0x17c   : > { %v1235_v24 = vadd.f32 %v1234_v25, %v1221_v59  ;;  %v1562_v22 = vpop.f32.mrf.mxu1 }
 0x17e   : > { %v1238_v58 = vmax.f32 %v1235_v24, 0.0 }
 0x180   : > { %v2081_v31 = vpack.c.bf16 %v1238_v58, %v1237_v36 }
 0x181   : > { %v1546_v55 = vpop.f32.mrf.mxu2 }
 0x182   : > { %2089 = vst [vmem:[%s2845_s20 + $0x10] sm:$0xff] %v2081_v31   ;;  %v1547_v7 = vadd.f32 %v1546_v55, %v1533_v4 }
 0x184   : > { %v1561_v18 = vadd.f32 %v1560_v44, %v1547_v7 }
 0x186   : > { %v1565_v23 = vmax.f32 %v1561_v18, 0.0 }
 0x189   : > { %v1548_v30 = vpop.f32.mrf.mxu2 }
 0x18a   : > { %v1549_v9 = vadd.f32 %v1548_v30, %v1535_v5 }
 0x18c   : > { %v1563_v39 = vadd.f32 %v1562_v22, %v1549_v9 }
 0x18e   : > { %v1566_v14 = vmax.f32 %v1563_v39, 0.0 }
 0x190   : > { %v2086_v1 = vpack.c.bf16 %v1566_v14, %v1565_v23 }
 0x192   : > { %2090 = vst [vmem:[%s2845_s20 + $0x18] sm:$0xff] %v2086_v1  }
 0x193 PF: > { %s13_s12 = sadd.s32 1, %s2113_s12  }
 0x194   : > { %p10_p4 = scmp.ge.s32.totalorder %s13_s12, 4  }
 0x196   :  { %12 = sbr.rel (!%p10_p4) target bundleno = 1 (0x1), region = 65 }

// kernel: adaptive_homotopy_forward.9
= control target key start
LH: loop header
LB: loop body
LE: loop exit
PB: predicated region body
PF: predicated region fallthrough
CT: control target
= control target key end

     0   :  { %s8598_s12 = smov 0   ;;  %s11557_s0 = inlined_call_operand.vmem [shape: bf16[2,10,10,128], index: 0, kind: input, shape index: {}]   ;;  %s11558_s1 = inlined_call_operand.vmem [shape: bf16[1152,128], index: 1, kind: input, shape index: {}]   ;;  %s11559_s2 = inlined_call_operand.vmem [shape: f32[1,128], index: 2, kind: input, shape index: {}]   ;;  %s11560_s3 = inlined_call_operand.vmem [shape: f32[2,4,64,128], index: 3, kind: output, shape index: {}]  }
   0x1 LB: > { %s6220_s13 = sadd.s32 4294967295, %s8576_s12   ;;  %p6224_p0 = scmp.ge.s32.totalorder %s8576_s12, 1  ;;  %s8576_s12 = sphi %s8598_s12, %s13_s12  }
   0x2   : > { %p137_p1 = scmp.lt.s32.totalorder %s8576_s12, 3 }
   0x4   : > { %p138_p2 = pnand %p6224_p0, %p137_p1 }
   0x6   : > { %141 = sbr.rel (%p138_p2) target bundleno = 789 (0x315), region = 32 }
   0xb   : > { %v8026_v0 = vld [vmem:[%s11558_s1 + $0x38] sm:$0xff]  ;;  %p161_p3 = scmp.lt.s32.totalorder %s6220_s13, 1  ;;  %v8025_v4 = vld [vmem:[%s11558_s1 + $0x30] sm:$0xff]  ;;  %v8024_v8 = vld [vmem:[%s11558_s1 + $0x28] sm:$0xff]  ;;  %vm1632_vm0 = vsmask.f32 3328 }
   0xc   : > { %v8034_v1 = vld [vmem:[%s11558_s1 + $0x78] sm:$0xff]  ;;  %1202 = vmatpush.bf16.msra.mxu0 %v8026_v0  ;;  %v8033_v5 = vld [vmem:[%s11558_s1 + $0x70] sm:$0xff]  ;;  %v8032_v9 = vld [vmem:[%s11558_s1 + $0x68] sm:$0xff]  ;;  %vm1633_vm1 = vsmask.f32 7440 }
   0xd   : > { %v8042_v2 = vld [vmem:[%s11558_s1 + $0xb8] sm:$0xff]  ;;  %1231 = vmatpush.bf16.msra.mxu1 %v8034_v1  ;;  %s11764_s13 = smov (!%p161_p3, %s6220_s13), 1  ;;  %v8041_v6 = vld [vmem:[%s11558_s1 + $0xb0] sm:$0xff]  ;;  %v8040_v10 = vld [vmem:[%s11558_s1 + $0xa8] sm:$0xff] }
   0xe   : > { %v8050_v3 = vld [vmem:[%s11558_s1 + $0xf8] sm:$0xff]  ;;  %1260 = vmatpush.bf16.msra.mxu2 %v8042_v2  ;;  %v8049_v7 = vld [vmem:[%s11558_s1 + $0xf0] sm:$0xff]  ;;  %s8415_s30 = smul.u32 80, %s11764_s13  ;;  %v8048_v11 = vld [vmem:[%s11558_s1 + $0xe8] sm:$0xff]  ;;  %s7982_s29 = sshll.u32 %s11764_s13, 8 }
   0xf   : > { %1289 = vmatpush.bf16.msra.mxu3 %v8050_v3  ;;  %v8023_v12 = vld [vmem:[%s11558_s1 + $0x20] sm:$0xff]  ;;  %v8022_v28 = vld [vmem:[%s11558_s1 + $0x18] sm:$0xff]  ;;  %v8021_v44 = vld [vmem:[%s11558_s1 + $0x10] sm:$0xff]  ;;  %s10243_s14 = scalar_lea.vmem %s11560_s3, %s7982_s29 }
  0x10   : > { %1203 = vmatpush.bf16.msra.mxu0 %v8025_v4  ;;  %s8648_s16 = scalar_lea.vmem %s11557_s0, %s8415_s30  ;;  %v8031_v13 = vld [vmem:[%s11558_s1 + $0x60] sm:$0xff]  ;;  %v8030_v29 = vld [vmem:[%s11558_s1 + $0x58] sm:$0xff]  ;;  %v8029_v49 = vld [vmem:[%s11558_s1 + $0x50] sm:$0xff] }
  0x11   : > { %1232 = vmatpush.bf16.msra.mxu1 %v8033_v5  ;;  %v8039_v14 = vld [vmem:[%s11558_s1 + $0xa0] sm:$0xff]  ;;  %v173_v18 = vld [vmem:[%s8648_s16 + $0x8] sm:$0xf]  ;;  %v174_v19 = vld [vmem:[%s8648_s16 + $0xc] sm:$0x1] }
  0x12   : > { %1261 = vmatpush.bf16.msra.mxu2 %v8041_v6  ;;  %v8047_v15 = vld [vmem:[%s11558_s1 + $0xe0] sm:$0xff]  ;;  %v8668_v22 = vunpack.c.l.b16 %v173_v18  ;;  %v8670_v23 = vunpack.c.l.b16 %v174_v19  ;;  %v175_v24 = vld [vmem:[%s8648_s16 + $0x10] sm:$0xf]  ;;  %v176_v25 = vld [vmem:[%s8648_s16 + $0x14] sm:$0x1] }
  0x13   : > { %1290 = vmatpush.bf16.msra.mxu3 %v8049_v7  ;;  %v171_v16 = vld [vmem:[%s8648_s16] sm:$0xf]  ;;  %v172_v17 = vld [vmem:[%s8648_s16 + $0x4] sm:$0x1]  ;;  %v8676_v27 = vunpack.c.l.b16 %v175_v24  ;;  %v8689_v33 = vunpack.c.l.b16 %v176_v25  ;;  %v8038_v34 = vld [vmem:[%s11558_s1 + $0x98] sm:$0xff] }
  0x14   : > { %1204 = vmatpush.bf16.msra.mxu0 %v8024_v8  ;;  %v8666_v20 = vunpack.c.l.b16 %v171_v16  ;;  %v208_v21 = vunpack.c.l.b16 %v172_v17  ;;  %11619 = vst [vmem:[#allocation3_spill] sm:$0xff] %v8668_v22  ;;  %v224_v31 = vpack.c.b16 %v8670_v23, %v8668_v22  ;;  %v1626_v32 = vpack.c.b16 %v8668_v22, %v8668_v22  ;;  %v8046_v35 = vld [vmem:[%s11558_s1 + $0xd8] sm:$0xff]  ;;  %v8037_v50 = vld [vmem:[%s11558_s1 + $0x90] sm:$0xff]  ;;  %v8020_v5 = vld [vmem:[%s11558_s1 + $0x8] sm:$0xff] }
  0x15   : > { %1233 = vmatpush.bf16.msra.mxu1 %v8032_v9  ;;  %11620 = vst [vmem:[#allocation4_spill] sm:$0xff] %v8670_v23  ;;  %v1630_v37 = vpack.c.b16 %v8670_v23, %v8670_v23  ;;  %v8045_v55 = vld [vmem:[%s11558_s1 + $0xd0] sm:$0xff]  ;;  %v225_v58 = vpack.c.b16 %v8689_v33, %v8676_v27  ;;  %v177_v59 = vld [vmem:[%s8648_s16 + $0x18] sm:$0xf]  ;;  %v178_v60 = vld [vmem:[%s8648_s16 + $0x1c] sm:$0x1] }
  0x16   : > { %1262 = vmatpush.bf16.msra.mxu2 %v8040_v10  ;;  %v1625_v26 = vpack.c.b16 %v8666_v20, %v8666_v20  ;;  %11621 = vst [vmem:[#allocation5_spill] sm:$0xff] %v8676_v27  ;;  %v223_v30 = vpack.c.b16 %v208_v21, %v8666_v20  ;;  %v1627_v36 = vpack.c.b16 %v208_v21, %v208_v21  ;;  %v239_v42 = vshrl.u32 %v224_v31, 16  ;;  %v8028_v6 = vld [vmem:[%s11558_s1 + $0x48] sm:$0xff]  ;;  %v8019_v24 = vld [vmem:[%s11558_s1] sm:$0xff]  ;;  %vm8755_vm2 = vmor %vm1632_vm0, %vm1633_vm1 }
  0x17   : > { %1291 = vmatpush.bf16.msra.mxu3 %v8048_v11  ;;  %11622 = vst [vmem:[#allocation6_spill] sm:$0xff] %v8689_v33  ;;  %v241_v43 = vshll.u32 %v224_v31, 16  ;;  %v1678_v48 = vshrl.u32 %v1626_v32, 16  ;;  %v1681_v53 = vshll.u32 %v1626_v32, 16  ;;  %v8710_v54 = vshll.u32 %v1630_v37, 16  ;;  %v8036_v11 = vld [vmem:[%s11558_s1 + $0x88] sm:$0xff] }
  0x18   : > { %1205 = vmatpush.bf16.msra.mxu0 %v8023_v12  ;;  %v1636_v38 = vshrl.u32 %v1625_v26, 16  ;;  %v1639_v39 = vshll.u32 %v1625_v26, 16  ;;  %v232_v40 = vshrl.u32 %v223_v30, 16  ;;  %v234_v41 = vshll.u32 %v223_v30, 16  ;;  %v8044_v12 = vld [vmem:[%s11558_s1 + $0xc8] sm:$0xff]  ;;  %v8027_v25 = vld [vmem:[%s11558_s1 + $0x40] sm:$0xff] }
  0x19   : > { %1234 = vmatpush.bf16.msra.mxu1 %v8031_v13  ;;  %v8702_v47 = vshll.u32 %v1627_v36, 16  ;;  %v243_v52 = vrot.slane %v241_v43, 1  ;;  %v1680_v57 = vrot.slane %v1678_v48, 4  ;;  %v1683_v0 = vrot.slane %v1681_v53, 5  ;;  %v8035_v31 = vld [vmem:[%s11558_s1 + $0x80] sm:$0xff]  ;;  %v8074_v36 = vld [vmem:[%s11558_s1 + $0x1b8] sm:$0xff] }
  0x1a   : > { %1263 = vmatpush.bf16.msra.mxu2 %v8039_v14  ;;  %v1638_v45 = vrot.slane %v1636_v38, 4  ;;  %v1641_v46 = vrot.slane %v1639_v39, 5  ;;  %v236_v51 = vrot.slane %v234_v41, 1  ;;  %v1689_v2 = vrot.slane %v8710_v54, 5  ;;  %v8043_v32 = vld [vmem:[%s11558_s1 + $0xc0] sm:$0xff]  ;;  %v8058_v41 = vld [vmem:[%s11558_s1 + $0x138] sm:$0xff] }
  0x1b   : > { %1292 = vmatpush.bf16.msra.mxu3 %v8047_v15  ;;  %v244_v62 = vor.u32 %v243_v52, %v239_v42  ;;  %v1647_v63 = vrot.slane %v8702_v47, 5  ;;  %v246_v3 = vshrl.u32 %v225_v58, 16  ;;  %v248_v4 = vshll.u32 %v225_v58, 16  ;;  %v8082_v42 = vld [vmem:[%s11558_s1 + $0x1f8] sm:$0xff]  ;;  %v179_v47 = vld [vmem:[%s8648_s16 + $0x20] sm:$0xf] }
  0x1c   : > { %1206 = vmatpush.bf16.msra.mxu0 %v8022_v28  ;;  %v1642_v56 = vor.u32 %v1641_v46, %v1638_v45  ;;  %v237_v61 = vor.u32 %v236_v51, %v232_v40  ;;  %v1684_v9 = vor.u32 %v1683_v0, %v1680_v57  ;;  %v8737_v15 = vunpack.c.l.b16 %v177_v59  ;;  %v8066_v51 = vld [vmem:[%s11558_s1 + $0x178] sm:$0xff]  ;;  %v180_v53 = vld [vmem:[%s8648_s16 + $0x24] sm:$0x1]  ;;  %v8073_v59 = vld [vmem:[%s11558_s1 + $0x1b0] sm:$0xff] }
  0x1d   : > { %1235 = vmatpush.bf16.msra.mxu1 %v8030_v29  ;;  %v8727_v8 = vunpack.c.l.b16 %v244_v62  ;;  %v250_v13 = vrot.slane %v248_v4, 1  ;;  %v8735_v14 = vunpack.c.h.b16 %v244_v62  ;;  %v8739_v16 = vunpack.c.l.b16 %v178_v60  ;;  %v8057_v60 = vld [vmem:[%s11558_s1 + $0x130] sm:$0xff] }
  0x1e   : > { %1264 = vmatpush.bf16.msra.mxu2 %v8038_v34  ;;  %v1643_v1 = vrot.slane %v1642_v56, 4  ;;  %v299_v7 = vunpack.c.l.b16 %v237_v61  ;;  %v1623_v10 = vunpack.c.h.b16 %v237_v61  ;;  %11623 = vst [vmem:[#allocation7_spill] sm:$0xff] %v8737_v15  ;;  %v1685_v19 = vrot.slane %v1684_v9, 4 }
  0x1f   : > { %1293 = vmatpush.bf16.msra.mxu3 %v8046_v35  ;;  %11624 = vst [vmem:[#allocation8_spill] sm:$0xff] %v8739_v16  ;;  %v8744_v18 = vpack.c.b16 %v8727_v8, %v8668_v22  ;;  %v11625_v26 = vmov 0  ;;  %v8761_v28 = vor.u32 %v250_v13, %v246_v3  ;;  %v1717_v30 = vpack.c.b16 %v8689_v33, %v8735_v14 }
  0x20   : > { %1207 = vmatpush.bf16.msra.mxu0 %v8021_v44  ;;  %v301_v17 = vpack.c.b16 %v299_v7, %v8666_v20  ;;  %v302_v21 = vpack.c.b16 %v8668_v22, %v299_v7  ;;  %v11626_v26 = vsel %vm8755_vm2, 4294967295, %v11625_v26  ;;  %v315_v20 = vpack.c.b16 %v8676_v27, %v8727_v8  ;;  %v182_v7 = vld [vmem:[%s8648_s16 + $0x2c] sm:$0x1] }
  0x21   : > { %1236 = vmatpush.bf16.msra.mxu1 %v8029_v49  ;;  %11627 = vst [vmem:[#allocation9_spill] sm:$0xff] %v11626_v26  ;;  %v1628_v29 = vpack.c.b16 %v8670_v23, %v1623_v10  ;;  %v8777_v37 = vunpack.c.l.b16 %v8761_v28  ;;  %v1648_v43 = vsel %vm8755_vm2, %v1643_v1, %v1647_v63  ;;  %v1731_v46 = vshll.u32 %v1717_v30, 16  ;;  %v8081_v1 = vld [vmem:[%s11558_s1 + $0x1f0] sm:$0xff] }
  0x22   : > { %1265 = vmatpush.bf16.msra.mxu2 %v8037_v50  ;;  %309 = vst [vmem:[#allocation2] sm:$0xff] %v301_v17  ;;  %v1650_v34 = vshrl.u32 %v302_v21, 16  ;;  %v1653_v35 = vshll.u32 %v302_v21, 16  ;;  %v1722_v39 = vshrl.u32 %v315_v20, 16  ;;  %v1725_v40 = vshll.u32 %v315_v20, 16 }
  0x23   : > { %1294 = vmatpush.bf16.msra.mxu3 %v8045_v55  ;;  %321 = vst [vmem:[#allocation2 + $0x24] sm:$0xff] %v8744_v18  ;;  %v1659_v38 = vshll.u32 %v1628_v29, 16  ;;  %v8791_v48 = vsel %vm8755_vm2, %v1685_v19, %v1689_v2  ;;  %v226_v52 = vpack.c.b16 %v8739_v16, %v8737_v15  ;;  %v1733_v56 = vrot.slane %v1731_v46, 5  ;;  %v8065_v2 = vld [vmem:[%s11558_s1 + $0x170] sm:$0xff] }
  0x24   : > { %1208 = vmatpush.bf16.msra.mxu0 %v8020_v5  ;;  %312 = vst [vmem:[#allocation2 + $0x18] sm:$0xff] %v8744_v18  ;;  %v1652_v44 = vrot.slane %v1650_v34, 4  ;;  %v1655_v45 = vrot.slane %v1653_v35, 5  ;;  %v1724_v49 = vrot.slane %v1722_v39, 4  ;;  %v1727_v50 = vrot.slane %v1725_v40, 5  ;;  %v8072_v35 = vld [vmem:[%s11558_s1 + $0x1a8] sm:$0xff] }
  0x25   : > { %1237 = vmatpush.bf16.msra.mxu1 %v8028_v6  ;;  %11628 = vst [vmem:[#allocation10_spill] sm:$0xff] %v8791_v48  ;;  %v1661_v55 = vrot.slane %v1659_v38, 5  ;;  %v8801_v57 = vpack.c.b16 %v8777_v37, %v8676_v27  ;;  %v253_v61 = vshrl.u32 %v226_v52, 16  ;;  %v255_v62 = vshll.u32 %v226_v52, 16  ;;  %v181_v6 = vld [vmem:[%s8648_s16 + $0x28] sm:$0xf] }
  0x26   : > { %1266 = vmatpush.bf16.msra.mxu2 %v8036_v11  ;;  %310 = vst [vmem:[#allocation2 + $0x8] sm:$0xff] %v302_v21  ;;  %v1656_v54 = vor.u32 %v1655_v45, %v1652_v44  ;;  %v1728_v58 = vor.u32 %v1727_v50, %v1724_v49  ;;  %v1716_v63 = vpack.c.b16 %v8676_v27, %v8676_v27  ;;  %v8820_v4 = vunpack.c.l.b16 %v179_v47 }
  0x27   : > { %1295 = vmatpush.bf16.msra.mxu3 %v8044_v12  ;;  %322 = vst [vmem:[#allocation2 + $0x2c] sm:$0xff] %v315_v20  ;;  %v1719_v3 = vpack.c.b16 %v8689_v33, %v8689_v33  ;;  %v8822_v5 = vunpack.c.l.b16 %v180_v53  ;;  %v257_v12 = vrot.slane %v255_v62, 1  ;;  %v1787_v13 = vpack.c.b16 %v8737_v15, %v8737_v15 }
  0x28   : > { %1209 = vmatpush.bf16.msra.mxu0 %v8019_v24  ;;  %v1657_v0 = vrot.slane %v1656_v54, 4  ;;  %333 = vst [vmem:[#allocation2 + $0x48] sm:$0xff] %v8801_v57  ;;  %v1729_v11 = vrot.slane %v1728_v58, 4  ;;  %v1790_v17 = vpack.c.b16 %v8739_v16, %v8739_v16  ;;  %v8834_v20 = vpack.c.b16 %v8737_v15, %v8777_v37  ;;  %v8080_v54 = vld [vmem:[%s11558_s1 + $0x1e8] sm:$0xff] }
  0x29   : > { %1238 = vmatpush.bf16.msra.mxu1 %v8027_v25  ;;  %11629 = vst [vmem:[#allocation11_spill] sm:$0xff] %v8820_v4  ;;  %v6230_v9 = vld [vmem:[#allocation2] sm:$0xf]  ;;  %v7983_v10 = vld [vmem:[#allocation2 + $0x4] sm:$0xf]  ;;  %v1750_v25 = vshrl.u32 %v1716_v63, 16  ;;  %v8837_v29 = vunpack.c.h.b16 %v8761_v28  ;;  %v258_v34 = vor.u32 %v257_v12, %v253_v61  ;;  %v8851_v40 = vpack.c.b16 %v8822_v5, %v8820_v4 }
  0x2a   : > { %1267 = vmatpush.bf16.msra.mxu2 %v8035_v31  ;;  %11630 = vst [vmem:[#allocation12_spill] sm:$0xff] %v8822_v5  ;;  %v7987_v19 = vld [vmem:[#allocation2 + $0x20] sm:$0xf0]  ;;  %v6232_v21 = vld [vmem:[#allocation2 + $0x24] sm:$0xf0]  ;;  %v1662_v24 = vsel %vm8755_vm2, %v1657_v0, %v1661_v55  ;;  %v1753_v46 = vshll.u32 %v1716_v63, 16  ;;  %v8861_v49 = vunpack.c.l.b16 %v182_v7 }
  0x2b   : > { %1296 = vmatpush.bf16.msra.mxu3 %v8043_v32  ;;  %1710 = vst [vmem:[#allocation2] sm:$0xff] %v1648_v43  ;;  %v6231_v30 = vor.u32 %v7987_v19, %v6230_v9  ;;  %v6235_v31 = vor.u32 %v7983_v10, %v6232_v21  ;;  %v1734_v32 = vsel %vm8755_vm2, %v1729_v11, %v1733_v56  ;;  %v1752_v28 = vrot.slane %v1750_v25, 4  ;;  %v8064_v55 = vld [vmem:[%s11558_s1 + $0x168] sm:$0xff]  ;;  %v8071_v7 = vld [vmem:[%s11558_s1 + $0x1a0] sm:$0xff] }
  0x2c   : > { %1318 = vmatpush.bf16.msrb.mxu0 %v8058_v41  ;;  %1781 = vst [vmem:[#allocation2 + $0x24] sm:$0xff] %v8791_v48  ;;  %v1788_v41 = vpack.c.b16 %v8739_v16, %v8837_v29  ;;  %v8857_v45 = vunpack.c.l.b16 %v258_v34  ;;  %v8859_v47 = vunpack.c.h.b16 %v258_v34  ;;  %v1759_v52 = vshll.u32 %v1719_v3, 16  ;;  %v8055_v9 = vld [vmem:[%s11558_s1 + $0x120] sm:$0xff] }
  0x2d   : > { %1347 = vmatpush.bf16.msrb.mxu1 %v8066_v51  ;;  %v6238_v38 = vld [vmem:[#allocation2 + $0x8] sm:$0xf]  ;;  %v7984_v39 = vld [vmem:[#allocation2 + $0xc] sm:$0xf]  ;;  %324 = vst [vmem:[#allocation2 + $0x3c] sm:$0xff] %v8801_v57  ;;  %1210 = vmatmul.bf16.vlgmr.msra.gmra.mxu0 %v6231_v30  ;;  %v1821_v53 = vshrl.u32 %v1787_v13, 16 }
  0x2e   : > { %1376 = vmatpush.bf16.msrb.mxu2 %v8074_v36  ;;  %v8056_v36 = vld [vmem:[%s11558_s1 + $0x128] sm:$0xff]  ;;  %1239 = vmatmul.bf16.vlgmr.msra.gmra.mxu1 %v6235_v31  ;;  %v6240_v44 = vld [vmem:[#allocation2 + $0x2c] sm:$0xf0]  ;;  %1711 = vst [vmem:[#allocation2 + $0x8] sm:$0xff] %v1662_v24  ;;  %v8871_v56 = vpack.c.b16 %v8857_v45, %v8737_v15  ;;  %v1755_v58 = vrot.slane %v1753_v46, 5  ;;  %v1761_v61 = vrot.slane %v1759_v52, 5 }
  0x2f   : > { %1405 = vmatpush.bf16.msrb.mxu3 %v8082_v42  ;;  %v8855_v42 = vunpack.c.l.b16 %v181_v6  ;;  %v7988_v43 = vld [vmem:[#allocation2 + $0x28] sm:$0xf0]  ;;  %11632 = vst [vmem:[#allocation14_spill] sm:$0xff] %v8857_v45  ;;  %v6243_v51 = vor.u32 %v7984_v39, %v6240_v44  ;;  %v1823_v62 = vrot.slane %v1821_v53, 4  ;;  %v1830_v63 = vshll.u32 %v1790_v17, 16  ;;  %v8079_v17 = vld [vmem:[%s11558_s1 + $0x1e0] sm:$0xff] }
  0x30   : > { %1319 = vmatpush.bf16.msrb.mxu0 %v8057_v60  ;;  %11633 = vst [vmem:[#allocation15_spill] sm:$0xff] %v8859_v47  ;;  %v6239_v50 = vor.u32 %v7988_v43, %v6238_v38  ;;  %v339_v60 = vpack.c.b16 %v8820_v4, %v8857_v45  ;;  %v260_v0 = vshrl.u32 %v8851_v40, 16  ;;  %v262_v3 = vshll.u32 %v8851_v40, 16  ;;  %v8063_v19 = vld [vmem:[%s11558_s1 + $0x160] sm:$0xff]  ;;  %v8070_v40 = vld [vmem:[%s11558_s1 + $0x198] sm:$0xff] }
  0x31   : > { %11631 = vst [vmem:[#allocation13_spill] sm:$0xff] %v8855_v42  ;;  %1348 = vmatpush.bf16.msrb.mxu1 %v8065_v2  ;;  %1297 = vmatmul.bf16.vlgmr.msra.gmra.mxu3 %v6243_v51  ;;  %v1793_v6 = vshrl.u32 %v8834_v20, 16  ;;  %v1832_v10 = vrot.slane %v1830_v63, 5  ;;  %v1796_v11 = vshll.u32 %v8834_v20, 16  ;;  %v1802_v12 = vshll.u32 %v1788_v41, 16  ;;  %v8054_v41 = vld [vmem:[%s11558_s1 + $0x118] sm:$0xff] }
  0x32   : > { %1377 = vmatpush.bf16.msrb.mxu2 %v8073_v59  ;;  %11634 = vst [vmem:[#allocation16_spill] sm:$0xff] %v8861_v49  ;;  %v1824_v59 = vshll.u32 %v1787_v13, 16  ;;  %v1859_v13 = vpack.c.b16 %v8822_v5, %v8859_v47  ;;  %v264_v25 = vrot.slane %v262_v3, 1  ;;  %v1867_v34 = vshll.u32 %v339_v60, 16  ;;  %v8078_v51 = vld [vmem:[%s11558_s1 + $0x1d8] sm:$0xff] }
  0x33   : > { %1782 = vst [vmem:[#allocation2 + $0x2c] sm:$0xff] %v1734_v32  ;;  %1406 = vmatpush.bf16.msrb.mxu3 %v8081_v1  ;;  %1268 = vmatmul.bf16.vlgmr.msra.gmra.mxu2 %v6239_v50  ;;  %v1756_v1 = vor.u32 %v1755_v58, %v1752_v28  ;;  %v1795_v30 = vrot.slane %v1793_v6, 4  ;;  %v1798_v31 = vrot.slane %v1796_v11, 5  ;;  %v1864_v32 = vshrl.u32 %v339_v60, 16  ;;  %v8062_v52 = vld [vmem:[%s11558_s1 + $0x158] sm:$0xff]  ;;  %v8069_v11 = vld [vmem:[%s11558_s1 + $0x190] sm:$0xff] }
  0x34   : > { %11635 = vst [vmem:[#allocation17_spill] sm:$0xff] %v8871_v56  ;;  %v1826_v2 = vrot.slane %v1824_v59, 5  ;;  %1320 = vmatpush.bf16.msrb.mxu0 %v8056_v36  ;;  %v8902_v39 = vor.u32 %v264_v25, %v260_v0  ;;  %v1873_v28 = vshll.u32 %v1859_v13, 16  ;;  %v1804_v44 = vrot.slane %v1802_v12, 5  ;;  %v183_v3 = vld [vmem:[%s8648_s16 + $0x30] sm:$0xf] }
  0x35   : > { %334 = vst [vmem:[#allocation2 + $0x50] sm:$0xff] %v8834_v20  ;;  %1349 = vmatpush.bf16.msrb.mxu1 %v8064_v55  ;;  %v1757_v21 = vrot.slane %v1756_v1, 4  ;;  %v8896_v20 = vld [vmem:[#allocation2 + $0x48] sm:$0xf]  ;;  %v1799_v43 = vor.u32 %v1798_v31, %v1795_v30  ;;  %v1866_v46 = vrot.slane %v1864_v32, 4  ;;  %v1869_v50 = vrot.slane %v1867_v34, 5 }
  0x36   : > { %345 = vst [vmem:[#allocation2 + $0x6c] sm:$0xff] %v8871_v56  ;;  %1378 = vmatpush.bf16.msrb.mxu2 %v8072_v35  ;;  %v1827_v24 = vor.u32 %v1826_v2, %v1823_v62  ;;  %v7992_v35 = vld [vmem:[#allocation2 + $0x4c] sm:$0xf]  ;;  %v8922_v55 = vunpack.c.l.b16 %v8902_v39  ;;  %v1875_v59 = vrot.slane %v1873_v28, 5  ;;  %v1858_v1 = vpack.c.b16 %v8820_v4, %v8820_v4  ;;  %v8053_v12 = vld [vmem:[%s11558_s1 + $0x110] sm:$0xff] }
  0x37   : > { %336 = vst [vmem:[#allocation2 + $0x60] sm:$0xff] %v8871_v56  ;;  %1407 = vmatpush.bf16.msrb.mxu3 %v8080_v54  ;;  %v8900_v36 = vsel %vm8755_vm2, %v1757_v21, %v1761_v61  ;;  %v1800_v63 = vrot.slane %v1799_v43, 4  ;;  %v1870_v0 = vor.u32 %v1869_v50, %v1866_v46  ;;  %v1861_v2 = vpack.c.b16 %v8822_v5, %v8822_v5  ;;  %v8077_v34 = vld [vmem:[%s11558_s1 + $0x1d0] sm:$0xff] }
  0x38   : > { %346 = vst [vmem:[#allocation2 + $0x74] sm:$0xff] %v339_v60  ;;  %v1828_v38 = vrot.slane %v1827_v24, 4  ;;  %1321 = vmatpush.bf16.msrb.mxu0 %v8055_v9  ;;  %v228_v60 = vpack.c.b16 %v8861_v49, %v8855_v42  ;;  %v8943_v24 = vpack.c.b16 %v8922_v55, %v8820_v4  ;;  %v1892_v25 = vshrl.u32 %v1858_v1, 16  ;;  %v184_v43 = vld [vmem:[%s8648_s16 + $0x34] sm:$0x1] }
  0x39   : > { %11636 = vst [vmem:[#allocation18_spill] sm:$0xff] %v8900_v36  ;;  %1350 = vmatpush.bf16.msrb.mxu1 %v8063_v19  ;;  %v1805_v19 = vsel %vm8755_vm2, %v1800_v63, %v1804_v44  ;;  %v1871_v21 = vrot.slane %v1870_v0, 4  ;;  %v1895_v32 = vshll.u32 %v1858_v1, 16  ;;  %v1932_v50 = vpack.c.b16 %v8861_v49, %v8861_v49 }
  0x3a   : > { %1379 = vmatpush.bf16.msrb.mxu2 %v8071_v7  ;;  %1852 = vst [vmem:[#allocation2 + $0x48] sm:$0xff] %v8900_v36  ;;  %v8919_v53 = vsel %vm8755_vm2, %v1828_v38, %v1832_v10  ;;  %v267_v9 = vshrl.u32 %v228_v60, 16  ;;  %v269_v10 = vshll.u32 %v228_v60, 16  ;;  %v1894_v28 = vrot.slane %v1892_v25, 4 }
  0x3b   : > { %1408 = vmatpush.bf16.msrb.mxu3 %v8079_v17  ;;  %11637 = vst [vmem:[#allocation19_spill] sm:$0xff] %v8922_v55  ;;  %v1876_v38 = vsel %vm8755_vm2, %v1871_v21, %v1875_v59  ;;  %v1897_v46 = vrot.slane %v1895_v32, 5  ;;  %v351_v59 = vpack.c.b16 %v8855_v42, %v8922_v55  ;;  %v8966_v63 = vunpack.c.l.b16 %v184_v43 }
  0x3c   : > { %v6274_v54 = vld [vmem:[#allocation2 + $0x50] sm:$0xf]  ;;  %v7993_v58 = vld [vmem:[#allocation2 + $0x54] sm:$0xf]  ;;  %1322 = vmatpush.bf16.msrb.mxu0 %v8054_v41  ;;  %11638 = vst [vmem:[#allocation20_spill] sm:$0xff] %v8943_v24  ;;  %v271_v31 = vrot.slane %v269_v10, 1  ;;  %v1929_v41 = vpack.c.b16 %v8855_v42, %v8855_v42 }
  0x3d   : > { %v7996_v61 = vld [vmem:[#allocation2 + $0x68] sm:$0xf0]  ;;  %v6268_v62 = vld [vmem:[#allocation2 + $0x6c] sm:$0xf0]  ;;  %1351 = vmatpush.bf16.msrb.mxu1 %v8062_v52  ;;  %1853 = vst [vmem:[#allocation2 + $0x50] sm:$0xff] %v1805_v19  ;;  %v1935_v25 = vshrl.u32 %v351_v59, 16 }
  0x3e   : > { %v6267_v6 = vor.u32 %v7996_v61, %v8896_v20  ;;  %v6271_v7 = vor.u32 %v7992_v35, %v6268_v62  ;;  %1923 = vst [vmem:[#allocation2 + $0x6c] sm:$0xff] %v8919_v53  ;;  %1380 = vmatpush.bf16.msrb.mxu2 %v8070_v40  ;;  %v8061_v35 = vld [vmem:[%s11558_s1 + $0x150] sm:$0xff]  ;;  %v1901_v40 = vshll.u32 %v1861_v2, 16  ;;  %v272_v44 = vor.u32 %v271_v31, %v267_v9  ;;  %v8067_v31 = vld [vmem:[%s11558_s1 + $0x180] sm:$0xff] }
  0x3f   : > { %v7997_v13 = vld [vmem:[#allocation2 + $0x70] sm:$0xf0]  ;;  %v6276_v17 = vld [vmem:[#allocation2 + $0x74] sm:$0xf0]  ;;  %1409 = vmatpush.bf16.msrb.mxu3 %v8078_v51  ;;  %357 = vst [vmem:[#allocation2 + $0x90] sm:$0xff] %v8943_v24  ;;  %v8959_v51 = vunpack.c.l.b16 %v183_v3  ;;  %v1898_v61 = vor.u32 %v1897_v46, %v1894_v28  ;;  %v1972_v62 = vshll.u32 %v1932_v50, 16  ;;  %v8969_v2 = vunpack.c.h.b16 %v8902_v39 }
  0x40   : > { %v6275_v30 = vor.u32 %v7997_v13, %v6274_v54  ;;  %v6279_v20 = vor.u32 %v7993_v58, %v6276_v17  ;;  %1215 = vmatmul.bf16.gmra.mxu0 %v6267_v6  ;;  %1244 = vmatmul.bf16.gmra.mxu1 %v6271_v7  ;;  %1924 = vst [vmem:[#allocation2 + $0x74] sm:$0xff] %v1876_v38  ;;  %v1903_v52 = vrot.slane %v1901_v40, 5  ;;  %v1963_v54 = vshrl.u32 %v1929_v41, 16  ;;  %v185_v6 = vld [vmem:[%s8648_s16 + $0x38] sm:$0xf]  ;;  %v8068_v13 = vld [vmem:[%s11558_s1 + $0x188] sm:$0xff] }
  0x41   : > { %11639 = vst [vmem:[#allocation21_spill] sm:$0xff] %v8959_v51  ;;  %v1966_v58 = vshll.u32 %v1929_v41, 16  ;;  %1323 = vmatpush.bf16.msrb.mxu0 %v8053_v12  ;;  %v8964_v60 = vunpack.c.l.b16 %v272_v44  ;;  %1352 = vmatpush.bf16.msrb.mxu1 %v8061_v35  ;;  %v8971_v3 = vunpack.c.h.b16 %v272_v44  ;;  %v1899_v9 = vrot.slane %v1898_v61, 4  ;;  %v186_v12 = vld [vmem:[%s8648_s16 + $0x3c] sm:$0x1]  ;;  %v8052_v39 = vld [vmem:[%s11558_s1 + $0x108] sm:$0xff] }
  0x42   : > { %348 = vst [vmem:[#allocation2 + $0x84] sm:$0xff] %v8943_v24  ;;  %1381 = vmatpush.bf16.msrb.mxu2 %v8069_v11  ;;  %1302 = vmatmul.bf16.gmra.mxu3 %v6279_v20  ;;  %v1965_v0 = vrot.slane %v1963_v54, 4  ;;  %v1974_v10 = vrot.slane %v1972_v62, 5  ;;  %v229_v19 = vpack.c.b16 %v8966_v63, %v8959_v51  ;;  %v1930_v21 = vpack.c.b16 %v8861_v49, %v8969_v2  ;;  %v8060_v20 = vld [vmem:[%s11558_s1 + $0x148] sm:$0xff]  ;;  %v8051_v50 = vld [vmem:[%s11558_s1 + $0x100] sm:$0xff] }
  0x43   : > { %11640 = vst [vmem:[#allocation22_spill] sm:$0xff] %v8966_v63  ;;  %1410 = vmatpush.bf16.msrb.mxu3 %v8077_v34  ;;  %1273 = vmatmul.bf16.gmra.mxu2 %v6275_v30  ;;  %v1968_v1 = vrot.slane %v1966_v58, 5  ;;  %v8976_v7 = vpack.c.b16 %v8964_v60, %v8855_v42  ;;  %v363_v11 = vpack.c.b16 %v8959_v51, %v8964_v60  ;;  %v8076_v30 = vld [vmem:[%s11558_s1 + $0x1c8] sm:$0xff]  ;;  %v1938_v38 = vshll.u32 %v351_v59, 16  ;;  %v8075_v61 = vld [vmem:[%s11558_s1 + $0x1c0] sm:$0xff] }
  0x44   : > { %358 = vst [vmem:[#allocation2 + $0x98] sm:$0xff] %v351_v59  ;;  %v9007_v35 = vsel %vm8755_vm2, %v1899_v9, %v1903_v52  ;;  %v2001_v28 = vpack.c.b16 %v8966_v63, %v8971_v3  ;;  %v9011_v40 = vunpack.c.l.b16 %v185_v6  ;;  %v274_v43 = vshrl.u32 %v229_v19, 16  ;;  %v8059_v9 = vld [vmem:[%s11558_s1 + $0x140] sm:$0xff] }
  0x45   : > { %11641 = vst [vmem:[#allocation23_spill] sm:$0xff] %v8969_v2  ;;  %v1969_v17 = vor.u32 %v1968_v1, %v1965_v0  ;;  %1324 = vmatpush.bf16.msrb.mxu0 %v8052_v39  ;;  %v276_v44 = vshll.u32 %v229_v19, 16  ;;  %v1937_v46 = vrot.slane %v1935_v25, 4  ;;  %1353 = vmatpush.bf16.msrb.mxu1 %v8060_v20  ;;  %v1940_v52 = vrot.slane %v1938_v38, 5 }
  0x46   : > { %11642 = vst [vmem:[#allocation24_spill] sm:$0xff] %v8971_v3  ;;  %v9001_v32 = vld [vmem:[#allocation2 + $0x90] sm:$0xf]  ;;  %v9003_v34 = vld [vmem:[#allocation2 + $0x94] sm:$0xf]  ;;  %1382 = vmatpush.bf16.msrb.mxu2 %v8068_v13  ;;  %v1944_v54 = vshll.u32 %v1930_v21, 16  ;;  %v9025_v6 = vunpack.c.l.b16 %v186_v12  ;;  %v2000_v19 = vpack.c.b16 %v8959_v51, %v8959_v51 }
  0x47   : > { %369 = vst [vmem:[#allocation2 + $0xb4] sm:$0xff] %v8976_v7  ;;  %v1970_v41 = vrot.slane %v1969_v17, 4  ;;  %1411 = vmatpush.bf16.msrb.mxu3 %v8076_v30  ;;  %v2006_v58 = vshrl.u32 %v363_v11, 16  ;;  %v2009_v59 = vshll.u32 %v363_v11, 16  ;;  %v278_v0 = vrot.slane %v276_v44, 1 }
  0x48   : > { %11643 = vst [vmem:[#allocation25_spill] sm:$0xff] %v9007_v35  ;;  %v2015_v1 = vshll.u32 %v2001_v28, 16  ;;  %v1941_v13 = vor.u32 %v1940_v52, %v1937_v46  ;;  %v1946_v39 = vrot.slane %v1944_v54, 5  ;;  %v230_v12 = vpack.c.b16 %v9025_v6, %v9011_v40  ;;  %v187_v28 = vld [vmem:[%s8648_s16 + $0x40] sm:$0xf] }
  0x49   : > { %11644 = vst [vmem:[#allocation26_spill] sm:$0xff] %v9011_v40  ;;  %v9023_v62 = vsel %vm8755_vm2, %v1970_v41, %v1974_v10  ;;  %v2008_v17 = vrot.slane %v2006_v58, 4  ;;  %1325 = vmatpush.bf16.msrb.mxu0 %v8051_v50  ;;  %v279_v10 = vor.u32 %v278_v0, %v274_v43  ;;  %v2011_v21 = vrot.slane %v2009_v59, 5  ;;  %1354 = vmatpush.bf16.msrb.mxu1 %v8059_v9 }
  0x4a   : > { %360 = vst [vmem:[#allocation2 + $0xa8] sm:$0xff] %v8976_v7  ;;  %1383 = vmatpush.bf16.msrb.mxu2 %v8067_v31  ;;  %v1942_v25 = vrot.slane %v1941_v13, 4  ;;  %v2003_v30 = vpack.c.b16 %v8966_v63, %v8966_v63  ;;  %v2034_v20 = vshrl.u32 %v2000_v19, 16  ;;  %v2037_v38 = vshll.u32 %v2000_v19, 16  ;;  %v188_v19 = vld [vmem:[%s8648_s16 + $0x44] sm:$0x1] }
  0x4b   : > { %1994 = vst [vmem:[#allocation2 + $0x90] sm:$0xff] %v9007_v35  ;;  %1412 = vmatpush.bf16.msrb.mxu3 %v8075_v61  ;;  %v9037_v46 = vunpack.c.l.b16 %v279_v10  ;;  %v2012_v31 = vor.u32 %v2011_v21, %v2008_v17  ;;  %v281_v43 = vshrl.u32 %v230_v12, 16  ;;  %v283_v50 = vshll.u32 %v230_v12, 16  ;;  %v6310_v58 = vld [vmem:[#allocation2 + $0x98] sm:$0xf] }
  0x4c   : > { %370 = vst [vmem:[#allocation2 + $0xbc] sm:$0xff] %v363_v11  ;;  %v2017_v11 = vrot.slane %v2015_v1, 5  ;;  %v8002_v59 = vld [vmem:[#allocation2 + $0x9c] sm:$0xf]  ;;  %v1947_v61 = vsel %vm8755_vm2, %v1942_v25, %v1946_v39  ;;  %v2036_v0 = vrot.slane %v2034_v20, 4  ;;  %v2039_v17 = vrot.slane %v2037_v38, 5 }
  0x4d   : > { %11645 = vst [vmem:[#allocation27_spill] sm:$0xff] %v9025_v6  ;;  %v2013_v1 = vrot.slane %v2012_v31, 4  ;;  %v285_v9 = vrot.slane %v283_v50, 1  ;;  %v9046_v13 = vpack.c.b16 %v9037_v46, %v8959_v51  ;;  %v2043_v21 = vshll.u32 %v2003_v30, 16 }
  0x4e   : > { %v8005_v41 = vld [vmem:[#allocation2 + $0xb0] sm:$0xf0]  ;;  %v6304_v44 = vld [vmem:[#allocation2 + $0xb4] sm:$0xf0]  ;;  %1995 = vst [vmem:[#allocation2 + $0x98] sm:$0xff] %v1947_v61  ;;  %v2071_v12 = vpack.c.b16 %v9011_v40, %v9011_v40  ;;  %v2074_v39 = vpack.c.b16 %v9025_v6, %v9025_v6  ;;  %v9053_v25 = vunpack.c.l.b16 %v187_v28  ;;  %v2040_v31 = vor.u32 %v2039_v17, %v2036_v0 }
  0x4f   : > { %v6303_v52 = vor.u32 %v8005_v41, %v9001_v32  ;;  %v6307_v54 = vor.u32 %v9003_v34, %v6304_v44  ;;  %2065 = vst [vmem:[#allocation2 + $0xb4] sm:$0xff] %v9023_v62  ;;  %v2018_v44 = vsel %vm8755_vm2, %v2013_v1, %v2017_v11  ;;  %v286_v38 = vor.u32 %v285_v9, %v281_v43 }
  0x50   : > { %381 = vst [vmem:[#allocation2 + $0xd8] sm:$0xff] %v9046_v13  ;;  %v2045_v50 = vrot.slane %v2043_v21, 5  ;;  %v2105_v30 = vshrl.u32 %v2071_v12, 16  ;;  %v2114_v28 = vshll.u32 %v2074_v39, 16  ;;  %v375_v11 = vpack.c.b16 %v9011_v40, %v9037_v46  ;;  %v8150_v39 = vld [vmem:[%s11558_s1 + $0xb8] sm:$0xff] }
  0x51   : > { %1220 = vmatmul.bf16.gmra.mxu0 %v6303_v52  ;;  %1249 = vmatmul.bf16.gmra.mxu1 %v6307_v54  ;;  %v2108_v52 = vshll.u32 %v2071_v12, 16  ;;  %v9058_v54 = vld [vmem:[#allocation2 + $0x18] sm:$0xf]  ;;  %v9060_v61 = vunpack.c.l.b16 %v286_v38  ;;  %372 = vst [vmem:[#allocation2 + $0xcc] sm:$0xff] %v9046_v13  ;;  %v9065_v43 = vunpack.c.l.b16 %v188_v19  ;;  %v2041_v0 = vrot.slane %v2040_v31, 4 }
  0x52   : > { %v2107_v1 = vrot.slane %v2105_v30, 4  ;;  %v9071_v17 = vunpack.c.h.b16 %v279_v10  ;;  %v8090_v19 = vld [vmem:[%s11558_s1 + $0x238] sm:$0xff]  ;;  %v2116_v21 = vrot.slane %v2114_v28, 5  ;;  %382 = vst [vmem:[#allocation2 + $0xe0] sm:$0xff] %v375_v11  ;;  %v9086_v12 = vld [vmem:[#allocation2 + $0x3c] sm:$0xf0]  ;;  %v9098_v31 = vunpack.c.h.b16 %v286_v38  ;;  %3074 = vmatpush.bf16.msra.mxu3 %v8150_v39 }
  0x53   : > { %v8006_v32 = vld [vmem:[#allocation2 + $0xb8] sm:$0xf0]  ;;  %v6312_v34 = vld [vmem:[#allocation2 + $0xbc] sm:$0xf0]  ;;  %11646 = vst [vmem:[#allocation28_spill] sm:$0xff] %v9065_v43  ;;  %v2110_v9 = vrot.slane %v2108_v52, 5  ;;  %v387_v10 = vpack.c.b16 %v9053_v25, %v9060_v61  ;;  %1434 = vmatpush.bf16.msra.mxu0 %v8090_v19  ;;  %v9125_v39 = vpack.c.b16 %v8727_v8, %v8727_v8 }
  0x54   : > { %v6311_v20 = vor.u32 %v8006_v32, %v6310_v58  ;;  %v6315_v41 = vor.u32 %v8002_v59, %v6312_v34  ;;  %2066 = vst [vmem:[#allocation2 + $0xbc] sm:$0xff] %v2018_v44  ;;  %v9067_v58 = vld [vmem:[#allocation2 + $0x38] sm:$0xf0]  ;;  %v9082_v34 = vpack.c.b16 %v9060_v61, %v9011_v40  ;;  %v2072_v30 = vpack.c.b16 %v9025_v6, %v9071_v17  ;;  %v8141_v52 = vld [vmem:[%s11558_s1 + $0x70] sm:$0xff] }
  0x55   : > { %v9069_v59 = vld [vmem:[#allocation2 + $0x1c] sm:$0xf]  ;;  %11647 = vst [vmem:[#allocation29_spill] sm:$0xff] %v9071_v17  ;;  %v2111_v44 = vor.u32 %v2110_v9, %v2107_v1  ;;  %v2077_v28 = vshrl.u32 %v375_v11, 16  ;;  %v8089_v38 = vld [vmem:[%s11558_s1 + $0x230] sm:$0xff]  ;;  %v2143_v19 = vpack.c.b16 %v9065_v43, %v9098_v31  ;;  %v2148_v42 = vshrl.u32 %v387_v10, 16 }
  0x56   : > { %1278 = vmatmul.bf16.gmra.mxu2 %v6311_v20  ;;  %1307 = vmatmul.bf16.gmra.mxu3 %v6315_v41  ;;  %1713 = vst [vmem:[#allocation2 + $0x18] sm:$0xff] %v8791_v48  ;;  %v8142_v32 = vld [vmem:[%s11558_s1 + $0x78] sm:$0xff]  ;;  %v9096_v41 = vsel %vm8755_vm2, %v2041_v0, %v2045_v50  ;;  %v2080_v48 = vshll.u32 %v375_v11, 16  ;;  %v8149_v50 = vld [vmem:[%s11558_s1 + $0xb0] sm:$0xff]  ;;  %v9119_v11 = vpack.c.b16 %v9065_v43, %v9053_v25  ;;  %v2086_v51 = vshll.u32 %v2072_v30, 16 }
  0x57   : > { %v8134_v20 = vld [vmem:[%s11558_s1 + $0x38] sm:$0xff]  ;;  %11648 = vst [vmem:[#allocation30_spill] sm:$0xff] %v9098_v31  ;;  %3045 = vmatpush.bf16.msra.mxu2 %v8142_v32  ;;  %v8133_v0 = vld [vmem:[%s11558_s1 + $0x30] sm:$0xff]  ;;  %v2112_v32 = vrot.slane %v2111_v44, 4  ;;  %v9130_v44 = vpack.c.b16 %v8777_v37, %v8777_v37  ;;  %v2151_v4 = vshll.u32 %v387_v10, 16  ;;  %v2157_v15 = vshll.u32 %v2143_v19, 16  ;;  %1435 = vmatpush.bf16.msra.mxu0 %v8089_v38 }
  0x58   : > { %1784 = vst [vmem:[#allocation2 + $0x3c] sm:$0xff] %v8900_v36  ;;  %v6338_v1 = vld [vmem:[#allocation2 + $0xd8] sm:$0xf]  ;;  %v8010_v9 = vld [vmem:[#allocation2 + $0xdc] sm:$0xf]  ;;  %3016 = vmatpush.bf16.msra.mxu1 %v8134_v20  ;;  %v2079_v36 = vrot.slane %v2077_v28, 4  ;;  %v1629_v28 = vpack.c.b16 %v8735_v14, %v8670_v23  ;;  %3075 = vmatpush.bf16.msra.mxu3 %v8149_v50 }
  0x59   : > { %393 = vst [vmem:[#allocation2 + $0xfc] sm:$0xff] %v9082_v34  ;;  %v2082_v40 = vrot.slane %v2080_v48, 5  ;;  %v2088_v22 = vrot.slane %v2086_v51, 5  ;;  %v9135_v20 = vsel %vm8755_vm2, %v2112_v32, %v2116_v21  ;;  %v2150_v48 = vrot.slane %v2148_v42, 4  ;;  %v6346_v50 = vld [vmem:[#allocation2 + $0xe0] sm:$0xf] }
  0x5a   : > { %384 = vst [vmem:[#allocation2 + $0xf0] sm:$0xff] %v9082_v34  ;;  %v2153_v30 = vrot.slane %v2151_v4, 5  ;;  %v1718_v4 = vpack.c.b16 %v8837_v29, %v8689_v33  ;;  %v9147_v42 = vpack.c.b16 %v8857_v45, %v8857_v45  ;;  %v1667_v33 = vshll.u32 %v8744_v18, 16 }
  0x5b   : > { %2136 = vst [vmem:[#allocation2 + $0xd8] sm:$0xff] %v9096_v41  ;;  %3046 = vmatpush.bf16.msra.mxu2 %v8141_v52  ;;  %v2083_v27 = vor.u32 %v2082_v40, %v2079_v36  ;;  %v2159_v52 = vrot.slane %v2157_v15, 5  ;;  %v1664_v36 = vshrl.u32 %v8744_v18, 16  ;;  %v1673_v23 = vshll.u32 %v1629_v28, 16 }
  0x5c   : > { %394 = vst [vmem:[#allocation2 + $0x104] sm:$0xff] %v387_v10  ;;  %3017 = vmatpush.bf16.msra.mxu1 %v8133_v0  ;;  %v295_v10 = vshll.u32 %v9119_v11, 16  ;;  %v2154_v38 = vor.u32 %v2153_v30, %v2150_v48  ;;  %v8011_v0 = vld [vmem:[#allocation2 + $0xe4] sm:$0xf]  ;;  %v1736_v45 = vshrl.u32 %v8801_v57, 16 }
  0x5d   : > { %311 = vst [vmem:[#allocation2 + $0x10] sm:$0xff] %v9125_v39  ;;  %v2084_v19 = vrot.slane %v2083_v27, 4  ;;  %v9151_v27 = vpack.c.b16 %v8922_v55, %v8922_v55  ;;  %v1666_v48 = vrot.slane %v1664_v36, 4  ;;  %v1739_v36 = vshll.u32 %v8801_v57, 16 }
  0x5e   : > { %11649 = vst [vmem:[#allocation31_spill] sm:$0xff] %v9135_v20  ;;  %v2155_v30 = vrot.slane %v2154_v38, 4  ;;  %v1738_v28 = vrot.slane %v1736_v45, 4  ;;  %v1745_v38 = vshll.u32 %v1718_v4, 16 }
  0x5f   : > { %323 = vst [vmem:[#allocation2 + $0x34] sm:$0xff] %v9130_v44  ;;  %v2089_v32 = vsel %vm8755_vm2, %v2084_v19, %v2088_v22  ;;  %v1669_v19 = vrot.slane %v1667_v33, 5  ;;  %v293_v33 = vshrl.u32 %v9119_v11, 16  ;;  %v1881_v11 = vshll.u32 %v8943_v24, 16 }
  0x60   : > { %v8014_v51 = vld [vmem:[#allocation2 + $0xf8] sm:$0xf0]  ;;  %v6340_v40 = vld [vmem:[#allocation2 + $0xfc] sm:$0xf0]  ;;  %313 = vst [vmem:[#allocation2 + $0x20] sm:$0xf] %v9125_v39  ;;  %v2160_v22 = vsel %vm8755_vm2, %v2155_v30, %v2159_v52 }
  0x61   : > { %v6339_v15 = vor.u32 %v8014_v51, %v6338_v1  ;;  %v6343_v21 = vor.u32 %v8010_v9, %v6340_v40  ;;  %2207 = vst [vmem:[#allocation2 + $0xfc] sm:$0xff] %v9135_v20  ;;  %v1789_v9 = vpack.c.b16 %v8859_v47, %v8739_v16  ;;  %v297_v52 = vrot.slane %v295_v10, 1  ;;  %v9179_v10 = vld [vmem:[#allocation2 + $0x60] sm:$0xf]  ;;  %v9193_v16 = vld [vmem:[#allocation2 + $0x84] sm:$0xf0] }
  0x62   : > { %2137 = vst [vmem:[#allocation2 + $0xe0] sm:$0xff] %v2089_v32 }
  0x63   : > { %1225 = vmatmul.bf16.gmra.mxu0 %v6339_v15  ;;  %1254 = vmatmul.bf16.gmra.mxu1 %v6343_v21  ;;  %v8015_v55 = vld [vmem:[#allocation2 + $0x100] sm:$0xf0]  ;;  %v6348_v1 = vld [vmem:[#allocation2 + $0x104] sm:$0xf0]  ;;  %325 = vst [vmem:[#allocation2 + $0x44] sm:$0xf] %v9130_v44  ;;  %v1670_v15 = vor.u32 %v1669_v19, %v1666_v48 }
  0x64   : > { %v6347_v51 = vor.u32 %v8015_v55, %v6346_v50  ;;  %v6351_v40 = vor.u32 %v8011_v0, %v6348_v1  ;;  %335 = vst [vmem:[#allocation2 + $0x58] sm:$0xff] %v9147_v42  ;;  %v1675_v21 = vrot.slane %v1673_v23, 5  ;;  %v1807_v55 = vshrl.u32 %v8871_v56, 16  ;;  %v9171_v45 = vld [vmem:[#allocation2 + $0x10] sm:$0xf] }
  0x65   : > { %2208 = vst [vmem:[#allocation2 + $0x104] sm:$0xff] %v2160_v22  ;;  %v1860_v50 = vpack.c.b16 %v8969_v2, %v8822_v5  ;;  %v1741_v0 = vrot.slane %v1739_v36, 5  ;;  %v9173_v4 = vld [vmem:[#allocation2 + $0x14] sm:$0xf]  ;;  %v1671_v32 = vrot.slane %v1670_v15, 4  ;;  %v1810_v48 = vshll.u32 %v8871_v56, 16 }
  0x66   : > { %1283 = vmatmul.bf16.gmra.mxu2 %v6347_v51  ;;  %1312 = vmatmul.bf16.gmra.mxu3 %v6351_v40  ;;  %347 = vst [vmem:[#allocation2 + $0x7c] sm:$0xff] %v9151_v27  ;;  %v1809_v23 = vrot.slane %v1807_v55, 4  ;;  %v1816_v30 = vshll.u32 %v1789_v9, 16  ;;  %v1747_v51 = vrot.slane %v1745_v38, 5  ;;  %v1878_v40 = vshrl.u32 %v8943_v24, 16  ;;  %v8140_v22 = vld [vmem:[%s11558_s1 + $0x68] sm:$0xff] }
  0x67   : > { %337 = vst [vmem:[#allocation2 + $0x68] sm:$0xf] %v9147_v42  ;;  %v1742_v1 = vor.u32 %v1741_v0, %v1738_v28  ;;  %v7989_v19 = vld [vmem:[#allocation2 + $0x30] sm:$0xf0]  ;;  %v6248_v36 = vld [vmem:[#allocation2 + $0x34] sm:$0xf0]  ;;  %v9186_v15 = vsel %vm8755_vm2, %v1671_v32, %v1675_v21  ;;  %3047 = vmatpush.bf16.msra.mxu2 %v8140_v22  ;;  %v9197_v24 = vpack.c.b16 %v8964_v60, %v8964_v60 }
  0x68   : > { %349 = vst [vmem:[#allocation2 + $0x8c] sm:$0xf] %v9151_v27  ;;  %v1812_v55 = vrot.slane %v1810_v48, 5  ;;  %v1818_v9 = vrot.slane %v1816_v30, 5  ;;  %v1887_v28 = vshll.u32 %v1860_v50, 16  ;;  %v1880_v21 = vrot.slane %v1878_v40, 4 }
  0x69   : > { %11650 = vst [vmem:[#allocation32_spill] sm:$0xff] %v9186_v15  ;;  %v9188_v38 = vld [vmem:[#allocation2 + $0x80] sm:$0xf0]  ;;  %v1743_v0 = vrot.slane %v1742_v1, 4  ;;  %v1883_v32 = vrot.slane %v1881_v11, 5  ;;  %v8088_v50 = vld [vmem:[%s11558_s1 + $0x228] sm:$0xff]  ;;  %v9208_v30 = vpack.c.b16 %v9037_v46, %v9037_v46  ;;  %v9218_v40 = vor.u32 %v297_v52, %v293_v33 }
  0x6a   : > { %1712 = vst [vmem:[#allocation2 + $0x10] sm:$0xff] %v9186_v15  ;;  %v9191_v5 = vld [vmem:[#allocation2 + $0x64] sm:$0xf]  ;;  %v1813_v56 = vor.u32 %v1812_v55, %v1809_v23  ;;  %v8148_v48 = vld [vmem:[%s11558_s1 + $0xa8] sm:$0xff]  ;;  %v1889_v55 = vrot.slane %v1887_v28, 5  ;;  %1436 = vmatpush.bf16.msra.mxu0 %v8088_v50  ;;  %v2020_v50 = vshrl.u32 %v9046_v13, 16 }
  0x6b   : > { %1855 = vst [vmem:[#allocation2 + $0x60] sm:$0xff] %v8919_v53  ;;  %v9212_v1 = vsel %vm8755_vm2, %v1743_v0, %v1747_v51  ;;  %v8132_v23 = vld [vmem:[%s11558_s1 + $0x28] sm:$0xff]  ;;  %v1884_v22 = vor.u32 %v1883_v32, %v1880_v21  ;;  %v8139_v15 = vld [vmem:[%s11558_s1 + $0x60] sm:$0xff]  ;;  %v6247_v0 = vor.u32 %v7989_v19, %v9171_v45  ;;  %v9229_v33 = vld [vmem:[#allocation2 + $0x58] sm:$0xf]  ;;  %3076 = vmatpush.bf16.msra.mxu3 %v8148_v48  ;;  %v9247_v19 = vunpack.c.l.b16 %v9218_v40 }
  0x6c   : > { %11651 = vst [vmem:[#allocation33_spill] sm:$0xff] %v9212_v1  ;;  %v1814_v11 = vrot.slane %v1813_v56, 4  ;;  %v8087_v51 = vld [vmem:[%s11558_s1 + $0x220] sm:$0xff]  ;;  %3018 = vmatpush.bf16.msra.mxu1 %v8132_v23  ;;  %v9232_v56 = vld [vmem:[#allocation2 + $0x5c] sm:$0xf]  ;;  %3048 = vmatpush.bf16.msra.mxu2 %v8139_v15  ;;  %v6259_v15 = vor.u32 %v9069_v59, %v9086_v12  ;;  %v1952_v59 = vshll.u32 %v8976_v7, 16  ;;  %v2002_v12 = vpack.c.b16 %v9071_v17, %v8966_v63 }
  0x6d   : > { %1926 = vst [vmem:[#allocation2 + $0x84] sm:$0xff] %v9007_v35  ;;  %v6251_v35 = vor.u32 %v9173_v4, %v6248_v36  ;;  %v1885_v28 = vrot.slane %v1884_v22, 4  ;;  %v8147_v45 = vld [vmem:[%s11558_s1 + $0xa0] sm:$0xff]  ;;  %v6255_v36 = vor.u32 %v9067_v58, %v9058_v54  ;;  %v1931_v54 = vpack.c.b16 %v8971_v3, %v8861_v49  ;;  %v9278_v63 = vld [vmem:[#allocation2 + $0xc8] sm:$0xf0] }
  0x6e   : > { %1783 = vst [vmem:[#allocation2 + $0x34] sm:$0xff] %v9212_v1  ;;  %v9236_v52 = vsel %vm8755_vm2, %v1814_v11, %v1818_v9  ;;  %v8131_v4 = vld [vmem:[%s11558_s1 + $0x20] sm:$0xff]  ;;  %v9253_v9 = vld [vmem:[#allocation2 + $0x78] sm:$0xf0]  ;;  %1437 = vmatpush.bf16.msra.mxu0 %v8087_v51  ;;  %v1949_v58 = vshrl.u32 %v8976_v7, 16  ;;  %v1954_v23 = vrot.slane %v1952_v59, 5 }
  0x6f   : > { %359 = vst [vmem:[#allocation2 + $0xa0] sm:$0xff] %v9197_v24  ;;  %v9255_v21 = vld [vmem:[#allocation2 + $0x7c] sm:$0xf0]  ;;  %v9259_v32 = vsel %vm8755_vm2, %v1885_v28, %v1889_v55  ;;  %3077 = vmatpush.bf16.msra.mxu3 %v8147_v45  ;;  %v1958_v11 = vshll.u32 %v1931_v54, 16  ;;  %v2029_v22 = vshll.u32 %v2002_v12, 16  ;;  %v2022_v55 = vrot.slane %v2020_v50, 4 }
  0x70   : > { %11652 = vst [vmem:[#allocation34_spill] sm:$0xff] %v9236_v52  ;;  %3019 = vmatpush.bf16.msra.mxu1 %v8131_v4  ;;  %v1951_v48 = vrot.slane %v1949_v58, 4  ;;  %v9276_v28 = vpack.c.b16 %v9060_v61, %v9060_v61  ;;  %v9280_v49 = vld [vmem:[#allocation2 + $0xac] sm:$0xf]  ;;  %v9284_v54 = vpack.c.b16 %v9247_v19, %v9247_v19  ;;  %v9286_v58 = vld [vmem:[#allocation2 + $0xcc] sm:$0xf0] }
  0x71   : > { %371 = vst [vmem:[#allocation2 + $0xc4] sm:$0xff] %v9208_v30  ;;  %v1960_v4 = vrot.slane %v1958_v11, 5  ;;  %v8138_v59 = vld [vmem:[%s11558_s1 + $0x58] sm:$0xff] }
  0x72   : > { %1854 = vst [vmem:[#allocation2 + $0x58] sm:$0xff] %v9236_v52  ;;  %v1955_v45 = vor.u32 %v1954_v23, %v1951_v48  ;;  %v8086_v12 = vld [vmem:[%s11558_s1 + $0x218] sm:$0xff]  ;;  %3049 = vmatpush.bf16.msra.mxu2 %v8138_v59  ;;  %v8129_v59 = vld [vmem:[%s11558_s1 + $0x10] sm:$0xff] }
  0x73   : > { %11653 = vst [vmem:[#allocation35_spill] sm:$0xff] %v9259_v32  ;;  %1326 = vmatmul.bf16.vlgmr.msrb.gmra.mxu0 %v6247_v0  ;;  %1355 = vmatmul.bf16.vlgmr.msrb.gmra.mxu1 %v6251_v35  ;;  %v2023_v35 = vshll.u32 %v9046_v13, 16  ;;  %v9272_v0 = vld [vmem:[#allocation2 + $0xa8] sm:$0xf]  ;;  %v8130_v48 = vld [vmem:[%s11558_s1 + $0x18] sm:$0xff] }
  0x74   : > { %361 = vst [vmem:[#allocation2 + $0xb0] sm:$0xf] %v9197_v24  ;;  %v1956_v50 = vrot.slane %v1955_v45, 4  ;;  %1438 = vmatpush.bf16.msra.mxu0 %v8086_v12  ;;  %3020 = vmatpush.bf16.msra.mxu1 %v8130_v48  ;;  %v6287_v48 = vor.u32 %v9232_v56, %v9255_v21  ;;  %v2094_v56 = vshll.u32 %v9082_v34, 16  ;;  %v9354_v21 = vunpack.c.h.b16 %v9218_v40 }
  0x75   : > { %1925 = vst [vmem:[#allocation2 + $0x7c] sm:$0xff] %v9259_v32  ;;  %v2025_v51 = vrot.slane %v2023_v35, 5  ;;  %v8146_v35 = vld [vmem:[%s11558_s1 + $0x98] sm:$0xff] }
  0x76   : > { %373 = vst [vmem:[#allocation2 + $0xd4] sm:$0xf] %v9208_v30  ;;  %1384 = vmatmul.bf16.vlgmr.msrb.gmra.mxu2 %v6255_v36  ;;  %1413 = vmatmul.bf16.vlgmr.msrb.gmra.mxu3 %v6259_v15  ;;  %v2031_v15 = vrot.slane %v2029_v22, 5  ;;  %v9302_v23 = vld [vmem:[#allocation2 + $0xa0] sm:$0xf]  ;;  %v8137_v22 = vld [vmem:[%s11558_s1 + $0x50] sm:$0xff]  ;;  %v9315_v45 = vsel %vm8755_vm2, %v1956_v50, %v1960_v4  ;;  %v9335_v50 = vpack.c.b16 %v9247_v19, %v9053_v25 }
  0x77   : > { %v2026_v36 = vor.u32 %v2025_v51, %v2022_v55  ;;  %1997 = vst [vmem:[#allocation2 + $0xa8] sm:$0xff] %v9023_v62  ;;  %v8085_v55 = vld [vmem:[%s11558_s1 + $0x210] sm:$0xff]  ;;  %v9311_v51 = vld [vmem:[#allocation2 + $0xa4] sm:$0xf]  ;;  %3078 = vmatpush.bf16.msra.mxu3 %v8146_v35  ;;  %3050 = vmatpush.bf16.msra.mxu2 %v8137_v22  ;;  %v6283_v35 = vor.u32 %v9253_v9, %v9229_v33  ;;  %v2091_v9 = vshrl.u32 %v9082_v34, 16 }
  0x78   : > { %2068 = vst [vmem:[#allocation2 + $0xcc] sm:$0xff] %v9096_v41  ;;  %v9324_v12 = vld [vmem:[#allocation2 + $0xc0] sm:$0xf0]  ;;  %v9326_v32 = vld [vmem:[#allocation2 + $0xc4] sm:$0xf0]  ;;  %1439 = vmatpush.bf16.msra.mxu0 %v8085_v55  ;;  %3021 = vmatpush.bf16.msra.mxu1 %v8129_v59  ;;  %v2073_v33 = vpack.c.b16 %v9098_v31, %v9025_v6  ;;  %v2162_v22 = vshrl.u32 %v9335_v50, 16  ;;  %v2144_v59 = vpack.c.b16 %v9354_v21, %v9065_v43 }
  0x79   : > { %v2027_v11 = vrot.slane %v2026_v36, 4  ;;  %383 = vst [vmem:[#allocation2 + $0xe8] sm:$0xff] %v9276_v28  ;;  %v8145_v36 = vld [vmem:[%s11558_s1 + $0x90] sm:$0xff]  ;;  %v2165_v55 = vshll.u32 %v9335_v50, 16  ;;  %v8136_v6 = vld [vmem:[%s11558_s1 + $0x48] sm:$0xff] }
  0x7a   : > { %11654 = vst [vmem:[#allocation36_spill] sm:$0xff] %v9315_v45  ;;  %v2164_v40 = vrot.slane %v2162_v22, 4  ;;  %v2145_v22 = vpack.c.b16 %v9065_v43, %v9065_v43 }
  0x7b   : > { %395 = vst [vmem:[#allocation2 + $0x10c] sm:$0xff] %v9284_v54  ;;  %v9331_v4 = vsel %vm8755_vm2, %v2027_v11, %v2031_v15  ;;  %3079 = vmatpush.bf16.msra.mxu3 %v8145_v36  ;;  %v6291_v15 = vor.u32 %v9188_v38, %v9179_v10  ;;  %v6295_v11 = vor.u32 %v9191_v5, %v9193_v16  ;;  %v9358_v10 = vld [vmem:[#allocation2 + $0xf0] sm:$0xf]  ;;  %v9360_v38 = vld [vmem:[#allocation2 + $0xf4] sm:$0xf]  ;;  %v2093_v16 = vrot.slane %v2091_v9, 4 }
  0x7c   : > { %1996 = vst [vmem:[#allocation2 + $0xa0] sm:$0xff] %v9315_v45  ;;  %v2096_v5 = vrot.slane %v2094_v56, 5  ;;  %v2100_v36 = vshll.u32 %v2073_v33, 16  ;;  %v8084_v33 = vld [vmem:[%s11558_s1 + $0x208] sm:$0xff]  ;;  %v2142_v56 = vpack.c.b16 %v9053_v25, %v9053_v25  ;;  %3051 = vmatpush.bf16.msra.mxu2 %v8136_v6  ;;  %v8135_v45 = vld [vmem:[%s11558_s1 + $0x40] sm:$0xff]  ;;  %v2185_v43 = vshll.u32 %v2145_v22, 16 }
  0x7d   : > { %11655 = vst [vmem:[#allocation37_spill] sm:$0xff] %v9331_v4  ;;  %1440 = vmatpush.bf16.msra.mxu0 %v8084_v33  ;;  %v8127_v6 = vld [vmem:[%s11558_s1] sm:$0xff] }
  0x7e   : > { %2067 = vst [vmem:[#allocation2 + $0xc4] sm:$0xff] %v9331_v4  ;;  %v2102_v9 = vrot.slane %v2100_v36, 5  ;;  %v2171_v4 = vshll.u32 %v2144_v59, 16  ;;  %v2176_v36 = vshrl.u32 %v2142_v56, 16  ;;  %v2179_v52 = vshll.u32 %v2142_v56, 16  ;;  %v8143_v59 = vld [vmem:[%s11558_s1 + $0x80] sm:$0xff] }
  0x7f   : > { %385 = vst [vmem:[#allocation2 + $0xf8] sm:$0xf] %v9276_v28 }
  0x80   : > { %397 = vst [vmem:[#allocation2 + $0x11c] sm:$0xf] %v9284_v54  ;;  %v9395_v33 = vld [vmem:[#allocation2 + $0xe8] sm:$0xf]  ;;  %v9397_v1 = vld [vmem:[#allocation2 + $0xec] sm:$0xf]  ;;  %3052 = vmatpush.bf16.msra.mxu2 %v8135_v45 }
  0x81   : > { %396 = vst [vmem:[#allocation2 + $0x114] sm:$0xff] %v9335_v50  ;;  %v2181_v56 = vrot.slane %v2179_v52, 5  ;;  %v6319_v52 = vor.u32 %v9324_v12, %v9302_v23  ;;  %v1692_v23 = vshrl.u32 %v9125_v39, 16  ;;  %v9431_v12 = vld [vmem:[#allocation2] sm:$0xf] }
  0x82   : > { %11656 = vst [vmem:[#allocation38_spill] sm:$0xff] %v9354_v21  ;;  %v9403_v22 = vld [vmem:[#allocation2 + $0x108] sm:$0xf0] }
  0x83   : > { %1331 = vmatmul.bf16.gmra.mxu0 %v6283_v35  ;;  %1360 = vmatmul.bf16.gmra.mxu1 %v6287_v48  ;;  %2139 = vst [vmem:[#allocation2 + $0xf0] sm:$0xff] %v9135_v20  ;;  %v2167_v35 = vrot.slane %v2165_v55, 5  ;;  %v8128_v55 = vld [vmem:[%s11558_s1 + $0x8] sm:$0xff]  ;;  %v2187_v20 = vrot.slane %v2185_v43, 5  ;;  %v6331_v43 = vor.u32 %v9280_v49, %v9286_v58  ;;  %v9437_v49 = vld [vmem:[#allocation2 + $0x20] sm:$0xf0] }
  0x84   : > { %3022 = vmatpush.bf16.msra.mxu1 %v8128_v55  ;;  %v9405_v55 = vld [vmem:[#allocation2 + $0x10c] sm:$0xf0]  ;;  %v9439_v58 = vld [vmem:[#allocation2 + $0x4] sm:$0xf] }
  0x85   : > { %v2168_v48 = vor.u32 %v2167_v35, %v2164_v40  ;;  %v2173_v35 = vrot.slane %v2171_v4, 5  ;;  %3452 = vst [vmem:[#allocation2] sm:$0xff] %v8744_v18  ;;  %v11660_v18 = vld [vmem:[#allocation5_spill] sm:$0xff] }
  0x86   : > { %1389 = vmatmul.bf16.gmra.mxu2 %v6291_v15  ;;  %1418 = vmatmul.bf16.gmra.mxu3 %v6295_v11  ;;  %v8144_v15 = vld [vmem:[%s11558_s1 + $0x88] sm:$0xff]  ;;  %v2097_v11 = vor.u32 %v2096_v5, %v2093_v16  ;;  %v8083_v16 = vld [vmem:[%s11558_s1 + $0x200] sm:$0xff] }
  0x87   : > { %3080 = vmatpush.bf16.msra.mxu3 %v8144_v15  ;;  %v2169_v40 = vrot.slane %v2168_v48, 4  ;;  %v2178_v15 = vrot.slane %v2176_v36, 4  ;;  %1441 = vmatpush.bf16.msra.mxu0 %v8083_v16  ;;  %v6327_v16 = vor.u32 %v9278_v63, %v9272_v0  ;;  %v1764_v63 = vshrl.u32 %v9130_v44, 16 }
  0x88   : > { %v2098_v5 = vrot.slane %v2097_v11, 4  ;;  %3023 = vmatpush.bf16.msra.mxu1 %v8127_v6  ;;  %v9417_v36 = vld [vmem:[#allocation2 + $0x110] sm:$0xf0]  ;;  %v1767_v0 = vshll.u32 %v9130_v44, 16 }
  0x89   : > { %v9410_v48 = vsel %vm8755_vm2, %v2169_v40, %v2173_v35  ;;  %v2182_v4 = vor.u32 %v2181_v56, %v2178_v15  ;;  %v9441_v35 = vld [vmem:[#allocation2 + $0x24] sm:$0xf0]  ;;  %v1766_v15 = vrot.slane %v1764_v63, 4 }
  0x8a   : > { %v9401_v11 = vsel %vm8755_vm2, %v2098_v5, %v2102_v9  ;;  %11658 = vst [vmem:[#allocation40_spill] sm:$0xff] %v9410_v48  ;;  %v6323_v9 = vor.u32 %v9311_v51, %v9326_v32  ;;  %v1631_v32 = vpack.c.b16 %v8735_v14, %v8735_v14  ;;  %v1695_v51 = vshll.u32 %v9125_v39, 16 }
  0x8b   : > { %11657 = vst [vmem:[#allocation39_spill] sm:$0xff] %v9401_v11  ;;  %3081 = vmatpush.bf16.msra.mxu3 %v8143_v59  ;;  %v2183_v5 = vrot.slane %v2182_v4, 4  ;;  %v1694_v59 = vrot.slane %v1692_v23, 4  ;;  %v1769_v56 = vrot.slane %v1767_v0, 5  ;;  %v9458_v0 = vld [vmem:[#allocation2 + $0x28] sm:$0xf0] }
  0x8c   : > { %2138 = vst [vmem:[#allocation2 + $0xe8] sm:$0xff] %v9401_v11  ;;  %v9419_v11 = vld [vmem:[#allocation2 + $0x114] sm:$0xf0]  ;;  %v1697_v6 = vrot.slane %v1695_v51, 5  ;;  %v1701_v40 = vshll.u32 %v1631_v32, 16 }
  0x8d   : > { %2209 = vst [vmem:[#allocation2 + $0x10c] sm:$0xff] %v9410_v48  ;;  %v2188_v45 = vsel %vm8755_vm2, %v2183_v5, %v2187_v20  ;;  %v1720_v20 = vpack.c.b16 %v8837_v29, %v8837_v29  ;;  %v9449_v51 = vld [vmem:[#allocation2 + $0xc] sm:$0xf]  ;;  %v9451_v32 = vld [vmem:[#allocation2 + $0x2c] sm:$0xf0] }
  0x8e   : > { %2210 = vst [vmem:[#allocation2 + $0x114] sm:$0xff] %v2188_v45  ;;  %v1698_v45 = vor.u32 %v1697_v6, %v1694_v59  ;;  %v1703_v23 = vrot.slane %v1701_v40, 5  ;;  %v8182_v59 = vld [vmem:[%s11558_s1 + $0x1b8] sm:$0xff] }
  0x8f   : > { %v1773_v4 = vshll.u32 %v1720_v20, 16  ;;  %3459 = vst [vmem:[#allocation2 + $0x24] sm:$0xff] %v8801_v57  ;;  %v1770_v20 = vor.u32 %v1769_v56, %v1766_v15  ;;  %3190 = vmatpush.bf16.msrb.mxu3 %v8182_v59  ;;  %v8166_v56 = vld [vmem:[%s11558_s1 + $0x138] sm:$0xff]  ;;  %v9508_v59 = vld [vmem:[#allocation2 + $0x48] sm:$0xf] }
  0x90   : > { %v1699_v6 = vrot.slane %v1698_v45, 4  ;;  %3132 = vmatpush.bf16.msrb.mxu1 %v8166_v56  ;;  %v9510_v56 = vld [vmem:[#allocation2 + $0x4c] sm:$0xf] }
  0x91   : > { %v1775_v63 = vrot.slane %v1773_v4, 5  ;;  %v1771_v40 = vrot.slane %v1770_v20, 4  ;;  %v8173_v4 = vld [vmem:[%s11558_s1 + $0x170] sm:$0xff]  ;;  %v6367_v20 = vor.u32 %v9360_v38, %v9419_v11  ;;  %v1909_v38 = vshll.u32 %v9151_v27, 16 }
  0x92   : > { %v1704_v15 = vsel %vm8755_vm2, %v1699_v6, %v1703_v23  ;;  %v8181_v23 = vld [vmem:[%s11558_s1 + $0x1b0] sm:$0xff] }
  0x93   : > { %1336 = vmatmul.bf16.gmra.mxu0 %v6319_v52  ;;  %1365 = vmatmul.bf16.gmra.mxu1 %v6323_v9  ;;  %v9445_v52 = vld [vmem:[#allocation2 + $0x8] sm:$0xf]  ;;  %v11659_v9 = vld [vmem:[#allocation3_spill] sm:$0xff]  ;;  %v9483_v45 = vsel %vm8755_vm2, %v1771_v40, %v1775_v63  ;;  %v8165_v63 = vld [vmem:[%s11558_s1 + $0x130] sm:$0xff] }
  0x94   : > { %v3450_v5 = vpack.c.b16 %v11659_v9, %v8727_v8  ;;  %v8158_v8 = vld [vmem:[%s11558_s1 + $0xf8] sm:$0xff]  ;;  %v8157_v9 = vld [vmem:[%s11558_s1 + $0xf0] sm:$0xff]  ;;  %11661 = vst [vmem:[#allocation3_spill] sm:$0xff] %v9483_v45  ;;  %3191 = vmatpush.bf16.msrb.mxu3 %v8181_v23  ;;  %3133 = vmatpush.bf16.msrb.mxu1 %v8165_v63 }
  0x95   : > { %3103 = vmatpush.bf16.msrb.mxu0 %v8158_v8  ;;  %v1791_v8 = vpack.c.b16 %v8859_v47, %v8859_v47  ;;  %v9517_v23 = vld [vmem:[#allocation2 + $0x6c] sm:$0xf0] }
  0x96   : > { %1394 = vmatmul.bf16.gmra.mxu2 %v6327_v16  ;;  %1423 = vmatmul.bf16.gmra.mxu3 %v6331_v43  ;;  %v3457_v16 = vpack.c.b16 %v11660_v18, %v8777_v37  ;;  %v8174_v43 = vld [vmem:[%s11558_s1 + $0x178] sm:$0xff]  ;;  %3453 = vst [vmem:[#allocation2 + $0x8] sm:$0xff] %v3450_v5  ;;  %v9466_v37 = vld [vmem:[#allocation2 + $0x20] sm:$0xf]  ;;  %v9479_v5 = vld [vmem:[#allocation2 + $0x40] sm:$0xf0]  ;;  %v6355_v18 = vor.u32 %v9403_v22, %v9395_v33 }
  0x97   : > { %3161 = vmatpush.bf16.msrb.mxu2 %v8174_v43  ;;  %1714 = vst [vmem:[#allocation2 + $0x20] sm:$0xf] %v1704_v15  ;;  %v6363_v43 = vor.u32 %v9417_v36, %v9358_v10  ;;  %v1835_v33 = vshrl.u32 %v9147_v42, 16  ;;  %v1838_v22 = vshll.u32 %v9147_v42, 16  ;;  %v1906_v10 = vshrl.u32 %v9151_v27, 16 }
  0x98   : > { %3460 = vst [vmem:[#allocation2 + $0x2c] sm:$0xff] %v3457_v16  ;;  %v6359_v16 = vor.u32 %v9397_v1, %v9405_v55  ;;  %v1862_v1 = vpack.c.b16 %v8969_v2, %v8969_v2  ;;  %v1844_v55 = vshll.u32 %v1791_v8, 16  ;;  %v1911_v15 = vrot.slane %v1909_v38, 5  ;;  %v8164_v38 = vld [vmem:[%s11558_s1 + $0x128] sm:$0xff] }
  0x99   : > { %1785 = vst [vmem:[#allocation2 + $0x44] sm:$0xf] %v9483_v45  ;;  %3104 = vmatpush.bf16.msrb.mxu0 %v8157_v9  ;;  %v1837_v11 = vrot.slane %v1835_v33, 4  ;;  %v1840_v6 = vrot.slane %v1838_v22, 5  ;;  %v1908_v40 = vrot.slane %v1906_v10, 4  ;;  %v11663_v33 = vld [vmem:[#allocation20_spill] sm:$0xff]  ;;  %3134 = vmatpush.bf16.msrb.mxu1 %v8164_v38  ;;  %v6671_v38 = vor.u32 %v9458_v0, %v9445_v52 }
  0x9a   : > { %v1915_v36 = vshll.u32 %v1862_v1, 16  ;;  %v9515_v9 = vld [vmem:[#allocation2 + $0x68] sm:$0xf0]  ;;  %v9578_v52 = vld [vmem:[#allocation2 + $0x90] sm:$0xf] }
  0x9b   : > { %3162 = vmatpush.bf16.msrb.mxu2 %v8173_v4  ;;  %v8172_v4 = vld [vmem:[%s11558_s1 + $0x168] sm:$0xff]  ;;  %v1912_v63 = vor.u32 %v1911_v15, %v1908_v40  ;;  %3473 = vst [vmem:[#allocation2 + $0x6c] sm:$0xff] %v11663_v33 }
  0x9c   : > { %v1917_v8 = vrot.slane %v1915_v36, 5  ;;  %v8180_v1 = vld [vmem:[%s11558_s1 + $0x1a8] sm:$0xff]  ;;  %v9539_v36 = vld [vmem:[%s11559_s2] ss:$0 sm:$0xff] }
  0x9d   : > { %v1913_v10 = vrot.slane %v1912_v63, 4  ;;  %3192 = vmatpush.bf16.msrb.mxu3 %v8180_v1  ;;  %v6263_v63 = vor.u32 %v9479_v5, %v9466_v37  ;;  %v1933_v37 = vpack.c.b16 %v8971_v3, %v8971_v3  ;;  %v1980_v5 = vshll.u32 %v9197_v24, 16 }
  0x9f   : > { %3163 = vmatpush.bf16.msrb.mxu2 %v8172_v4  ;;  %v9549_v15 = vsel %vm8755_vm2, %v1913_v10, %v1917_v8  ;;  %v8179_v4 = vld [vmem:[%s11558_s1 + $0x1a0] sm:$0xff]  ;;  %v6663_v8 = vor.u32 %v9437_v49, %v9431_v12  ;;  %v6667_v10 = vor.u32 %v9439_v58, %v9441_v35  ;;  %v1977_v12 = vshrl.u32 %v9197_v24, 16 }
  0xa0   : > { %v2004_v49 = vpack.c.b16 %v9071_v17, %v9071_v17  ;;  %v2048_v58 = vshrl.u32 %v9208_v30, 16  ;;  %v2051_v35 = vshll.u32 %v9208_v30, 16 }
  0xa1   : > { %3193 = vmatpush.bf16.msrb.mxu3 %v8179_v4  ;;  %v1979_v0 = vrot.slane %v1977_v12, 4 }
  0xa2   : > { %v2057_v4 = vshll.u32 %v2004_v49, 16 }
  0xa3   : > { %1341 = vmatmul.bf16.gmra.mxu0 %v6355_v18  ;;  %1370 = vmatmul.bf16.gmra.mxu1 %v6359_v16  ;;  %v11662_v18 = vld [vmem:[#allocation17_spill] sm:$0xff]  ;;  %v8156_v16 = vld [vmem:[%s11558_s1 + $0xe8] sm:$0xff] }
  0xa4   : > { %3466 = vst [vmem:[#allocation2 + $0x48] sm:$0xff] %v11662_v18  ;;  %3105 = vmatpush.bf16.msrb.mxu0 %v8156_v16  ;;  %v9554_v16 = vld [vmem:[#allocation2 + $0x88] sm:$0xf0] }
  0xa5   : > { %11665 = vst [vmem:[#allocation17_spill] sm:$0xff] %v9549_v15 }
  0xa6   : > { %1399 = vmatmul.bf16.gmra.mxu2 %v6363_v43  ;;  %1428 = vmatmul.bf16.gmra.mxu3 %v6367_v20  ;;  %v1841_v43 = vor.u32 %v1840_v6, %v1837_v11  ;;  %v1846_v20 = vrot.slane %v1844_v55, 5  ;;  %v8171_v11 = vld [vmem:[%s11558_s1 + $0x160] sm:$0xff]  ;;  %v9541_v6 = vld [vmem:[#allocation2 + $0x68] sm:$0xf]  ;;  %1927 = vst [vmem:[#allocation2 + $0x8c] sm:$0xf] %v9549_v15 }
  0xa7   : > { %v8155_v55 = vld [vmem:[%s11558_s1 + $0xe0] sm:$0xff]  ;;  %3164 = vmatpush.bf16.msrb.mxu2 %v8171_v11  ;;  %v8170_v15 = vld [vmem:[%s11558_s1 + $0x158] sm:$0xff] }
  0xa8   : > { %v1842_v22 = vrot.slane %v1841_v43, 4  ;;  %3106 = vmatpush.bf16.msrb.mxu0 %v8155_v55  ;;  %v8163_v11 = vld [vmem:[%s11558_s1 + $0x120] sm:$0xff]  ;;  %v1986_v55 = vshll.u32 %v1933_v37, 16 }
  0xa9   : > { %3135 = vmatpush.bf16.msrb.mxu1 %v8163_v11  ;;  %v9587_v11 = vld [vmem:[#allocation2 + $0xb4] sm:$0xf0] }
  0xaa   : > { %v9545_v40 = vsel %vm8755_vm2, %v1842_v22, %v1846_v20  ;;  %v1211_v43 = vpop.f32.mrf.mxu0  ;;  %v1988_v48 = vrot.slane %v1986_v55, 5 }
  0xab   : > { %11664 = vst [vmem:[#allocation5_spill] sm:$0xff] %v9545_v40  ;;  %v1240_v20 = vpop.f32.mrf.mxu1  ;;  %v1212_v1 = vadd.f32 %v9539_v36, %v1211_v43  ;;  %v9580_v43 = vld [vmem:[#allocation2 + $0xb0] sm:$0xf0]  ;;  %3165 = vmatpush.bf16.msrb.mxu2 %v8170_v15  ;;  %v9609_v15 = vld [vmem:[#allocation2 + $0xb0] sm:$0xf] }
  0xac   : > { %1856 = vst [vmem:[#allocation2 + $0x68] sm:$0xf] %v9545_v40 }
  0xad   : > { %v1241_v22 = vadd.f32 %v1240_v20, %v1212_v1  ;;  %v1982_v20 = vrot.slane %v1980_v5, 5  ;;  %v9582_v1 = vld [vmem:[#allocation2 + $0x94] sm:$0xf]  ;;  %3487 = vst [vmem:[#allocation2 + $0xb4] sm:$0xff] %v9046_v13 }
  0xae   : > { %3480 = vst [vmem:[#allocation2 + $0x90] sm:$0xff] %v8976_v7 }
  0xaf   : > { %v1983_v49 = vor.u32 %v1982_v20, %v1979_v0  ;;  %v8169_v0 = vld [vmem:[%s11558_s1 + $0x150] sm:$0xff] }
  0xb0   : > { %v8177_v20 = vld [vmem:[%s11558_s1 + $0x190] sm:$0xff]  ;;  %3166 = vmatpush.bf16.msrb.mxu2 %v8169_v0  ;;  %v2193_v0 = vshll.u32 %v9284_v54, 16 }
  0xb1   : > { %v1984_v3 = vrot.slane %v1983_v49, 4 }
  0xb2   : > { %v1213_v40 = vpop.f32.mrf.mxu0 }
  0xb3   : > { %1442 = vmatmul.bf16.vlgmr.msra.gmra.mxu0 %v6263_v63  ;;  %3024 = vmatmul.bf16.vlgmr.msra.gmra.mxu1 %v6663_v8  ;;  %v2050_v63 = vrot.slane %v2048_v58, 4  ;;  %v2053_v8 = vrot.slane %v2051_v35, 5  ;;  %v1242_v45 = vpop.f32.mrf.mxu1  ;;  %v1214_v12 = vadd.f32 %v9539_v36, %v1213_v40  ;;  %v2059_v58 = vrot.slane %v2057_v4, 5  ;;  %v8178_v35 = vld [vmem:[%s11558_s1 + $0x198] sm:$0xff] }
  0xb4   : > { %v1298_v37 = vpop.f32.mrf.mxu3  ;;  %3194 = vmatpush.bf16.msrb.mxu3 %v8178_v35  ;;  %v8162_v40 = vld [vmem:[%s11558_s1 + $0x118] sm:$0xff]  ;;  %v6703_v35 = vor.u32 %v9510_v56, %v9517_v23  ;;  %v2146_v56 = vpack.c.b16 %v9354_v21, %v9354_v21  ;;  %v2190_v23 = vshrl.u32 %v9284_v54, 16 }
  0xb5   : > { %v2054_v5 = vor.u32 %v2053_v8, %v2050_v63  ;;  %v1243_v17 = vadd.f32 %v1242_v45, %v1214_v12  ;;  %v9613_v45 = vsel %vm8755_vm2, %v1984_v3, %v1988_v48  ;;  %v9622_v63 = vld [vmem:[#allocation2 + $0xd0] sm:$0xf0]  ;;  %3136 = vmatpush.bf16.msrb.mxu1 %v8162_v40  ;;  %v6699_v8 = vor.u32 %v9515_v9, %v9508_v59 }
  0xb6   : > { %3053 = vmatmul.bf16.vlgmr.msra.gmra.mxu2 %v6667_v10  ;;  %3082 = vmatmul.bf16.vlgmr.msra.gmra.mxu3 %v6671_v38  ;;  %v8154_v10 = vld [vmem:[%s11558_s1 + $0xd8] sm:$0xff]  ;;  %v1269_v38 = vpop.f32.mrf.mxu2  ;;  %11666 = vst [vmem:[#allocation20_spill] sm:$0xff] %v9613_v45  ;;  %v8161_v59 = vld [vmem:[%s11558_s1 + $0x110] sm:$0xff]  ;;  %v2075_v9 = vpack.c.b16 %v9098_v31, %v9098_v31 }
  0xb7   : > { %v1270_v55 = vadd.f32 %v1269_v38, %v1241_v22  ;;  %3107 = vmatpush.bf16.msrb.mxu0 %v8154_v10  ;;  %v2055_v2 = vrot.slane %v2054_v5, 4  ;;  %v8153_v22 = vld [vmem:[%s11558_s1 + $0xd0] sm:$0xff]  ;;  %1998 = vst [vmem:[#allocation2 + $0xb0] sm:$0xf] %v9613_v45 }
  0xb8   : > { %3195 = vmatpush.bf16.msrb.mxu3 %v8177_v20  ;;  %v6706_v10 = vld [vmem:[#allocation2 + $0x50] sm:$0xf]  ;;  %v8105_v38 = vld [vmem:[#allocation2 + $0x70] sm:$0xf0]  ;;  %v9650_v20 = vld [vmem:[#allocation2 + $0xdc] sm:$0xf] }
  0xb9   : > { %v9598_v47 = vadd.f32 %v1298_v37, %v1270_v55  ;;  %v9617_v4 = vsel %vm8755_vm2, %v2055_v2, %v2059_v58  ;;  %v6299_v2 = vor.u32 %v9554_v16, %v9541_v6  ;;  %v6707_v55 = vor.u32 %v8105_v38, %v6706_v10  ;;  %v9642_v16 = vld [vmem:[#allocation2 + $0xd8] sm:$0xf]  ;;  %3137 = vmatpush.bf16.msrb.mxu1 %v8161_v59 }
  0xba   : > { %11667 = vst [vmem:[#allocation41_spill] sm:$0xff] %v9617_v4  ;;  %v2119_v6 = vshrl.u32 %v9276_v28, 16 }
  0xbb   : > { %2069 = vst [vmem:[#allocation2 + $0xd4] sm:$0xf] %v9617_v4  ;;  %3108 = vmatpush.bf16.msrb.mxu0 %v8153_v22  ;;  %v9648_v22 = vld [vmem:[#allocation2 + $0xf8] sm:$0xf0] }
  0xbc   : > { %v1300_v12 = vpop.f32.mrf.mxu3  ;;  %3494 = vst [vmem:[#allocation2 + $0xd8] sm:$0xff] %v9082_v34 }
  0xbd   : > { %v1216_v3 = vpop.f32.mrf.mxu0  ;;  %v1245_v48 = vpop.f32.mrf.mxu1 }
  0xbe   : > { %v1271_v37 = vpop.f32.mrf.mxu2  ;;  %v1217_v49 = vadd.f32 %v9539_v36, %v1216_v3  ;;  %v2121_v3 = vrot.slane %v2119_v6, 4  ;;  %v8152_v6 = vld [vmem:[%s11558_s1 + $0xc8] sm:$0xff] }
  0xbf   : > { %v1272_v5 = vadd.f32 %v1271_v37, %v1243_v17  ;;  %v2122_v17 = vshll.u32 %v9276_v28, 16  ;;  %v2192_v37 = vrot.slane %v2190_v23, 4  ;;  %3109 = vmatpush.bf16.msrb.mxu0 %v8152_v6 }
  0xc0   : > { %v1246_v58 = vadd.f32 %v1245_v48, %v1217_v49  ;;  %v2199_v49 = vshll.u32 %v2146_v56, 16 }
  0xc1   : > { %v9633_v40 = vadd.f32 %v1300_v12, %v1272_v5  ;;  %v2124_v48 = vrot.slane %v2122_v17, 5  ;;  %v2195_v12 = vrot.slane %v2193_v0, 5  ;;  %v8176_v17 = vld [vmem:[%s11558_s1 + $0x188] sm:$0xff] }
  0xc2   : > { %v2201_v0 = vrot.slane %v2199_v49, 5  ;;  %3196 = vmatpush.bf16.msrb.mxu3 %v8176_v17 }
  0xc3   : > { %1447 = vmatmul.bf16.gmra.mxu0 %v6299_v2  ;;  %3029 = vmatmul.bf16.gmra.mxu1 %v6699_v8  ;;  %v2128_v2 = vshll.u32 %v2075_v9, 16  ;;  %v9652_v8 = vld [vmem:[#allocation2 + $0xfc] sm:$0xf0]  ;;  %v8168_v9 = vld [vmem:[%s11558_s1 + $0x148] sm:$0xff]  ;;  %v2196_v23 = vor.u32 %v2195_v12, %v2192_v37 }
  0xc4   : > { %3506 = vst [vmem:[#allocation2 + $0xfc] sm:$0xff] %v9335_v50  ;;  %3167 = vmatpush.bf16.msrb.mxu2 %v8168_v9  ;;  %v8151_v37 = vld [vmem:[%s11558_s1 + $0xc0] sm:$0xff] }
  0xc5   : > { %v1218_v10 = vpop.f32.mrf.mxu0  ;;  %v1247_v38 = vpop.f32.mrf.mxu1  ;;  %3110 = vmatpush.bf16.msrb.mxu0 %v8151_v37  ;;  %v8242_v37 = vld [vmem:[%s11558_s1 + $0x38] sm:$0xff] }
  0xc6   : > { %3058 = vmatmul.bf16.gmra.mxu2 %v6703_v35  ;;  %3087 = vmatmul.bf16.gmra.mxu3 %v6707_v55  ;;  %v1274_v5 = vpop.f32.mrf.mxu2  ;;  %v1303_v59 = vpop.f32.mrf.mxu3  ;;  %v1219_v4 = vadd.f32 %v9539_v36, %v1218_v10  ;;  %v2125_v35 = vor.u32 %v2124_v48, %v2121_v3  ;;  %v2130_v55 = vrot.slane %v2128_v2, 5  ;;  %v2197_v48 = vrot.slane %v2196_v23, 4  ;;  %v9668_v2 = vld [vmem:[#allocation2 + $0xf8] sm:$0xf]  ;;  %v9670_v10 = vld [vmem:[#allocation2 + $0x118] sm:$0xf0] }
  0xc7   : > { %v1275_v56 = vadd.f32 %v1274_v5, %v1246_v58  ;;  %v8160_v58 = vld [vmem:[%s11558_s1 + $0x108] sm:$0xff]  ;;  %v6335_v5 = vor.u32 %v9622_v63, %v9609_v15  ;;  %v8159_v23 = vld [vmem:[%s11558_s1 + $0x100] sm:$0xff]  ;;  %v6739_v15 = vor.u32 %v9582_v1, %v9587_v11  ;;  %v9718_v1 = vld [vmem:[#allocation2 + $0x1c] sm:$0xf] }
  0xc8   : > { %v1248_v45 = vadd.f32 %v1247_v38, %v1219_v4  ;;  %v2126_v21 = vrot.slane %v2125_v35, 4  ;;  %v9682_v4 = vsel %vm8755_vm2, %v2197_v48, %v2201_v0  ;;  %v8167_v38 = vld [vmem:[%s11558_s1 + $0x140] sm:$0xff]  ;;  %3138 = vmatpush.bf16.msrb.mxu1 %v8160_v58  ;;  %v6742_v35 = vld [vmem:[#allocation2 + $0x98] sm:$0xf]  ;;  %v9708_v48 = vld [vmem:[#allocation2 + $0x10] sm:$0xf] }
  0xc9   : > { %v9666_v3 = vadd.f32 %v1303_v59, %v1275_v56  ;;  %11669 = vst [vmem:[#allocation43_spill] sm:$0xff] %v9682_v4  ;;  %v6735_v59 = vor.u32 %v9580_v43, %v9578_v52  ;;  %3168 = vmatpush.bf16.msrb.mxu2 %v8167_v38  ;;  %v9706_v43 = vld [vmem:[#allocation2 + $0x14] sm:$0xf]  ;;  %v9710_v58 = vld [vmem:[#allocation2 + $0x34] sm:$0xf0] }
  0xca   : > { %v9674_v31 = vsel %vm8755_vm2, %v2126_v21, %v2130_v55  ;;  %v8175_v21 = vld [vmem:[%s11558_s1 + $0x180] sm:$0xff]  ;;  %2211 = vst [vmem:[#allocation2 + $0x11c] sm:$0xf] %v9682_v4  ;;  %v8114_v55 = vld [vmem:[#allocation2 + $0xb8] sm:$0xf0] }
  0xcb   : > { %11668 = vst [vmem:[#allocation42_spill] sm:$0xff] %v9674_v31  ;;  %3197 = vmatpush.bf16.msrb.mxu3 %v8175_v21  ;;  %v6743_v63 = vor.u32 %v8114_v55, %v6742_v35  ;;  %v9716_v38 = vld [vmem:[#allocation2 + $0x18] sm:$0xf]  ;;  %v9720_v11 = vld [vmem:[#allocation2 + $0x38] sm:$0xf0] }
  0xcc   : > { %2140 = vst [vmem:[#allocation2 + $0xf8] sm:$0xf] %v9674_v31  ;;  %3139 = vmatpush.bf16.msrb.mxu1 %v8159_v23  ;;  %v8189_v23 = vld [vmem:[%s11558_s1 + $0x1f0] sm:$0xff]  ;;  %v9899_v31 = vld [vmem:[#allocation2 + $0x108] sm:$0xf0] }
  0xcd   : > { %3454 = vst [vmem:[#allocation2 + $0x10] sm:$0xff] %v9125_v39  ;;  %v8190_v39 = vld [vmem:[%s11558_s1 + $0x1f8] sm:$0xff]  ;;  %4315 = vmatpush.bf16.msra.mxu2 %v8242_v37  ;;  %v8123_v37 = vld [vmem:[#allocation2 + $0x100] sm:$0xf0] }
  0xce   : > { %v1221_v12 = vpop.f32.mrf.mxu0  ;;  %v1250_v49 = vpop.f32.mrf.mxu1  ;;  %3455 = vst [vmem:[#allocation2 + $0x18] sm:$0xff] %v8801_v57  ;;  %3219 = vmatpush.bf16.msra.mxu0 %v8190_v39 }
  0xcf   : > { %v1276_v9 = vpop.f32.mrf.mxu2  ;;  %v1305_v6 = vpop.f32.mrf.mxu3  ;;  %v1222_v17 = vadd.f32 %v9539_v36, %v1221_v12 }
  0xd0   : > { %v1277_v56 = vadd.f32 %v1276_v9, %v1248_v45  ;;  %v9712_v45 = vld [vmem:[#allocation2 + $0x30] sm:$0xf0] }
  0xd1   : > { %v1251_v0 = vadd.f32 %v1250_v49, %v1222_v17  ;;  %3461 = vst [vmem:[#allocation2 + $0x34] sm:$0xff] %v9130_v44  ;;  %v9725_v49 = vld [vmem:[#allocation2 + $0x3c] sm:$0xf0]  ;;  %v8198_v17 = vld [vmem:[%s11558_s1 + $0x238] sm:$0xff] }
  0xd2   : > { %v9704_v52 = vadd.f32 %v1305_v6, %v1277_v56  ;;  %3462 = vst [vmem:[#allocation2 + $0x3c] sm:$0xff] %v11662_v18  ;;  %v8241_v56 = vld [vmem:[%s11558_s1 + $0x30] sm:$0xff]  ;;  %3248 = vmatpush.bf16.msra.mxu1 %v8198_v17  ;;  %3220 = vmatpush.bf16.msra.mxu0 %v8189_v23  ;;  %v11671_v17 = vld [vmem:[#allocation14_spill] sm:$0xff] }
  0xd3   : > { %1452 = vmatmul.bf16.gmra.mxu0 %v6335_v5  ;;  %3034 = vmatmul.bf16.gmra.mxu1 %v6735_v59  ;;  %v8250_v5 = vld [vmem:[%s11558_s1 + $0x78] sm:$0xff]  ;;  %v8249_v18 = vld [vmem:[%s11558_s1 + $0x70] sm:$0xff] }
  0xd4   : > { %4344 = vmatpush.bf16.msra.mxu3 %v8250_v5  ;;  %4316 = vmatpush.bf16.msra.mxu2 %v8241_v56  ;;  %v11672_v56 = vld [vmem:[#allocation7_spill] sm:$0xff] }
  0xd5   : > { %v9768_v23 = vpack.c.b16 %v11672_v56, %v11671_v17  ;;  %v8196_v56 = vld [vmem:[%s11558_s1 + $0x228] sm:$0xff] }
  0xd6   : > { %3063 = vmatmul.bf16.gmra.mxu2 %v6739_v15  ;;  %3092 = vmatmul.bf16.gmra.mxu3 %v6743_v63  ;;  %v1223_v21 = vpop.f32.mrf.mxu0  ;;  %v1252_v12 = vpop.f32.mrf.mxu1  ;;  %v6771_v15 = vor.u32 %v9648_v22, %v9642_v16  ;;  %v6778_v63 = vld [vmem:[#allocation2 + $0xe0] sm:$0xf]  ;;  %v8197_v22 = vld [vmem:[%s11558_s1 + $0x230] sm:$0xff] }
  0xd7   : > { %v1224_v55 = vadd.f32 %v9539_v36, %v1223_v21  ;;  %11673 = vst [vmem:[#allocation14_spill] sm:$0xff] %v9768_v23  ;;  %3249 = vmatpush.bf16.msra.mxu1 %v8197_v22 }
  0xd8   : > { %4345 = vmatpush.bf16.msra.mxu3 %v8249_v18  ;;  %v11674_v18 = vld [vmem:[#allocation19_spill] sm:$0xff] }
  0xd9   : > { %v1279_v59 = vpop.f32.mrf.mxu2  ;;  %v1308_v35 = vpop.f32.mrf.mxu3  ;;  %v1253_v6 = vadd.f32 %v1252_v12, %v1224_v55  ;;  %v6775_v55 = vor.u32 %v9650_v20, %v9652_v8  ;;  %v11675_v20 = vld [vmem:[#allocation11_spill] sm:$0xff] }
  0xda   : > { %v1280_v9 = vadd.f32 %v1279_v59, %v1251_v0  ;;  %v6371_v0 = vor.u32 %v9670_v10, %v9668_v2  ;;  %v9762_v10 = vld [vmem:[#allocation2 + $0x58] sm:$0xf]  ;;  %v9772_v8 = vpack.c.b16 %v11675_v20, %v11674_v18  ;;  %v8239_v20 = vld [vmem:[%s11558_s1 + $0x20] sm:$0xff] }
  0xdb   : > { %3250 = vmatpush.bf16.msra.mxu1 %v8196_v56  ;;  %v11679_v56 = vld [vmem:[#allocation13_spill] sm:$0xff] }
  0xdc   : > { %v9736_v57 = vadd.f32 %v1308_v35, %v1280_v9  ;;  %v6779_v9 = vor.u32 %v8123_v37, %v6778_v63  ;;  %11676 = vst [vmem:[#allocation7_spill] sm:$0xff] %v9772_v8  ;;  %v9774_v63 = vld [vmem:[#allocation2 + $0x78] sm:$0xf0]  ;;  %v8240_v37 = vld [vmem:[%s11558_s1 + $0x28] sm:$0xff] }
  0xdd   : > { %4317 = vmatpush.bf16.msra.mxu2 %v8240_v37  ;;  %v8187_v37 = vld [vmem:[%s11558_s1 + $0x1e0] sm:$0xff] }
  0xe0   : > { %v1226_v5 = vpop.f32.mrf.mxu0  ;;  %v1255_v59 = vpop.f32.mrf.mxu1 }
  0xe1   : > { %v1281_v21 = vpop.f32.mrf.mxu2  ;;  %v1310_v12 = vpop.f32.mrf.mxu3  ;;  %v1227_v35 = vadd.f32 %v9539_v36, %v1226_v5  ;;  %4318 = vmatpush.bf16.msra.mxu2 %v8239_v20  ;;  %v9835_v20 = vld [vmem:[#allocation2 + $0xc0] sm:$0xf0] }
  0xe2   : > { %v1282_v39 = vadd.f32 %v1281_v21, %v1253_v6  ;;  %v9764_v6 = vld [vmem:[#allocation2 + $0x5c] sm:$0xf]  ;;  %v8188_v21 = vld [vmem:[%s11558_s1 + $0x1e8] sm:$0xff] }
  0xe3   : > { %1457 = vmatmul.bf16.gmra.mxu0 %v6371_v0  ;;  %3039 = vmatmul.bf16.gmra.mxu1 %v6771_v15  ;;  %v1256_v16 = vadd.f32 %v1255_v59, %v1227_v35  ;;  %v9776_v0 = vld [vmem:[#allocation2 + $0x7c] sm:$0xf0]  ;;  %3468 = vst [vmem:[#allocation2 + $0x58] sm:$0xff] %v9147_v42  ;;  %v9779_v15 = vld [vmem:[#allocation2 + $0x54] sm:$0xf] }
  0xe4   : > { %v9757_v2 = vadd.f32 %v1310_v12, %v1282_v39  ;;  %3475 = vst [vmem:[#allocation2 + $0x7c] sm:$0xff] %v9151_v27  ;;  %v9788_v12 = vld [vmem:[#allocation2 + $0x74] sm:$0xf0]  ;;  %v8248_v39 = vld [vmem:[%s11558_s1 + $0x68] sm:$0xff]  ;;  %3221 = vmatpush.bf16.msra.mxu0 %v8188_v21  ;;  %v6679_v21 = vor.u32 %v9712_v45, %v9708_v48  ;;  %v9827_v48 = vld [vmem:[#allocation2 + $0xa0] sm:$0xf] }
  0xe5   : > { %3467 = vst [vmem:[#allocation2 + $0x50] sm:$0xff] %v9768_v23  ;;  %4346 = vmatpush.bf16.msra.mxu3 %v8248_v39  ;;  %v9829_v45 = vld [vmem:[#allocation2 + $0xa4] sm:$0xf] }
  0xe6   : > { %11670 = vst [vmem:[#allocation44_spill] sm:$0xff] %v9757_v2  ;;  %3068 = vmatmul.bf16.gmra.mxu2 %v6775_v55  ;;  %3097 = vmatmul.bf16.gmra.mxu3 %v6779_v9  ;;  %v8191_v23 = vld [vmem:[%s11558_s1 + $0x200] sm:$0xff] }
  0xe7   : > { %3474 = vst [vmem:[#allocation2 + $0x74] sm:$0xff] %v9772_v8 }
  0xe8   : > { %v1228_v55 = vpop.f32.mrf.mxu0  ;;  %v1257_v9 = vpop.f32.mrf.mxu1  ;;  %3222 = vmatpush.bf16.msra.mxu0 %v8187_v37  ;;  %3482 = vst [vmem:[#allocation2 + $0xa0] sm:$0xff] %v9197_v24  ;;  %v8238_v37 = vld [vmem:[%s11558_s1 + $0x18] sm:$0xff] }
  0xe9   : > { %v1284_v5 = vpop.f32.mrf.mxu2  ;;  %v1313_v59 = vpop.f32.mrf.mxu3  ;;  %v1229_v22 = vadd.f32 %v9539_v36, %v1228_v55  ;;  %v6675_v36 = vor.u32 %v9449_v51, %v9451_v32  ;;  %v8195_v32 = vld [vmem:[%s11558_s1 + $0x220] sm:$0xff]  ;;  %4319 = vmatpush.bf16.msra.mxu2 %v8238_v37 }
  0xea   : > { %v1285_v35 = vadd.f32 %v1284_v5, %v1256_v16  ;;  %v8247_v16 = vld [vmem:[%s11558_s1 + $0x60] sm:$0xff]  ;;  %3251 = vmatpush.bf16.msra.mxu1 %v8195_v32  ;;  %v8245_v32 = vld [vmem:[%s11558_s1 + $0x50] sm:$0xff] }
  0xeb   : > { %v1258_v18 = vadd.f32 %v1257_v9, %v1229_v22  ;;  %4347 = vmatpush.bf16.msra.mxu3 %v8247_v16  ;;  %v6683_v9 = vor.u32 %v9706_v43, %v9710_v58  ;;  %v6687_v22 = vor.u32 %v9720_v11, %v9716_v38  ;;  %v11680_v43 = vld [vmem:[#allocation21_spill] sm:$0xff]  ;;  %v9837_v38 = vld [vmem:[#allocation2 + $0xc4] sm:$0xf0]  ;;  %v9840_v11 = vld [vmem:[#allocation2 + $0x9c] sm:$0xf] }
  0xec   : > { %v9796_v17 = vadd.f32 %v1313_v59, %v1285_v35  ;;  %v3485_v58 = vpack.c.b16 %v11680_v43, %v9037_v46  ;;  %3489 = vst [vmem:[#allocation2 + $0xc4] sm:$0xff] %v9208_v30  ;;  %v9849_v46 = vld [vmem:[#allocation2 + $0xbc] sm:$0xf0]  ;;  %v8246_v16 = vld [vmem:[%s11558_s1 + $0x58] sm:$0xff] }
  0xed   : > { %v6722_v43 = vld [vmem:[#allocation2 + $0x60] sm:$0xf] }
  0xee   : > { %11677 = vst [vmem:[#allocation19_spill] sm:$0xff] %v9796_v17 }
  0xef   : > { %3488 = vst [vmem:[#allocation2 + $0xbc] sm:$0xff] %v3485_v58  ;;  %4348 = vmatpush.bf16.msra.mxu3 %v8246_v16  ;;  %v8107_v58 = vld [vmem:[#allocation2 + $0x80] sm:$0xf0] }
  0xf0   : > { %v9814_v35 = vpop.f32.mrf.mxu0  ;;  %v9816_v55 = vpop.f32.mrf.mxu1 }
  0xf1   : > { %v1286_v39 = vpop.f32.mrf.mxu2  ;;  %v1315_v5 = vpop.f32.mrf.mxu3 }
  0xf2   : > { %v1287_v59 = vadd.f32 %v1286_v39, %v1258_v18  ;;  %v3478_v18 = vpack.c.b16 %v11679_v56, %v8964_v60  ;;  %v8186_v60 = vld [vmem:[%s11558_s1 + $0x1d8] sm:$0xff]  ;;  %v6711_v56 = vor.u32 %v9779_v15, %v9788_v12  ;;  %v6723_v15 = vor.u32 %v8107_v58, %v6722_v43  ;;  %v9893_v12 = vld [vmem:[#allocation2 + $0xec] sm:$0xf] }
  0xf3   : > { %3111 = vmatmul.bf16.vlgmr.msrb.gmra.mxu0 %v6675_v36  ;;  %3140 = vmatmul.bf16.vlgmr.msrb.gmra.mxu1 %v6679_v21 }
  0xf4   : > { %v9822_v51 = vadd.f32 %v1315_v5, %v1287_v59  ;;  %3481 = vst [vmem:[#allocation2 + $0x98] sm:$0xff] %v3478_v18  ;;  %3223 = vmatpush.bf16.msra.mxu0 %v8186_v60  ;;  %v8194_v59 = vld [vmem:[%s11558_s1 + $0x218] sm:$0xff]  ;;  %v6715_v18 = vor.u32 %v9774_v63, %v9762_v10  ;;  %4349 = vmatpush.bf16.msra.mxu3 %v8245_v32  ;;  %v8193_v10 = vld [vmem:[%s11558_s1 + $0x210] sm:$0xff]  ;;  %v9891_v63 = vld [vmem:[#allocation2 + $0xe8] sm:$0xf] }
  0xf5   : > { %3252 = vmatpush.bf16.msra.mxu1 %v8194_v59  ;;  %v6719_v59 = vor.u32 %v9764_v6, %v9776_v0  ;;  %v3500_v32 = vpack.c.b16 %v9053_v25, %v9247_v19  ;;  %v9901_v6 = vld [vmem:[#allocation2 + $0x10c] sm:$0xf0]  ;;  %3496 = vst [vmem:[#allocation2 + $0xe8] sm:$0xff] %v9276_v28  ;;  %v9904_v0 = vld [vmem:[#allocation2 + $0xe4] sm:$0xf]  ;;  %v8184_v25 = vld [vmem:[%s11558_s1 + $0x1c8] sm:$0xff] }
  0xf6   : > { %11678 = vst [vmem:[#allocation11_spill] sm:$0xff] %v9822_v51  ;;  %3169 = vmatmul.bf16.vlgmr.msrb.gmra.mxu2 %v6683_v9  ;;  %3198 = vmatmul.bf16.vlgmr.msrb.gmra.mxu3 %v6687_v22  ;;  %v8237_v9 = vld [vmem:[%s11558_s1 + $0x10] sm:$0xff]  ;;  %v8244_v19 = vld [vmem:[%s11558_s1 + $0x48] sm:$0xff] }
  0xf7   : > { %v8185_v22 = vld [vmem:[%s11558_s1 + $0x1d0] sm:$0xff]  ;;  %4320 = vmatpush.bf16.msra.mxu2 %v8237_v9  ;;  %v11681_v9 = vld [vmem:[#allocation26_spill] sm:$0xff]  ;;  %3508 = vst [vmem:[#allocation2 + $0x10c] sm:$0xff] %v9284_v54 }
  0xf8   : > { %v9858_v39 = vpop.f32.mrf.mxu0  ;;  %v9860_v5 = vpop.f32.mrf.mxu1  ;;  %3224 = vmatpush.bf16.msra.mxu0 %v8185_v22  ;;  %v3492_v22 = vpack.c.b16 %v11681_v9, %v9060_v61  ;;  %v6780_v61 = vld [vmem:[#allocation2 + $0x104] sm:$0xf0]  ;;  %4350 = vmatpush.bf16.msra.mxu3 %v8244_v19  ;;  %v8183_v9 = vld [vmem:[%s11558_s1 + $0x1c0] sm:$0xff]  ;;  %v8116_v19 = vld [vmem:[#allocation2 + $0xc8] sm:$0xf0] }
  0xf9   : > { %v9854_v36 = vpop.f32.mrf.mxu2  ;;  %v9856_v21 = vpop.f32.mrf.mxu3  ;;  %3253 = vmatpush.bf16.msra.mxu1 %v8193_v10  ;;  %3507 = vst [vmem:[#allocation2 + $0x104] sm:$0xff] %v3500_v32  ;;  %v8235_v10 = vld [vmem:[%s11558_s1] sm:$0xff]  ;;  %v6747_v32 = vor.u32 %v9840_v11, %v9849_v46 }
  0xfa   : > { %3495 = vst [vmem:[#allocation2 + $0xe0] sm:$0xff] %v3492_v22  ;;  %v8243_v22 = vld [vmem:[%s11558_s1 + $0x40] sm:$0xff] }
  0xfb   : > { %v9953_v11 = vld [vmem:[#allocation2 + $0x20] sm:$0xf]  ;;  %v9955_v46 = vld [vmem:[#allocation2 + $0x40] sm:$0xf0] }
  0xfc   : > { %3225 = vmatpush.bf16.msra.mxu0 %v8184_v25  ;;  %v6758_v25 = vld [vmem:[#allocation2 + $0xa8] sm:$0xf]  ;;  %4351 = vmatpush.bf16.msra.mxu3 %v8243_v22  ;;  %3456 = vst [vmem:[#allocation2 + $0x20] sm:$0xf] %v9130_v44  ;;  %v9963_v22 = vld [vmem:[#allocation2 + $0x20] sm:$0xf0] }
  0xfd   : > { %3463 = vst [vmem:[#allocation2 + $0x44] sm:$0xf] %v9147_v42 }
 0x100   : > { %v9882_v16 = vpop.f32.mrf.mxu0  ;;  %v9884_v4 = vpop.f32.mrf.mxu1  ;;  %3226 = vmatpush.bf16.msra.mxu0 %v8183_v9  ;;  %v9961_v9 = vld [vmem:[#allocation2 + $0x4] sm:$0xf] }
 0x101   : > { %v9878_v37 = vpop.f32.mrf.mxu2  ;;  %v9880_v60 = vpop.f32.mrf.mxu3 }
 0x103   : > { %3116 = vmatmul.bf16.gmra.mxu0 %v6711_v56  ;;  %3145 = vmatmul.bf16.gmra.mxu1 %v6715_v18  ;;  %v8236_v56 = vld [vmem:[%s11558_s1 + $0x8] sm:$0xff] }
 0x104   : > { %4321 = vmatpush.bf16.msra.mxu2 %v8236_v56  ;;  %v6751_v56 = vor.u32 %v9835_v20, %v9827_v48  ;;  %v6755_v48 = vor.u32 %v9829_v45, %v9837_v38  ;;  %v6759_v20 = vor.u32 %v8116_v19, %v6758_v25  ;;  %v9965_v45 = vld [vmem:[#allocation2 + $0x24] sm:$0xf0]  ;;  %v11682_v38 = vld [vmem:[#allocation10_spill] sm:$0xff]  ;;  %v6783_v25 = vor.u32 %v9904_v0, %v6780_v61  ;;  %v9990_v0 = vld [vmem:[#allocation2 + $0x64] sm:$0xf] }
 0x105   : > { %v6787_v19 = vor.u32 %v9899_v31, %v9891_v63  ;;  %v9992_v61 = vld [vmem:[#allocation2 + $0x84] sm:$0xf0]  ;;  %3469 = vst [vmem:[#allocation2 + $0x60] sm:$0xff] %v11663_v33  ;;  %v1328_v63 = vadd.f32 %v9814_v35, %v9598_v47 }
 0x106   : > { %3174 = vmatmul.bf16.gmra.mxu2 %v6719_v59  ;;  %3203 = vmatmul.bf16.gmra.mxu3 %v6723_v15  ;;  %v8192_v15 = vld [vmem:[%s11558_s1 + $0x208] sm:$0xff]  ;;  %3476 = vst [vmem:[#allocation2 + $0x84] sm:$0xff] %v8976_v7 }
 0x107   : > { %3254 = vmatpush.bf16.msra.mxu1 %v8192_v15  ;;  %v9996_v31 = vld [vmem:[#allocation2 + $0x68] sm:$0xf]  ;;  %v10012_v7 = vld [vmem:[#allocation2 + $0x68] sm:$0xf0] }
 0x108   : > { %v9920_v58 = vpop.f32.mrf.mxu0  ;;  %v9922_v59 = vpop.f32.mrf.mxu1  ;;  %4322 = vmatpush.bf16.msra.mxu2 %v8235_v10  ;;  %v9959_v10 = vld [vmem:[#allocation2] sm:$0xf]  ;;  %3470 = vst [vmem:[#allocation2 + $0x68] sm:$0xf] %v9151_v27  ;;  %v11689_v27 = vld [vmem:[#allocation25_spill] sm:$0xff] }
 0x109   : > { %v9916_v18 = vpop.f32.mrf.mxu2  ;;  %v9918_v43 = vpop.f32.mrf.mxu3  ;;  %4753 = vst [vmem:[#allocation2] sm:$0xff] %v11682_v38 }
 0x10b   : > { %3255 = vmatpush.bf16.msra.mxu1 %v8191_v23 }
 0x110   : > { %v9947_v15 = vpop.f32.mrf.mxu0  ;;  %v9949_v51 = vpop.f32.mrf.mxu1 }
 0x111   : > { %v9940_v26 = vpop.f32.mrf.mxu2  ;;  %v9942_v8 = vpop.f32.mrf.mxu3 }
 0x113   : > { %3121 = vmatmul.bf16.gmra.mxu0 %v6747_v32  ;;  %3150 = vmatmul.bf16.gmra.mxu1 %v6751_v56  ;;  %v11683_v32 = vld [vmem:[#allocation18_spill] sm:$0xff] }
 0x114   : > { %4774 = vst [vmem:[#allocation2 + $0x24] sm:$0xff] %v11683_v32 }
 0x116   : > { %3179 = vmatmul.bf16.gmra.mxu2 %v6755_v48  ;;  %3208 = vmatmul.bf16.gmra.mxu3 %v6759_v20  ;;  %v6794_v48 = vld [vmem:[#allocation2 + $0xf0] sm:$0xf]  ;;  %v8125_v20 = vld [vmem:[#allocation2 + $0x110] sm:$0xf0] }
 0x118   : > { %v9973_v44 = vpop.f32.mrf.mxu0  ;;  %v9975_v42 = vpop.f32.mrf.mxu1 }
 0x119   : > { %v9969_v23 = vpop.f32.mrf.mxu2  ;;  %v9971_v56 = vpop.f32.mrf.mxu3  ;;  %11685 = vst [vmem:[#allocation21_spill] sm:$0xff] %v9973_v44  ;;  %v6795_v44 = vor.u32 %v8125_v20, %v6794_v48  ;;  %v6691_v48 = vor.u32 %v9718_v1, %v9725_v49  ;;  %v6695_v20 = vor.u32 %v9955_v46, %v9953_v11  ;;  %v7107_v1 = vor.u32 %v9961_v9, %v9965_v45  ;;  %v8258_v11 = vld [vmem:[%s11558_s1 + $0xb8] sm:$0xff]  ;;  %v10060_v45 = vld [vmem:[#allocation2 + $0xcc] sm:$0xf0] }
 0x11a   : > { %11684 = vst [vmem:[#allocation13_spill] sm:$0xff] %v9971_v56  ;;  %v6791_v56 = vor.u32 %v9893_v12, %v9901_v6  ;;  %v10004_v12 = vld [vmem:[#allocation2 + $0x48] sm:$0xf]  ;;  %v10006_v6 = vld [vmem:[#allocation2 + $0x4c] sm:$0xf]  ;;  %v8282_v46 = vld [vmem:[%s11558_s1 + $0x178] sm:$0xff]  ;;  %4373 = vmatpush.bf16.msrb.mxu0 %v8258_v11 }
 0x11b   : > { %4795 = vst [vmem:[#allocation2 + $0x48] sm:$0xff] %v8919_v53  ;;  %4460 = vmatpush.bf16.msrb.mxu3 %v8282_v46  ;;  %v8272_v46 = vld [vmem:[%s11558_s1 + $0x128] sm:$0xff] }
 0x11c   : > { %3490 = vst [vmem:[#allocation2 + $0xcc] sm:$0xff] %v9082_v34 }
 0x120   : > { %v9984_v32 = vpop.f32.mrf.mxu0  ;;  %v9986_v2 = vpop.f32.mrf.mxu1 }
 0x121   : > { %v9980_v17 = vpop.f32.mrf.mxu2  ;;  %v9982_v38 = vpop.f32.mrf.mxu3  ;;  %11686 = vst [vmem:[#allocation26_spill] sm:$0xff] %v9986_v2  ;;  %v10000_v2 = vld [vmem:[#allocation2 + $0x88] sm:$0xf0] }
 0x122   : > { %3477 = vst [vmem:[#allocation2 + $0x8c] sm:$0xf] %v9197_v24  ;;  %v1357_v24 = vadd.f32 %v9816_v55, %v1328_v63  ;;  %v10038_v55 = vld [vmem:[%s11559_s2] ss:$0 sm:$0xff]  ;;  %v10063_v63 = vld [vmem:[#allocation2 + $0xb0] sm:$0xf] }
 0x123   : > { %3126 = vmatmul.bf16.gmra.mxu0 %v6783_v25  ;;  %3155 = vmatmul.bf16.gmra.mxu1 %v6787_v19  ;;  %v1330_v19 = vadd.f32 %v9858_v39, %v9633_v40  ;;  %v7103_v40 = vor.u32 %v9963_v22, %v9959_v10  ;;  %v8274_v39 = vld [vmem:[%s11558_s1 + $0x138] sm:$0xff]  ;;  %3484 = vst [vmem:[#allocation2 + $0xb0] sm:$0xf] %v9208_v30  ;;  %v8257_v30 = vld [vmem:[%s11558_s1 + $0xb0] sm:$0xff] }
 0x124   : > { %v1386_v25 = vadd.f32 %v9854_v36, %v1357_v24  ;;  %v8266_v10 = vld [vmem:[%s11558_s1 + $0xf8] sm:$0xff]  ;;  %4431 = vmatpush.bf16.msrb.mxu2 %v8274_v39  ;;  %4374 = vmatpush.bf16.msrb.mxu0 %v8257_v30 }
 0x125   : > { %v1359_v49 = vadd.f32 %v9860_v5, %v1330_v19  ;;  %v10057_v5 = vld [vmem:[#allocation2 + $0xac] sm:$0xf]  ;;  %v10069_v19 = vld [vmem:[#allocation2 + $0x90] sm:$0xf]  ;;  %4402 = vmatpush.bf16.msrb.mxu1 %v8266_v10 }
 0x126   : > { %3184 = vmatmul.bf16.gmra.mxu2 %v6791_v56  ;;  %3213 = vmatmul.bf16.gmra.mxu3 %v6795_v44  ;;  %v10014_v44 = vld [vmem:[#allocation2 + $0x6c] sm:$0xf0]  ;;  %v1415_v53 = vadd.f32 %v9856_v21, %v1386_v25  ;;  %3483 = vst [vmem:[#allocation2 + $0xa8] sm:$0xff] %v9046_v13  ;;  %v10067_v25 = vld [vmem:[#allocation2 + $0xd0] sm:$0xf0] }
 0x127   : > { %4816 = vst [vmem:[#allocation2 + $0x6c] sm:$0xff] %v11689_v27  ;;  %v1388_v9 = vadd.f32 %v9878_v37, %v1359_v49  ;;  %v1333_v37 = vadd.f32 %v9882_v16, %v9666_v3  ;;  %v10074_v13 = vld [vmem:[#allocation2 + $0xb0] sm:$0xf0] }
 0x128   : > { %v10017_v47 = vpop.f32.mrf.mxu0  ;;  %v10019_v35 = vpop.f32.mrf.mxu1  ;;  %3491 = vst [vmem:[#allocation2 + $0xd4] sm:$0xf] %v9276_v28  ;;  %v8273_v3 = vld [vmem:[%s11558_s1 + $0x130] sm:$0xff] }
 0x129   : > { %v10008_v33 = vpop.f32.mrf.mxu2  ;;  %v10010_v56 = vpop.f32.mrf.mxu3  ;;  %11688 = vst [vmem:[#allocation18_spill] sm:$0xff] %v10019_v35  ;;  %v1417_v34 = vadd.f32 %v9880_v60, %v1388_v9  ;;  %v8281_v28 = vld [vmem:[%s11558_s1 + $0x170] sm:$0xff]  ;;  %v1362_v49 = vadd.f32 %v9884_v4, %v1333_v37  ;;  %4432 = vmatpush.bf16.msrb.mxu2 %v8273_v3  ;;  %v8280_v4 = vld [vmem:[%s11558_s1 + $0x168] sm:$0xff]  ;;  %v1335_v9 = vadd.f32 %v9920_v58, %v9704_v52  ;;  %v8279_v3 = vld [vmem:[%s11558_s1 + $0x160] sm:$0xff] }
 0x12a   : > { %11687 = vst [vmem:[#allocation10_spill] sm:$0xff] %v10010_v56  ;;  %4461 = vmatpush.bf16.msrb.mxu3 %v8281_v28  ;;  %v8264_v37 = vld [vmem:[%s11558_s1 + $0xe8] sm:$0xff] }
 0x12b   : > { %v1364_v30 = vadd.f32 %v9922_v59, %v1335_v9 }
 0x12d   : > { %4433 = vmatpush.bf16.msrb.mxu2 %v8272_v46 }
 0x12e   : > { %4462 = vmatpush.bf16.msrb.mxu3 %v8280_v4 }
 0x130   : > { %v1443_v27 = vpop.f32.mrf.mxu0  ;;  %v3025_v36 = vpop.f32.mrf.mxu1 }
 0x131   : > { %v10031_v56 = vpop.f32.mrf.mxu2  ;;  %v10033_v35 = vpop.f32.mrf.mxu3  ;;  %v1444_v21 = vadd.f32 %v1443_v27, %v1415_v53  ;;  %v3026_v24 = vadd.f32 %v10038_v55, %v3025_v36  ;;  %v10079_v53 = vld [vmem:[#allocation2 + $0xb4] sm:$0xf0] }
 0x132   : > { %4858 = vst [vmem:[#allocation2 + $0xb4] sm:$0xff] %v9096_v41  ;;  %v8256_v41 = vld [vmem:[%s11558_s1 + $0xa8] sm:$0xff]  ;;  %4463 = vmatpush.bf16.msrb.mxu3 %v8279_v3 }
 0x133   : > { %3227 = vmatmul.bf16.vlgmr.msra.gmra.mxu0 %v6691_v48  ;;  %3256 = vmatmul.bf16.vlgmr.msra.gmra.mxu1 %v6695_v20  ;;  %v1463_v22 = vsub.f32 0.0, %v1444_v21  ;;  %v10077_v20 = vld [vmem:[#allocation2 + $0x94] sm:$0xf] }
 0x134   : > { %4837 = vst [vmem:[#allocation2 + $0x90] sm:$0xff] %v9023_v62  ;;  %v1391_v62 = vadd.f32 %v9916_v18, %v1362_v49  ;;  %v6727_v18 = vor.u32 %v9990_v0, %v9992_v61  ;;  %4375 = vmatpush.bf16.msrb.mxu0 %v8256_v41  ;;  %v7139_v61 = vor.u32 %v10012_v7, %v10004_v12  ;;  %v8263_v12 = vld [vmem:[%s11558_s1 + $0xe0] sm:$0xff]  ;;  %v10142_v7 = vld [vmem:[#allocation2 + $0xf4] sm:$0xf]  ;;  %v8262_v41 = vld [vmem:[%s11558_s1 + $0xd8] sm:$0xff] }
 0x135   : > { %v1471_v48 = vmul.f32 1.442695, %v1463_v22  ;;  %3497 = vst [vmem:[#allocation2 + $0xf0] sm:$0xff] %v9335_v50  ;;  %v11690_v50 = vld [vmem:[#allocation4_spill] sm:$0xff] }
 0x136   : > { %4323 = vmatmul.bf16.vlgmr.msra.gmra.mxu2 %v7103_v40  ;;  %4352 = vmatmul.bf16.vlgmr.msra.gmra.mxu3 %v7107_v1  ;;  %v8265_v1 = vld [vmem:[%s11558_s1 + $0xf0] sm:$0xff]  ;;  %v4737_v49 = vpack.c.b16 %v11690_v50, %v8735_v14 }
 0x137   : > { %8428 = vpow2.f32 %v1471_v48  ;;  %4403 = vmatpush.bf16.msrb.mxu1 %v8265_v1 }
 0x138   : > { %v1445_v40 = vpop.f32.mrf.mxu0  ;;  %v3027_v60 = vpop.f32.mrf.mxu1 }
 0x139   : > { %v3054_v27 = vpop.f32.mrf.mxu2  ;;  %v3083_v36 = vpop.f32.mrf.mxu3  ;;  %v1446_v21 = vadd.f32 %v1445_v40, %v1417_v34  ;;  %v1420_v34 = vadd.f32 %v9918_v43, %v1391_v62  ;;  %v3028_v52 = vadd.f32 %v10038_v55, %v3027_v60  ;;  %v8271_v43 = vld [vmem:[%s11558_s1 + $0x120] sm:$0xff]  ;;  %v10148_v60 = vld [vmem:[#allocation2 + $0xf8] sm:$0xf] }
 0x13a   : > { %v3055_v16 = vadd.f32 %v3054_v27, %v3026_v24  ;;  %v6731_v24 = vor.u32 %v10000_v2, %v9996_v31  ;;  %v7143_v31 = vor.u32 %v10006_v6, %v10014_v44  ;;  %v1338_v6 = vadd.f32 %v9947_v15, %v9736_v57  ;;  %4434 = vmatpush.bf16.msrb.mxu2 %v8271_v43  ;;  %v8270_v57 = vld [vmem:[%s11558_s1 + $0x118] sm:$0xff] }
 0x13b   : > { %v1464_v11 = vsub.f32 0.0, %v1446_v21  ;;  %4404 = vmatpush.bf16.msrb.mxu1 %v8264_v37  ;;  %v1393_v44 = vadd.f32 %v9940_v26, %v1364_v30  ;;  %v8254_v15 = vld [vmem:[%s11558_s1 + $0x98] sm:$0xff]  ;;  %3498 = vst [vmem:[#allocation2 + $0xf8] sm:$0xf] %v9284_v54  ;;  %v8556_v21 = vld [vmem:[#allocation2 + $0x8] sm:$0xff]  ;;  %v8269_v30 = vld [vmem:[%s11558_s1 + $0x110] sm:$0xff] }
 0x13c   : > { %v10097_v39 = vadd.f32 %v3083_v36, %v3055_v16  ;;  %v8255_v36 = vld [vmem:[%s11558_s1 + $0xa0] sm:$0xff]  ;;  %v8278_v26 = vld [vmem:[%s11558_s1 + $0x158] sm:$0xff]  ;;  %v4739_v62 = vshrl.u32 %v8556_v21, 16  ;;  %v1367_v54 = vadd.f32 %v9949_v51, %v1338_v6 }
 0x13d   : > { %v8429_v10 = vpop.eup %8428  ;;  %v1473_v22 = vmul.f32 1.442695, %v1464_v11  ;;  %4376 = vmatpush.bf16.msrb.mxu0 %v8255_v36  ;;  %v10175_v37 = vld [vmem:[#allocation2 + $0xdc] sm:$0xf]  ;;  %4464 = vmatpush.bf16.msrb.mxu3 %v8278_v26  ;;  %v10182_v51 = vld [vmem:[#allocation2 + $0xfc] sm:$0xf0] }
 0x13e   : > { %v10118_v48 = vadd.f32 1.0, %v8429_v10  ;;  %v11691_v10 = vld [vmem:[#allocation6_spill] sm:$0xff]  ;;  %4435 = vmatpush.bf16.msrb.mxu2 %v8270_v57  ;;  %v1396_v36 = vadd.f32 %v9969_v23, %v1367_v54  ;;  %v8261_v57 = vld [vmem:[%s11558_s1 + $0xd0] sm:$0xff]  ;;  %v11693_v26 = vld [vmem:[#allocation44_spill] sm:$0xff] }
 0x13f   : > { %8430 = vpow2.f32 %v1473_v22  ;;  %4405 = vmatpush.bf16.msrb.mxu1 %v8263_v12  ;;  %v4758_v9 = vpack.c.b16 %v11691_v10, %v8837_v29  ;;  %v4742_v22 = vshll.u32 %v8556_v21, 16  ;;  %v10196_v12 = vrot.slane %v4739_v62, 4  ;;  %v11697_v10 = vld [vmem:[#allocation26_spill] sm:$0xff] }
 0x140   : > { %8432 = vrcp.f32 %v10118_v48  ;;  %v1448_v2 = vpop.f32.mrf.mxu0  ;;  %v3030_v0 = vpop.f32.mrf.mxu1  ;;  %v1506_v62 = vand.u32 2147483648, %v10118_v48  ;;  %vm1500_vm4 = vweird.f32 %v10118_v48 }
 0x141   : > { %v3056_v58 = vpop.f32.mrf.mxu2  ;;  %v3085_v27 = vpop.f32.mrf.mxu3  ;;  %v1449_v16 = vadd.f32 %v1448_v2, %v1420_v34  ;;  %v3031_v46 = vadd.f32 %v10038_v55, %v3030_v0  ;;  %4377 = vmatpush.bf16.msrb.mxu0 %v8254_v15  ;;  %v1422_v34 = vadd.f32 %v9942_v8, %v1393_v44  ;;  %v10180_v2 = vld [vmem:[#allocation2 + $0xf8] sm:$0xf0]  ;;  %v11692_v0 = vld [vmem:[#allocation31_spill] sm:$0xff]  ;;  %v10204_v15 = vrot.slane %v4742_v22, 5 }
 0x142   : > { %v3057_v28 = vadd.f32 %v3056_v58, %v3028_v52  ;;  %4436 = vmatpush.bf16.msrb.mxu2 %v8269_v30 }
 0x143   : > { %3232 = vmatmul.bf16.gmra.mxu0 %v6727_v18  ;;  %3261 = vmatmul.bf16.gmra.mxu1 %v6731_v24  ;;  %v1465_v59 = vsub.f32 0.0, %v1449_v16  ;;  %v10173_v24 = vld [vmem:[#allocation2 + $0xd8] sm:$0xf] }
 0x144   : > { %v10145_v40 = vadd.f32 %v3085_v27, %v3057_v28  ;;  %4406 = vmatpush.bf16.msrb.mxu1 %v8262_v41  ;;  %4879 = vst [vmem:[#allocation2 + $0xd8] sm:$0xff] %v11692_v0  ;;  %v8253_v28 = vld [vmem:[%s11558_s1 + $0x90] sm:$0xff]  ;;  %v6763_v0 = vor.u32 %v10057_v5, %v10060_v45  ;;  %v6767_v5 = vor.u32 %v10067_v25, %v10063_v63  ;;  %v8260_v45 = vld [vmem:[%s11558_s1 + $0xc8] sm:$0xff] }
 0x145   : > { %v8431_v1 = vpop.eup %8430  ;;  %v1475_v11 = vmul.f32 1.442695, %v1465_v59  ;;  %v10193_v16 = vld [vmem:[#allocation2 + $0x114] sm:$0xff]  ;;  %4378 = vmatpush.bf16.msrb.mxu0 %v8253_v28 }
 0x146   : > { %4328 = vmatmul.bf16.gmra.mxu2 %v7139_v61  ;;  %4357 = vmatmul.bf16.gmra.mxu3 %v7143_v31  ;;  %v10166_v4 = vpop.eup %8432  ;;  %v10171_v18 = vadd.f32 1.0, %v8431_v1  ;;  %v8557_v61 = vld [vmem:[#allocation2 + $0x2c] sm:$0xff]  ;;  %4934 = vst [vmem:[#allocation2 + $0xfc] sm:$0xff] %v10193_v16 }
 0x147   : > { %v1496_v52 = vmul.f32 %v10166_v4, %v10118_v48  ;;  %8434 = vpow2.f32 %v1475_v11  ;;  %v4760_v31 = vshrl.u32 %v8557_v61, 16  ;;  %v4763_v43 = vshll.u32 %v8557_v61, 16  ;;  %v8277_v59 = vld [vmem:[%s11558_s1 + $0x150] sm:$0xff]  ;;  %v8268_v61 = vld [vmem:[%s11558_s1 + $0x108] sm:$0xff] }
 0x148   : > { %8436 = vrcp.f32 %v10171_v18  ;;  %v1450_v8 = vpop.f32.mrf.mxu0  ;;  %v3032_v3 = vpop.f32.mrf.mxu1  ;;  %v11694_v1 = vld [vmem:[#allocation21_spill] sm:$0xff]  ;;  %v1504_v11 = vand.u32 2147483647, %v10118_v48  ;;  %vm1501_vm3 = vweird.f32 %v10166_v4  ;;  %4465 = vmatpush.bf16.msrb.mxu3 %v8277_v59  ;;  %4407 = vmatpush.bf16.msrb.mxu1 %v8261_v57  ;;  %v1507_v48 = vor.u32 1.1754944e-38, %v1506_v62 }
 0x149   : > { %v3059_v58 = vpop.f32.mrf.mxu2  ;;  %v3088_v27 = vpop.f32.mrf.mxu3  ;;  %v1497_v23 = vsub.f32 1.0, %v1496_v52  ;;  %v1451_v44 = vadd.f32 %v1450_v8, %v1422_v34  ;;  %v1340_v21 = vadd.f32 %v11694_v1, %v11693_v26  ;;  %v10215_v22 = vrot.slane %v4760_v31, 4  ;;  %v11695_v52 = vld [vmem:[#allocation13_spill] sm:$0xff]  ;;  %v8276_v31 = vld [vmem:[%s11558_s1 + $0x148] sm:$0xff]  ;;  %vm1502_vm5 = vmor %vm1500_vm4, %vm1501_vm3  ;;  %4437 = vmatpush.bf16.msrb.mxu2 %v8268_v61 }
 0x14a   : > { %v3060_v6 = vadd.f32 %v3059_v58, %v3031_v46  ;;  %v10217_v34 = vrot.slane %v4763_v43, 5  ;;  %v1425_v58 = vadd.f32 %v11695_v52, %v1396_v36  ;;  %vm1505_vm6 = vcmp.eq.f32.partialorder %v1504_v11, 8.507059e+37 }
 0x14b   : > { %v1498_v46 = vmul.f32 %v10166_v4, %v1497_v23  ;;  %v1466_v54 = vsub.f32 0.0, %v1451_v44  ;;  %v1369_v28 = vadd.f32 %v9975_v42, %v1340_v21  ;;  %v7175_v1 = vor.u32 %v10074_v13, %v10069_v19  ;;  %v8267_v19 = vld [vmem:[%s11558_s1 + $0x100] sm:$0xff] }
 0x14c   : > { %v10213_v41 = vadd.f32 %v3088_v27, %v3060_v6  ;;  %v8252_v27 = vld [vmem:[%s11558_s1 + $0x88] sm:$0xff]  ;;  %v3033_v6 = vadd.f32 %v10038_v55, %v3032_v3  ;;  %4466 = vmatpush.bf16.msrb.mxu3 %v8276_v31  ;;  %4408 = vmatpush.bf16.msrb.mxu1 %v8260_v45  ;;  %v1519_v52 = vand.u32 2147483647, %v10171_v18  ;;  %v1521_v61 = vand.u32 2147483648, %v10171_v18  ;;  %v8251_v13 = vld [vmem:[%s11558_s1 + $0x80] sm:$0xff] }
 0x14d   : > { %v8435_v8 = vpop.eup %8434  ;;  %v1499_v43 = vadd.f32 %v10166_v4, %v1498_v46  ;;  %v1477_v36 = vmul.f32 1.442695, %v1466_v54  ;;  %4379 = vmatpush.bf16.msrb.mxu0 %v8252_v27  ;;  %v1398_v3 = vadd.f32 %v9980_v17, %v1369_v28  ;;  %v11696_v46 = vld [vmem:[#allocation19_spill] sm:$0xff]  ;;  %v10289_v27 = vshll.u32 %v4758_v9, 16  ;;  %4438 = vmatpush.bf16.msrb.mxu2 %v8267_v19  ;;  %v11703_v19 = vld [vmem:[#allocation14_spill] sm:$0xff] }
 0x14e   : > { %v10238_v30 = vpop.eup %8436  ;;  %v10248_v23 = vadd.f32 1.0, %v8435_v8  ;;  %v1343_v54 = vadd.f32 %v9984_v32, %v11696_v46  ;;  %v4745_v31 = vor.u32 %v10204_v15, %v10196_v12  ;;  %v4766_v8 = vor.u32 %v10217_v34, %v10215_v22  ;;  %v10312_v34 = vld [vmem:[#allocation2 + $0x14] sm:$0xf]  ;;  %v8126_v46 = vld [vmem:[#allocation2 + $0x118] sm:$0xf0] }
 0x14f   : > { %v1503_v63 = vsel %vm1502_vm5, %v10166_v4, %v1499_v43  ;;  %v1511_v25 = vmul.f32 %v10238_v30, %v10171_v18  ;;  %8438 = vpow2.f32 %v1477_v36  ;;  %v7179_v4 = vor.u32 %v10077_v20, %v10079_v53  ;;  %v8275_v20 = vld [vmem:[%s11558_s1 + $0x140] sm:$0xff] }
 0x150   : > { %v1508_v59 = vsel %vm1505_vm6, %v1507_v48, %v1503_v63  ;;  %8440 = vrcp.f32 %v10248_v23  ;;  %v1453_v57 = vpop.f32.mrf.mxu0  ;;  %v3035_v26 = vpop.f32.mrf.mxu1  ;;  %vm1516_vm7 = vweird.f32 %v10238_v30  ;;  %vm1515_vm8 = vweird.f32 %v10171_v18  ;;  %4467 = vmatpush.bf16.msrb.mxu3 %v8275_v20  ;;  %v10310_v18 = vld [vmem:[#allocation2 + $0x10] sm:$0xf]  ;;  %v10319_v48 = vld [vmem:[#allocation2 + $0x30] sm:$0xf0]  ;;  %v10321_v63 = vld [vmem:[#allocation2 + $0x34] sm:$0xf0] }
 0x151   : > { %v3061_v44 = vpop.f32.mrf.mxu2  ;;  %v3090_v42 = vpop.f32.mrf.mxu3  ;;  %1615 = vst [vmem:[%s10243_s14] sm:$0xff] %v1508_v59  ;;  %v1512_v21 = vsub.f32 1.0, %v1511_v25  ;;  %v1454_v62 = vadd.f32 %v1453_v57, %v1425_v58  ;;  %v8259_v58 = vld [vmem:[%s11558_s1 + $0xc0] sm:$0xff]  ;;  %v3036_v50 = vadd.f32 %v10038_v55, %v3035_v26  ;;  %4380 = vmatpush.bf16.msrb.mxu0 %v8251_v13  ;;  %v1372_v9 = vadd.f32 %v11697_v10, %v1343_v54  ;;  %vm10304_vm9 = vmor %vm1515_vm8, %vm1516_vm7  ;;  %v11700_v25 = vld [vmem:[#allocation32_spill] sm:$0xff] }
 0x152   : > { %v3062_v11 = vadd.f32 %v3061_v44, %v3033_v6  ;;  %v1522_v15 = vor.u32 1.1754944e-38, %v1521_v61  ;;  %4409 = vmatpush.bf16.msrb.mxu1 %v8259_v58  ;;  %vm1520_vm10 = vcmp.eq.f32.partialorder %v1519_v52, 8.507059e+37  ;;  %4755 = vst [vmem:[#allocation2 + $0x10] sm:$0xff] %v11700_v25  ;;  %v11701_v44 = vld [vmem:[#allocation11_spill] sm:$0xff]  ;;  %v11702_v26 = vld [vmem:[#allocation33_spill] sm:$0xff]  ;;  %v4781_v13 = vshrl.u32 %v11703_v19, 16 }
 0x153   : > { %3237 = vmatmul.bf16.gmra.mxu0 %v6763_v0  ;;  %3266 = vmatmul.bf16.gmra.mxu1 %v6767_v5  ;;  %v1513_v17 = vmul.f32 %v10238_v30, %v1512_v21  ;;  %v1467_v53 = vsub.f32 0.0, %v1454_v62  ;;  %v10284_v0 = vshll.u32 %v4737_v49, 16  ;;  %v1427_v49 = vadd.f32 %v9982_v38, %v1398_v3  ;;  %4776 = vst [vmem:[#allocation2 + $0x34] sm:$0xff] %v11702_v26  ;;  %v6796_v62 = vld [vmem:[#allocation2 + $0x114] sm:$0xf0] }
 0x154   : > { %v10276_v32 = vadd.f32 %v3090_v42, %v3062_v11  ;;  %v1401_v6 = vadd.f32 %v10008_v33, %v1372_v9  ;;  %v1345_v42 = vadd.f32 %v10017_v47, %v11701_v44  ;;  %v10332_v3 = vrot.slane %v4766_v8, 4  ;;  %v11704_v20 = vld [vmem:[#allocation10_spill] sm:$0xff] }
 0x155   : > { %v8439_v43 = vpop.eup %8438  ;;  %v1514_v36 = vadd.f32 %v10238_v30, %v1513_v17  ;;  %v1479_v14 = vmul.f32 1.442695, %v1467_v53  ;;  %v1534_v33 = vand.u32 2147483647, %v10248_v23  ;;  %v1536_v47 = vand.u32 2147483648, %v10248_v23  ;;  %v11705_v53 = vld [vmem:[#allocation18_spill] sm:$0xff] }
 0x156   : > { %4333 = vmatmul.bf16.gmra.mxu2 %v7175_v1  ;;  %4362 = vmatmul.bf16.gmra.mxu3 %v7179_v4  ;;  %v10298_v29 = vpop.eup %8440  ;;  %v10308_v22 = vadd.f32 1.0, %v8439_v43  ;;  %v10329_v1 = vrot.slane %v4745_v31, 4  ;;  %v1430_v17 = vadd.f32 %v11704_v20, %v1401_v6  ;;  %v1374_v58 = vadd.f32 %v11705_v53, %v1345_v42  ;;  %v189_v42 = vld [vmem:[%s8648_s16 + $0x48] sm:$0xf]  ;;  %v10388_v53 = vld [vmem:[#allocation2 + $0x2c] sm:$0xf0] }
 0x157   : > { %v1518_v38 = vsel %vm10304_vm9, %v10238_v30, %v1514_v36  ;;  %v1526_v5 = vmul.f32 %v10298_v29, %v10248_v23  ;;  %8442 = vpow2.f32 %v1479_v14  ;;  %vm1531_vm11 = vweird.f32 %v10298_v29 }
 0x158   : > { %v1523_v30 = vsel %vm1520_vm10, %v1522_v15, %v1518_v38  ;;  %8444 = vrcp.f32 %v10308_v22  ;;  %v1455_v59 = vpop.f32.mrf.mxu0  ;;  %v3037_v57 = vpop.f32.mrf.mxu1  ;;  %v6799_v31 = vor.u32 %v10142_v7, %v6796_v62  ;;  %vm1530_vm12 = vweird.f32 %v10248_v23 }
 0x159   : > { %v3064_v45 = vpop.f32.mrf.mxu2  ;;  %v3093_v28 = vpop.f32.mrf.mxu3  ;;  %1616 = vst [vmem:[%s10243_s14 + $0x8] sm:$0xff] %v1523_v30  ;;  %v1527_v4 = vsub.f32 1.0, %v1526_v5  ;;  %v1456_v11 = vadd.f32 %v1455_v59, %v1427_v49  ;;  %v6803_v14 = vor.u32 %v8126_v46, %v10148_v60  ;;  %v1403_v49 = vadd.f32 %v10031_v56, %v1374_v58  ;;  %vm1532_vm13 = vmor %vm1530_vm12, %vm1531_vm11  ;;  %v10365_v30 = vld [vmem:[#allocation2 + $0x28] sm:$0xf0] }
 0x15a   : > { %v3065_v21 = vadd.f32 %v3064_v45, %v3036_v50  ;;  %vm1535_vm14 = vcmp.eq.f32.partialorder %v1534_v33, 8.507059e+37  ;;  %v1537_v10 = vor.u32 1.1754944e-38, %v1536_v47  ;;  %v3038_v23 = vadd.f32 %v10038_v55, %v3037_v57 }
 0x15b   : > { %v1528_v54 = vmul.f32 %v10298_v29, %v1527_v4  ;;  %v1468_v61 = vsub.f32 0.0, %v1456_v11  ;;  %v7211_v45 = vor.u32 %v10180_v2, %v10173_v24  ;;  %v4784_v59 = vshll.u32 %v11703_v19, 16  ;;  %v190_v2 = vld [vmem:[%s8648_s16 + $0x4c] sm:$0x1] }
 0x15c   : > { %v10338_v52 = vadd.f32 %v3093_v28, %v3065_v21  ;;  %v10361_v28 = vld [vmem:[#allocation2 + $0x8] sm:$0xf]  ;;  %v1549_v57 = vand.u32 2147483647, %v10308_v22  ;;  %v1551_v24 = vand.u32 2147483648, %v10308_v22  ;;  %v10371_v26 = vunpack.c.l.b16 %v189_v42  ;;  %v11707_v21 = vld [vmem:[#allocation7_spill] sm:$0xff] }
 0x15d   : > { %v8443_v8 = vpop.eup %8442  ;;  %v1529_v43 = vadd.f32 %v10298_v29, %v1528_v54  ;;  %v1481_v36 = vmul.f32 1.442695, %v1468_v61  ;;  %v4802_v11 = vshrl.u32 %v11707_v21, 16  ;;  %v4805_v62 = vshll.u32 %v11707_v21, 16 }
 0x15e   : > { %v10347_v50 = vpop.eup %8444  ;;  %v10350_v9 = vadd.f32 1.0, %v8443_v8  ;;  %11706 = vst [vmem:[#allocation25_spill] sm:$0xff] %v10371_v26  ;;  %v1432_v33 = vadd.f32 %v10033_v35, %v1403_v49  ;;  %v10380_v47 = vunpack.c.l.b16 %v190_v2  ;;  %vm1545_vm0 = vweird.f32 %v10308_v22  ;;  %v8290_v35 = vld [vmem:[%s11558_s1 + $0x1b8] sm:$0xff] }
 0x15f   : > { %v1533_v7 = vsel %vm1532_vm13, %v10298_v29, %v1529_v43  ;;  %v1541_v12 = vmul.f32 %v10347_v50, %v10308_v22  ;;  %8446 = vpow2.f32 %v1481_v36  ;;  %v7215_v29 = vor.u32 %v10175_v37, %v10182_v51  ;;  %v10403_v36 = vld [vmem:[#allocation2 + $0x58] sm:$0xf]  ;;  %4489 = vmatpush.bf16.msra.mxu0 %v8290_v35 }
 0x160   : > { %v1538_v38 = vsel %vm1535_vm14, %v1537_v10, %v1533_v7  ;;  %8448 = vrcp.f32 %v10350_v9  ;;  %v1458_v56 = vpop.f32.mrf.mxu0  ;;  %v3040_v5 = vpop.f32.mrf.mxu1  ;;  %vm1546_vm15 = vweird.f32 %v10347_v50  ;;  %11708 = vst [vmem:[#allocation4_spill] sm:$0xff] %v10380_v47  ;;  %v7111_v20 = vor.u32 %v10365_v30, %v10361_v28  ;;  %v10518_v28 = vld [vmem:[#allocation2 + $0x98] sm:$0xff] }
 0x161   : > { %v3066_v60 = vpop.f32.mrf.mxu2  ;;  %v3095_v15 = vpop.f32.mrf.mxu3  ;;  %1617 = vst [vmem:[%s10243_s14 + $0x10] sm:$0xff] %v1538_v38  ;;  %v1542_v25 = vsub.f32 1.0, %v1541_v12  ;;  %v1459_v44 = vadd.f32 %v1458_v56, %v1430_v17  ;;  %v10386_v17 = vld [vmem:[#allocation2 + $0xc] sm:$0xf]  ;;  %vm10394_vm1 = vmor %vm1545_vm0, %vm1546_vm15  ;;  %v3041_v22 = vadd.f32 %v10038_v55, %v3040_v5  ;;  %v3442_v43 = vpack.c.b16 %v10380_v47, %v10371_v26 }
 0x162   : > { %v3067_v6 = vadd.f32 %v3066_v60, %v3038_v23  ;;  %vm1550_vm3 = vcmp.eq.f32.partialorder %v1549_v57, 8.507059e+37  ;;  %v10412_v23 = vld [vmem:[#allocation2 + $0x78] sm:$0xf0]  ;;  %v10414_v60 = vld [vmem:[#allocation2 + $0x7c] sm:$0xf0]  ;;  %v7119_v2 = vor.u32 %v10319_v48, %v10310_v18  ;;  %vm1560_vm4 = vweird.f32 %v10350_v9 }
 0x163   : > { %3242 = vmatmul.bf16.gmra.mxu0 %v6799_v31  ;;  %3271 = vmatmul.bf16.gmra.mxu1 %v6803_v14  ;;  %v1543_v37 = vmul.f32 %v10347_v50, %v1542_v25  ;;  %v1469_v4 = vsub.f32 0.0, %v1459_v44  ;;  %v1552_v31 = vor.u32 1.1754944e-38, %v1551_v24  ;;  %v10405_v14 = vld [vmem:[#allocation2 + $0x5c] sm:$0xf]  ;;  %v1564_v56 = vand.u32 2147483647, %v10350_v9 }
 0x164   : > { %v10375_v51 = vadd.f32 %v3095_v15, %v3067_v6  ;;  %v11711_v15 = vld [vmem:[#allocation34_spill] sm:$0xff]  ;;  %v1566_v6 = vand.u32 2147483648, %v10350_v9  ;;  %v3444_v44 = vshrl.u32 %v3442_v43, 16  ;;  %v3446_v42 = vshll.u32 %v3442_v43, 16  ;;  %v11725_v48 = vld [vmem:[#allocation23_spill] sm:$0xff] }
 0x165   : > { %v8447_v46 = vpop.eup %8446  ;;  %v1544_v54 = vadd.f32 %v10347_v50, %v1543_v37  ;;  %v1483_v61 = vmul.f32 1.442695, %v1469_v4  ;;  %4797 = vst [vmem:[#allocation2 + $0x58] sm:$0xff] %v11711_v15  ;;  %v7123_v37 = vor.u32 %v10312_v34, %v10321_v63  ;;  %vm10445_vm6 = vcmp.eq.f32.partialorder %v1564_v56, 8.507059e+37  ;;  %v11726_v34 = vld [vmem:[#allocation12_spill] sm:$0xff] }
 0x166   : > { %4338 = vmatmul.bf16.gmra.mxu2 %v7211_v45  ;;  %4367 = vmatmul.bf16.gmra.mxu3 %v7215_v29  ;;  %v10390_v58 = vpop.eup %8448  ;;  %v10398_v8 = vadd.f32 1.0, %v8447_v46  ;;  %v7115_v45 = vor.u32 %v10386_v17, %v10388_v53  ;;  %v11712_v29 = vld [vmem:[#allocation35_spill] sm:$0xff]  ;;  %v3448_v46 = vrot.slane %v3446_v42, 1  ;;  %v4750_v17 = vrot.slane %v10284_v0, 5  ;;  %v8306_v53 = vld [vmem:[%s11558_s1 + $0x238] sm:$0xff] }
 0x167   : > { %v1548_v49 = vsel %vm10394_vm1, %v10347_v50, %v1544_v54  ;;  %v1556_v10 = vmul.f32 %v10390_v58, %v10350_v9  ;;  %8450 = vpow2.f32 %v1483_v61  ;;  %4818 = vst [vmem:[#allocation2 + $0x7c] sm:$0xff] %v11712_v29  ;;  %vm1561_vm5 = vweird.f32 %v10390_v58  ;;  %4547 = vmatpush.bf16.msra.mxu2 %v8306_v53  ;;  %v8305_v9 = vld [vmem:[%s11558_s1 + $0x230] sm:$0xff]  ;;  %v11720_v53 = vld [vmem:[#allocation8_spill] sm:$0xff] }
 0x168   : > { %v1553_v38 = vsel %vm1550_vm3, %v1552_v31, %v1548_v49  ;;  %8452 = vrcp.f32 %v10398_v8  ;;  %v1460_v50 = vpop.f32.mrf.mxu0  ;;  %v3042_v5 = vpop.f32.mrf.mxu1  ;;  %v8350_v31 = vld [vmem:[%s11558_s1 + $0x38] sm:$0xff]  ;;  %v1567_v0 = vor.u32 1.1754944e-38, %v1566_v6  ;;  %vm10460_vm7 = vmor %vm1560_vm4, %vm1561_vm5  ;;  %v4823_v30 = vshrl.u32 %v10518_v28, 16 }
 0x169   : > { %v3069_v7 = vpop.f32.mrf.mxu2  ;;  %v3098_v12 = vpop.f32.mrf.mxu3  ;;  %1618 = vst [vmem:[%s10243_s14 + $0x18] sm:$0xff] %v1553_v38  ;;  %v1557_v25 = vsub.f32 1.0, %v1556_v10  ;;  %v1461_v24 = vadd.f32 %v1460_v50, %v1432_v33  ;;  %v4771_v33 = vrot.slane %v10289_v27, 5  ;;  %v10449_v27 = vor.u32 %v3448_v46, %v3444_v44  ;;  %v8298_v10 = vld [vmem:[%s11558_s1 + $0x1f8] sm:$0xff]  ;;  %5743 = vmatpush.bf16.msra.mxu3 %v8350_v31 }
 0x16a   : > { %v3070_v57 = vadd.f32 %v3069_v7, %v3041_v22  ;;  %v4751_v50 = vsel %vm8755_vm2, %v10329_v1, %v4750_v17  ;;  %v1579_v44 = vand.u32 2147483647, %v10398_v8  ;;  %4518 = vmatpush.bf16.msra.mxu1 %v8298_v10  ;;  %v3043_v46 = vadd.f32 %v10038_v55, %v3042_v5  ;;  %v8288_v10 = vld [vmem:[%s11558_s1 + $0x1a8] sm:$0xff] }
 0x16b   : > { %v1558_v4 = vmul.f32 %v10390_v58, %v1557_v25  ;;  %v1470_v61 = vsub.f32 0.0, %v1461_v24  ;;  %11715 = vst [vmem:[#allocation6_spill] sm:$0xff] %v10449_v27  ;;  %v4772_v29 = vsel %vm8755_vm2, %v10332_v3, %v4771_v33  ;;  %v8289_v25 = vld [vmem:[%s11558_s1 + $0x1b0] sm:$0xff]  ;;  %v3499_v3 = vunpack.c.l.b16 %v10449_v27  ;;  %v11719_v33 = vld [vmem:[#allocation15_spill] sm:$0xff]  ;;  %4548 = vmatpush.bf16.msra.mxu2 %v8305_v9 }
 0x16c   : > { %v10431_v54 = vadd.f32 %v3098_v12, %v3070_v57  ;;  %4754 = vst [vmem:[#allocation2 + $0x8] sm:$0xff] %v4751_v50  ;;  %v8349_v24 = vld [vmem:[%s11558_s1 + $0x30] sm:$0xff]  ;;  %v4779_v35 = vpack.c.b16 %v11720_v53, %v11719_v33  ;;  %4490 = vmatpush.bf16.msra.mxu0 %v8289_v25  ;;  %v4783_v5 = vrot.slane %v4781_v13, 4  ;;  %v8296_v50 = vld [vmem:[%s11558_s1 + $0x1e8] sm:$0xff]  ;;  %vm1575_vm9 = vweird.f32 %v10398_v8  ;;  %v8295_v33 = vld [vmem:[%s11558_s1 + $0x1e0] sm:$0xff] }
 0x16d   : > { %v8451_v22 = vpop.eup %8450  ;;  %v1559_v43 = vadd.f32 %v10390_v58, %v1558_v4  ;;  %v1485_v38 = vmul.f32 1.442695, %v1470_v61  ;;  %4775 = vst [vmem:[#allocation2 + $0x2c] sm:$0xff] %v4772_v29  ;;  %v10504_v49 = vpack.c.b16 %v3499_v3, %v3499_v3  ;;  %5744 = vmatpush.bf16.msra.mxu3 %v8349_v24  ;;  %v4786_v9 = vrot.slane %v4784_v59, 5  ;;  %v10590_v53 = vld [vmem:[#allocation2 + $0xa4] sm:$0xf] }
 0x16e   : > { %v10454_v7 = vpop.eup %8452  ;;  %v10464_v15 = vadd.f32 1.0, %v8451_v22  ;;  %v1581_v22 = vand.u32 2147483648, %v10398_v8  ;;  %v4790_v25 = vshll.u32 %v4779_v35, 16  ;;  %vm10551_vm11 = vcmp.eq.f32.partialorder %v1579_v44, 8.507059e+37  ;;  %v8303_v44 = vld [vmem:[%s11558_s1 + $0x220] sm:$0xff] }
 0x16f   : > { %v1563_v6 = vsel %vm10460_vm7, %v10390_v58, %v1559_v43  ;;  %v1571_v1 = vmul.f32 %v10454_v7, %v10398_v8  ;;  %v8297_v58 = vld [vmem:[%s11558_s1 + $0x1f0] sm:$0xff]  ;;  %v3501_v43 = vpack.c.b16 %v3499_v3, %v10371_v26  ;;  %vm1576_vm8 = vweird.f32 %v10454_v7  ;;  %3510 = vst [vmem:[#allocation2 + $0x11c] sm:$0xf] %v10504_v49 }
 0x170   : > { %v1568_v4 = vsel %vm10445_vm6, %v1567_v0, %v1563_v6  ;;  %8454 = vrcp.f32 %v10464_v15  ;;  %v10495_v61 = vpop.f32.mrf.mxu0  ;;  %v10497_v17 = vpop.f32.mrf.mxu1  ;;  %v8304_v0 = vld [vmem:[%s11558_s1 + $0x228] sm:$0xff]  ;;  %4519 = vmatpush.bf16.msra.mxu1 %v8297_v58  ;;  %vm10547_vm10 = vmor %vm1575_vm9, %vm1576_vm8  ;;  %v1582_v18 = vor.u32 1.1754944e-38, %v1581_v22  ;;  %v4800_v63 = vpack.c.b16 %v11726_v34, %v11725_v48  ;;  %4491 = vmatpush.bf16.msra.mxu0 %v8288_v10  ;;  %v10581_v58 = vld [vmem:[#allocation2 + $0x50] sm:$0xf] }
 0x171   : > { %v3071_v42 = vpop.f32.mrf.mxu2  ;;  %v3100_v57 = vpop.f32.mrf.mxu3  ;;  %1619 = vst [vmem:[%s10243_s14 + $0x20] sm:$0xff] %v1568_v4  ;;  %v1572_v31 = vsub.f32 1.0, %v1571_v1  ;;  %8456 = vpow2.f32 %v1485_v38  ;;  %v8348_v38 = vld [vmem:[%s11558_s1 + $0x28] sm:$0xff]  ;;  %v4787_v19 = vor.u32 %v4786_v9, %v4783_v5  ;;  %v4792_v59 = vrot.slane %v4790_v25, 5  ;;  %4549 = vmatpush.bf16.msra.mxu2 %v8304_v0  ;;  %v10583_v4 = vld [vmem:[#allocation2 + $0x70] sm:$0xf0] }
 0x172   : > { %v3072_v55 = vadd.f32 %v3071_v42, %v3043_v46  ;;  %3509 = vst [vmem:[#allocation2 + $0x114] sm:$0xff] %v3501_v43  ;;  %v4807_v3 = vrot.slane %v4805_v62, 5  ;;  %v8287_v42 = vld [vmem:[%s11558_s1 + $0x1a0] sm:$0xff]  ;;  %v4811_v46 = vshll.u32 %v4800_v63, 16  ;;  %5745 = vmatpush.bf16.msra.mxu3 %v8348_v38  ;;  %v10600_v5 = vld [vmem:[#allocation2 + $0x74] sm:$0xf0]  ;;  %vm1590_vm13 = vweird.f32 %v10464_v15 }
 0x173   : > { %4381 = vmatmul.bf16.vlgmr.msrb.gmra.mxu0 %v7111_v20  ;;  %4410 = vmatmul.bf16.vlgmr.msrb.gmra.mxu1 %v7115_v45  ;;  %v4826_v20 = vshll.u32 %v10518_v28, 16  ;;  %v10522_v45 = vld [vmem:[#allocation2 + $0xbc] sm:$0xff]  ;;  %v1573_v13 = vmul.f32 %v10454_v7, %v1572_v31  ;;  %v4788_v0 = vrot.slane %v4787_v19, 4 }
 0x174   : > { %v4844_v12 = vshrl.u32 %v10522_v45, 16  ;;  %v10534_v29 = vadd.f32 %v3100_v57, %v3072_v55  ;;  %v8347_v57 = vld [vmem:[%s11558_s1 + $0x20] sm:$0xff]  ;;  %4520 = vmatpush.bf16.msra.mxu1 %v8296_v50  ;;  %v10598_v55 = vld [vmem:[#allocation2 + $0x54] sm:$0xf]  ;;  %v1594_v50 = vand.u32 2147483647, %v10464_v15  ;;  %4492 = vmatpush.bf16.msra.mxu0 %v8287_v42 }
 0x175   : > { %v1574_v6 = vadd.f32 %v10454_v7, %v1573_v13  ;;  %v11727_v13 = vld [vmem:[#allocation36_spill] sm:$0xff]  ;;  %v4813_v25 = vrot.slane %v4811_v46, 5  ;;  %v4793_v8 = vsel %vm8755_vm2, %v4788_v0, %v4792_v59  ;;  %4550 = vmatpush.bf16.msra.mxu2 %v8303_v44  ;;  %v8302_v48 = vld [vmem:[%s11558_s1 + $0x218] sm:$0xff]  ;;  %v4847_v63 = vshll.u32 %v10522_v45, 16 }
 0x176   : > { %4439 = vmatmul.bf16.vlgmr.msrb.gmra.mxu2 %v7119_v2  ;;  %4468 = vmatmul.bf16.vlgmr.msrb.gmra.mxu3 %v7123_v37  ;;  %v10557_v2 = vpop.eup %8454  ;;  %v4804_v37 = vrot.slane %v4802_v11, 4  ;;  %v8286_v34 = vld [vmem:[%s11558_s1 + $0x198] sm:$0xff]  ;;  %4796 = vst [vmem:[#allocation2 + $0x50] sm:$0xff] %v4793_v8  ;;  %v10622_v59 = vld [vmem:[#allocation2 + $0xc4] sm:$0xf0]  ;;  %v7147_v44 = vor.u32 %v10583_v4, %v10581_v58  ;;  %v7151_v42 = vor.u32 %v10598_v55, %v10600_v5  ;;  %vm10641_vm14 = vcmp.eq.f32.partialorder %v1594_v50, 8.507059e+37 }
 0x177   : > { %v1578_v11 = vsel %vm10547_vm10, %v10454_v7, %v1574_v6  ;;  %v1586_v21 = vmul.f32 %v10557_v2, %v10464_v15  ;;  %v10588_v7 = vld [vmem:[#allocation2 + $0xa0] sm:$0xf]  ;;  %v8457_v35 = vpop.eup %8456  ;;  %v1596_v6 = vand.u32 2147483648, %v10464_v15  ;;  %vm1591_vm12 = vweird.f32 %v10557_v2  ;;  %5746 = vmatpush.bf16.msra.mxu3 %v8347_v57  ;;  %v11731_v58 = vld [vmem:[#allocation24_spill] sm:$0xff]  ;;  %v11735_v55 = vld [vmem:[#allocation29_spill] sm:$0xff] }
 0x178   : > { %v1583_v31 = vsel %vm10551_vm11, %v1582_v18, %v1578_v11  ;;  %v10594_v22 = vpop.f32.mrf.mxu0  ;;  %v10596_v43 = vpop.f32.mrf.mxu1  ;;  %v4808_v10 = vor.u32 %v4807_v3, %v4804_v37  ;;  %4839 = vst [vmem:[#allocation2 + $0xa0] sm:$0xff] %v11727_v13  ;;  %v10605_v9 = vadd.f32 1.0, %v8457_v35  ;;  %v10610_v18 = vld [vmem:[#allocation2 + $0xc0] sm:$0xf0]  ;;  %4521 = vmatpush.bf16.msra.mxu1 %v8295_v33  ;;  %v8346_v37 = vld [vmem:[%s11558_s1 + $0x18] sm:$0xff]  ;;  %v7155_v11 = vor.u32 %v10412_v23, %v10403_v36  ;;  %v11732_v4 = vld [vmem:[#allocation16_spill] sm:$0xff] }
 0x179   : > { %v10577_v62 = vpop.f32.mrf.mxu2  ;;  %v10579_v24 = vpop.f32.mrf.mxu3  ;;  %1620 = vst [vmem:[%s10243_s14 + $0x28] sm:$0xff] %v1583_v31  ;;  %v1587_v38 = vsub.f32 1.0, %v1586_v21  ;;  %v8294_v3 = vld [vmem:[%s11558_s1 + $0x1d8] sm:$0xff]  ;;  %v11728_v21 = vld [vmem:[#allocation37_spill] sm:$0xff]  ;;  %v4821_v35 = vpack.c.b16 %v11732_v4, %v11731_v58  ;;  %vm10649_vm15 = vmor %vm1590_vm13, %vm1591_vm12  ;;  %v1597_v36 = vor.u32 1.1754944e-38, %v1596_v6  ;;  %v4825_v23 = vrot.slane %v4823_v30, 4  ;;  %4551 = vmatpush.bf16.msra.mxu2 %v8302_v48  ;;  %4493 = vmatpush.bf16.msra.mxu0 %v8286_v34 }
 0x17a   : > { %v4809_v1 = vrot.slane %v4808_v10, 4  ;;  %8458 = vrcp.f32 %v10605_v9  ;;  %4860 = vst [vmem:[#allocation2 + $0xc4] sm:$0xff] %v11728_v21  ;;  %v4828_v15 = vrot.slane %v4826_v20, 5  ;;  %v11736_v5 = vld [vmem:[#allocation22_spill] sm:$0xff]  ;;  %v8301_v10 = vld [vmem:[%s11558_s1 + $0x210] sm:$0xff]  ;;  %v4846_v50 = vrot.slane %v4844_v12, 4 }
 0x17b   : > { %v1588_v19 = vmul.f32 %v10557_v2, %v1587_v38  ;;  %v4842_v0 = vpack.c.b16 %v11736_v5, %v11735_v55  ;;  %v8285_v13 = vld [vmem:[%s11558_s1 + $0x190] sm:$0xff]  ;;  %v4832_v20 = vshll.u32 %v4821_v35, 16  ;;  %5747 = vmatpush.bf16.msra.mxu3 %v8346_v37  ;;  %v7159_v48 = vor.u32 %v10405_v14, %v10414_v60  ;;  %v8562_v21 = vld [vmem:[#allocation2 + $0x104] sm:$0xff]  ;;  %v10690_v4 = vld [vmem:[#allocation2 + $0x98] sm:$0xf] }
 0x17c   : > { %v4814_v57 = vsel %vm8755_vm2, %v4809_v1, %v4813_v25  ;;  %v4849_v25 = vrot.slane %v4847_v63, 5  ;;  %4522 = vmatpush.bf16.msra.mxu1 %v8294_v3  ;;  %v8345_v6 = vld [vmem:[%s11558_s1 + $0x10] sm:$0xff]  ;;  %v4829_v45 = vor.u32 %v4828_v15, %v4825_v23  ;;  %v8561_v63 = vld [vmem:[#allocation2 + $0xe0] sm:$0xff]  ;;  %v4893_v33 = vshll.u32 %v8562_v21, 16  ;;  %v10695_v35 = vld [vmem:[#allocation2 + $0xb8] sm:$0xf0] }
 0x17d   : > { %v1589_v46 = vadd.f32 %v10557_v2, %v1588_v19  ;;  %4817 = vst [vmem:[#allocation2 + $0x74] sm:$0xff] %v4814_v57  ;;  %v4853_v34 = vshll.u32 %v4842_v0, 16  ;;  %v4865_v19 = vshrl.u32 %v8561_v63, 16  ;;  %v4868_v37 = vshll.u32 %v8561_v63, 16  ;;  %4552 = vmatpush.bf16.msra.mxu2 %v8301_v10  ;;  %4494 = vmatpush.bf16.msra.mxu0 %v8285_v13  ;;  %v8293_v60 = vld [vmem:[%s11558_s1 + $0x1d0] sm:$0xff]  ;;  %v8300_v0 = vld [vmem:[%s11558_s1 + $0x208] sm:$0xff] }
 0x17e   : > { %v4834_v3 = vrot.slane %v4832_v20, 5  ;;  %v4850_v57 = vor.u32 %v4849_v25, %v4846_v50  ;;  %v4830_v14 = vrot.slane %v4829_v45, 4  ;;  %v1609_v15 = vand.u32 2147483647, %v10605_v9  ;;  %v11737_v13 = vld [vmem:[#allocation30_spill] sm:$0xff] }
 0x17f   : > { %v1593_v30 = vsel %vm10649_vm15, %v10557_v2, %v1589_v46  ;;  %v4890_v46 = vshrl.u32 %v8562_v21, 16  ;;  %5748 = vmatpush.bf16.msra.mxu3 %v8345_v6  ;;  %v1611_v55 = vand.u32 2147483648, %v10605_v9  ;;  %v4867_v50 = vrot.slane %v4865_v19, 4  ;;  %v10715_v25 = vld [vmem:[#allocation2 + $0x108] sm:$0xf0]  ;;  %v11740_v19 = vld [vmem:[#allocation38_spill] sm:$0xff] }
 0x180   : > { %v1598_v8 = vsel %vm10641_vm14, %v1597_v36, %v1593_v30  ;;  %v10679_v2 = vpop.f32.mrf.mxu0  ;;  %v10681_v1 = vpop.f32.mrf.mxu1  ;;  %v4851_v31 = vrot.slane %v4850_v57, 4  ;;  %v4855_v36 = vrot.slane %v4853_v34, 5  ;;  %v4835_v5 = vsel %vm8755_vm2, %v4830_v14, %v4834_v3  ;;  %4523 = vmatpush.bf16.msra.mxu1 %v8293_v60  ;;  %v11738_v30 = vld [vmem:[#allocation27_spill] sm:$0xff]  ;;  %v10718_v34 = vld [vmem:[#allocation2 + $0xec] sm:$0xf] }
 0x181   : > { %v10668_v38 = vpop.f32.mrf.mxu2  ;;  %v10670_v28 = vpop.f32.mrf.mxu3  ;;  %1621 = vst [vmem:[%s10243_s14 + $0x30] sm:$0xff] %v1598_v8  ;;  %v4863_v20 = vpack.c.b16 %v11738_v30, %v11737_v13  ;;  %v4870_v8 = vrot.slane %v4868_v37, 5  ;;  %v4895_v45 = vrot.slane %v4893_v33, 5  ;;  %4553 = vmatpush.bf16.msra.mxu2 %v8300_v0  ;;  %v11739_v21 = vld [vmem:[#allocation28_spill] sm:$0xff]  ;;  %v10727_v60 = vld [vmem:[#allocation2 + $0x10c] sm:$0xf0]  ;;  %vm1605_vm1 = vweird.f32 %v10605_v9 }
 0x182   : > { %v10685_v12 = vpop.eup %8458  ;;  %v4856_v10 = vsel %vm8755_vm2, %v4851_v31, %v4855_v36  ;;  %v11742_v31 = vld [vmem:[#allocation39_spill] sm:$0xff]  ;;  %v8284_v37 = vld [vmem:[%s11558_s1 + $0x188] sm:$0xff]  ;;  %v1612_v13 = vor.u32 1.1754944e-38, %v1611_v55  ;;  %vm1610_vm4 = vcmp.eq.f32.partialorder %v1609_v15, 8.507059e+37 }
 0x183   : > { %4386 = vmatmul.bf16.gmra.mxu0 %v7147_v44  ;;  %4415 = vmatmul.bf16.gmra.mxu1 %v7151_v42  ;;  %v1601_v58 = vmul.f32 %v10685_v12, %v10605_v9  ;;  %v10697_v44 = vld [vmem:[#allocation2 + $0x9c] sm:$0xf]  ;;  %v10699_v42 = vld [vmem:[#allocation2 + $0xbc] sm:$0xf0]  ;;  %vm1606_vm0 = vweird.f32 %v10685_v12  ;;  %v4874_v57 = vshll.u32 %v4863_v20, 16  ;;  %v11743_v0 = vld [vmem:[#allocation40_spill] sm:$0xff] }
 0x184   : > { %4838 = vst [vmem:[#allocation2 + $0x98] sm:$0xff] %v4835_v5  ;;  %vm1607_vm3 = vmor %vm1605_vm1, %vm1606_vm0  ;;  %4495 = vmatpush.bf16.msra.mxu0 %v8284_v37  ;;  %v8283_v55 = vld [vmem:[%s11558_s1 + $0x180] sm:$0xff]  ;;  %v7220_v37 = vld [vmem:[#allocation2 + $0x104] sm:$0xf0] }
 0x185   : > { %v1602_v23 = vsub.f32 1.0, %v1601_v58  ;;  %4859 = vst [vmem:[#allocation2 + $0xbc] sm:$0xff] %v4856_v10  ;;  %v11741_v58 = vpack.c.b16 %v11739_v21, %v11740_v19  ;;  %v8344_v10 = vld [vmem:[%s11558_s1 + $0x8] sm:$0xff]  ;;  %v4876_v30 = vrot.slane %v4874_v57, 5  ;;  %v7218_v15 = vld [vmem:[#allocation2 + $0xe0] sm:$0xf] }
 0x186   : > { %4444 = vmatmul.bf16.gmra.mxu2 %v7155_v11  ;;  %4473 = vmatmul.bf16.gmra.mxu3 %v7159_v48  ;;  %v10713_v11 = vld [vmem:[#allocation2 + $0xe8] sm:$0xf]  ;;  %v4892_v48 = vrot.slane %v4890_v46, 4  ;;  %4936 = vst [vmem:[#allocation2 + $0x10c] sm:$0xff] %v11743_v0  ;;  %v8227_v57 = vld [vmem:[#allocation2 + $0xe4] sm:$0xf] }
 0x187   : > { %v1603_v6 = vmul.f32 %v10685_v12, %v1602_v23  ;;  %v4899_v14 = vshll.u32 %v11741_v58, 16  ;;  %4881 = vst [vmem:[#allocation2 + $0xe8] sm:$0xff] %v11742_v31  ;;  %v4871_v23 = vor.u32 %v4870_v8, %v4867_v50  ;;  %5749 = vmatpush.bf16.msra.mxu3 %v8344_v10  ;;  %v8292_v8 = vld [vmem:[%s11558_s1 + $0x1c8] sm:$0xff]  ;;  %v7183_v58 = vor.u32 %v10695_v35, %v10690_v4  ;;  %v8231_v31 = vld [vmem:[#allocation2 + $0x100] sm:$0xf0] }
 0x188   : > { %v10735_v33 = vpop.f32.mrf.mxu0  ;;  %v10737_v36 = vpop.f32.mrf.mxu1  ;;  %v4896_v5 = vor.u32 %v4895_v45, %v4892_v48  ;;  %v8299_v45 = vld [vmem:[%s11558_s1 + $0x200] sm:$0xff]  ;;  %4524 = vmatpush.bf16.msra.mxu1 %v8292_v8  ;;  %4496 = vmatpush.bf16.msra.mxu0 %v8283_v55  ;;  %v7191_v4 = vor.u32 %v10610_v18, %v10588_v7  ;;  %v7195_v35 = vor.u32 %v10590_v53, %v10622_v59  ;;  %v8202_v10 = vld [vmem:[#allocation2 + $0x1c] sm:$0xf] }
 0x189   : > { %v10720_v63 = vpop.f32.mrf.mxu2  ;;  %v10722_v3 = vpop.f32.mrf.mxu3  ;;  %v1604_v46 = vadd.f32 %v10685_v12, %v1603_v6  ;;  %v4901_v20 = vrot.slane %v4899_v14, 5  ;;  %v4872_v6 = vrot.slane %v4871_v23, 4  ;;  %v7187_v14 = vor.u32 %v10697_v44, %v10699_v42  ;;  %4554 = vmatpush.bf16.msra.mxu2 %v8299_v45  ;;  %v8291_v44 = vld [vmem:[%s11558_s1 + $0x1c0] sm:$0xff]  ;;  %v7126_v42 = vld [vmem:[#allocation2 + $0x18] sm:$0xf] }
 0x18a   : > { %v4897_v50 = vrot.slane %v4896_v5, 4  ;;  %v7134_v7 = vld [vmem:[#allocation2 + $0x20] sm:$0xf]  ;;  %v8207_v59 = vld [vmem:[#allocation2 + $0x40] sm:$0xf0]  ;;  %v7219_v45 = vor.u32 %v8231_v31, %v7218_v15  ;;  %v7223_v55 = vor.u32 %v8227_v57, %v7220_v37  ;;  %v3113_v31 = vadd.f32 %v10495_v61, %v10097_v39  ;;  %v11748_v61 = vld [vmem:[#allocation20_spill] sm:$0xff] }
 0x18b   : > { %v1608_v9 = vsel %vm1607_vm3, %v10685_v12, %v1604_v46  ;;  %v8343_v12 = vld [vmem:[%s11558_s1] sm:$0xff]  ;;  %v4877_v21 = vsel %vm8755_vm2, %v4872_v6, %v4876_v30 }
 0x18c   : > { %v1613_v48 = vsel %vm1610_vm4, %v1612_v13, %v1608_v9  ;;  %v4902_v19 = vsel %vm8755_vm2, %v4897_v50, %v4901_v20  ;;  %4880 = vst [vmem:[#allocation2 + $0xe0] sm:$0xff] %v4877_v21  ;;  %5750 = vmatpush.bf16.msra.mxu3 %v8343_v12  ;;  %4525 = vmatpush.bf16.msra.mxu1 %v8291_v44  ;;  %v8206_v13 = vld [vmem:[#allocation2 + $0x38] sm:$0xf0]  ;;  %v7128_v30 = vld [vmem:[#allocation2 + $0x3c] sm:$0xf0]  ;;  %v8563_v20 = vld [vmem:[#allocation2 + $0x24] sm:$0xff] }
 0x18d   : > { %1622 = vst [vmem:[%s10243_s14 + $0x38] sm:$0xff] %v1613_v48  ;;  %v8564_v9 = vld [vmem:[#allocation2 + $0x48] sm:$0xff]  ;;  %v11744_v6 = vld [vmem:[#allocation3_spill] sm:$0xff]  ;;  %v11745_v48 = vld [vmem:[#allocation5_spill] sm:$0xff] }
 0x18e   : > { %4935 = vst [vmem:[#allocation2 + $0x104] sm:$0xff] %v4902_v19  ;;  %v10804_v15 = vld [vmem:[#allocation2 + $0x60] sm:$0xf]  ;;  %v10806_v57 = vld [vmem:[#allocation2 + $0x64] sm:$0xf]  ;;  %v8565_v44 = vld [vmem:[#allocation2 + $0x6c] sm:$0xff] }
 0x18f   : > { %4756 = vst [vmem:[#allocation2 + $0x18] sm:$0xff] %v8563_v20  ;;  %v10810_v37 = vld [vmem:[#allocation2 + $0x80] sm:$0xf0]  ;;  %v10820_v20 = vld [vmem:[#allocation2 + $0x88] sm:$0xf0] }
 0x190   : > { %v10771_v5 = vpop.f32.mrf.mxu0  ;;  %v10773_v0 = vpop.f32.mrf.mxu1  ;;  %4777 = vst [vmem:[#allocation2 + $0x3c] sm:$0xff] %v8564_v9  ;;  %v11747_v9 = vld [vmem:[#allocation17_spill] sm:$0xff] }
 0x191   : > { %v10767_v46 = vpop.f32.mrf.mxu2  ;;  %v10769_v23 = vpop.f32.mrf.mxu3  ;;  %4757 = vst [vmem:[#allocation2 + $0x20] sm:$0xf] %v11744_v6 }
 0x192   : > { %4778 = vst [vmem:[#allocation2 + $0x44] sm:$0xf] %v11745_v48  ;;  %v3142_v48 = vadd.f32 %v10497_v17, %v3113_v31 }
 0x193   : > { %4391 = vmatmul.bf16.gmra.mxu0 %v7183_v58  ;;  %4420 = vmatmul.bf16.gmra.mxu1 %v7187_v14  ;;  %v7227_v14 = vor.u32 %v10715_v25, %v10713_v11  ;;  %4798 = vst [vmem:[#allocation2 + $0x60] sm:$0xff] %v8565_v44  ;;  %v8566_v11 = vld [vmem:[#allocation2 + $0x90] sm:$0xff]  ;;  %v10814_v25 = vld [vmem:[#allocation2 + $0x68] sm:$0xf]  ;;  %v7542_v44 = vld [vmem:[#allocation2] sm:$0xf] }
 0x194   : > { %4799 = vst [vmem:[#allocation2 + $0x68] sm:$0xf] %v11747_v9 }
 0x195   : > { %4820 = vst [vmem:[#allocation2 + $0x8c] sm:$0xf] %v11748_v61  ;;  %v7135_v61 = vor.u32 %v8207_v59, %v7134_v7  ;;  %v10864_v7 = vld [vmem:[#allocation2 + $0xcc] sm:$0xf0]  ;;  %v8567_v59 = vld [vmem:[#allocation2 + $0xb4] sm:$0xff] }
 0x196   : > { %4449 = vmatmul.bf16.gmra.mxu2 %v7191_v4  ;;  %4478 = vmatmul.bf16.gmra.mxu3 %v7195_v35  ;;  %v7231_v4 = vor.u32 %v10718_v34, %v10727_v60  ;;  %v10812_v35 = vld [vmem:[#allocation2 + $0x84] sm:$0xf0] }
 0x197   : > { %4819 = vst [vmem:[#allocation2 + $0x84] sm:$0xff] %v8566_v11  ;;  %v8311_v11 = vld [vmem:[#allocation2 + $0x20] sm:$0xf0] }
 0x198   : > { %v10787_v50 = vpop.f32.mrf.mxu0  ;;  %v10789_v8 = vpop.f32.mrf.mxu1 }
 0x199   : > { %v10782_v18 = vpop.f32.mrf.mxu2  ;;  %v10784_v53 = vpop.f32.mrf.mxu3 }
 0x1a0   : > { %v10796_v19 = vpop.f32.mrf.mxu0  ;;  %v10798_v58 = vpop.f32.mrf.mxu1 }
 0x1a1   : > { %v10792_v12 = vpop.f32.mrf.mxu2  ;;  %v10794_v21 = vpop.f32.mrf.mxu3 }
 0x1a3   : > { %4396 = vmatmul.bf16.gmra.mxu0 %v7219_v45  ;;  %4425 = vmatmul.bf16.gmra.mxu1 %v7223_v55  ;;  %v3171_v45 = vadd.f32 %v10577_v62, %v3142_v48  ;;  %v3115_v55 = vadd.f32 %v10594_v22, %v10145_v40 }
 0x1a5   : > { %v3200_v56 = vadd.f32 %v10579_v24, %v3171_v45  ;;  %v3144_v17 = vadd.f32 %v10596_v43, %v3115_v55  ;;  %v8374_v24 = vld [vmem:[%s11558_s1 + $0xf8] sm:$0xff]  ;;  %v10867_v45 = vld [vmem:[#allocation2 + $0xb0] sm:$0xf] }
 0x1a6   : > { %4454 = vmatmul.bf16.gmra.mxu2 %v7227_v14  ;;  %4483 = vmatmul.bf16.gmra.mxu3 %v7231_v4  ;;  %v7127_v14 = vor.u32 %v8206_v13, %v7126_v42  ;;  %v7131_v4 = vor.u32 %v8202_v10, %v7128_v30  ;;  %v8358_v42 = vld [vmem:[%s11558_s1 + $0x78] sm:$0xff]  ;;  %v10860_v13 = vld [vmem:[#allocation2 + $0xac] sm:$0xf] }
 0x1a7   : > { %v3173_v40 = vadd.f32 %v10668_v38, %v3144_v17  ;;  %v8382_v10 = vld [vmem:[%s11558_s1 + $0x138] sm:$0xff]  ;;  %5830 = vmatpush.bf16.msrb.mxu2 %v8374_v24  ;;  %5772 = vmatpush.bf16.msrb.mxu0 %v8358_v42  ;;  %v10858_v38 = vld [vmem:[#allocation2 + $0xa8] sm:$0xf]  ;;  %v10862_v30 = vld [vmem:[#allocation2 + $0xc8] sm:$0xf0] }
 0x1a8   : > { %v10823_v6 = vpop.f32.mrf.mxu0  ;;  %v10825_v39 = vpop.f32.mrf.mxu1  ;;  %5859 = vmatpush.bf16.msrb.mxu3 %v8382_v10  ;;  %4840 = vst [vmem:[#allocation2 + $0xa8] sm:$0xff] %v8567_v59  ;;  %v8381_v24 = vld [vmem:[%s11558_s1 + $0x130] sm:$0xff]  ;;  %v7167_v59 = vor.u32 %v10806_v57, %v10812_v35  ;;  %v8364_v35 = vld [vmem:[%s11558_s1 + $0xa8] sm:$0xff] }
 0x1a9   : > { %v10816_v34 = vpop.f32.mrf.mxu2  ;;  %v10818_v60 = vpop.f32.mrf.mxu3  ;;  %v3202_v31 = vadd.f32 %v10670_v28, %v3173_v40  ;;  %v11750_v28 = vld [vmem:[#allocation42_spill] sm:$0xff]  ;;  %v8373_v40 = vld [vmem:[%s11558_s1 + $0xf0] sm:$0xff] }
 0x1aa   : > { %11746 = vst [vmem:[#allocation31_spill] sm:$0xff] %v10818_v60  ;;  %v7543_v60 = vor.u32 %v8311_v11, %v7542_v44  ;;  %v10870_v44 = vld [vmem:[#allocation2 + $0xd0] sm:$0xf0] }
 0x1ab   : > { %v11749_v11 = vld [vmem:[#allocation41_spill] sm:$0xff]  ;;  %4862 = vst [vmem:[#allocation2 + $0xd4] sm:$0xf] %v11750_v28  ;;  %5831 = vmatpush.bf16.msrb.mxu2 %v8373_v40  ;;  %v8371_v28 = vld [vmem:[%s11558_s1 + $0xe0] sm:$0xff] }
 0x1ac   : > { %4841 = vst [vmem:[#allocation2 + $0xb0] sm:$0xf] %v11749_v11  ;;  %v8365_v10 = vld [vmem:[%s11558_s1 + $0xb0] sm:$0xff]  ;;  %5860 = vmatpush.bf16.msrb.mxu3 %v8381_v24  ;;  %v7171_v11 = vor.u32 %v10820_v20, %v10814_v25  ;;  %v8355_v25 = vld [vmem:[%s11558_s1 + $0x60] sm:$0xff] }
 0x1ad   : > { %v8363_v24 = vld [vmem:[%s11558_s1 + $0xa0] sm:$0xff] }
 0x1b0   : > { %v3228_v47 = vpop.f32.mrf.mxu0  ;;  %v3257_v26 = vpop.f32.mrf.mxu1 }
 0x1b1   : > { %v10833_v9 = vpop.f32.mrf.mxu2  ;;  %v10835_v27 = vpop.f32.mrf.mxu3  ;;  %v3229_v62 = vadd.f32 %v3228_v47, %v3200_v56  ;;  %v10851_v47 = vld [vmem:[%s11559_s2] ss:$0 sm:$0xff]  ;;  %v3118_v56 = vadd.f32 %v10679_v2, %v10213_v41  ;;  %v8568_v2 = vld [vmem:[#allocation2 + $0xd8] sm:$0xff] }
 0x1b2   : > { %4861 = vst [vmem:[#allocation2 + $0xcc] sm:$0xff] %v8568_v2 }
 0x1b3   : > { %4497 = vmatmul.bf16.vlgmr.msra.gmra.mxu0 %v7127_v14  ;;  %4526 = vmatmul.bf16.vlgmr.msra.gmra.mxu1 %v7131_v4  ;;  %v3258_v22 = vadd.f32 %v3257_v26, %v3229_v62  ;;  %v8366_v26 = vld [vmem:[%s11558_s1 + $0xb8] sm:$0xff] }
 0x1b4   : > { %5801 = vmatpush.bf16.msrb.mxu1 %v8366_v26  ;;  %v3120_v26 = vadd.f32 %v10735_v33, %v10276_v32  ;;  %v8380_v32 = vld [vmem:[%s11558_s1 + $0x128] sm:$0xff] }
 0x1b5   : > { %v3277_v43 = vsub.f32 0.0, %v3258_v22  ;;  %v8357_v22 = vld [vmem:[%s11558_s1 + $0x70] sm:$0xff]  ;;  %5861 = vmatpush.bf16.msrb.mxu3 %v8380_v32 }
 0x1b6   : > { %4555 = vmatmul.bf16.vlgmr.msra.gmra.mxu2 %v7135_v61  ;;  %5751 = vmatmul.bf16.vlgmr.msra.gmra.mxu3 %v7543_v60  ;;  %v3147_v61 = vadd.f32 %v10681_v1, %v3118_v56 }
 0x1b7   : > { %v3285_v60 = vmul.f32 1.442695, %v3277_v43  ;;  %5773 = vmatpush.bf16.msrb.mxu0 %v8357_v22  ;;  %v7163_v43 = vor.u32 %v10810_v37, %v10804_v15 }
 0x1b8   : > { %v3230_v14 = vpop.f32.mrf.mxu0  ;;  %v3259_v4 = vpop.f32.mrf.mxu1  ;;  %v3176_v1 = vadd.f32 %v10720_v63, %v3147_v61  ;;  %5802 = vmatpush.bf16.msrb.mxu1 %v8365_v10  ;;  %v7578_v63 = vld [vmem:[#allocation2 + $0x48] sm:$0xf]  ;;  %v10933_v10 = vld [vmem:[#allocation2 + $0xf0] sm:$0xf] }
 0x1b9   : > { %v4324_v48 = vpop.f32.mrf.mxu2  ;;  %v4353_v41 = vpop.f32.mrf.mxu3  ;;  %8460 = vpow2.f32 %v3285_v60  ;;  %v3231_v17 = vadd.f32 %v3230_v14, %v3202_v31  ;;  %v8320_v31 = vld [vmem:[#allocation2 + $0x68] sm:$0xf0] }
 0x1ba   : > { %v4325_v55 = vadd.f32 %v10851_v47, %v4324_v48  ;;  %v8372_v60 = vld [vmem:[%s11558_s1 + $0xe8] sm:$0xff]  ;;  %v3205_v15 = vadd.f32 %v10722_v3, %v3176_v1  ;;  %v7579_v61 = vor.u32 %v8320_v31, %v7578_v63  ;;  %v3149_v3 = vadd.f32 %v10737_v36, %v3120_v26  ;;  %v8379_v36 = vld [vmem:[%s11558_s1 + $0x120] sm:$0xff]  ;;  %v10935_v26 = vld [vmem:[#allocation2 + $0xf4] sm:$0xf] }
 0x1bb   : > { %v3260_v42 = vadd.f32 %v3259_v4, %v3231_v17  ;;  %v8356_v48 = vld [vmem:[%s11558_s1 + $0x68] sm:$0xff]  ;;  %5832 = vmatpush.bf16.msrb.mxu2 %v8372_v60  ;;  %v3123_v1 = vadd.f32 %v10771_v5, %v10338_v52  ;;  %5862 = vmatpush.bf16.msrb.mxu3 %v8379_v36  ;;  %v8378_v52 = vld [vmem:[%s11558_s1 + $0x118] sm:$0xff]  ;;  %4882 = vst [vmem:[#allocation2 + $0xf0] sm:$0xff] %v10193_v16  ;;  %v7614_v36 = vld [vmem:[#allocation2 + $0x90] sm:$0xf] }
 0x1bc   : > { %v10875_v62 = vadd.f32 %v4353_v41, %v4325_v55  ;;  %5774 = vmatpush.bf16.msrb.mxu0 %v8356_v48  ;;  %5803 = vmatpush.bf16.msrb.mxu1 %v8364_v35  ;;  %v3178_v20 = vadd.f32 %v10767_v46, %v3149_v3  ;;  %v8370_v46 = vld [vmem:[%s11558_s1 + $0xd8] sm:$0xff]  ;;  %v8361_v3 = vld [vmem:[%s11558_s1 + $0x90] sm:$0xff] }
 0x1bd   : > { %v3278_v56 = vsub.f32 0.0, %v3260_v42  ;;  %v8362_v60 = vld [vmem:[%s11558_s1 + $0x98] sm:$0xff] }
 0x1be   : > { %v10951_v48 = vld [vmem:[#allocation2 + $0xf8] sm:$0xf] }
 0x1bf   : > { %v8461_v33 = vpop.eup %8460  ;;  %v3287_v37 = vmul.f32 1.442695, %v3278_v56  ;;  %5833 = vmatpush.bf16.msrb.mxu2 %v8371_v28  ;;  %v8354_v56 = vld [vmem:[%s11558_s1 + $0x58] sm:$0xff]  ;;  %5863 = vmatpush.bf16.msrb.mxu3 %v8378_v52  ;;  %v7199_v28 = vor.u32 %v10862_v30, %v10858_v38  ;;  %v8368_v38 = vld [vmem:[%s11558_s1 + $0xc8] sm:$0xff] }
 0x1c0   : > { %v10909_v2 = vadd.f32 1.0, %v8461_v33  ;;  %v3233_v14 = vpop.f32.mrf.mxu0  ;;  %v3262_v4 = vpop.f32.mrf.mxu1  ;;  %5775 = vmatpush.bf16.msrb.mxu0 %v8355_v25  ;;  %5804 = vmatpush.bf16.msrb.mxu1 %v8363_v24  ;;  %v3152_v33 = vadd.f32 %v10773_v0, %v3123_v1  ;;  %v8369_v0 = vld [vmem:[%s11558_s1 + $0xd0] sm:$0xff]  ;;  %v7203_v25 = vor.u32 %v10860_v13, %v10864_v7  ;;  %v8352_v13 = vld [vmem:[%s11558_s1 + $0x48] sm:$0xff] }
 0x1c1   : > { %v4326_v41 = vpop.f32.mrf.mxu2  ;;  %v4355_v57 = vpop.f32.mrf.mxu3  ;;  %8462 = vpow2.f32 %v3287_v37  ;;  %v3234_v17 = vadd.f32 %v3233_v14, %v3205_v15  ;;  %v8353_v14 = vld [vmem:[%s11558_s1 + $0x50] sm:$0xff] }
 0x1c2   : > { %v4327_v55 = vadd.f32 %v10851_v47, %v4326_v41  ;;  %8464 = vrcp.f32 %v10909_v2  ;;  %v8329_v1 = vld [vmem:[#allocation2 + $0xb0] sm:$0xf0]  ;;  %vm3314_vm6 = vweird.f32 %v10909_v2 }
 0x1c3   : > { %4502 = vmatmul.bf16.gmra.mxu0 %v7163_v43  ;;  %4531 = vmatmul.bf16.gmra.mxu1 %v7167_v59  ;;  %v3263_v22 = vadd.f32 %v3262_v4, %v3234_v17  ;;  %v3207_v43 = vadd.f32 %v10769_v23, %v3178_v20  ;;  %v11751_v23 = vld [vmem:[#allocation43_spill] sm:$0xff]  ;;  %v3320_v17 = vand.u32 2147483648, %v10909_v2 }
 0x1c4   : > { %v10926_v40 = vadd.f32 %v4355_v57, %v4327_v55  ;;  %4883 = vst [vmem:[#allocation2 + $0xf8] sm:$0xf] %v11751_v23  ;;  %5834 = vmatpush.bf16.msrb.mxu2 %v8370_v46  ;;  %5776 = vmatpush.bf16.msrb.mxu0 %v8354_v56  ;;  %v3181_v55 = vadd.f32 %v10782_v18, %v3152_v33  ;;  %v8377_v18 = vld [vmem:[%s11558_s1 + $0x110] sm:$0xff] }
 0x1c5   : > { %v3279_v42 = vsub.f32 0.0, %v3263_v22  ;;  %5805 = vmatpush.bf16.msrb.mxu1 %v8362_v60  ;;  %v3318_v22 = vand.u32 2147483647, %v10909_v2  ;;  %v3125_v46 = vadd.f32 %v10787_v50, %v10375_v51  ;;  %5864 = vmatpush.bf16.msrb.mxu3 %v8377_v18  ;;  %v7207_v51 = vor.u32 %v10870_v44, %v10867_v45  ;;  %v8376_v50 = vld [vmem:[%s11558_s1 + $0x108] sm:$0xff] }
 0x1c6   : > { %4560 = vmatmul.bf16.gmra.mxu2 %v7171_v11  ;;  %5756 = vmatmul.bf16.gmra.mxu3 %v7579_v61  ;;  %v7615_v60 = vor.u32 %v8329_v1, %v7614_v36 }
 0x1c7   : > { %v8463_v5 = vpop.eup %8462  ;;  %v3289_v59 = vmul.f32 1.442695, %v3279_v42  ;;  %v3210_v42 = vadd.f32 %v10784_v53, %v3181_v55  ;;  %vm3319_vm8 = vcmp.eq.f32.partialorder %v3318_v22, 8.507059e+37 }
 0x1c8   : > { %v10953_v32 = vpop.eup %8464  ;;  %v10956_v15 = vadd.f32 1.0, %v8463_v5  ;;  %v3235_v37 = vpop.f32.mrf.mxu0  ;;  %5835 = vmatpush.bf16.msrb.mxu2 %v8369_v0  ;;  %5777 = vmatpush.bf16.msrb.mxu0 %v8353_v14  ;;  %v8360_v5 = vld [vmem:[%s11558_s1 + $0x88] sm:$0xff]  ;;  %v3154_v14 = vadd.f32 %v10789_v8, %v3125_v46 }
 0x1c9   : > { %v4329_v63 = vpop.f32.mrf.mxu2  ;;  %v4358_v31 = vpop.f32.mrf.mxu3  ;;  %v3310_v57 = vmul.f32 %v10953_v32, %v10909_v2  ;;  %8466 = vpow2.f32 %v3289_v59  ;;  %v3236_v35 = vadd.f32 %v3235_v37, %v3207_v43  ;;  %vm3315_vm5 = vweird.f32 %v10953_v32  ;;  %5806 = vmatpush.bf16.msrb.mxu1 %v8361_v3  ;;  %5865 = vmatpush.bf16.msrb.mxu3 %v8376_v50 }
 0x1ca   : > { %v4330_v16 = vadd.f32 %v10851_v47, %v4329_v63  ;;  %v3264_v41 = vpop.f32.mrf.mxu1  ;;  %8468 = vrcp.f32 %v10956_v15  ;;  %vm11009_vm7 = vmor %vm3314_vm6, %vm3315_vm5  ;;  %v3321_v59 = vor.u32 1.1754944e-38, %v3320_v17  ;;  %v4918_v37 = vshrl.u32 %v10504_v49, 16 }
 0x1cb   : > { %v3311_v4 = vsub.f32 1.0, %v3310_v57  ;;  %v3265_v61 = vadd.f32 %v3264_v41, %v3236_v35  ;;  %v3128_v41 = vadd.f32 %v10796_v19, %v10431_v54  ;;  %v8351_v57 = vld [vmem:[%s11558_s1 + $0x40] sm:$0xff]  ;;  %v3333_v18 = vand.u32 2147483647, %v10956_v15 }
 0x1cc   : > { %v10970_v11 = vadd.f32 %v4358_v31, %v4330_v16  ;;  %5836 = vmatpush.bf16.msrb.mxu2 %v8368_v38  ;;  %5778 = vmatpush.bf16.msrb.mxu0 %v8352_v13  ;;  %v8375_v54 = vld [vmem:[%s11558_s1 + $0x100] sm:$0xff]  ;;  %v11045_v17 = vrot.slane %v4918_v37, 4  ;;  %vm3329_vm10 = vweird.f32 %v10956_v15 }
 0x1cd   : > { %v3312_v20 = vmul.f32 %v10953_v32, %v3311_v4  ;;  %v3280_v24 = vsub.f32 0.0, %v3265_v61  ;;  %5807 = vmatpush.bf16.msrb.mxu1 %v8360_v5  ;;  %v8359_v19 = vld [vmem:[%s11558_s1 + $0x80] sm:$0xff]  ;;  %v3335_v4 = vand.u32 2147483648, %v10956_v15  ;;  %v3157_v36 = vadd.f32 %v10798_v58, %v3128_v41  ;;  %5866 = vmatpush.bf16.msrb.mxu3 %v8375_v54  ;;  %v8234_v5 = vld [vmem:[#allocation2 + $0x118] sm:$0xf0] }
 0x1ce   : > { %vm3334_vm12 = vcmp.eq.f32.partialorder %v3333_v18, 8.507059e+37 }
 0x1cf   : > { %v8467_v30 = vpop.eup %8466  ;;  %v3313_v7 = vadd.f32 %v10953_v32, %v3312_v20  ;;  %v3291_v56 = vmul.f32 1.442695, %v3280_v24 }
 0x1d0   : > { %v11005_v43 = vpop.eup %8468  ;;  %v11013_v63 = vadd.f32 1.0, %v8467_v30  ;;  %v3238_v44 = vpop.f32.mrf.mxu0  ;;  %5779 = vmatpush.bf16.msrb.mxu0 %v8351_v57 }
 0x1d1   : > { %v4331_v53 = vpop.f32.mrf.mxu2  ;;  %v4360_v52 = vpop.f32.mrf.mxu3  ;;  %v3317_v33 = vsel %vm11009_vm7, %v10953_v32, %v3313_v7  ;;  %v3325_v16 = vmul.f32 %v11005_v43, %v10956_v15  ;;  %8470 = vpow2.f32 %v3291_v56  ;;  %v8367_v32 = vld [vmem:[%s11558_s1 + $0xc0] sm:$0xff]  ;;  %v3239_v0 = vadd.f32 %v3238_v44, %v3210_v42  ;;  %5808 = vmatpush.bf16.msrb.mxu1 %v8359_v19 }
 0x1d2   : > { %v4332_v45 = vadd.f32 %v10851_v47, %v4331_v53  ;;  %v3267_v31 = vpop.f32.mrf.mxu1  ;;  %v3322_v23 = vsel %vm3319_vm8, %v3321_v59, %v3317_v33  ;;  %8472 = vrcp.f32 %v11013_v63  ;;  %vm3330_vm9 = vweird.f32 %v11005_v43  ;;  %5837 = vmatpush.bf16.msrb.mxu2 %v8367_v32  ;;  %v8233_v53 = vld [vmem:[#allocation2 + $0x110] sm:$0xf0] }
 0x1d3   : > { %4507 = vmatmul.bf16.gmra.mxu0 %v7199_v28  ;;  %4536 = vmatmul.bf16.gmra.mxu1 %v7203_v25  ;;  %7092 = vst [vmem:[%s10243_s14 + $0x40] sm:$0xff] %v3322_v23  ;;  %v3326_v35 = vsub.f32 1.0, %v3325_v16  ;;  %v3268_v3 = vadd.f32 %v3267_v31, %v3239_v0  ;;  %v4921_v28 = vshll.u32 %v10504_v49, 16  ;;  %v3183_v25 = vadd.f32 %v10792_v12, %v3154_v14  ;;  %vm3331_vm11 = vmor %vm3329_vm10, %vm3330_vm9  ;;  %v11754_v16 = vld [vmem:[#allocation31_spill] sm:$0xff] }
 0x1d4   : > { %v11032_v55 = vadd.f32 %v4360_v52, %v4332_v45  ;;  %v3130_v49 = vadd.f32 %v10823_v6, %v10534_v29  ;;  %v3336_v12 = vor.u32 1.1754944e-38, %v3335_v4  ;;  %v3186_v29 = vadd.f32 %v10816_v34, %v3157_v36  ;;  %v7236_v52 = vld [vmem:[#allocation2 + $0x114] sm:$0xf0]  ;;  %v8338_v34 = vld [vmem:[#allocation2 + $0xf8] sm:$0xf0] }
 0x1d5   : > { %v3327_v61 = vmul.f32 %v11005_v43, %v3326_v35  ;;  %v3281_v22 = vsub.f32 0.0, %v3268_v3  ;;  %v3212_v56 = vadd.f32 %v10794_v21, %v3183_v25  ;;  %v3348_v59 = vand.u32 2147483647, %v11013_v63 }
 0x1d6   : > { %4565 = vmatmul.bf16.gmra.mxu2 %v7207_v51  ;;  %5761 = vmatmul.bf16.gmra.mxu3 %v7615_v60  ;;  %v3159_v2 = vadd.f32 %v10825_v39, %v3130_v49  ;;  %v3350_v21 = vand.u32 2147483648, %v11013_v63  ;;  %v7235_v31 = vor.u32 %v8233_v53, %v10933_v10  ;;  %v7239_v60 = vor.u32 %v10935_v26, %v7236_v52 }
 0x1d7   : > { %v8471_v8 = vpop.eup %8470  ;;  %v3328_v20 = vadd.f32 %v11005_v43, %v3327_v61  ;;  %v3293_v7 = vmul.f32 1.442695, %v3281_v22  ;;  %v11072_v33 = vrot.slane %v4921_v28, 5  ;;  %v3215_v37 = vadd.f32 %v11754_v16, %v3186_v29  ;;  %v11755_v22 = vld [vmem:[#allocation25_spill] sm:$0xff] }
 0x1d8   : > { %v8473_v42 = vpop.eup %8472  ;;  %v11056_v46 = vadd.f32 1.0, %v8471_v8  ;;  %v3240_v38 = vpop.f32.mrf.mxu0  ;;  %v3188_v41 = vadd.f32 %v10833_v9, %v3159_v2  ;;  %vm3344_vm14 = vweird.f32 %v11013_v63  ;;  %v7243_v35 = vor.u32 %v8234_v5, %v10951_v48 }
 0x1d9   : > { %v4334_v24 = vpop.f32.mrf.mxu2  ;;  %v4363_v1 = vpop.f32.mrf.mxu3  ;;  %v3332_v13 = vsel %vm3331_vm11, %v11005_v43, %v3328_v20  ;;  %v3340_v30 = vmul.f32 %v8473_v42, %v11013_v63  ;;  %v7650_v43 = vld [vmem:[#allocation2 + $0xd8] sm:$0xf]  ;;  %v3241_v45 = vadd.f32 %v3240_v38, %v3212_v56  ;;  %vm3345_vm13 = vweird.f32 %v8473_v42 }
 0x1da   : > { %v4335_v58 = vadd.f32 %v10851_v47, %v4334_v24  ;;  %v3269_v15 = vpop.f32.mrf.mxu1  ;;  %v3337_v6 = vsel %vm3334_vm12, %v3336_v12, %v3332_v13  ;;  %8474 = vrcp.f32 %v11056_v46  ;;  %v7651_v0 = vor.u32 %v8338_v34, %v7650_v43  ;;  %vm3346_vm15 = vmor %vm3344_vm14, %vm3345_vm13 }
 0x1db   : > { %7093 = vst [vmem:[%s10243_s14 + $0x48] sm:$0xff] %v3337_v6  ;;  %v3341_v51 = vsub.f32 1.0, %v3340_v30  ;;  %8476 = vpow2.f32 %v3293_v7  ;;  %v3270_v23 = vadd.f32 %v3269_v15, %v3241_v45  ;;  %vm3349_vm0 = vcmp.eq.f32.partialorder %v3348_v59, 8.507059e+37  ;;  %v11759_v6 = vld [vmem:[#allocation6_spill] sm:$0xff] }
 0x1dc   : > { %v11065_v50 = vadd.f32 %v4363_v1, %v4335_v58  ;;  %v3351_v10 = vor.u32 1.1754944e-38, %v3350_v21  ;;  %v3363_v63 = vand.u32 2147483647, %v11056_v46  ;;  %v4885_v24 = vpack.c.b16 %v11755_v22, %v11755_v22  ;;  %v11756_v1 = vld [vmem:[#allocation4_spill] sm:$0xff]  ;;  %v8313_v22 = vld [vmem:[#allocation2 + $0x30] sm:$0xf0] }
 0x1dd   : > { %v3342_v44 = vmul.f32 %v8473_v42, %v3341_v51  ;;  %v3282_v26 = vsub.f32 0.0, %v3270_v23  ;;  %v3217_v49 = vadd.f32 %v10835_v27, %v3188_v41  ;;  %v3365_v12 = vand.u32 2147483648, %v11056_v46 }
 0x1de   : > { %v4904_v15 = vshrl.u32 %v4885_v24, 16  ;;  %vm3359_vm3 = vweird.f32 %v11056_v46  ;;  %vm11094_vm4 = vcmp.eq.f32.partialorder %v3363_v63, 8.507059e+37  ;;  %v4907_v30 = vshll.u32 %v4885_v24, 16  ;;  %v7558_v63 = vld [vmem:[#allocation2 + $0x10] sm:$0xf] }
 0x1df   : > { %v3343_v39 = vadd.f32 %v8473_v42, %v3342_v44  ;;  %v3295_v25 = vmul.f32 1.442695, %v3282_v26  ;;  %v4884_v53 = vunpack.c.h.b16 %v11759_v6  ;;  %v3366_v5 = vor.u32 1.1754944e-38, %v3365_v12  ;;  %v11114_v26 = vld [vmem:[#allocation2 + $0x2c] sm:$0xf0] }
 0x1e0   : > { %v8475_v54 = vpop.eup %8474  ;;  %v3243_v14 = vpop.f32.mrf.mxu0  ;;  %v4906_v29 = vrot.slane %v4904_v15, 4  ;;  %v4909_v43 = vrot.slane %v4907_v30, 5 }
 0x1e1   : > { %v4336_v32 = vpop.f32.mrf.mxu2  ;;  %v4365_v57 = vpop.f32.mrf.mxu3  ;;  %v3347_v61 = vsel %vm3346_vm15, %v8473_v42, %v3343_v39  ;;  %v3355_v18 = vmul.f32 %v8475_v54, %v11056_v46  ;;  %v3244_v3 = vadd.f32 %v3243_v14, %v3215_v37  ;;  %v4887_v42 = vpack.c.b16 %v11756_v1, %v11756_v1  ;;  %v8390_v14 = vld [vmem:[%s11558_s1 + $0x178] sm:$0xff] }
 0x1e2   : > { %v4337_v19 = vadd.f32 %v10851_v47, %v4336_v32  ;;  %v3272_v4 = vpop.f32.mrf.mxu1  ;;  %v8477_v9 = vpop.eup %8476  ;;  %v3352_v48 = vsel %vm3349_vm0, %v3351_v10, %v3347_v61  ;;  %vm3360_vm1 = vweird.f32 %v8475_v54  ;;  %v4924_v46 = vor.u32 %v11072_v33, %v11045_v17  ;;  %v7550_v17 = vld [vmem:[#allocation2 + $0x8] sm:$0xf]  ;;  %v8312_v33 = vld [vmem:[#allocation2 + $0x28] sm:$0xf0]  ;;  %5888 = vmatpush.bf16.msra.mxu0 %v8390_v14 }
 0x1e3   : > { %4512 = vmatmul.bf16.gmra.mxu0 %v7235_v31  ;;  %4541 = vmatmul.bf16.gmra.mxu1 %v7239_v60  ;;  %v11081_v28 = vadd.f32 1.0, %v8477_v9  ;;  %7094 = vst [vmem:[%s10243_s14 + $0x50] sm:$0xff] %v3352_v48  ;;  %v3356_v36 = vsub.f32 1.0, %v3355_v18  ;;  %v3273_v20 = vadd.f32 %v3272_v4, %v3244_v3  ;;  %v4913_v7 = vshll.u32 %v4887_v42, 16  ;;  %vm3361_vm5 = vmor %vm3359_vm3, %vm3360_vm1  ;;  %v8307_v31 = vld [vmem:[#allocation2 + $0x4] sm:$0xf] }
 0x1e4   : > { %v11083_v8 = vadd.f32 %v4365_v57, %v4337_v19  ;;  %v4888_v34 = vpack.c.b16 %v4884_v53, %v4884_v53  ;;  %v7544_v60 = vld [vmem:[#allocation2 + $0x24] sm:$0xf0]  ;;  %v4910_v41 = vor.u32 %v4909_v43, %v4906_v29  ;;  %v11112_v10 = vld [vmem:[#allocation2 + $0xc] sm:$0xf]  ;;  %v8406_v19 = vld [vmem:[%s11558_s1 + $0x1f8] sm:$0xff]  ;;  %v7559_v43 = vor.u32 %v8313_v22, %v7558_v63 }
 0x1e5   : > { %8478 = vrcp.f32 %v11081_v28  ;;  %v3357_v58 = vmul.f32 %v8475_v54, %v3356_v36  ;;  %v3283_v38 = vsub.f32 0.0, %v3273_v20  ;;  %v4915_v23 = vrot.slane %v4913_v7, 5  ;;  %v8414_v4 = vld [vmem:[%s11558_s1 + $0x238] sm:$0xff]  ;;  %5946 = vmatpush.bf16.msra.mxu2 %v8406_v19  ;;  %v8405_v42 = vld [vmem:[%s11558_s1 + $0x1f0] sm:$0xff] }
 0x1e6   : > { %4570 = vmatmul.bf16.gmra.mxu2 %v7243_v35  ;;  %5766 = vmatmul.bf16.gmra.mxu3 %v7651_v0  ;;  %8480 = vpow2.f32 %v3295_v25  ;;  %v4925_v35 = vrot.slane %v4924_v46, 4  ;;  %v4927_v0 = vshll.u32 %v4888_v34, 16  ;;  %v4911_v61 = vrot.slane %v4910_v41, 4  ;;  %v8398_v3 = vld [vmem:[%s11558_s1 + $0x1b8] sm:$0xff]  ;;  %v8397_v29 = vld [vmem:[%s11558_s1 + $0x1b0] sm:$0xff]  ;;  %v8412_v34 = vld [vmem:[%s11558_s1 + $0x228] sm:$0xff] }
 0x1e7   : > { %v3358_v27 = vadd.f32 %v8475_v54, %v3357_v58  ;;  %v3297_v56 = vmul.f32 1.442695, %v3283_v38  ;;  %v7547_v18 = vor.u32 %v8307_v31, %v7544_v60  ;;  %v7551_v20 = vor.u32 %v8312_v33, %v7550_v17  ;;  %5975 = vmatpush.bf16.msra.mxu3 %v8414_v4  ;;  %5917 = vmatpush.bf16.msra.mxu1 %v8398_v3  ;;  %v8387_v41 = vld [vmem:[%s11558_s1 + $0x160] sm:$0xff]  ;;  %v7586_v3 = vld [vmem:[#allocation2 + $0x50] sm:$0xf] }
 0x1e8   : > { %v3245_v59 = vpop.f32.mrf.mxu0  ;;  %v4929_v25 = vrot.slane %v4927_v0, 5  ;;  %v3378_v24 = vand.u32 2147483647, %v11081_v28  ;;  %v3380_v1 = vand.u32 2147483648, %v11081_v28  ;;  %v4916_v15 = vsel %vm8755_vm2, %v4911_v61, %v4915_v23  ;;  %v8395_v0 = vld [vmem:[%s11558_s1 + $0x1a0] sm:$0xff] }
 0x1e9   : > { %v4339_v52 = vpop.f32.mrf.mxu2  ;;  %v4368_v51 = vpop.f32.mrf.mxu3  ;;  %v3362_v45 = vsel %vm3361_vm5, %v8475_v54, %v3358_v27  ;;  %8482 = vpow2.f32 %v3297_v56  ;;  %v3246_v44 = vadd.f32 %v3245_v59, %v3217_v49  ;;  %v8389_v49 = vld [vmem:[%s11558_s1 + $0x170] sm:$0xff]  ;;  %4937 = vst [vmem:[#allocation2 + $0x114] sm:$0xff] %v4916_v15  ;;  %5947 = vmatpush.bf16.msra.mxu2 %v8405_v42  ;;  %v8388_v59 = vld [vmem:[%s11558_s1 + $0x168] sm:$0xff]  ;;  %v8410_v42 = vld [vmem:[%s11558_s1 + $0x218] sm:$0xff] }
 0x1ea   : > { %v4340_v2 = vadd.f32 %v10851_v47, %v4339_v52  ;;  %v3274_v21 = vpop.f32.mrf.mxu1  ;;  %v3367_v37 = vsel %vm11094_vm4, %v3366_v5, %v3362_v45  ;;  %v4930_v13 = vsel %vm8755_vm2, %v4925_v35, %v4929_v25  ;;  %v8413_v56 = vld [vmem:[%s11558_s1 + $0x230] sm:$0xff]  ;;  %v7555_v5 = vor.u32 %v11112_v10, %v11114_v26  ;;  %5889 = vmatpush.bf16.msra.mxu0 %v8389_v49  ;;  %v8411_v35 = vld [vmem:[%s11558_s1 + $0x220] sm:$0xff]  ;;  %v8402_v25 = vld [vmem:[%s11558_s1 + $0x1d8] sm:$0xff] }
 0x1eb   : > { %v11103_v16 = vpop.eup %8478  ;;  %7095 = vst [vmem:[%s10243_s14 + $0x58] sm:$0xff] %v3367_v37  ;;  %v3275_v54 = vadd.f32 %v3274_v21, %v3246_v44  ;;  %vm3374_vm2 = vweird.f32 %v11081_v28  ;;  %vm3379_vm8 = vcmp.eq.f32.partialorder %v3378_v24, 8.507059e+37  ;;  %5976 = vmatpush.bf16.msra.mxu3 %v8413_v56  ;;  %5918 = vmatpush.bf16.msra.mxu1 %v8397_v29  ;;  %v8396_v44 = vld [vmem:[%s11558_s1 + $0x1a8] sm:$0xff]  ;;  %v8403_v37 = vld [vmem:[%s11558_s1 + $0x1e0] sm:$0xff]  ;;  %v7580_v61 = vld [vmem:[#allocation2 + $0x6c] sm:$0xf0] }
 0x1ec   : > { %v11107_v39 = vadd.f32 %v4368_v51, %v4340_v2  ;;  %v8481_v32 = vpop.eup %8480  ;;  %v3370_v57 = vmul.f32 %v11103_v16, %v11081_v28  ;;  %vm3375_vm6 = vweird.f32 %v11103_v16  ;;  %4938 = vst [vmem:[#allocation2 + $0x11c] sm:$0xf] %v4930_v13  ;;  %v3381_v2 = vor.u32 1.1754944e-38, %v3380_v1  ;;  %v8404_v28 = vld [vmem:[%s11558_s1 + $0x1e8] sm:$0xff]  ;;  %v8317_v1 = vld [vmem:[#allocation2 + $0x54] sm:$0xf] }
 0x1ed   : > { %v11125_v9 = vadd.f32 1.0, %v8481_v32  ;;  %v3284_v36 = vsub.f32 0.0, %v3275_v54  ;;  %vm11164_vm7 = vmor %vm3374_vm2, %vm3375_vm6  ;;  %5948 = vmatpush.bf16.msra.mxu2 %v8404_v28  ;;  %v8394_v49 = vld [vmem:[%s11558_s1 + $0x198] sm:$0xff]  ;;  %v8401_v29 = vld [vmem:[%s11558_s1 + $0x1d0] sm:$0xff] }
 0x1ee   : > { %v3371_v48 = vsub.f32 1.0, %v3370_v57  ;;  %5890 = vmatpush.bf16.msra.mxu0 %v8388_v59  ;;  %v11198_v57 = vld [vmem:[#allocation2 + $0x4c] sm:$0xf]  ;;  %v7588_v38 = vld [vmem:[#allocation2 + $0x74] sm:$0xf0] }
 0x1ef   : > { %8484 = vrcp.f32 %v11125_v9  ;;  %v8483_v12 = vpop.eup %8482  ;;  %v3299_v30 = vmul.f32 1.442695, %v3284_v36  ;;  %5977 = vmatpush.bf16.msra.mxu3 %v8412_v34  ;;  %5919 = vmatpush.bf16.msra.mxu1 %v8396_v44  ;;  %v3393_v10 = vand.u32 2147483647, %v11125_v9  ;;  %v3395_v26 = vand.u32 2147483648, %v11125_v9  ;;  %v8386_v36 = vld [vmem:[%s11558_s1 + $0x158] sm:$0xff] }
 0x1f0   : > { %v3372_v58 = vmul.f32 %v11103_v16, %v3371_v48  ;;  %v11151_v6 = vadd.f32 1.0, %v8483_v12  ;;  %v11154_v52 = vpop.f32.mrf.mxu0  ;;  %v8321_v48 = vld [vmem:[#allocation2 + $0x70] sm:$0xf0]  ;;  %vm3389_vm10 = vweird.f32 %v11125_v9  ;;  %v7583_v24 = vor.u32 %v11198_v57, %v7580_v61  ;;  %v8400_v57 = vld [vmem:[%s11558_s1 + $0x1c8] sm:$0xff] }
 0x1f1   : > { %v4341_v7 = vpop.f32.mrf.mxu2  ;;  %v4370_v27 = vpop.f32.mrf.mxu3  ;;  %8486 = vpow2.f32 %v3299_v30  ;;  %5949 = vmatpush.bf16.msra.mxu2 %v8403_v37  ;;  %vm3394_vm12 = vcmp.eq.f32.partialorder %v3393_v10, 8.507059e+37  ;;  %v3396_v12 = vor.u32 1.1754944e-38, %v3395_v26 }
 0x1f2   : > { %v4342_v53 = vadd.f32 %v10851_v47, %v4341_v7  ;;  %v11156_v51 = vpop.f32.mrf.mxu1  ;;  %v3373_v46 = vadd.f32 %v11103_v16, %v3372_v58  ;;  %8488 = vrcp.f32 %v11151_v6  ;;  %5891 = vmatpush.bf16.msra.mxu0 %v8387_v41  ;;  %v7587_v58 = vor.u32 %v8321_v48, %v7586_v3  ;;  %v7594_v7 = vld [vmem:[#allocation2 + $0x58] sm:$0xf]  ;;  %v8409_v47 = vld [vmem:[%s11558_s1 + $0x210] sm:$0xff] }
 0x1f3   : > { %5780 = vmatmul.bf16.vlgmr.msrb.gmra.mxu0 %v7547_v18  ;;  %5809 = vmatmul.bf16.vlgmr.msrb.gmra.mxu1 %v7551_v20  ;;  %v3408_v30 = vand.u32 2147483647, %v11151_v6  ;;  %vm3404_vm14 = vweird.f32 %v11151_v6  ;;  %v8325_v48 = vld [vmem:[#allocation2 + $0x94] sm:$0xf] }
 0x1f4   : > { %v3377_v21 = vsel %vm11164_vm7, %v11103_v16, %v3373_v46  ;;  %v11178_v45 = vadd.f32 %v4370_v27, %v4342_v53  ;;  %5978 = vmatpush.bf16.msra.mxu3 %v8411_v35  ;;  %5920 = vmatpush.bf16.msra.mxu1 %v8395_v0  ;;  %v8322_v27 = vld [vmem:[#allocation2 + $0x78] sm:$0xf0]  ;;  %v8385_v53 = vld [vmem:[%s11558_s1 + $0x150] sm:$0xff]  ;;  %v8384_v35 = vld [vmem:[%s11558_s1 + $0x148] sm:$0xff] }
 0x1f5   : > { %v8485_v31 = vpop.eup %8484  ;;  %v3382_v60 = vsel %vm3379_vm8, %v3381_v2, %v3377_v21  ;;  %5950 = vmatpush.bf16.msra.mxu2 %v8402_v25  ;;  %v7595_v34 = vor.u32 %v8322_v27, %v7594_v7  ;;  %vm3409_vm0 = vcmp.eq.f32.partialorder %v3408_v30, 8.507059e+37  ;;  %v8408_v0 = vld [vmem:[%s11558_s1 + $0x208] sm:$0xff]  ;;  %v7616_v25 = vld [vmem:[#allocation2 + $0xb4] sm:$0xf0] }
 0x1f6   : > { %5838 = vmatmul.bf16.vlgmr.msrb.gmra.mxu2 %v7555_v5  ;;  %5867 = vmatmul.bf16.vlgmr.msrb.gmra.mxu3 %v7559_v43  ;;  %7096 = vst [vmem:[%s10243_s14 + $0x60] sm:$0xff] %v3382_v60  ;;  %v3385_v16 = vmul.f32 %v8485_v31, %v11125_v9  ;;  %vm3390_vm9 = vweird.f32 %v8485_v31  ;;  %v3410_v9 = vand.u32 2147483648, %v11151_v6 }
 0x1f7   : > { %v8487_v23 = vpop.eup %8486  ;;  %vm3391_vm11 = vmor %vm3389_vm10, %vm3390_vm9  ;;  %5892 = vmatpush.bf16.msra.mxu0 %v8386_v36 }
 0x1f8   : > { %v3386_v17 = vsub.f32 1.0, %v3385_v16  ;;  %v11206_v54 = vpop.eup %8488  ;;  %v11210_v19 = vadd.f32 1.0, %v8487_v23  ;;  %v11212_v14 = vpop.f32.mrf.mxu0  ;;  %5979 = vmatpush.bf16.msra.mxu3 %v8410_v42  ;;  %5921 = vmatpush.bf16.msra.mxu1 %v8394_v49  ;;  %v3411_v28 = vor.u32 1.1754944e-38, %v3410_v9  ;;  %v8393_v16 = vld [vmem:[%s11558_s1 + $0x190] sm:$0xff]  ;;  %v8407_v42 = vld [vmem:[%s11558_s1 + $0x200] sm:$0xff] }
 0x1f9   : > { %v11194_v33 = vpop.f32.mrf.mxu2  ;;  %v11196_v32 = vpop.f32.mrf.mxu3  ;;  %v3400_v63 = vmul.f32 %v11206_v54, %v11151_v6  ;;  %vm3405_vm13 = vweird.f32 %v11206_v54  ;;  %v7591_v6 = vor.u32 %v8317_v1, %v7588_v38  ;;  %5951 = vmatpush.bf16.msra.mxu2 %v8401_v29  ;;  %v8383_v1 = vld [vmem:[%s11558_s1 + $0x140] sm:$0xff]  ;;  %v8326_v49 = vld [vmem:[#allocation2 + $0x9c] sm:$0xf] }
 0x1fa   : > { %v11214_v4 = vpop.f32.mrf.mxu1  ;;  %v3387_v18 = vmul.f32 %v8485_v31, %v3386_v17  ;;  %8490 = vrcp.f32 %v11210_v19  ;;  %vm3406_vm15 = vmor %vm3404_vm14, %vm3405_vm13  ;;  %v3425_v41 = vand.u32 2147483648, %v11210_v19  ;;  %v3423_v17 = vand.u32 2147483647, %v11210_v19  ;;  %v7630_v38 = vld [vmem:[#allocation2 + $0xa0] sm:$0xf] }
 0x1fb   : > { %v3401_v22 = vsub.f32 1.0, %v3400_v63  ;;  %5893 = vmatpush.bf16.msra.mxu0 %v8385_v53  ;;  %vm3419_vm3 = vweird.f32 %v11210_v19  ;;  %v8391_v53 = vld [vmem:[%s11558_s1 + $0x180] sm:$0xff] }
 0x1fc   : > { %v3388_v20 = vadd.f32 %v8485_v31, %v3387_v18  ;;  %5980 = vmatpush.bf16.msra.mxu3 %v8409_v47  ;;  %5922 = vmatpush.bf16.msra.mxu1 %v8393_v16  ;;  %v3426_v61 = vor.u32 1.1754944e-38, %v3425_v41  ;;  %vm3424_vm5 = vcmp.eq.f32.partialorder %v3423_v17, 8.507059e+37  ;;  %v7660_v41 = vld [vmem:[#allocation2 + $0x104] sm:$0xf0]  ;;  %v8340_v17 = vld [vmem:[#allocation2 + $0x108] sm:$0xf0] }
 0x1fd   : > { %v3402_v13 = vmul.f32 %v11206_v54, %v3401_v22  ;;  %5952 = vmatpush.bf16.msra.mxu2 %v8400_v57  ;;  %v8392_v22 = vld [vmem:[%s11558_s1 + $0x188] sm:$0xff] }
 0x1fe   : > { %v3392_v15 = vsel %vm3391_vm11, %v8485_v31, %v3388_v20  ;;  %v8330_v20 = vld [vmem:[#allocation2 + $0xb8] sm:$0xf0] }
 0x1ff   : > { %v3397_v56 = vsel %vm3394_vm12, %v3396_v12, %v3392_v15  ;;  %v3403_v5 = vadd.f32 %v11206_v54, %v3402_v13  ;;  %5894 = vmatpush.bf16.msra.mxu0 %v8384_v35  ;;  %v7619_v12 = vor.u32 %v8325_v48, %v7616_v25  ;;  %v8331_v15 = vld [vmem:[#allocation2 + $0xc0] sm:$0xf0]  ;;  %v4383_v48 = vadd.f32 %v11154_v52, %v10875_v62  ;;  %v7568_v62 = vld [vmem:[#allocation2 + $0x3c] sm:$0xf0] }
 0x200   : > { %7097 = vst [vmem:[%s10243_s14 + $0x68] sm:$0xff] %v3397_v56  ;;  %v8491_v2 = vpop.eup %8490  ;;  %v11256_v59 = vpop.f32.mrf.mxu0  ;;  %5981 = vmatpush.bf16.msra.mxu3 %v8408_v0  ;;  %5923 = vmatpush.bf16.msra.mxu1 %v8392_v22  ;;  %v7631_v29 = vor.u32 %v8331_v15, %v7630_v38  ;;  %v8309_v22 = vld [vmem:[#allocation2 + $0x14] sm:$0xf]  ;;  %v7574_v52 = vld [vmem:[#allocation2 + $0x20] sm:$0xf] }
 0x201   : > { %v11247_v43 = vpop.f32.mrf.mxu2  ;;  %v11249_v46 = vpop.f32.mrf.mxu3  ;;  %v3407_v44 = vsel %vm3406_vm15, %v11206_v54, %v3403_v5  ;;  %v3415_v31 = vmul.f32 %v8491_v2, %v11210_v19  ;;  %vm3420_vm1 = vweird.f32 %v8491_v2  ;;  %v7622_v19 = vld [vmem:[#allocation2 + $0x98] sm:$0xf]  ;;  %v8315_v15 = vld [vmem:[#allocation2 + $0x40] sm:$0xf0] }
 0x202   : > { %v11258_v21 = vpop.f32.mrf.mxu1  ;;  %v3412_v60 = vsel %vm3409_vm0, %v3411_v28, %v3407_v44  ;;  %vm3421_vm4 = vmor %vm3419_vm3, %vm3420_vm1  ;;  %v7623_v9 = vor.u32 %v8330_v20, %v7622_v19  ;;  %v7658_v44 = vld [vmem:[#allocation2 + $0xe0] sm:$0xf] }
 0x203   : > { %5785 = vmatmul.bf16.gmra.mxu0 %v7583_v24  ;;  %5814 = vmatmul.bf16.gmra.mxu1 %v7587_v58  ;;  %7098 = vst [vmem:[%s10243_s14 + $0x70] sm:$0xff] %v3412_v60  ;;  %v3416_v37 = vsub.f32 1.0, %v3415_v31  ;;  %v8399_v24 = vld [vmem:[%s11558_s1 + $0x1c0] sm:$0xff] }
 0x204   : > { %v7624_v58 = vld [vmem:[#allocation2 + $0xbc] sm:$0xf0]  ;;  %5953 = vmatpush.bf16.msra.mxu2 %v8399_v24  ;;  %5895 = vmatpush.bf16.msra.mxu0 %v8383_v1  ;;  %v8339_v31 = vld [vmem:[#allocation2 + $0x100] sm:$0xf0]  ;;  %v4412_v24 = vadd.f32 %v11156_v51, %v4383_v48  ;;  %v7560_v1 = vld [vmem:[#allocation2 + $0x34] sm:$0xf0] }
 0x205   : > { %v3417_v23 = vmul.f32 %v8491_v2, %v3416_v37  ;;  %5982 = vmatpush.bf16.msra.mxu3 %v8407_v42  ;;  %v7627_v56 = vor.u32 %v8326_v49, %v7624_v58  ;;  %5924 = vmatpush.bf16.msra.mxu1 %v8391_v53  ;;  %v8335_v60 = vld [vmem:[#allocation2 + $0xe4] sm:$0xf]  ;;  %v7659_v37 = vor.u32 %v8339_v31, %v7658_v44  ;;  %v7566_v42 = vld [vmem:[#allocation2 + $0x18] sm:$0xf]  ;;  %v8314_v49 = vld [vmem:[#allocation2 + $0x38] sm:$0xf0] }
 0x206   : > { %5843 = vmatmul.bf16.gmra.mxu2 %v7591_v6  ;;  %5872 = vmatmul.bf16.gmra.mxu3 %v7595_v34  ;;  %v8334_v6 = vld [vmem:[#allocation2 + $0xdc] sm:$0xf]  ;;  %v7652_v34 = vld [vmem:[#allocation2 + $0xfc] sm:$0xf0]  ;;  %v7563_v58 = vor.u32 %v8309_v22, %v7560_v1  ;;  %v7567_v38 = vor.u32 %v8314_v49, %v7566_v42  ;;  %v7575_v31 = vor.u32 %v8315_v15, %v7574_v52  ;;  %v8323_v1 = vld [vmem:[#allocation2 + $0x80] sm:$0xf0] }
 0x207   : > { %v3418_v54 = vadd.f32 %v8491_v2, %v3417_v23  ;;  %v7655_v16 = vor.u32 %v8334_v6, %v7652_v34  ;;  %v7666_v23 = vld [vmem:[#allocation2 + $0xe8] sm:$0xf]  ;;  %v7596_v48 = vld [vmem:[#allocation2 + $0x7c] sm:$0xf0] }
 0x208   : > { %v11282_v18 = vpop.f32.mrf.mxu0 }
 0x209   : > { %v11278_v10 = vpop.f32.mrf.mxu2  ;;  %v11280_v26 = vpop.f32.mrf.mxu3  ;;  %v3422_v3 = vsel %vm3421_vm4, %v8491_v2, %v3418_v54 }
 0x20a   : > { %v11284_v63 = vpop.f32.mrf.mxu1  ;;  %v3427_v36 = vsel %vm3424_vm5, %v3426_v61, %v3422_v3  ;;  %v7663_v61 = vor.u32 %v8335_v60, %v7660_v41  ;;  %v7667_v3 = vor.u32 %v8340_v17, %v7666_v23 }
 0x20b   : > { %7099 = vst [vmem:[%s10243_s14 + $0x78] sm:$0xff] %v3427_v36 }
 0x210   : > { %v11303_v7 = vpop.f32.mrf.mxu0 }
 0x211   : > { %v11299_v13 = vpop.f32.mrf.mxu2  ;;  %v11301_v30 = vpop.f32.mrf.mxu3 }
 0x212   : > { %v11305_v27 = vpop.f32.mrf.mxu1 }
 0x213   : > { %5790 = vmatmul.bf16.gmra.mxu0 %v7619_v12  ;;  %5819 = vmatmul.bf16.gmra.mxu1 %v7623_v9  ;;  %v4441_v12 = vadd.f32 %v11194_v33, %v4412_v24  ;;  %v8310_v9 = vld [vmem:[#allocation2 + $0x1c] sm:$0xf]  ;;  %v7602_v24 = vld [vmem:[#allocation2 + $0x60] sm:$0xf] }
 0x214   : > { %v7571_v44 = vor.u32 %v8310_v9, %v7568_v62  ;;  %v7604_v9 = vld [vmem:[#allocation2 + $0x84] sm:$0xf0] }
 0x215   : > { %v4470_v51 = vadd.f32 %v11196_v32, %v4441_v12  ;;  %v7603_v12 = vor.u32 %v8323_v1, %v7602_v24  ;;  %v8328_v1 = vld [vmem:[#allocation2 + $0xac] sm:$0xf] }
 0x216   : > { %5848 = vmatmul.bf16.gmra.mxu2 %v7627_v56  ;;  %5877 = vmatmul.bf16.gmra.mxu3 %v7631_v29  ;;  %v4385_v56 = vadd.f32 %v11212_v14, %v10926_v40  ;;  %v4388_v40 = vadd.f32 %v11256_v59, %v10970_v11  ;;  %v8319_v59 = vld [vmem:[#allocation2 + $0x64] sm:$0xf] }
 0x218   : > { %v11314_v2 = vpop.f32.mrf.mxu0  ;;  %v4414_v33 = vadd.f32 %v11214_v4, %v4385_v56  ;;  %v4417_v4 = vadd.f32 %v11258_v21, %v4388_v40 }
 0x219   : > { %v11310_v5 = vpop.f32.mrf.mxu2  ;;  %v11312_v47 = vpop.f32.mrf.mxu3 }
 0x21a   : > { %v11316_v28 = vpop.f32.mrf.mxu1  ;;  %v4446_v42 = vadd.f32 %v11278_v10, %v4417_v4 }
 0x21c   : > { %v4475_v15 = vadd.f32 %v11280_v26, %v4446_v42  ;;  %v4393_v26 = vadd.f32 %v11303_v7, %v11065_v50  ;;  %v8332_v50 = vld [vmem:[#allocation2 + $0xc8] sm:$0xf0]  ;;  %v7640_v42 = vld [vmem:[#allocation2 + $0xcc] sm:$0xf0] }
 0x220   : > { %v11322_v0 = vpop.f32.mrf.mxu0 }
 0x221   : > { %v11318_v57 = vpop.f32.mrf.mxu2  ;;  %v11320_v35 = vpop.f32.mrf.mxu3 }
 0x222   : > { %v11324_v54 = vpop.f32.mrf.mxu1 }
 0x223   : > { %5795 = vmatmul.bf16.gmra.mxu0 %v7655_v16  ;;  %5824 = vmatmul.bf16.gmra.mxu1 %v7659_v37  ;;  %v4443_v16 = vadd.f32 %v11247_v43, %v4414_v33 }
 0x225   : > { %v4472_v32 = vadd.f32 %v11249_v46, %v4443_v16  ;;  %v8324_v46 = vld [vmem:[#allocation2 + $0x88] sm:$0xf0] }
 0x226   : > { %5853 = vmatmul.bf16.gmra.mxu2 %v7663_v61  ;;  %5882 = vmatmul.bf16.gmra.mxu3 %v7667_v3  ;;  %v8318_v3 = vld [vmem:[#allocation2 + $0x5c] sm:$0xf] }
 0x227   : > { %v7599_v49 = vor.u32 %v8318_v3, %v7596_v48  ;;  %v7632_v3 = vld [vmem:[#allocation2 + $0xc4] sm:$0xf0] }
 0x228   : > { %v11332_v19 = vpop.f32.mrf.mxu0 }
 0x229   : > { %v11328_v25 = vpop.f32.mrf.mxu2  ;;  %v11330_v36 = vpop.f32.mrf.mxu3 }
 0x22a   : > { %v11334_v20 = vpop.f32.mrf.mxu1 }
 0x230   : > { %v4498_v6 = vpop.f32.mrf.mxu0 }
 0x231   : > { %v11340_v29 = vpop.f32.mrf.mxu2  ;;  %v11342_v53 = vpop.f32.mrf.mxu3  ;;  %v4499_v60 = vadd.f32 %v4498_v6, %v4470_v51  ;;  %v7607_v6 = vor.u32 %v8319_v59, %v7604_v9  ;;  %v8333_v9 = vld [vmem:[#allocation2 + $0xd0] sm:$0xf0] }
 0x232   : > { %v4527_v34 = vpop.f32.mrf.mxu1 }
 0x233   : > { %5896 = vmatmul.bf16.vlgmr.msra.gmra.mxu0 %v7563_v58  ;;  %5925 = vmatmul.bf16.vlgmr.msra.gmra.mxu1 %v7567_v38  ;;  %v4528_v14 = vadd.f32 %v4527_v34, %v4499_v60  ;;  %v7610_v58 = vld [vmem:[#allocation2 + $0x68] sm:$0xf]  ;;  %v4390_v38 = vadd.f32 %v11282_v18, %v11032_v55 }
 0x234   : > { %v7611_v34 = vor.u32 %v8324_v46, %v7610_v58 }
 0x236   : > { %5954 = vmatmul.bf16.vlgmr.msra.gmra.mxu2 %v7571_v44  ;;  %5983 = vmatmul.bf16.vlgmr.msra.gmra.mxu3 %v7575_v31  ;;  %v4419_v44 = vadd.f32 %v11284_v63, %v4390_v38 }
 0x238   : > { %v4500_v17 = vpop.f32.mrf.mxu0  ;;  %v4448_v55 = vadd.f32 %v11299_v13, %v4419_v44  ;;  %v4422_v13 = vadd.f32 %v11305_v27, %v4393_v26 }
 0x239   : > { %v4556_v37 = vpop.f32.mrf.mxu2  ;;  %v11349_v41 = vpop.f32.mrf.mxu3  ;;  %v4501_v43 = vadd.f32 %v4500_v17, %v4472_v32 }
 0x23a   : > { %v4557_v23 = vadd.f32 %v4556_v37, %v4528_v14  ;;  %v4529_v61 = vpop.f32.mrf.mxu1  ;;  %v4477_v63 = vadd.f32 %v11301_v30, %v4448_v55  ;;  %v4451_v7 = vadd.f32 %v11310_v5, %v4422_v13  ;;  %v4395_v30 = vadd.f32 %v11314_v2, %v11083_v8 }
 0x23b   : > { %v4530_v62 = vadd.f32 %v4529_v61, %v4501_v43  ;;  %v8327_v61 = vld [vmem:[#allocation2 + $0xa4] sm:$0xf]  ;;  %v7643_v2 = vor.u32 %v8328_v1, %v7640_v42  ;;  %v7674_v42 = vld [vmem:[#allocation2 + $0xf0] sm:$0xf] }
 0x23c   : > { %v4576_v22 = vsub.f32 0.0, %v4557_v23  ;;  %v4480_v38 = vadd.f32 %v11312_v47, %v4451_v7  ;;  %v7668_v7 = vld [vmem:[#allocation2 + $0x10c] sm:$0xf0] }
 0x23e   : > { %v4584_v11 = vmul.f32 1.442695, %v4576_v22  ;;  %v7638_v22 = vld [vmem:[#allocation2 + $0xa8] sm:$0xf] }
 0x23f   : > { %v7639_v27 = vor.u32 %v8332_v50, %v7638_v22 }
 0x240   : > { %8492 = vpow2.f32 %v4584_v11  ;;  %v4503_v51 = vpop.f32.mrf.mxu0 }
 0x241   : > { %v4558_v52 = vpop.f32.mrf.mxu2  ;;  %v11356_v21 = vpop.f32.mrf.mxu3  ;;  %v4504_v33 = vadd.f32 %v4503_v51, %v4475_v15 }
 0x242   : > { %v4559_v56 = vadd.f32 %v4558_v52, %v4530_v62  ;;  %v4532_v10 = vpop.f32.mrf.mxu1 }
 0x243   : > { %5901 = vmatmul.bf16.gmra.mxu0 %v7599_v49  ;;  %5930 = vmatmul.bf16.gmra.mxu1 %v7603_v12  ;;  %v4533_v40 = vadd.f32 %v4532_v10, %v4504_v33  ;;  %v7635_v49 = vor.u32 %v8327_v61, %v7632_v3  ;;  %v7646_v12 = vld [vmem:[#allocation2 + $0xb0] sm:$0xf]  ;;  %v4424_v10 = vadd.f32 %v11316_v28, %v4395_v30 }
 0x244   : > { %v4577_v31 = vsub.f32 0.0, %v4559_v56  ;;  %v7647_v51 = vor.u32 %v8333_v9, %v7646_v12  ;;  %v4398_v28 = vadd.f32 %v11322_v0, %v11107_v39  ;;  %v4400_v30 = vadd.f32 %v11332_v19, %v11178_v45 }
 0x246   : > { %v8493_v60 = vpop.eup %8492  ;;  %v4586_v18 = vmul.f32 1.442695, %v4577_v31  ;;  %5959 = vmatmul.bf16.gmra.mxu2 %v7607_v6  ;;  %5988 = vmatmul.bf16.gmra.mxu3 %v7611_v34 }
 0x247   : > { %v4600_v16 = vadd.f32 1.0, %v8493_v60  ;;  %v4453_v60 = vadd.f32 %v11318_v57, %v4424_v10 }
 0x248   : > { %8494 = vpow2.f32 %v4586_v18  ;;  %v4505_v23 = vpop.f32.mrf.mxu0 }
 0x249   : > { %8496 = vrcp.f32 %v4600_v16  ;;  %v4561_v14 = vpop.f32.mrf.mxu2  ;;  %v11363_v37 = vpop.f32.mrf.mxu3  ;;  %v4506_v4 = vadd.f32 %v4505_v23, %v4477_v63  ;;  %v4617_v6 = vand.u32 2147483647, %v4600_v16  ;;  %v4619_v34 = vand.u32 2147483648, %v4600_v16 }
 0x24a   : > { %v4562_v32 = vadd.f32 %v4561_v14, %v4533_v40  ;;  %v4534_v17 = vpop.f32.mrf.mxu1  ;;  %vm4613_vm2 = vweird.f32 %v4600_v16  ;;  %v4482_v13 = vadd.f32 %v11320_v35, %v4453_v60 }
 0x24b   : > { %v4535_v46 = vadd.f32 %v4534_v17, %v4506_v4  ;;  %vm4618_vm8 = vcmp.eq.f32.partialorder %v4617_v6, 8.507059e+37  ;;  %v4620_v40 = vor.u32 1.1754944e-38, %v4619_v34  ;;  %v4427_v4 = vadd.f32 %v11324_v54, %v4398_v28 }
 0x24c   : > { %v4578_v48 = vsub.f32 0.0, %v4562_v32 }
 0x24d   : > { %v4456_v35 = vadd.f32 %v11328_v25, %v4427_v4 }
 0x24e   : > { %v8495_v43 = vpop.eup %8494  ;;  %v4588_v24 = vmul.f32 1.442695, %v4578_v48  ;;  %v8336_v48 = vld [vmem:[#allocation2 + $0xec] sm:$0xf] }
 0x24f   : > { %v8497_v11 = vpop.eup %8496  ;;  %v11370_v59 = vadd.f32 1.0, %v8495_v43  ;;  %v7671_v9 = vor.u32 %v8336_v48, %v7668_v7 }
 0x250   : > { %v4609_v58 = vmul.f32 %v8497_v11, %v4600_v16  ;;  %8498 = vpow2.f32 %v4588_v24  ;;  %v4508_v56 = vpop.f32.mrf.mxu0  ;;  %vm4614_vm6 = vweird.f32 %v8497_v11 }
 0x251   : > { %8500 = vrcp.f32 %v11370_v59  ;;  %v4563_v5 = vpop.f32.mrf.mxu2  ;;  %v11374_v62 = vpop.f32.mrf.mxu3  ;;  %v4509_v31 = vadd.f32 %v4508_v56, %v4480_v38  ;;  %vm4615_vm7 = vmor %vm4613_vm2, %vm4614_vm6  ;;  %v4632_v22 = vand.u32 2147483647, %v11370_v59  ;;  %v4634_v50 = vand.u32 2147483648, %v11370_v59 }
 0x252   : > { %v4610_v52 = vsub.f32 1.0, %v4609_v58  ;;  %v4564_v15 = vadd.f32 %v4563_v5, %v4535_v46  ;;  %v4537_v8 = vpop.f32.mrf.mxu1  ;;  %vm4628_vm10 = vweird.f32 %v11370_v59  ;;  %v7676_v58 = vld [vmem:[#allocation2 + $0x114] sm:$0xf0] }
 0x253   : > { %5906 = vmatmul.bf16.gmra.mxu0 %v7635_v49  ;;  %5935 = vmatmul.bf16.gmra.mxu1 %v7639_v27  ;;  %v4538_v57 = vadd.f32 %v4537_v8, %v4509_v31  ;;  %v8337_v49 = vld [vmem:[#allocation2 + $0xf4] sm:$0xf]  ;;  %v7682_v46 = vld [vmem:[#allocation2 + $0xf8] sm:$0xf]  ;;  %vm4633_vm12 = vcmp.eq.f32.partialorder %v4632_v22, 8.507059e+37  ;;  %v4635_v5 = vor.u32 1.1754944e-38, %v4634_v50 }
 0x254   : > { %v4611_v44 = vmul.f32 %v8497_v11, %v4610_v52  ;;  %v4579_v47 = vsub.f32 0.0, %v4564_v15  ;;  %v8342_v15 = vld [vmem:[#allocation2 + $0x118] sm:$0xf0] }
 0x255   : > { %v7683_v31 = vor.u32 %v8342_v15, %v7682_v46 }
 0x256   : > { %v8499_v33 = vpop.eup %8498  ;;  %v4612_v55 = vadd.f32 %v8497_v11, %v4611_v44  ;;  %v4590_v18 = vmul.f32 1.442695, %v4579_v47  ;;  %5964 = vmatmul.bf16.gmra.mxu2 %v7643_v2  ;;  %5993 = vmatmul.bf16.gmra.mxu3 %v7647_v51  ;;  %v7679_v47 = vor.u32 %v8337_v49, %v7676_v58 }
 0x257   : > { %v8501_v26 = vpop.eup %8500  ;;  %v11380_v14 = vadd.f32 1.0, %v8499_v33  ;;  %v4429_v33 = vadd.f32 %v11334_v20, %v4400_v30 }
 0x258   : > { %v4616_v63 = vsel %vm4615_vm7, %v8497_v11, %v4612_v55  ;;  %v4624_v32 = vmul.f32 %v8501_v26, %v11370_v59  ;;  %8502 = vpow2.f32 %v4590_v18  ;;  %v4510_v61 = vpop.f32.mrf.mxu0  ;;  %vm4629_vm9 = vweird.f32 %v8501_v26  ;;  %v8341_v11 = vld [vmem:[#allocation2 + $0x110] sm:$0xf0] }
 0x259   : > { %v4621_v23 = vsel %vm4618_vm8, %v4620_v40, %v4616_v63  ;;  %8504 = vrcp.f32 %v11380_v14  ;;  %v4566_v16 = vpop.f32.mrf.mxu2  ;;  %v11384_v17 = vpop.f32.mrf.mxu3  ;;  %v4511_v1 = vadd.f32 %v4510_v61, %v4482_v13  ;;  %vm4630_vm11 = vmor %vm4628_vm10, %vm4629_vm9  ;;  %v7675_v25 = vor.u32 %v8341_v11, %v7674_v42 }
 0x25a   : > { %7532 = vst [vmem:[%s10243_s14 + $0x80] sm:$0xff] %v4621_v23  ;;  %v4625_v39 = vsub.f32 1.0, %v4624_v32  ;;  %v4567_v0 = vadd.f32 %v4566_v16, %v4538_v57  ;;  %v4539_v3 = vpop.f32.mrf.mxu1  ;;  %v4485_v59 = vadd.f32 %v11330_v36, %v4456_v35  ;;  %v4647_v60 = vand.u32 2147483647, %v11380_v14 }
 0x25b   : > { %v4540_v56 = vadd.f32 %v4539_v3, %v4511_v1  ;;  %v4649_v55 = vand.u32 2147483648, %v11380_v14  ;;  %v4458_v40 = vadd.f32 %v11340_v29, %v4429_v33  ;;  %vm4643_vm14 = vweird.f32 %v11380_v14 }
 0x25c   : > { %v4626_v43 = vmul.f32 %v8501_v26, %v4625_v39  ;;  %v4580_v24 = vsub.f32 0.0, %v4567_v0  ;;  %vm4648_vm0 = vcmp.eq.f32.partialorder %v4647_v60, 8.507059e+37 }
 0x25d   : > { %v4650_v57 = vor.u32 1.1754944e-38, %v4649_v55 }
 0x25e   : > { %v8503_v27 = vpop.eup %8502  ;;  %v4627_v12 = vadd.f32 %v8501_v26, %v4626_v43  ;;  %v4592_v54 = vmul.f32 1.442695, %v4580_v24 }
 0x25f   : > { %v8505_v38 = vpop.eup %8504  ;;  %v11396_v52 = vadd.f32 1.0, %v8503_v27 }
 0x260   : > { %v4631_v45 = vsel %vm4630_vm11, %v8501_v26, %v4627_v12  ;;  %v4639_v19 = vmul.f32 %v8505_v38, %v11380_v14  ;;  %8506 = vpow2.f32 %v4592_v54  ;;  %v4513_v34 = vpop.f32.mrf.mxu0  ;;  %vm4644_vm13 = vweird.f32 %v8505_v38 }
 0x261   : > { %v4636_v8 = vsel %vm4633_vm12, %v4635_v5, %v4631_v45  ;;  %8508 = vrcp.f32 %v11396_v52  ;;  %v4568_v2 = vpop.f32.mrf.mxu2  ;;  %v11401_v51 = vpop.f32.mrf.mxu3  ;;  %v4514_v26 = vadd.f32 %v4513_v34, %v4485_v59  ;;  %vm4645_vm15 = vmor %vm4643_vm14, %vm4644_vm13  ;;  %v4487_v14 = vadd.f32 %v11342_v53, %v4458_v40 }
 0x262   : > { %7533 = vst [vmem:[%s10243_s14 + $0x88] sm:$0xff] %v4636_v8  ;;  %v4640_v10 = vsub.f32 1.0, %v4639_v19  ;;  %v4569_v6 = vadd.f32 %v4568_v2, %v4540_v56  ;;  %v4542_v44 = vpop.f32.mrf.mxu1  ;;  %v4662_v50 = vand.u32 2147483647, %v11396_v52  ;;  %v4664_v7 = vand.u32 2147483648, %v11396_v52 }
 0x263   : > { %5911 = vmatmul.bf16.gmra.mxu0 %v7671_v9  ;;  %5940 = vmatmul.bf16.gmra.mxu1 %v7675_v25  ;;  %v4543_v39 = vadd.f32 %v4542_v44, %v4514_v26  ;;  %vm4658_vm3 = vweird.f32 %v11396_v52 }
 0x264   : > { %v4641_v36 = vmul.f32 %v8505_v38, %v4640_v10  ;;  %v4581_v18 = vsub.f32 0.0, %v4569_v6  ;;  %vm4663_vm5 = vcmp.eq.f32.partialorder %v4662_v50, 8.507059e+37  ;;  %v4665_v30 = vor.u32 1.1754944e-38, %v4664_v7 }
 0x266   : > { %v8507_v28 = vpop.eup %8506  ;;  %v4642_v63 = vadd.f32 %v8505_v38, %v4641_v36  ;;  %v4594_v32 = vmul.f32 1.442695, %v4581_v18  ;;  %5969 = vmatmul.bf16.gmra.mxu2 %v7679_v47  ;;  %5998 = vmatmul.bf16.gmra.mxu3 %v7683_v31 }
 0x267   : > { %v8509_v20 = vpop.eup %8508  ;;  %v4604_v23 = vadd.f32 1.0, %v8507_v28 }
 0x268   : > { %v4646_v16 = vsel %vm4645_vm15, %v8505_v38, %v4642_v63  ;;  %v4654_v13 = vmul.f32 %v8509_v20, %v11396_v52  ;;  %8510 = vpow2.f32 %v4594_v32  ;;  %v4515_v4 = vpop.f32.mrf.mxu0  ;;  %vm4659_vm1 = vweird.f32 %v8509_v20 }
 0x269   : > { %v4651_v0 = vsel %vm4648_vm0, %v4650_v57, %v4646_v16  ;;  %8512 = vrcp.f32 %v4604_v23  ;;  %v4571_v29 = vpop.f32.mrf.mxu2  ;;  %v11410_v61 = vpop.f32.mrf.mxu3  ;;  %v4516_v1 = vadd.f32 %v4515_v4, %v4487_v14  ;;  %vm4660_vm4 = vmor %vm4658_vm3, %vm4659_vm1  ;;  %v4679_v15 = vand.u32 2147483648, %v4604_v23 }
 0x26a   : > { %7534 = vst [vmem:[%s10243_s14 + $0x90] sm:$0xff] %v4651_v0  ;;  %v4655_v3 = vsub.f32 1.0, %v4654_v13  ;;  %v4572_v48 = vadd.f32 %v4571_v29, %v4543_v39  ;;  %v4544_v22 = vpop.f32.mrf.mxu1  ;;  %v4677_v19 = vand.u32 2147483647, %v4604_v23  ;;  %vm4673_vm2 = vweird.f32 %v4604_v23 }
 0x26b   : > { %v4545_v54 = vadd.f32 %v4544_v22, %v4516_v1  ;;  %v4680_v6 = vor.u32 1.1754944e-38, %v4679_v15 }
 0x26c   : > { %v4656_v43 = vmul.f32 %v8509_v20, %v4655_v3  ;;  %v4582_v24 = vsub.f32 0.0, %v4572_v48  ;;  %vm4678_vm8 = vcmp.eq.f32.partialorder %v4677_v19, 8.507059e+37 }
 0x26e   : > { %v8511_v42 = vpop.eup %8510  ;;  %v4657_v11 = vadd.f32 %v8509_v20, %v4656_v43  ;;  %v4596_v35 = vmul.f32 1.442695, %v4582_v24 }
 0x26f   : > { %v8513_v53 = vpop.eup %8512  ;;  %v4605_v49 = vadd.f32 1.0, %v8511_v42 }
 0x270   : > { %v4661_v27 = vsel %vm4660_vm4, %v8509_v20, %v4657_v11  ;;  %v4669_v12 = vmul.f32 %v8513_v53, %v4604_v23  ;;  %8514 = vpow2.f32 %v4596_v35  ;;  %v11420_v25 = vpop.f32.mrf.mxu0  ;;  %vm4674_vm6 = vweird.f32 %v8513_v53 }
 0x271   : > { %v4666_v9 = vsel %vm4663_vm5, %v4665_v30, %v4661_v27  ;;  %8516 = vrcp.f32 %v4605_v49  ;;  %v4573_v58 = vpop.f32.mrf.mxu2  ;;  %v11417_v46 = vpop.f32.mrf.mxu3  ;;  %vm4675_vm7 = vmor %vm4673_vm2, %vm4674_vm6  ;;  %v4694_v26 = vand.u32 2147483648, %v4605_v49  ;;  %v4692_v40 = vand.u32 2147483647, %v4605_v49 }
 0x272   : > { %7535 = vst [vmem:[%s10243_s14 + $0x98] sm:$0xff] %v4666_v9  ;;  %v4670_v38 = vsub.f32 1.0, %v4669_v12  ;;  %v4574_v5 = vadd.f32 %v4573_v58, %v4545_v54  ;;  %v11422_v52 = vpop.f32.mrf.mxu1  ;;  %vm4688_vm10 = vweird.f32 %v4605_v49 }
 0x273   : > { %v4695_v57 = vor.u32 1.1754944e-38, %v4694_v26  ;;  %vm4693_vm12 = vcmp.eq.f32.partialorder %v4692_v40, 8.507059e+37 }
 0x274   : > { %v4671_v45 = vmul.f32 %v8513_v53, %v4670_v38  ;;  %v4583_v56 = vsub.f32 0.0, %v4574_v5 }
 0x276   : > { %v8515_v59 = vpop.eup %8514  ;;  %v4672_v8 = vadd.f32 %v8513_v53, %v4671_v45  ;;  %v4598_v2 = vmul.f32 1.442695, %v4583_v56 }
 0x277   : > { %v8517_v10 = vpop.eup %8516  ;;  %v4606_v34 = vadd.f32 1.0, %v8515_v59 }
 0x278   : > { %v4676_v44 = vsel %vm4675_vm7, %v8513_v53, %v4672_v8  ;;  %v4684_v47 = vmul.f32 %v8517_v10, %v4605_v49  ;;  %8518 = vpow2.f32 %v4598_v2  ;;  %v11429_v36 = vpop.f32.mrf.mxu0  ;;  %vm4689_vm9 = vweird.f32 %v8517_v10 }
 0x279   : > { %v4681_v31 = vsel %vm4678_vm8, %v4680_v6, %v4676_v44  ;;  %8520 = vrcp.f32 %v4606_v34  ;;  %v11424_v33 = vpop.f32.mrf.mxu2  ;;  %v11426_v60 = vpop.f32.mrf.mxu3  ;;  %vm4690_vm11 = vmor %vm4688_vm10, %vm4689_vm9  ;;  %v4709_v4 = vand.u32 2147483648, %v4606_v34  ;;  %v4707_v50 = vand.u32 2147483647, %v4606_v34 }
 0x27a   : > { %7536 = vst [vmem:[%s10243_s14 + $0xa0] sm:$0xff] %v4681_v31  ;;  %v4685_v55 = vsub.f32 1.0, %v4684_v47  ;;  %v11431_v18 = vpop.f32.mrf.mxu1  ;;  %vm4703_vm14 = vweird.f32 %v4606_v34  ;;  %v11469_v47 = vld [vmem:[%s11559_s2] ss:$0 sm:$0xff] }
 0x27b   : > { %v4710_v24 = vor.u32 1.1754944e-38, %v4709_v4  ;;  %vm4708_vm0 = vcmp.eq.f32.partialorder %v4707_v50, 8.507059e+37  ;;  %v5753_v26 = vadd.f32 %v11469_v47, %v11349_v41 }
 0x27c   : > { %v4686_v28 = vmul.f32 %v8517_v10, %v4685_v55 }
 0x27e   : > { %v8519_v63 = vpop.eup %8518  ;;  %v4687_v32 = vadd.f32 %v8517_v10, %v4686_v28  ;;  %v5782_v28 = vadd.f32 %v11420_v25, %v5753_v26 }
 0x27f   : > { %v8521_v20 = vpop.eup %8520  ;;  %v4607_v23 = vadd.f32 1.0, %v8519_v63 }
 0x280   : > { %v4691_v16 = vsel %vm4690_vm11, %v8517_v10, %v4687_v32  ;;  %v4699_v13 = vmul.f32 %v8521_v20, %v4606_v34  ;;  %v11438_v3 = vpop.f32.mrf.mxu0  ;;  %vm4704_vm13 = vweird.f32 %v8521_v20 }
 0x281   : > { %v4696_v39 = vsel %vm4693_vm12, %v4695_v57, %v4691_v16  ;;  %8522 = vrcp.f32 %v4607_v23  ;;  %v11433_v0 = vpop.f32.mrf.mxu2  ;;  %v11435_v29 = vpop.f32.mrf.mxu3  ;;  %vm4705_vm15 = vmor %vm4703_vm14, %vm4704_vm13  ;;  %v4724_v12 = vand.u32 2147483648, %v4607_v23  ;;  %v4722_v9 = vand.u32 2147483647, %v4607_v23 }
 0x282   : > { %7537 = vst [vmem:[%s10243_s14 + $0xa8] sm:$0xff] %v4696_v39  ;;  %v4700_v14 = vsub.f32 1.0, %v4699_v13  ;;  %v11440_v48 = vpop.f32.mrf.mxu1  ;;  %vm4718_vm3 = vweird.f32 %v4607_v23  ;;  %v5811_v57 = vadd.f32 %v11422_v52, %v5782_v28  ;;  %v5758_v52 = vadd.f32 %v11469_v47, %v11363_v37 }
 0x283   : > { %v4725_v38 = vor.u32 1.1754944e-38, %v4724_v12  ;;  %vm4723_vm5 = vcmp.eq.f32.partialorder %v4722_v9, 8.507059e+37  ;;  %v5760_v12 = vadd.f32 %v11469_v47, %v11374_v62 }
 0x284   : > { %v4701_v22 = vmul.f32 %v8521_v20, %v4700_v14  ;;  %v5840_v16 = vadd.f32 %v11424_v33, %v5811_v57  ;;  %v5787_v33 = vadd.f32 %v11438_v3, %v5758_v52 }
 0x286   : > { %v4702_v7 = vadd.f32 %v8521_v20, %v4701_v22  ;;  %v5869_v39 = vadd.f32 %v11426_v60, %v5840_v16 }
 0x287   : > { %v8523_v43 = vpop.eup %8522 }
 0x288   : > { %v4706_v1 = vsel %vm4705_vm15, %v8521_v20, %v4702_v7  ;;  %v4714_v42 = vmul.f32 %v8523_v43, %v4607_v23  ;;  %v5788_v49 = vpop.f32.mrf.mxu0  ;;  %vm4719_vm1 = vweird.f32 %v8523_v43  ;;  %v5755_v23 = vadd.f32 %v11469_v47, %v11356_v21 }
 0x289   : > { %v4711_v11 = vsel %vm4708_vm0, %v4710_v24, %v4706_v1  ;;  %v5844_v35 = vpop.f32.mrf.mxu2  ;;  %v11442_v53 = vpop.f32.mrf.mxu3  ;;  %vm4720_vm4 = vmor %vm4718_vm3, %vm4719_vm1 }
 0x28a   : > { %7538 = vst [vmem:[%s10243_s14 + $0xb0] sm:$0xff] %v4711_v11  ;;  %v4715_v30 = vsub.f32 1.0, %v4714_v42  ;;  %v11445_v27 = vpop.f32.mrf.mxu1  ;;  %v5784_v13 = vadd.f32 %v11429_v36, %v5755_v23  ;;  %v5816_v11 = vadd.f32 %v11440_v48, %v5787_v33 }
 0x28c   : > { %v4716_v54 = vmul.f32 %v8523_v43, %v4715_v30  ;;  %v5813_v22 = vadd.f32 %v11431_v18, %v5784_v13  ;;  %v5845_v37 = vadd.f32 %v5844_v35, %v5816_v11  ;;  %v5763_v35 = vadd.f32 %v11469_v47, %v11384_v17 }
 0x28d   : > { %v5765_v17 = vadd.f32 %v11469_v47, %v11401_v51 }
 0x28e   : > { %v4717_v58 = vadd.f32 %v8523_v43, %v4716_v54  ;;  %v5842_v21 = vadd.f32 %v11433_v0, %v5813_v22  ;;  %v5789_v0 = vadd.f32 %v5788_v49, %v5760_v12 }
 0x290   : > { %v4721_v5 = vsel %vm4720_vm4, %v8523_v43, %v4717_v58  ;;  %v11450_v56 = vpop.f32.mrf.mxu0  ;;  %v5871_v24 = vadd.f32 %v11435_v29, %v5842_v21  ;;  %v5818_v48 = vadd.f32 %v11445_v27, %v5789_v0 }
 0x291   : > { %v4726_v15 = vsel %vm4723_vm5, %v4725_v38, %v4721_v5  ;;  %v5846_v45 = vpop.f32.mrf.mxu2  ;;  %v11447_v19 = vpop.f32.mrf.mxu3  ;;  %v5874_v5 = vadd.f32 %v11442_v53, %v5845_v37  ;;  %v5792_v22 = vadd.f32 %v11450_v56, %v5763_v35 }
 0x292   : > { %7539 = vst [vmem:[%s10243_s14 + $0xb8] sm:$0xff] %v4726_v15  ;;  %v11452_v59 = vpop.f32.mrf.mxu1  ;;  %v5847_v23 = vadd.f32 %v5846_v45, %v5818_v48 }
 0x293   : > { %v5821_v33 = vadd.f32 %v11452_v59, %v5792_v22 }
 0x294   : > { %v5876_v53 = vadd.f32 %v11447_v19, %v5847_v23 }
 0x298   : > { %v11458_v10 = vpop.f32.mrf.mxu0 }
 0x299   : > { %v11454_v8 = vpop.f32.mrf.mxu2  ;;  %v11456_v2 = vpop.f32.mrf.mxu3  ;;  %v5794_v56 = vadd.f32 %v11458_v10, %v5765_v17 }
 0x29a   : > { %v11460_v6 = vpop.f32.mrf.mxu1 }
 0x2a0   : > { %v11471_v31 = vpop.f32.mrf.mxu0 }
 0x2a1   : > { %v11462_v34 = vpop.f32.mrf.mxu2  ;;  %v11464_v44 = vpop.f32.mrf.mxu3 }
 0x2a2   : > { %v11473_v55 = vpop.f32.mrf.mxu1 }
 0x2a8   : > { %v11482_v32 = vpop.f32.mrf.mxu0 }
 0x2a9   : > { %v11478_v40 = vpop.f32.mrf.mxu2  ;;  %v11480_v63 = vpop.f32.mrf.mxu3 }
 0x2aa   : > { %v11484_v20 = vpop.f32.mrf.mxu1 }
 0x2b0   : > { %v5897_v14 = vpop.f32.mrf.mxu0 }
 0x2b1   : > { %v11491_v41 = vpop.f32.mrf.mxu2  ;;  %v11493_v25 = vpop.f32.mrf.mxu3  ;;  %v5898_v50 = vadd.f32 %v5897_v14, %v5869_v39 }
 0x2b2   : > { %v5926_v4 = vpop.f32.mrf.mxu1 }
 0x2b3   : > { %v5927_v7 = vadd.f32 %v5926_v4, %v5898_v50 }
 0x2b8   : > { %v5899_v42 = vpop.f32.mrf.mxu0 }
 0x2b9   : > { %v5955_v36 = vpop.f32.mrf.mxu2  ;;  %v5984_v43 = vpop.f32.mrf.mxu3  ;;  %v5900_v18 = vadd.f32 %v5899_v42, %v5871_v24 }
 0x2ba   : > { %v5956_v1 = vadd.f32 %v5955_v36, %v5927_v7  ;;  %v5928_v60 = vpop.f32.mrf.mxu1 }
 0x2bb   : > { %v5929_v3 = vadd.f32 %v5928_v60, %v5900_v18 }
 0x2bc   : > { %v5985_v30 = vadd.f32 %v5984_v43, %v5956_v1  ;;  %v5850_v43 = vadd.f32 %v11454_v8, %v5821_v33  ;;  %v5823_v8 = vadd.f32 %v11460_v6, %v5794_v56 }
 0x2be   : > { %v6004_v54 = vsub.f32 0.0, %v5985_v30  ;;  %v5879_v37 = vadd.f32 %v11456_v2, %v5850_v43 }
 0x2c0   : > { %v6012_v9 = vmul.f32 1.442695, %v6004_v54  ;;  %v5902_v15 = vpop.f32.mrf.mxu0 }
 0x2c1   : > { %v5957_v58 = vpop.f32.mrf.mxu2  ;;  %v5986_v38 = vpop.f32.mrf.mxu3  ;;  %v5903_v57 = vadd.f32 %v5902_v15, %v5874_v5 }
 0x2c2   : > { %8524 = vpow2.f32 %v6012_v9  ;;  %v5958_v29 = vadd.f32 %v5957_v58, %v5929_v3  ;;  %v5931_v26 = vpop.f32.mrf.mxu1 }
 0x2c3   : > { %v5932_v13 = vadd.f32 %v5931_v26, %v5903_v57 }
 0x2c4   : > { %v5987_v28 = vadd.f32 %v5986_v38, %v5958_v29  ;;  %v5768_v38 = vadd.f32 %v11469_v47, %v11410_v61  ;;  %v5852_v29 = vadd.f32 %v11462_v34, %v5823_v8 }
 0x2c6   : > { %v6005_v16 = vsub.f32 0.0, %v5987_v28  ;;  %v5797_v48 = vadd.f32 %v11471_v31, %v5768_v38 }
 0x2c8   : > { %v8525_v62 = vpop.eup %8524  ;;  %v6014_v49 = vmul.f32 1.442695, %v6005_v16  ;;  %v5904_v27 = vpop.f32.mrf.mxu0 }
 0x2c9   : > { %v6028_v39 = vadd.f32 1.0, %v8525_v62  ;;  %v5960_v14 = vpop.f32.mrf.mxu2  ;;  %v5989_v4 = vpop.f32.mrf.mxu3  ;;  %v5905_v21 = vadd.f32 %v5904_v27, %v5876_v53 }
 0x2ca   : > { %8526 = vpow2.f32 %v6014_v49  ;;  %v5961_v50 = vadd.f32 %v5960_v14, %v5932_v13  ;;  %v5933_v52 = vpop.f32.mrf.mxu1  ;;  %v5881_v13 = vadd.f32 %v11464_v44, %v5852_v29  ;;  %v5770_v14 = vadd.f32 %v11469_v47, %v11417_v46 }
 0x2cb   : > { %8528 = vrcp.f32 %v6028_v39  ;;  %v5934_v19 = vadd.f32 %v5933_v52, %v5905_v21  ;;  %v6045_v0 = vand.u32 2147483647, %v6028_v39  ;;  %v6047_v9 = vand.u32 2147483648, %v6028_v39 }
 0x2cc   : > { %v5990_v45 = vadd.f32 %v5989_v4, %v5961_v50  ;;  %vm6041_vm2 = vweird.f32 %v6028_v39  ;;  %v5826_v4 = vadd.f32 %v11473_v55, %v5797_v48  ;;  %v5799_v21 = vadd.f32 %v11482_v32, %v5770_v14 }
 0x2cd   : > { %vm6046_vm8 = vcmp.eq.f32.partialorder %v6045_v0, 8.507059e+37  ;;  %v6048_v6 = vor.u32 1.1754944e-38, %v6047_v9 }
 0x2ce   : > { %v6006_v7 = vsub.f32 0.0, %v5990_v45  ;;  %v5855_v45 = vadd.f32 %v11478_v40, %v5826_v4  ;;  %v5828_v56 = vadd.f32 %v11484_v20, %v5799_v21 }
 0x2d0   : > { %v8527_v36 = vpop.eup %8526  ;;  %v6016_v24 = vmul.f32 1.442695, %v6006_v7  ;;  %v5907_v12 = vpop.f32.mrf.mxu0  ;;  %v5884_v32 = vadd.f32 %v11480_v63, %v5855_v45 }
 0x2d1   : > { %v8529_v1 = vpop.eup %8528  ;;  %v6029_v42 = vadd.f32 1.0, %v8527_v36  ;;  %v5962_v60 = vpop.f32.mrf.mxu2  ;;  %v5908_v58 = vadd.f32 %v5907_v12, %v5879_v37 }
 0x2d2   : > { %v5991_v11 = vpop.f32.mrf.mxu3  ;;  %v6037_v30 = vmul.f32 %v8529_v1, %v6028_v39  ;;  %8530 = vpow2.f32 %v6016_v24  ;;  %v5963_v18 = vadd.f32 %v5962_v60, %v5934_v19  ;;  %v5936_v59 = vpop.f32.mrf.mxu1  ;;  %vm6042_vm6 = vweird.f32 %v8529_v1 }
 0x2d3   : > { %8532 = vrcp.f32 %v6029_v42  ;;  %vm6043_vm7 = vmor %vm6041_vm2, %vm6042_vm6  ;;  %v5937_v61 = vadd.f32 %v5936_v59, %v5908_v58  ;;  %v6060_v53 = vand.u32 2147483647, %v6029_v42  ;;  %v6062_v22 = vand.u32 2147483648, %v6029_v42 }
 0x2d4   : > { %v6038_v51 = vsub.f32 1.0, %v6037_v30  ;;  %v5992_v54 = vadd.f32 %v5991_v11, %v5963_v18  ;;  %vm6056_vm10 = vweird.f32 %v6029_v42  ;;  %v5857_v30 = vadd.f32 %v11491_v41, %v5828_v56 }
 0x2d5   : > { %vm6061_vm12 = vcmp.eq.f32.partialorder %v6060_v53, 8.507059e+37  ;;  %v6063_v46 = vor.u32 1.1754944e-38, %v6062_v22 }
 0x2d6   : > { %v6039_v3 = vmul.f32 %v8529_v1, %v6038_v51  ;;  %v6007_v10 = vsub.f32 0.0, %v5992_v54  ;;  %v5886_v0 = vadd.f32 %v11493_v25, %v5857_v30 }
 0x2d8   : > { %v8531_v5 = vpop.eup %8530  ;;  %v6040_v15 = vadd.f32 %v8529_v1, %v6039_v3  ;;  %v6018_v26 = vmul.f32 1.442695, %v6007_v10  ;;  %v5909_v35 = vpop.f32.mrf.mxu0 }
 0x2d9   : > { %v8533_v2 = vpop.eup %8532  ;;  %v11522_v28 = vadd.f32 1.0, %v8531_v5  ;;  %v5965_v57 = vpop.f32.mrf.mxu2  ;;  %v5910_v52 = vadd.f32 %v5909_v35, %v5881_v13 }
 0x2da   : > { %v5994_v23 = vpop.f32.mrf.mxu3  ;;  %v6044_v16 = vsel %vm6043_vm7, %v8529_v1, %v6040_v15  ;;  %v6052_v62 = vmul.f32 %v8533_v2, %v6029_v42  ;;  %8534 = vpow2.f32 %v6018_v26  ;;  %v5938_v49 = vpop.f32.mrf.mxu1  ;;  %v5966_v39 = vadd.f32 %v5965_v57, %v5937_v61 }
 0x2db   : > { %v6049_v34 = vsel %vm6046_vm8, %v6048_v6, %v6044_v16  ;;  %8536 = vrcp.f32 %v11522_v28  ;;  %vm6057_vm9 = vweird.f32 %v8533_v2  ;;  %v5939_v40 = vadd.f32 %v5938_v49, %v5910_v52 }
 0x2dc   : > { %7972 = vst [vmem:[%s10243_s14 + $0xc0] sm:$0xff] %v6049_v34  ;;  %v6053_v31 = vsub.f32 1.0, %v6052_v62  ;;  %v5995_v27 = vadd.f32 %v5994_v23, %v5966_v39  ;;  %vm6058_vm11 = vmor %vm6056_vm10, %vm6057_vm9  ;;  %v6077_v18 = vand.u32 2147483648, %v11522_v28  ;;  %v6075_v51 = vand.u32 2147483647, %v11522_v28 }
 0x2dd   : > { %vm6071_vm14 = vweird.f32 %v11522_v28 }
 0x2de   : > { %v6054_v50 = vmul.f32 %v8533_v2, %v6053_v31  ;;  %v6008_v7 = vsub.f32 0.0, %v5995_v27  ;;  %v6078_v9 = vor.u32 1.1754944e-38, %v6077_v18  ;;  %vm6076_vm0 = vcmp.eq.f32.partialorder %v6075_v51, 8.507059e+37 }
 0x2e0   : > { %v8535_v33 = vpop.eup %8534  ;;  %v6055_v44 = vadd.f32 %v8533_v2, %v6054_v50  ;;  %v6020_v19 = vmul.f32 1.442695, %v6008_v7  ;;  %v5912_v1 = vpop.f32.mrf.mxu0 }
 0x2e1   : > { %v8537_v17 = vpop.eup %8536  ;;  %v11532_v47 = vadd.f32 1.0, %v8535_v33  ;;  %v5967_v55 = vpop.f32.mrf.mxu2  ;;  %v5913_v12 = vadd.f32 %v5912_v1, %v5884_v32 }
 0x2e2   : > { %v5996_v36 = vpop.f32.mrf.mxu3  ;;  %v6059_v43 = vsel %vm6058_vm11, %v8533_v2, %v6055_v44  ;;  %v6067_v24 = vmul.f32 %v8537_v17, %v11522_v28  ;;  %v5968_v11 = vadd.f32 %v5967_v55, %v5939_v40  ;;  %v5941_v59 = vpop.f32.mrf.mxu1  ;;  %vm6072_vm13 = vweird.f32 %v8537_v17 }
 0x2e3   : > { %v6064_v42 = vsel %vm6061_vm12, %v6063_v46, %v6059_v43  ;;  %8538 = vrcp.f32 %v11532_v47  ;;  %vm6073_vm15 = vmor %vm6071_vm14, %vm6072_vm13  ;;  %v5942_v41 = vadd.f32 %v5941_v59, %v5913_v12  ;;  %v6092_v25 = vand.u32 2147483648, %v11532_v47 }
 0x2e4   : > { %7973 = vst [vmem:[%s10243_s14 + $0xc8] sm:$0xff] %v6064_v42  ;;  %v6068_v60 = vsub.f32 1.0, %v6067_v24  ;;  %8540 = vpow2.f32 %v6020_v19  ;;  %v5997_v63 = vadd.f32 %v5996_v36, %v5968_v11  ;;  %v6090_v23 = vand.u32 2147483647, %v11532_v47 }
 0x2e5   : > { %vm6086_vm3 = vweird.f32 %v11532_v47  ;;  %v6093_v49 = vor.u32 1.1754944e-38, %v6092_v25 }
 0x2e6   : > { %v6069_v37 = vmul.f32 %v8537_v17, %v6068_v60  ;;  %v6009_v20 = vsub.f32 0.0, %v5997_v63  ;;  %vm6091_vm5 = vcmp.eq.f32.partialorder %v6090_v23, 8.507059e+37 }
 0x2e8   : > { %v6070_v54 = vadd.f32 %v8537_v17, %v6069_v37  ;;  %v6022_v29 = vmul.f32 1.442695, %v6009_v20  ;;  %v5914_v15 = vpop.f32.mrf.mxu0 }
 0x2e9   : > { %v8539_v8 = vpop.eup %8538  ;;  %v5970_v3 = vpop.f32.mrf.mxu2  ;;  %v5915_v28 = vadd.f32 %v5914_v15, %v5886_v0 }
 0x2ea   : > { %v5999_v10 = vpop.f32.mrf.mxu3  ;;  %v8541_v58 = vpop.eup %8540  ;;  %v6074_v38 = vsel %vm6073_vm15, %v8537_v17, %v6070_v54  ;;  %v6082_v5 = vmul.f32 %v8539_v8, %v11532_v47  ;;  %v5971_v48 = vadd.f32 %v5970_v3, %v5942_v41  ;;  %8542 = vpow2.f32 %v6022_v29 }
 0x2eb   : > { %v6079_v26 = vsel %vm6076_vm0, %v6078_v9, %v6074_v38  ;;  %v6032_v2 = vadd.f32 1.0, %v8541_v58  ;;  %vm6087_vm1 = vweird.f32 %v8539_v8  ;;  %v5943_v62 = vpop.f32.mrf.mxu1 }
 0x2ec   : > { %7974 = vst [vmem:[%s10243_s14 + $0xd0] sm:$0xff] %v6079_v26  ;;  %v6083_v6 = vsub.f32 1.0, %v6082_v5  ;;  %v6000_v16 = vadd.f32 %v5999_v10, %v5971_v48  ;;  %v5944_v34 = vadd.f32 %v5943_v62, %v5915_v28  ;;  %vm6088_vm4 = vmor %vm6086_vm3, %vm6087_vm1 }
 0x2ed   : > { %8544 = vrcp.f32 %v6032_v2  ;;  %v6107_v44 = vand.u32 2147483648, %v6032_v2  ;;  %v6105_v17 = vand.u32 2147483647, %v6032_v2  ;;  %vm6101_vm2 = vweird.f32 %v6032_v2 }
 0x2ee   : > { %v6084_v57 = vmul.f32 %v8539_v8, %v6083_v6  ;;  %v6010_v35 = vsub.f32 0.0, %v6000_v16 }
 0x2ef   : > { %v6108_v43 = vor.u32 1.1754944e-38, %v6107_v44  ;;  %vm6106_vm8 = vcmp.eq.f32.partialorder %v6105_v17, 8.507059e+37 }
 0x2f0   : > { %v6085_v61 = vadd.f32 %v8539_v8, %v6084_v57  ;;  %v8543_v31 = vpop.eup %8542  ;;  %v6024_v14 = vmul.f32 1.442695, %v6010_v35 }
 0x2f1   : > { %v5972_v13 = vpop.f32.mrf.mxu2  ;;  %v6033_v50 = vadd.f32 1.0, %v8543_v31 }
 0x2f2   : > { %v6089_v39 = vsel %vm6088_vm4, %v8539_v8, %v6085_v61  ;;  %v5973_v4 = vadd.f32 %v5972_v13, %v5944_v34  ;;  %v6001_v27 = vpop.f32.mrf.mxu3  ;;  %8546 = vpow2.f32 %v6024_v14 }
 0x2f3   : > { %v8545_v53 = vpop.eup %8544  ;;  %v6094_v22 = vsel %vm6091_vm5, %v6093_v49, %v6089_v39  ;;  %8548 = vrcp.f32 %v6033_v50  ;;  %v6122_v56 = vand.u32 2147483648, %v6033_v50  ;;  %v6120_v11 = vand.u32 2147483647, %v6033_v50 }
 0x2f4   : > { %7975 = vst [vmem:[%s10243_s14 + $0xd8] sm:$0xff] %v6094_v22  ;;  %v6097_v52 = vmul.f32 %v8545_v53, %v6032_v2  ;;  %v6002_v45 = vadd.f32 %v6001_v27, %v5973_v4  ;;  %vm6102_vm6 = vweird.f32 %v8545_v53  ;;  %vm6116_vm10 = vweird.f32 %v6033_v50 }
 0x2f5   : > { %vm6103_vm7 = vmor %vm6101_vm2, %vm6102_vm6  ;;  %v6123_v59 = vor.u32 1.1754944e-38, %v6122_v56  ;;  %vm6121_vm12 = vcmp.eq.f32.partialorder %v6120_v11, 8.507059e+37 }
 0x2f6   : > { %v6098_v21 = vsub.f32 1.0, %v6097_v52  ;;  %v6011_v33 = vsub.f32 0.0, %v6002_v45 }
 0x2f8   : > { %v6099_v7 = vmul.f32 %v8545_v53, %v6098_v21  ;;  %v6026_v46 = vmul.f32 1.442695, %v6011_v33  ;;  %v8547_v47 = vpop.eup %8546 }
 0x2f9   : > { %v8549_v36 = vpop.eup %8548  ;;  %v6034_v24 = vadd.f32 1.0, %v8547_v47 }
 0x2fa   : > { %v6100_v55 = vadd.f32 %v8545_v53, %v6099_v7  ;;  %8550 = vpow2.f32 %v6026_v46  ;;  %v6112_v40 = vmul.f32 %v8549_v36, %v6033_v50  ;;  %vm6117_vm9 = vweird.f32 %v8549_v36 }
 0x2fb   : > { %8552 = vrcp.f32 %v6034_v24  ;;  %vm6118_vm11 = vmor %vm6116_vm10, %vm6117_vm9  ;;  %v6137_v20 = vand.u32 2147483648, %v6034_v24  ;;  %v6135_v0 = vand.u32 2147483647, %v6034_v24  ;;  %vm6131_vm14 = vweird.f32 %v6034_v24 }
 0x2fc   : > { %v6104_v19 = vsel %vm6103_vm7, %v8545_v53, %v6100_v55  ;;  %v6113_v32 = vsub.f32 1.0, %v6112_v40 }
 0x2fd   : > { %v6109_v1 = vsel %vm6106_vm8, %v6108_v43, %v6104_v19  ;;  %v6138_v10 = vor.u32 1.1754944e-38, %v6137_v20  ;;  %vm6136_vm0 = vcmp.eq.f32.partialorder %v6135_v0, 8.507059e+37 }
 0x2fe   : > { %7976 = vst [vmem:[%s10243_s14 + $0xe0] sm:$0xff] %v6109_v1  ;;  %v6114_v60 = vmul.f32 %v8549_v36, %v6113_v32 }
 0x300   : > { %v8551_v42 = vpop.eup %8550  ;;  %v6115_v18 = vadd.f32 %v8549_v36, %v6114_v60 }
 0x301   : > { %v6035_v30 = vadd.f32 1.0, %v8551_v42  ;;  %v8553_v12 = vpop.eup %8552 }
 0x302   : > { %v6119_v37 = vsel %vm6118_vm11, %v8549_v36, %v6115_v18  ;;  %v6127_v51 = vmul.f32 %v8553_v12, %v6034_v24  ;;  %vm6132_vm13 = vweird.f32 %v8553_v12 }
 0x303   : > { %8554 = vrcp.f32 %v6035_v30  ;;  %v6124_v63 = vsel %vm6121_vm12, %v6123_v59, %v6119_v37  ;;  %vm6133_vm15 = vmor %vm6131_vm14, %vm6132_vm13  ;;  %v6152_v29 = vand.u32 2147483648, %v6035_v30  ;;  %v6150_v26 = vand.u32 2147483647, %v6035_v30 }
 0x304   : > { %7977 = vst [vmem:[%s10243_s14 + $0xe8] sm:$0xff] %v6124_v63  ;;  %v6128_v54 = vsub.f32 1.0, %v6127_v51  ;;  %vm6146_vm3 = vweird.f32 %v6035_v30 }
 0x305   : > { %v6153_v48 = vor.u32 1.1754944e-38, %v6152_v29  ;;  %vm6151_vm5 = vcmp.eq.f32.partialorder %v6150_v26, 8.507059e+37 }
 0x306   : > { %v6129_v8 = vmul.f32 %v8553_v12, %v6128_v54 }
 0x308   : > { %v6130_v41 = vadd.f32 %v8553_v12, %v6129_v8 }
 0x309   : > { %v8555_v9 = vpop.eup %8554 }
 0x30a   : > { %v6142_v3 = vmul.f32 %v8555_v9, %v6035_v30  ;;  %v6134_v58 = vsel %vm6133_vm15, %v8553_v12, %v6130_v41  ;;  %vm6147_vm1 = vweird.f32 %v8555_v9 }
 0x30b   : > { %v6139_v5 = vsel %vm6136_vm0, %v6138_v10, %v6134_v58  ;;  %vm6148_vm4 = vmor %vm6146_vm3, %vm6147_vm1 }
 0x30c   : > { %v6143_v38 = vsub.f32 1.0, %v6142_v3  ;;  %7978 = vst [vmem:[%s10243_s14 + $0xf0] sm:$0xff] %v6139_v5 }
 0x30e   : > { %v6144_v15 = vmul.f32 %v8555_v9, %v6143_v38 }
 0x310   : > { %v6145_v2 = vadd.f32 %v8555_v9, %v6144_v15 }
 0x312   : > { %v6149_v6 = vsel %vm6148_vm4, %v8555_v9, %v6145_v2 }
 0x313   : > { %v6154_v28 = vsel %vm6151_vm5, %v6153_v48, %v6149_v6 }
 0x314   : > { %7979 = vst [vmem:[%s10243_s14 + $0xf8] sm:$0xff] %v6154_v28 }
 0x315 PF: > { %s13_s12 = sadd.s32 1, %s8576_s12  }
 0x316   : > { %p10_p4 = scmp.ge.s32.totalorder %s13_s12, 4  }
 0x318   :  { %12 = sbr.rel (!%p10_p4) target bundleno = 1 (0x1), region = 65 }

</bundles_post_ra>
